<compile_context>
chip_gen: v6e
topology: v6e:2x2x1
jax: 0.10.0
libtpu: 0.0.40
codegen_flags: <defaults>
</compile_context>

<pallas_src>
import functools

import jax
import jax.numpy as jnp
from jax import lax
from jax.experimental import pallas as pl
from jax.experimental.pallas import tpu as pltpu

TASK_EMB = 256
PROMPT_POOL = 20
TOP_K = 5
BN_EPS = 1e-5

ACT_DTYPE = jnp.bfloat16      # inter-kernel activation storage
MXU_DTYPE = jnp.bfloat16      # matmul operand dtype (f32 accumulation)
VMEM_LIMIT = 32 * 1024 * 1024  # safe scoped limit on v5e / v6e / v7x


def _cparams(semantics):
    return pltpu.CompilerParams(dimension_semantics=semantics,
                                vmem_limit_bytes=VMEM_LIMIT)


# ---------------------------------------------------------------------------
# Elementwise activations (f32; v5e has no bf16 VPU/EUP path)
# ---------------------------------------------------------------------------
def _apply_act(x, act):
    if act == "none":
        return x
    if act == "relu":
        return jnp.maximum(x, 0.0)
    if act == "gelu":
        # tanh-form GELU: ~5 VALU ops + 1 EUP tanh (vs ~12 VALU + 1 EUP exp
        # for the erf polynomial) -- moves work off the saturating VALU slot.
        # TODO(synk): deviates ~1e-3 from torch.nn.GELU's exact-erf default.
        c = 0.7978845608028654
        return 0.5 * x * (1.0 + jnp.tanh(c * (x + 0.044715 * x * x * x)))
    raise ValueError(f"unknown act {act}")


# ---------------------------------------------------------------------------
# Tiled matmul + bias + activation (real-scale im2col'd stem/embed convs)
# ---------------------------------------------------------------------------
def _pick_tile(dim, candidates):
    for t in candidates:
        if dim % t == 0:
            return t
    return dim


def _matmul_kernel(x_ref, w_ref, b_ref, o_ref, acc_ref, *, act):
    @pl.when(pl.program_id(2) == 0)
    def _():
        acc_ref[...] = jnp.zeros_like(acc_ref)

    acc_ref[...] += jnp.dot(x_ref[...], w_ref[...],
                            preferred_element_type=jnp.float32)

    @pl.when(pl.program_id(2) == pl.num_programs(2) - 1)
    def _():
        o_ref[...] = _apply_act(acc_ref[...] + b_ref[...],
                                act).astype(o_ref.dtype)


def matmul_bias_act(x, w, b, act="none", out_dtype=jnp.float32):
    """y = act(x @ w + b).

    MXU-friendly shapes go through a tiled Pallas kernel (f32 VMEM
    accumulation); degenerate shapes (tiny / unaligned N or K, e.g. the toy
    stem convs: K=27, N=8) are handed to XLA -- a Pallas pass there is pure
    launch overhead with <5% MXU utilisation and lane-masked stores.
    """
    M, K = x.shape
    N = w.shape[1]
    if (N % 128 != 0) or (K % 128 != 0) or (M % 8 != 0):
        y = jnp.dot(x.astype(jnp.float32), w.astype(jnp.float32)) + b
        return _apply_act(y, act).astype(out_dtype)
    tm = _pick_tile(M, (256, 128, 64, 32, 16, 8))
    tn = _pick_tile(N, (512, 384, 256, 128))
    tk = _pick_tile(K, (512, 384, 256, 128))
    grid = (M // tm, N // tn, K // tk)
    return pl.pallas_call(
        functools.partial(_matmul_kernel, act=act),
        out_shape=jax.ShapeDtypeStruct((M, N), out_dtype),
        grid=grid,
        in_specs=[
            pl.BlockSpec((tm, tk), lambda i, j, k: (i, k)),
            pl.BlockSpec((tk, tn), lambda i, j, k: (k, j)),
            pl.BlockSpec((1, tn), lambda i, j, k: (0, j)),
        ],
        out_specs=pl.BlockSpec((tm, tn), lambda i, j, k: (i, j)),
        scratch_shapes=[pltpu.VMEM((tm, tn), jnp.float32)],
        compiler_params=_cparams(("parallel", "parallel", "arbitrary")),
    )(x.astype(MXU_DTYPE), w.astype(MXU_DTYPE),
      b.reshape(1, N).astype(jnp.float32))


def conv3x3_s2(x, w, b, act="none"):
    """3x3 conv, stride 2, pad 1 (stem / patch embedding), via im2col.

    # TODO(synk): at real RCViT resolutions move the im2col into a Pallas
    # kernel (taps as an extra reduction axis) to avoid the 9x HBM patches
    # tensor; only the 3 small stem/embed convs use this path.
    """
    B, H, W, Cin = x.shape
    Cout = w.shape[-1]
    Ho = (H - 1) // 2 + 1
    Wo = (W - 1) // 2 + 1
    xp = jnp.pad(x, ((0, 0), (1, 1), (1, 1), (0, 0)))
    rows = []
    for dy in range(3):
        cols = [xp[:, dy:dy + 2 * Ho - 1:2, dx:dx + 2 * Wo - 1:2, :]
                for dx in range(3)]
        rows.append(jnp.stack(cols, axis=3))
    patches = jnp.stack(rows, axis=3)                      # (B,Ho,Wo,3,3,Cin)
    patches = patches.reshape(B * Ho * Wo, 9 * Cin)
    y = matmul_bias_act(patches, w.reshape(9 * Cin, Cout), b, act,
                        out_dtype=jnp.float32)
    return y.reshape(B, Ho, Wo, Cout)


# ---------------------------------------------------------------------------
# Fused AdditiveBlock kernel (channel-major (C, HWp) slab per image)
# ---------------------------------------------------------------------------
def _block_kernel(x_ref, m_ref, dwT_ref, vecT_ref, w1_ref, w2_ref,
                  wqkv_ref, bqkv_ref, chq_ref, chk_ref,
                  fc1_ref, fc1b_ref, fc2_ref, o_ref, *, img_w, n_valid):
    """One full AdditiveBlock on a single image's (C, HWp) slab (kept in VMEM).

      x += LocalIntegration(x)
      x += AdditiveTokenMixer(norm1(x))
      x += Mlp(norm2(x))

    BatchNorms are folded into the adjacent 1x1 convs/matmuls (eval mode);
    DropPath/Dropout are identity.  Tokens >= n_valid are zero padding; their
    outputs are garbage and are sliced off by the wrapper.
    """
    C = x_ref.shape[1]
    HWp = x_ref.shape[2]
    inv_n = 1.0 / float(n_valid)

    x = x_ref[0]                     # (C, HWp) bf16
    mask9 = m_ref[...]               # (9, HWp) f32 tap-validity (host-built)
    dwT = dwT_ref[...]               # (C, 45) f32: 5 packed dwconv tap tables
    vecT = vecT_ref[...]             # (C, 10) f32: packed biases / gate vecs
    valid = mask9[4:5]               # (1, HWp) token-validity (centre tap)

    def col(v2d, i):                 # static width-1 lane slice -> (rows, 1)
        return v2d[:, i:i + 1]

    def dwconv(t, tbl, bias_col, act):
        # depthwise 3x3, stride 1, pad 1 on the flattened token (lane) axis:
        # each off-centre tap is a lane roll masked at the image boundary.
        acc = t * col(dwT, tbl * 9 + 4)                  # centre tap, no mask
        for dy in (-1, 0, 1):
            for dx in (-1, 0, 1):
                if dy == 0 and dx == 0:
                    continue
                shift = dy * img_w + dx
                j = (dy + 1) * 3 + (dx + 1)
                shifted = pltpu.roll(t, (-shift) % HWp, 1)
                acc = acc + (shifted * mask9[j:j + 1]) * col(dwT, tbl * 9 + j)
        return _apply_act(acc + bias_col, act)

    # ---- x = x + LocalIntegration(x) -------------------------------------
    xf = x.astype(jnp.float32)
    t = jnp.dot(w1_ref[...], x, preferred_element_type=jnp.float32) + col(vecT, 0)
    t = dwconv(t, 0, col(vecT, 1), "gelu")
    y = jnp.dot(w2_ref[...], t.astype(MXU_DTYPE),
                preferred_element_type=jnp.float32) + col(vecT, 2)
    x1 = xf + y

    # ---- x = x + AdditiveTokenMixer(norm1(x)) -----------------------------
    # single fused (3C, C) @ (C, HWp) qkv matmul, then static sublane slices
    qkv = jnp.dot(wqkv_ref[...], x1.astype(MXU_DTYPE),
                  preferred_element_type=jnp.float32) + bqkv_ref[...]
    q = qkv[:C]
    k = qkv[C:2 * C]
    v = qkv[2 * C:]

    def spatial_channel(t, tbl, b_i, a_i, ch_ref):
        # SpatialOperation: t * sigmoid(conv1x1_{C->1}(relu(BN(dwconv(t)))))
        s = dwconv(t, tbl, col(vecT, b_i), "relu")
        gate = jax.nn.sigmoid(jnp.sum(s * col(vecT, a_i), axis=0, keepdims=True))
        t = t * gate
        # ChannelOperation: t * sigmoid(conv1x1(global_avg_pool(t)))
        # (masked mean: exclude the zero-padded tokens)
        pooled = jnp.sum(t * valid, axis=1, keepdims=True) * inv_n   # (C, 1)
        g = jax.nn.sigmoid(jnp.dot(ch_ref[...], pooled.astype(MXU_DTYPE),
                                   preferred_element_type=jnp.float32))
        return t * g

    q = spatial_channel(q, 1, 3, 4, chq_ref)
    k = spatial_channel(k, 2, 5, 6, chk_ref)
    m = dwconv(q + k, 3, col(vecT, 7), "none")
    out = dwconv(m * v, 4, col(vecT, 8), "none")
    x2 = x1 + out

    # ---- x = x + Mlp(norm2(x)) --------------------------------------------
    h = _apply_act(jnp.dot(fc1_ref[...], x2.astype(MXU_DTYPE),
                           preferred_element_type=jnp.float32) + fc1b_ref[...],
                   "gelu")
    y = jnp.dot(fc2_ref[...], h.astype(MXU_DTYPE),
                preferred_element_type=jnp.float32) + col(vecT, 9)
    o_ref[0] = (x2 + y).astype(o_ref.dtype)


def _full_spec(a):
    nd = a.ndim
    return pl.BlockSpec(a.shape, lambda b, _nd=nd: (0,) * _nd)


def additive_block(x, mask9, img_w, n_valid, p):
    """x: (B, C, HWp) bf16 channel-major slab -> same shape/dtype."""
    B, C, HWp = x.shape
    operands = (x, mask9, p["dwT"], p["vecT"], p["w1"], p["w2"], p["wqkv"],
                p["bqkv"], p["chq"], p["chk"], p["fc1"], p["fc1b"], p["fc2"])
    in_specs = [pl.BlockSpec((1, C, HWp), lambda b: (b, 0, 0))]
    in_specs += [_full_spec(a) for a in operands[1:]]
    return pl.pallas_call(
        functools.partial(_block_kernel, img_w=img_w, n_valid=n_valid),
        out_shape=jax.ShapeDtypeStruct((B, C, HWp), ACT_DTYPE),
        grid=(B,),                       # batch stays the parallel grid axis
        in_specs=in_specs,
        out_specs=pl.BlockSpec((1, C, HWp), lambda b: (b, 0, 0)),
        compiler_params=_cparams(("parallel",)),
    )(*operands)


# ---------------------------------------------------------------------------
# BatchNorm (eval) folding helpers
# ---------------------------------------------------------------------------
def bn_scale_shift(bn):
    s = bn["gamma"] / jnp.sqrt(bn["var"] + BN_EPS)
    t = bn["beta"] - s * bn["mean"]
    return s, t


def fold_bn_after(w, b, bn):
    """Fold BN applied AFTER a conv (per output channel = last weight axis)."""
    s, t = bn_scale_shift(bn)
    return w * s, s * b + t


def fold_bn_before(w, b, bn):
    """Fold BN applied BEFORE a 1x1 conv / matmul with weight (Cin, Cout)."""
    s, t = bn_scale_shift(bn)
    return s[:, None] * w, t @ w + b


def _dw_masks(H, W, HWp):
    """(9, HWp) f32 validity masks for the 3x3 taps (zero-padding emulation).

    Row (dy+1)*3+(dx+1) is 1 where the (dy, dx) neighbour of a token lies
    inside the H x W image; tokens >= H*W (lane padding) have a zero centre
    mask, which doubles as the token-validity vector.
    """
    ii = jnp.arange(HWp, dtype=jnp.int32)
    rid, cid = ii // W, ii % W
    rows = []
    for dy in (-1, 0, 1):
        for dx in (-1, 0, 1):
            ok = ((rid + dy >= 0) & (rid + dy < H) &
                  (cid + dx >= 0) & (cid + dx < W))
            rows.append(ok.astype(jnp.float32))
    return jnp.stack(rows, axis=0)


# ---------------------------------------------------------------------------
# Per-block parameter preparation: BN folding, channel-major transposition and
# operand packing.  Runs under jit on closed-over params -> constant folded.
# ---------------------------------------------------------------------------
def _prep_block(p):
    C = p["attn"]["qkv_w"].shape[0]
    f32 = jnp.float32

    def colv(v):
        return jnp.reshape(v, (-1, 1)).astype(f32)

    # LocalIntegration: conv1x1 -> BN -> dwconv3x3 -> GELU -> conv1x1
    w1, b1 = fold_bn_after(p["local"]["c1_w"], p["local"]["c1_b"],
                           p["local"]["bn"])
    # AdditiveTokenMixer: norm1 (BN) folded into the fused qkv projection
    qkv_w, qkv_b = fold_bn_before(p["attn"]["qkv_w"],
                                  jnp.zeros((3 * C,), f32), p["norm1"])

    def _sp(spp):  # SpatialOperation: dwconv -> BN -> ReLU -> 1x1(C->1) -> sigmoid
        dw_w, dw_b = fold_bn_after(spp["dw_w"], spp["dw_b"], spp["bn"])
        return dw_w.reshape(9, C), dw_b, spp["attn_w"].reshape(C)

    dwq_w, dwq_b, aq = _sp(p["attn"]["sp_q"])
    dwk_w, dwk_b, ak = _sp(p["attn"]["sp_k"])

    # Mlp: norm2 (BN) folded into fc1
    fw1, fb1 = fold_bn_before(p["mlp"]["fc1_w"], p["mlp"]["fc1_b"], p["norm2"])

    # packed dwconv tap tables: [local, sp_q, sp_k, dwc, proj] -> (C, 45)
    dw_tables = [p["local"]["dw_w"].reshape(9, C), dwq_w, dwk_w,
                 p["attn"]["dwc_w"].reshape(9, C),
                 p["attn"]["proj_w"].reshape(9, C)]
    dwT = jnp.concatenate([t.T for t in dw_tables], axis=1).astype(f32)

    # packed per-channel bias / gate vectors -> (C, 10)
    vecT = jnp.stack([b1, p["local"]["dw_b"], p["local"]["c2_b"],
                      dwq_b, aq, dwk_b, ak,
                      p["attn"]["dwc_b"], p["attn"]["proj_b"],
                      p["mlp"]["fc2_b"]], axis=1).astype(f32)

    return {
        "dwT": dwT, "vecT": vecT,
        "w1": w1.T.astype(MXU_DTYPE),                      # (C, C)
        "w2": p["local"]["c2_w"].T.astype(MXU_DTYPE),      # (C, C)
        "wqkv": qkv_w.T.astype(MXU_DTYPE),                 # (3C, C)
        "bqkv": colv(qkv_b),                               # (3C, 1)
        "chq": p["attn"]["ch_q"]["w"].T.astype(MXU_DTYPE),
        "chk": p["attn"]["ch_k"]["w"].T.astype(MXU_DTYPE),
        "fc1": fw1.T.astype(MXU_DTYPE),                    # (hidden, C)
        "fc1b": colv(fb1),                                 # (hidden, 1)
        "fc2": p["mlp"]["fc2_w"].T.astype(MXU_DTYPE),      # (C, hidden)
    }


# ---------------------------------------------------------------------------
# Model forward
# ---------------------------------------------------------------------------
def rcvit_forward(params, x_nchw):
    # TODO(synk): training-mode BatchNorm (batch statistics) not implemented;
    # eval-mode running-stats semantics are used (standard inference path).
    x = jnp.transpose(x_nchw, (0, 2, 3, 1)).astype(jnp.float32)   # NCHW->NHWC

    # stem: two 3x3 stride-2 convs, BN folded, ReLU fused.
    w1, b1 = fold_bn_after(params["stem"]["c1_w"], params["stem"]["c1_b"],
                           params["stem"]["bn1"])
    x = conv3x3_s2(x, w1, b1, act="relu")
    w2, b2 = fold_bn_after(params["stem"]["c2_w"], params["stem"]["c2_b"],
                           params["stem"]["bn2"])
    x = conv3x3_s2(x, w2, b2, act="relu")

    for entry in params["network"]:
        if entry["type"] == "stage":
            B, H, W, C = x.shape
            HW = H * W
            HWp = ((HW + 127) // 128) * 128      # lane-dense padded token count
            mask9 = _dw_masks(H, W, HWp)
            # channel-major (B, C, HWp) slab: tokens on the lane axis.
            xt = jnp.transpose(x, (0, 3, 1, 2)).reshape(B, C, HW)
            xt = jnp.pad(xt, ((0, 0), (0, 0), (0, HWp - HW))).astype(ACT_DTYPE)
            for bp in entry["blocks"]:
                xt = additive_block(xt, mask9, W, HW, _prep_block(bp))
            x = jnp.transpose(xt[:, :, :HW].reshape(B, C, H, W), (0, 2, 3, 1))
        else:
            w, b = fold_bn_after(entry["w"], entry["b"], entry["bn"])
            x = conv3x3_s2(x, w, b, act="none")

    # final BatchNorm (eval affine) + global average pool -> cls_embed.
    # tiny batch-row tail matmuls are intentionally left to XLA.
    s, t = bn_scale_shift(params["norm"])
    cls_embed = jnp.mean(x.astype(jnp.float32), axis=(1, 2)) * s + t

    cls_proj = cls_embed @ params["reduce_sim_w"]
    cls_proj_n = cls_proj / jnp.clip(
        jnp.linalg.norm(cls_proj, axis=-1, keepdims=True), 1e-12)
    keys = params["dap_keys"]
    keys_n = keys / jnp.clip(
        jnp.linalg.norm(keys, axis=-1, keepdims=True), 1e-12)
    sim = cls_proj_n @ keys_n.T                          # (B, pool)
    _, topk_idx = lax.top_k(sim, TOP_K)
    selected = keys_n[topk_idx]                          # (B, K, 256)
    sim_pull = jnp.sum(selected * cls_proj_n[:, None, :], axis=-1)
    reduce_sim = jnp.mean(jnp.mean(sim_pull, axis=1)) * TOP_K

    head = cls_embed @ params["head_w"] + params["head_b"]
    dist = cls_embed @ params["dist_w"] + params["dist_b"]
    cls_out = (head + dist) / 2.0
    return cls_out, reduce_sim


# ---------------------------------------------------------------------------
# Deterministic synthetic parameter construction
# ---------------------------------------------------------------------------
class _KeyGen:
    def __init__(self, key):
        self._key = key

    def __call__(self):
        self._key, k = jax.random.split(self._key)
        return k


def _normal(kg, shape, std):
    return (std * jax.random.normal(kg(), shape)).astype(jnp.float32)


def _bn_params(kg, c):
    return {
        "gamma": (1.0 + 0.1 * jax.random.normal(kg(), (c,))).astype(jnp.float32),
        "beta": _normal(kg, (c,), 0.1),
        "mean": _normal(kg, (c,), 0.1),
        "var": (1.0 + 0.1 * jnp.abs(jax.random.normal(kg(), (c,)))).astype(jnp.float32),
    }


def _spatial_op_params(kg, dim):
    return {"dw_w": _normal(kg, (3, 3, dim), 0.1),
            "dw_b": _normal(kg, (dim,), 0.02),
            "bn": _bn_params(kg, dim),
            "attn_w": _normal(kg, (dim, 1), 0.1)}        # Conv2d(dim,1,1,bias=False)


def _block_params(kg, dim, hidden):
    # Per-block DAP sub-modules (dap_downsample, dap_film, dap_norm, down_proj)
    # are never used in RCViT.forward, so they are omitted here.
    return {
        "local": {
            "c1_w": _normal(kg, (dim, dim), 0.05), "c1_b": _normal(kg, (dim,), 0.02),
            "bn": _bn_params(kg, dim),
            "dw_w": _normal(kg, (3, 3, dim), 0.1), "dw_b": _normal(kg, (dim,), 0.02),
            "c2_w": _normal(kg, (dim, dim), 0.05), "c2_b": _normal(kg, (dim,), 0.02),
        },
        "norm1": _bn_params(kg, dim),
        "attn": {
            "qkv_w": _normal(kg, (dim, 3 * dim), 0.05),
            "sp_q": _spatial_op_params(kg, dim),
            "ch_q": {"w": _normal(kg, (dim, dim), 0.1)},
            "sp_k": _spatial_op_params(kg, dim),
            "ch_k": {"w": _normal(kg, (dim, dim), 0.1)},
            "dwc_w": _normal(kg, (3, 3, dim), 0.1), "dwc_b": _normal(kg, (dim,), 0.02),
            "proj_w": _normal(kg, (3, 3, dim), 0.1), "proj_b": _normal(kg, (dim,), 0.02),
        },
        "norm2": _bn_params(kg, dim),
        "mlp": {
            "fc1_w": _normal(kg, (dim, hidden), 0.05), "fc1_b": _normal(kg, (hidden,), 0.02),
            "fc2_w": _normal(kg, (hidden, dim), 0.05), "fc2_b": _normal(kg, (dim,), 0.02),
        },
    }


def make_params(key, layers, embed_dims, mlp_ratio, num_classes):
    kg = _KeyGen(key)
    c0 = embed_dims[0]
    params = {
        "stem": {
            "c1_w": _normal(kg, (3, 3, 3, c0 // 2), 0.1), "c1_b": _normal(kg, (c0 // 2,), 0.02),
            "bn1": _bn_params(kg, c0 // 2),
            "c2_w": _normal(kg, (3, 3, c0 // 2, c0), 0.1), "c2_b": _normal(kg, (c0,), 0.02),
            "bn2": _bn_params(kg, c0),
        }
    }
    network = []
    for i, nblk in enumerate(layers):
        dim = embed_dims[i]
        blocks = [_block_params(kg, dim, int(dim * mlp_ratio)) for _ in range(nblk)]
        network.append({"type": "stage", "blocks": blocks})
        if i >= len(layers) - 1:
            break
        network.append({
            "type": "embed",
            "w": _normal(kg, (3, 3, embed_dims[i], embed_dims[i + 1]), 0.1),
            "b": _normal(kg, (embed_dims[i + 1],), 0.02),
            "bn": _bn_params(kg, embed_dims[i + 1]),
        })
    params["network"] = network
    cl = embed_dims[-1]
    params["norm"] = _bn_params(kg, cl)
    params["reduce_sim_w"] = _normal(kg, (cl, TASK_EMB), 0.02)     # Linear, no bias
    params["dap_keys"] = _normal(kg, (PROMPT_POOL, TASK_EMB), 0.1)
    params["head_w"] = _normal(kg, (cl, num_classes), 0.02)
    params["head_b"] = jnp.zeros((num_classes,), jnp.float32)
    params["dist_w"] = _normal(kg, (cl, num_classes), 0.02)
    params["dist_b"] = jnp.zeros((num_classes,), jnp.float32)
    return params


# ---------------------------------------------------------------------------
if __name__ == "__main__":
    key = jax.random.PRNGKey(0)
    pkey, xkey = jax.random.split(key)

    layers = (1, 1)
    embed_dims = (16, 32)
    mlp_ratio = 4.0
    num_classes = 10

    params = make_params(pkey, layers, embed_dims, mlp_ratio, num_classes)
    x = jax.random.normal(xkey, (2, 3, 32, 32), jnp.float32)   # NCHW, like PyTorch

    fwd = jax.jit(lambda inp: rcvit_forward(params, inp))
    cls_out, reduce_sim = fwd(x)
    jax.block_until_ready((cls_out, reduce_sim))

    assert cls_out.shape == (2, num_classes)
    assert reduce_sim.shape == ()
    assert bool(jnp.all(jnp.isfinite(cls_out))) and bool(jnp.isfinite(reduce_sim))
    print("KERNEL_OK")
</pallas_src>

<mosaic_0001>
module attributes {stable_mosaic.version = 11 : i64} {
  func.func @_block_kernel(%arg0: i32, %arg1: memref<1x16x128xbf16, #tpu.memory_space<vmem>>, %arg2: memref<9x128xf32, #tpu.memory_space<vmem>>, %arg3: memref<16x45xf32, #tpu.memory_space<vmem>>, %arg4: memref<16x10xf32, #tpu.memory_space<vmem>>, %arg5: memref<16x16xbf16, #tpu.memory_space<vmem>>, %arg6: memref<16x16xbf16, #tpu.memory_space<vmem>>, %arg7: memref<48x16xbf16, #tpu.memory_space<vmem>>, %arg8: memref<48x1xf32, #tpu.memory_space<vmem>>, %arg9: memref<16x16xbf16, #tpu.memory_space<vmem>>, %arg10: memref<16x16xbf16, #tpu.memory_space<vmem>>, %arg11: memref<64x16xbf16, #tpu.memory_space<vmem>>, %arg12: memref<64x1xf32, #tpu.memory_space<vmem>>, %arg13: memref<16x64xbf16, #tpu.memory_space<vmem>>, %arg14: memref<1x16x128xbf16, #tpu.memory_space<vmem>>) attributes {dimension_semantics = [#tpu.dimension_semantics<parallel>], iteration_bounds = array<i64: 2>, scalar_prefetch = 0 : i64, scratch_operands = 0 : i64, tpu.core_type = #tpu.core_type<tc>, window_params = [{transform_indices = @transform_0, window_bounds = array<i64: 1, 16, 128>}, {pipeline_mode = #tpu.pipeline_mode<synchronous>, transform_indices = @transform_1, window_bounds = array<i64: 9, 128>}, {pipeline_mode = #tpu.pipeline_mode<synchronous>, transform_indices = @transform_2, window_bounds = array<i64: 16, 45>}, {pipeline_mode = #tpu.pipeline_mode<synchronous>, transform_indices = @transform_3, window_bounds = array<i64: 16, 10>}, {pipeline_mode = #tpu.pipeline_mode<synchronous>, transform_indices = @transform_4, window_bounds = array<i64: 16, 16>}, {pipeline_mode = #tpu.pipeline_mode<synchronous>, transform_indices = @transform_5, window_bounds = array<i64: 16, 16>}, {pipeline_mode = #tpu.pipeline_mode<synchronous>, transform_indices = @transform_6, window_bounds = array<i64: 48, 16>}, {pipeline_mode = #tpu.pipeline_mode<synchronous>, transform_indices = @transform_7, window_bounds = array<i64: 48, 1>}, {pipeline_mode = #tpu.pipeline_mode<synchronous>, transform_indices = @transform_8, window_bounds = array<i64: 16, 16>}, {pipeline_mode = #tpu.pipeline_mode<synchronous>, transform_indices = @transform_9, window_bounds = array<i64: 16, 16>}, {pipeline_mode = #tpu.pipeline_mode<synchronous>, transform_indices = @transform_10, window_bounds = array<i64: 64, 16>}, {pipeline_mode = #tpu.pipeline_mode<synchronous>, transform_indices = @transform_11, window_bounds = array<i64: 64, 1>}, {pipeline_mode = #tpu.pipeline_mode<synchronous>, transform_indices = @transform_12, window_bounds = array<i64: 16, 64>}, {transform_indices = @transform_13, window_bounds = array<i64: 1, 16, 128>}]} {
    %c0 = arith.constant 0 : index
    %c0_0 = arith.constant 0 : index
    %c0_1 = arith.constant 0 : index
    %0 = vector.load %arg1[%c0, %c0_0, %c0_1] : memref<1x16x128xbf16, #tpu.memory_space<vmem>>, vector<1x16x128xbf16>
    %1 = vector.shape_cast %0 : vector<1x16x128xbf16> to vector<16x128xbf16>
    %c0_2 = arith.constant 0 : index
    %c0_3 = arith.constant 0 : index
    %2 = vector.load %arg2[%c0_2, %c0_3] : memref<9x128xf32, #tpu.memory_space<vmem>>, vector<9x128xf32>
    %c0_4 = arith.constant 0 : index
    %c0_5 = arith.constant 0 : index
    %3 = vector.load %arg3[%c0_4, %c0_5] : memref<16x45xf32, #tpu.memory_space<vmem>>, vector<16x45xf32>
    %c0_6 = arith.constant 0 : index
    %c0_7 = arith.constant 0 : index
    %4 = vector.load %arg4[%c0_6, %c0_7] : memref<16x10xf32, #tpu.memory_space<vmem>>, vector<16x10xf32>
    %5 = vector.extract_strided_slice %2 {offsets = [4, 0], sizes = [1, 128], strides = [1, 1]} : vector<9x128xf32> to vector<1x128xf32>
    %6 = arith.extf %1 : vector<16x128xbf16> to vector<16x128xf32>
    %c0_8 = arith.constant 0 : index
    %c0_9 = arith.constant 0 : index
    %7 = vector.load %arg5[%c0_8, %c0_9] : memref<16x16xbf16, #tpu.memory_space<vmem>>, vector<16x16xbf16>
    %cst = arith.constant dense<0.000000e+00> : vector<16x128xf32>
    %8 = tpu.matmul %7, %1, %cst {dimension_numbers = #tpu.dot_dimension_numbers<[1], [0], [0], [1], [0, 0, 1, 1], [], []>} : vector<16x16xbf16>, vector<16x128xbf16>, vector<16x128xf32> -> vector<16x128xf32>
    %9 = vector.extract_strided_slice %4 {offsets = [0, 0], sizes = [16, 1], strides = [1, 1]} : vector<16x10xf32> to vector<16x1xf32>
    %10 = vector.broadcast %9 : vector<16x1xf32> to vector<16x128xf32>
    %11 = arith.addf %8, %10 : vector<16x128xf32>
    %12 = vector.extract_strided_slice %4 {offsets = [0, 1], sizes = [16, 1], strides = [1, 1]} : vector<16x10xf32> to vector<16x1xf32>
    %13 = vector.extract_strided_slice %3 {offsets = [0, 4], sizes = [16, 1], strides = [1, 1]} : vector<16x45xf32> to vector<16x1xf32>
    %14 = vector.broadcast %13 : vector<16x1xf32> to vector<16x128xf32>
    %15 = arith.mulf %11, %14 : vector<16x128xf32>
    %c9_i32 = arith.constant 9 : i32
    %16 = tpu.dynamic_rotate %11 by %c9_i32 dim 1 : vector<16x128xf32>, i32 -> vector<16x128xf32>
    %17 = vector.extract_strided_slice %2 {offsets = [0, 0], sizes = [1, 128], strides = [1, 1]} : vector<9x128xf32> to vector<1x128xf32>
    %18 = vector.broadcast %17 : vector<1x128xf32> to vector<16x128xf32>
    %19 = arith.mulf %16, %18 : vector<16x128xf32>
    %20 = vector.extract_strided_slice %3 {offsets = [0, 0], sizes = [16, 1], strides = [1, 1]} : vector<16x45xf32> to vector<16x1xf32>
    %21 = vector.broadcast %20 : vector<16x1xf32> to vector<16x128xf32>
    %22 = arith.mulf %19, %21 : vector<16x128xf32>
    %23 = arith.addf %15, %22 : vector<16x128xf32>
    %c8_i32 = arith.constant 8 : i32
    %24 = tpu.dynamic_rotate %11 by %c8_i32 dim 1 : vector<16x128xf32>, i32 -> vector<16x128xf32>
    %25 = vector.extract_strided_slice %2 {offsets = [1, 0], sizes = [1, 128], strides = [1, 1]} : vector<9x128xf32> to vector<1x128xf32>
    %26 = vector.broadcast %25 : vector<1x128xf32> to vector<16x128xf32>
    %27 = arith.mulf %24, %26 : vector<16x128xf32>
    %28 = vector.extract_strided_slice %3 {offsets = [0, 1], sizes = [16, 1], strides = [1, 1]} : vector<16x45xf32> to vector<16x1xf32>
    %29 = vector.broadcast %28 : vector<16x1xf32> to vector<16x128xf32>
    %30 = arith.mulf %27, %29 : vector<16x128xf32>
    %31 = arith.addf %23, %30 : vector<16x128xf32>
    %c7_i32 = arith.constant 7 : i32
    %32 = tpu.dynamic_rotate %11 by %c7_i32 dim 1 : vector<16x128xf32>, i32 -> vector<16x128xf32>
    %33 = vector.extract_strided_slice %2 {offsets = [2, 0], sizes = [1, 128], strides = [1, 1]} : vector<9x128xf32> to vector<1x128xf32>
    %34 = vector.broadcast %33 : vector<1x128xf32> to vector<16x128xf32>
    %35 = arith.mulf %32, %34 : vector<16x128xf32>
    %36 = vector.extract_strided_slice %3 {offsets = [0, 2], sizes = [16, 1], strides = [1, 1]} : vector<16x45xf32> to vector<16x1xf32>
    %37 = vector.broadcast %36 : vector<16x1xf32> to vector<16x128xf32>
    %38 = arith.mulf %35, %37 : vector<16x128xf32>
    %39 = arith.addf %31, %38 : vector<16x128xf32>
    %c1_i32 = arith.constant 1 : i32
    %40 = tpu.dynamic_rotate %11 by %c1_i32 dim 1 : vector<16x128xf32>, i32 -> vector<16x128xf32>
    %41 = vector.extract_strided_slice %2 {offsets = [3, 0], sizes = [1, 128], strides = [1, 1]} : vector<9x128xf32> to vector<1x128xf32>
    %42 = vector.broadcast %41 : vector<1x128xf32> to vector<16x128xf32>
    %43 = arith.mulf %40, %42 : vector<16x128xf32>
    %44 = vector.extract_strided_slice %3 {offsets = [0, 3], sizes = [16, 1], strides = [1, 1]} : vector<16x45xf32> to vector<16x1xf32>
    %45 = vector.broadcast %44 : vector<16x1xf32> to vector<16x128xf32>
    %46 = arith.mulf %43, %45 : vector<16x128xf32>
    %47 = arith.addf %39, %46 : vector<16x128xf32>
    %c127_i32 = arith.constant 127 : i32
    %48 = tpu.dynamic_rotate %11 by %c127_i32 dim 1 : vector<16x128xf32>, i32 -> vector<16x128xf32>
    %49 = vector.extract_strided_slice %2 {offsets = [5, 0], sizes = [1, 128], strides = [1, 1]} : vector<9x128xf32> to vector<1x128xf32>
    %50 = vector.broadcast %49 : vector<1x128xf32> to vector<16x128xf32>
    %51 = arith.mulf %48, %50 : vector<16x128xf32>
    %52 = vector.extract_strided_slice %3 {offsets = [0, 5], sizes = [16, 1], strides = [1, 1]} : vector<16x45xf32> to vector<16x1xf32>
    %53 = vector.broadcast %52 : vector<16x1xf32> to vector<16x128xf32>
    %54 = arith.mulf %51, %53 : vector<16x128xf32>
    %55 = arith.addf %47, %54 : vector<16x128xf32>
    %c121_i32 = arith.constant 121 : i32
    %56 = tpu.dynamic_rotate %11 by %c121_i32 dim 1 : vector<16x128xf32>, i32 -> vector<16x128xf32>
    %57 = vector.extract_strided_slice %2 {offsets = [6, 0], sizes = [1, 128], strides = [1, 1]} : vector<9x128xf32> to vector<1x128xf32>
    %58 = vector.broadcast %57 : vector<1x128xf32> to vector<16x128xf32>
    %59 = arith.mulf %56, %58 : vector<16x128xf32>
    %60 = vector.extract_strided_slice %3 {offsets = [0, 6], sizes = [16, 1], strides = [1, 1]} : vector<16x45xf32> to vector<16x1xf32>
    %61 = vector.broadcast %60 : vector<16x1xf32> to vector<16x128xf32>
    %62 = arith.mulf %59, %61 : vector<16x128xf32>
    %63 = arith.addf %55, %62 : vector<16x128xf32>
    %c120_i32 = arith.constant 120 : i32
    %64 = tpu.dynamic_rotate %11 by %c120_i32 dim 1 : vector<16x128xf32>, i32 -> vector<16x128xf32>
    %65 = vector.extract_strided_slice %2 {offsets = [7, 0], sizes = [1, 128], strides = [1, 1]} : vector<9x128xf32> to vector<1x128xf32>
    %66 = vector.broadcast %65 : vector<1x128xf32> to vector<16x128xf32>
    %67 = arith.mulf %64, %66 : vector<16x128xf32>
    %68 = vector.extract_strided_slice %3 {offsets = [0, 7], sizes = [16, 1], strides = [1, 1]} : vector<16x45xf32> to vector<16x1xf32>
    %69 = vector.broadcast %68 : vector<16x1xf32> to vector<16x128xf32>
    %70 = arith.mulf %67, %69 : vector<16x128xf32>
    %71 = arith.addf %63, %70 : vector<16x128xf32>
    %c119_i32 = arith.constant 119 : i32
    %72 = tpu.dynamic_rotate %11 by %c119_i32 dim 1 : vector<16x128xf32>, i32 -> vector<16x128xf32>
    %73 = vector.extract_strided_slice %2 {offsets = [8, 0], sizes = [1, 128], strides = [1, 1]} : vector<9x128xf32> to vector<1x128xf32>
    %74 = vector.broadcast %73 : vector<1x128xf32> to vector<16x128xf32>
    %75 = arith.mulf %72, %74 : vector<16x128xf32>
    %76 = vector.extract_strided_slice %3 {offsets = [0, 8], sizes = [16, 1], strides = [1, 1]} : vector<16x45xf32> to vector<16x1xf32>
    %77 = vector.broadcast %76 : vector<16x1xf32> to vector<16x128xf32>
    %78 = arith.mulf %75, %77 : vector<16x128xf32>
    %79 = arith.addf %71, %78 : vector<16x128xf32>
    %80 = vector.broadcast %12 : vector<16x1xf32> to vector<16x128xf32>
    %81 = arith.addf %79, %80 : vector<16x128xf32>
    %cst_10 = arith.constant 5.000000e-01 : f32
    %82 = vector.broadcast %cst_10 : f32 to vector<16x128xf32>
    %83 = arith.mulf %82, %81 : vector<16x128xf32>
    %cst_11 = arith.constant 4.471500e-02 : f32
    %84 = vector.broadcast %cst_11 : f32 to vector<16x128xf32>
    %85 = arith.mulf %84, %81 : vector<16x128xf32>
    %86 = arith.mulf %85, %81 : vector<16x128xf32>
    %87 = arith.mulf %86, %81 : vector<16x128xf32>
    %88 = arith.addf %81, %87 : vector<16x128xf32>
    %cst_12 = arith.constant 0.797884583 : f32
    %89 = vector.broadcast %cst_12 : f32 to vector<16x128xf32>
    %90 = arith.mulf %89, %88 : vector<16x128xf32>
    %91 = math.tanh %90 : vector<16x128xf32>
    %cst_13 = arith.constant 1.000000e+00 : f32
    %92 = vector.broadcast %cst_13 : f32 to vector<16x128xf32>
    %93 = arith.addf %92, %91 : vector<16x128xf32>
    %94 = arith.mulf %83, %93 : vector<16x128xf32>
    %c0_14 = arith.constant 0 : index
    %c0_15 = arith.constant 0 : index
    %95 = vector.load %arg6[%c0_14, %c0_15] : memref<16x16xbf16, #tpu.memory_space<vmem>>, vector<16x16xbf16>
    %96 = arith.truncf %94 : vector<16x128xf32> to vector<16x128xbf16>
    %cst_16 = arith.constant dense<0.000000e+00> : vector<16x128xf32>
    %97 = tpu.matmul %95, %96, %cst_16 {dimension_numbers = #tpu.dot_dimension_numbers<[1], [0], [0], [1], [0, 0, 1, 1], [], []>} : vector<16x16xbf16>, vector<16x128xbf16>, vector<16x128xf32> -> vector<16x128xf32>
    %98 = vector.extract_strided_slice %4 {offsets = [0, 2], sizes = [16, 1], strides = [1, 1]} : vector<16x10xf32> to vector<16x1xf32>
    %99 = vector.broadcast %98 : vector<16x1xf32> to vector<16x128xf32>
    %100 = arith.addf %97, %99 : vector<16x128xf32>
    %101 = arith.addf %6, %100 : vector<16x128xf32>
    %c0_17 = arith.constant 0 : index
    %c0_18 = arith.constant 0 : index
    %102 = vector.load %arg7[%c0_17, %c0_18] : memref<48x16xbf16, #tpu.memory_space<vmem>>, vector<48x16xbf16>
    %103 = arith.truncf %101 : vector<16x128xf32> to vector<16x128xbf16>
    %cst_19 = arith.constant dense<0.000000e+00> : vector<48x128xf32>
    %104 = tpu.matmul %102, %103, %cst_19 {dimension_numbers = #tpu.dot_dimension_numbers<[1], [0], [0], [1], [0, 0, 1, 1], [], []>} : vector<48x16xbf16>, vector<16x128xbf16>, vector<48x128xf32> -> vector<48x128xf32>
    %c0_20 = arith.constant 0 : index
    %c0_21 = arith.constant 0 : index
    %105 = vector.load %arg8[%c0_20, %c0_21] : memref<48x1xf32, #tpu.memory_space<vmem>>, vector<48x1xf32>
    %106 = vector.broadcast %105 : vector<48x1xf32> to vector<48x128xf32>
    %107 = arith.addf %104, %106 : vector<48x128xf32>
    %108 = vector.extract_strided_slice %107 {offsets = [0, 0], sizes = [16, 128], strides = [1, 1]} : vector<48x128xf32> to vector<16x128xf32>
    %109 = vector.extract_strided_slice %107 {offsets = [16, 0], sizes = [16, 128], strides = [1, 1]} : vector<48x128xf32> to vector<16x128xf32>
    %110 = vector.extract_strided_slice %107 {offsets = [32, 0], sizes = [16, 128], strides = [1, 1]} : vector<48x128xf32> to vector<16x128xf32>
    %111 = vector.extract_strided_slice %4 {offsets = [0, 3], sizes = [16, 1], strides = [1, 1]} : vector<16x10xf32> to vector<16x1xf32>
    %112 = vector.extract_strided_slice %3 {offsets = [0, 13], sizes = [16, 1], strides = [1, 1]} : vector<16x45xf32> to vector<16x1xf32>
    %113 = vector.broadcast %112 : vector<16x1xf32> to vector<16x128xf32>
    %114 = arith.mulf %108, %113 : vector<16x128xf32>
    %c9_i32_22 = arith.constant 9 : i32
    %115 = tpu.dynamic_rotate %108 by %c9_i32_22 dim 1 : vector<16x128xf32>, i32 -> vector<16x128xf32>
    %116 = vector.extract_strided_slice %2 {offsets = [0, 0], sizes = [1, 128], strides = [1, 1]} : vector<9x128xf32> to vector<1x128xf32>
    %117 = vector.broadcast %116 : vector<1x128xf32> to vector<16x128xf32>
    %118 = arith.mulf %115, %117 : vector<16x128xf32>
    %119 = vector.extract_strided_slice %3 {offsets = [0, 9], sizes = [16, 1], strides = [1, 1]} : vector<16x45xf32> to vector<16x1xf32>
    %120 = vector.broadcast %119 : vector<16x1xf32> to vector<16x128xf32>
    %121 = arith.mulf %118, %120 : vector<16x128xf32>
    %122 = arith.addf %114, %121 : vector<16x128xf32>
    %c8_i32_23 = arith.constant 8 : i32
    %123 = tpu.dynamic_rotate %108 by %c8_i32_23 dim 1 : vector<16x128xf32>, i32 -> vector<16x128xf32>
    %124 = vector.extract_strided_slice %2 {offsets = [1, 0], sizes = [1, 128], strides = [1, 1]} : vector<9x128xf32> to vector<1x128xf32>
    %125 = vector.broadcast %124 : vector<1x128xf32> to vector<16x128xf32>
    %126 = arith.mulf %123, %125 : vector<16x128xf32>
    %127 = vector.extract_strided_slice %3 {offsets = [0, 10], sizes = [16, 1], strides = [1, 1]} : vector<16x45xf32> to vector<16x1xf32>
    %128 = vector.broadcast %127 : vector<16x1xf32> to vector<16x128xf32>
    %129 = arith.mulf %126, %128 : vector<16x128xf32>
    %130 = arith.addf %122, %129 : vector<16x128xf32>
    %c7_i32_24 = arith.constant 7 : i32
    %131 = tpu.dynamic_rotate %108 by %c7_i32_24 dim 1 : vector<16x128xf32>, i32 -> vector<16x128xf32>
    %132 = vector.extract_strided_slice %2 {offsets = [2, 0], sizes = [1, 128], strides = [1, 1]} : vector<9x128xf32> to vector<1x128xf32>
    %133 = vector.broadcast %132 : vector<1x128xf32> to vector<16x128xf32>
    %134 = arith.mulf %131, %133 : vector<16x128xf32>
    %135 = vector.extract_strided_slice %3 {offsets = [0, 11], sizes = [16, 1], strides = [1, 1]} : vector<16x45xf32> to vector<16x1xf32>
    %136 = vector.broadcast %135 : vector<16x1xf32> to vector<16x128xf32>
    %137 = arith.mulf %134, %136 : vector<16x128xf32>
    %138 = arith.addf %130, %137 : vector<16x128xf32>
    %c1_i32_25 = arith.constant 1 : i32
    %139 = tpu.dynamic_rotate %108 by %c1_i32_25 dim 1 : vector<16x128xf32>, i32 -> vector<16x128xf32>
    %140 = vector.extract_strided_slice %2 {offsets = [3, 0], sizes = [1, 128], strides = [1, 1]} : vector<9x128xf32> to vector<1x128xf32>
    %141 = vector.broadcast %140 : vector<1x128xf32> to vector<16x128xf32>
    %142 = arith.mulf %139, %141 : vector<16x128xf32>
    %143 = vector.extract_strided_slice %3 {offsets = [0, 12], sizes = [16, 1], strides = [1, 1]} : vector<16x45xf32> to vector<16x1xf32>
    %144 = vector.broadcast %143 : vector<16x1xf32> to vector<16x128xf32>
    %145 = arith.mulf %142, %144 : vector<16x128xf32>
    %146 = arith.addf %138, %145 : vector<16x128xf32>
    %c127_i32_26 = arith.constant 127 : i32
    %147 = tpu.dynamic_rotate %108 by %c127_i32_26 dim 1 : vector<16x128xf32>, i32 -> vector<16x128xf32>
    %148 = vector.extract_strided_slice %2 {offsets = [5, 0], sizes = [1, 128], strides = [1, 1]} : vector<9x128xf32> to vector<1x128xf32>
    %149 = vector.broadcast %148 : vector<1x128xf32> to vector<16x128xf32>
    %150 = arith.mulf %147, %149 : vector<16x128xf32>
    %151 = vector.extract_strided_slice %3 {offsets = [0, 14], sizes = [16, 1], strides = [1, 1]} : vector<16x45xf32> to vector<16x1xf32>
    %152 = vector.broadcast %151 : vector<16x1xf32> to vector<16x128xf32>
    %153 = arith.mulf %150, %152 : vector<16x128xf32>
    %154 = arith.addf %146, %153 : vector<16x128xf32>
    %c121_i32_27 = arith.constant 121 : i32
    %155 = tpu.dynamic_rotate %108 by %c121_i32_27 dim 1 : vector<16x128xf32>, i32 -> vector<16x128xf32>
    %156 = vector.extract_strided_slice %2 {offsets = [6, 0], sizes = [1, 128], strides = [1, 1]} : vector<9x128xf32> to vector<1x128xf32>
    %157 = vector.broadcast %156 : vector<1x128xf32> to vector<16x128xf32>
    %158 = arith.mulf %155, %157 : vector<16x128xf32>
    %159 = vector.extract_strided_slice %3 {offsets = [0, 15], sizes = [16, 1], strides = [1, 1]} : vector<16x45xf32> to vector<16x1xf32>
    %160 = vector.broadcast %159 : vector<16x1xf32> to vector<16x128xf32>
    %161 = arith.mulf %158, %160 : vector<16x128xf32>
    %162 = arith.addf %154, %161 : vector<16x128xf32>
    %c120_i32_28 = arith.constant 120 : i32
    %163 = tpu.dynamic_rotate %108 by %c120_i32_28 dim 1 : vector<16x128xf32>, i32 -> vector<16x128xf32>
    %164 = vector.extract_strided_slice %2 {offsets = [7, 0], sizes = [1, 128], strides = [1, 1]} : vector<9x128xf32> to vector<1x128xf32>
    %165 = vector.broadcast %164 : vector<1x128xf32> to vector<16x128xf32>
    %166 = arith.mulf %163, %165 : vector<16x128xf32>
    %167 = vector.extract_strided_slice %3 {offsets = [0, 16], sizes = [16, 1], strides = [1, 1]} : vector<16x45xf32> to vector<16x1xf32>
    %168 = vector.broadcast %167 : vector<16x1xf32> to vector<16x128xf32>
    %169 = arith.mulf %166, %168 : vector<16x128xf32>
    %170 = arith.addf %162, %169 : vector<16x128xf32>
    %c119_i32_29 = arith.constant 119 : i32
    %171 = tpu.dynamic_rotate %108 by %c119_i32_29 dim 1 : vector<16x128xf32>, i32 -> vector<16x128xf32>
    %172 = vector.extract_strided_slice %2 {offsets = [8, 0], sizes = [1, 128], strides = [1, 1]} : vector<9x128xf32> to vector<1x128xf32>
    %173 = vector.broadcast %172 : vector<1x128xf32> to vector<16x128xf32>
    %174 = arith.mulf %171, %173 : vector<16x128xf32>
    %175 = vector.extract_strided_slice %3 {offsets = [0, 17], sizes = [16, 1], strides = [1, 1]} : vector<16x45xf32> to vector<16x1xf32>
    %176 = vector.broadcast %175 : vector<16x1xf32> to vector<16x128xf32>
    %177 = arith.mulf %174, %176 : vector<16x128xf32>
    %178 = arith.addf %170, %177 : vector<16x128xf32>
    %179 = vector.broadcast %111 : vector<16x1xf32> to vector<16x128xf32>
    %180 = arith.addf %178, %179 : vector<16x128xf32>
    %cst_30 = arith.constant 0.000000e+00 : f32
    %181 = vector.broadcast %cst_30 : f32 to vector<16x128xf32>
    %182 = arith.maximumf %180, %181 : vector<16x128xf32>
    %183 = vector.extract_strided_slice %4 {offsets = [0, 4], sizes = [16, 1], strides = [1, 1]} : vector<16x10xf32> to vector<16x1xf32>
    %184 = vector.broadcast %183 : vector<16x1xf32> to vector<16x128xf32>
    %185 = arith.mulf %182, %184 : vector<16x128xf32>
    %cst_31 = arith.constant dense<0.000000e+00> : vector<128xf32>
    %186 = vector.multi_reduction <add>, %185, %cst_31 [0] : vector<16x128xf32> to vector<128xf32>
    %187 = vector.shape_cast %186 : vector<128xf32> to vector<1x128xf32>
    %188 = arith.negf %187 : vector<1x128xf32>
    %189 = math.exp %188 : vector<1x128xf32>
    %cst_32 = arith.constant 1.000000e+00 : f32
    %190 = vector.broadcast %cst_32 : f32 to vector<1x128xf32>
    %191 = arith.addf %190, %189 : vector<1x128xf32>
    %192 = arith.divf %190, %191 : vector<1x128xf32>
    %193 = vector.broadcast %192 : vector<1x128xf32> to vector<16x128xf32>
    %194 = arith.mulf %108, %193 : vector<16x128xf32>
    %195 = vector.broadcast %5 : vector<1x128xf32> to vector<16x128xf32>
    %196 = arith.mulf %194, %195 : vector<16x128xf32>
    %cst_33 = arith.constant dense<0.000000e+00> : vector<16xf32>
    %197 = vector.multi_reduction <add>, %196, %cst_33 [1] : vector<16x128xf32> to vector<16xf32>
    %198 = vector.shape_cast %197 : vector<16xf32> to vector<16x1xf32>
    %cst_34 = arith.constant 1.562500e-02 : f32
    %199 = vector.broadcast %cst_34 : f32 to vector<16x1xf32>
    %200 = arith.mulf %198, %199 : vector<16x1xf32>
    %c0_35 = arith.constant 0 : index
    %c0_36 = arith.constant 0 : index
    %201 = vector.load %arg9[%c0_35, %c0_36] : memref<16x16xbf16, #tpu.memory_space<vmem>>, vector<16x16xbf16>
    %202 = arith.truncf %200 : vector<16x1xf32> to vector<16x1xbf16>
    %cst_37 = arith.constant dense<0.000000e+00> : vector<16x1xf32>
    %203 = tpu.matmul %201, %202, %cst_37 {dimension_numbers = #tpu.dot_dimension_numbers<[1], [0], [0], [1], [0, 0, 1, 1], [], []>} : vector<16x16xbf16>, vector<16x1xbf16>, vector<16x1xf32> -> vector<16x1xf32>
    %204 = arith.negf %203 : vector<16x1xf32>
    %205 = math.exp %204 : vector<16x1xf32>
    %cst_38 = arith.constant 1.000000e+00 : f32
    %206 = vector.broadcast %cst_38 : f32 to vector<16x1xf32>
    %207 = arith.addf %206, %205 : vector<16x1xf32>
    %208 = arith.divf %206, %207 : vector<16x1xf32>
    %209 = vector.broadcast %208 : vector<16x1xf32> to vector<16x128xf32>
    %210 = arith.mulf %194, %209 : vector<16x128xf32>
    %211 = vector.extract_strided_slice %4 {offsets = [0, 5], sizes = [16, 1], strides = [1, 1]} : vector<16x10xf32> to vector<16x1xf32>
    %212 = vector.extract_strided_slice %3 {offsets = [0, 22], sizes = [16, 1], strides = [1, 1]} : vector<16x45xf32> to vector<16x1xf32>
    %213 = vector.broadcast %212 : vector<16x1xf32> to vector<16x128xf32>
    %214 = arith.mulf %109, %213 : vector<16x128xf32>
    %c9_i32_39 = arith.constant 9 : i32
    %215 = tpu.dynamic_rotate %109 by %c9_i32_39 dim 1 : vector<16x128xf32>, i32 -> vector<16x128xf32>
    %216 = vector.extract_strided_slice %2 {offsets = [0, 0], sizes = [1, 128], strides = [1, 1]} : vector<9x128xf32> to vector<1x128xf32>
    %217 = vector.broadcast %216 : vector<1x128xf32> to vector<16x128xf32>
    %218 = arith.mulf %215, %217 : vector<16x128xf32>
    %219 = vector.extract_strided_slice %3 {offsets = [0, 18], sizes = [16, 1], strides = [1, 1]} : vector<16x45xf32> to vector<16x1xf32>
    %220 = vector.broadcast %219 : vector<16x1xf32> to vector<16x128xf32>
    %221 = arith.mulf %218, %220 : vector<16x128xf32>
    %222 = arith.addf %214, %221 : vector<16x128xf32>
    %c8_i32_40 = arith.constant 8 : i32
    %223 = tpu.dynamic_rotate %109 by %c8_i32_40 dim 1 : vector<16x128xf32>, i32 -> vector<16x128xf32>
    %224 = vector.extract_strided_slice %2 {offsets = [1, 0], sizes = [1, 128], strides = [1, 1]} : vector<9x128xf32> to vector<1x128xf32>
    %225 = vector.broadcast %224 : vector<1x128xf32> to vector<16x128xf32>
    %226 = arith.mulf %223, %225 : vector<16x128xf32>
    %227 = vector.extract_strided_slice %3 {offsets = [0, 19], sizes = [16, 1], strides = [1, 1]} : vector<16x45xf32> to vector<16x1xf32>
    %228 = vector.broadcast %227 : vector<16x1xf32> to vector<16x128xf32>
    %229 = arith.mulf %226, %228 : vector<16x128xf32>
    %230 = arith.addf %222, %229 : vector<16x128xf32>
    %c7_i32_41 = arith.constant 7 : i32
    %231 = tpu.dynamic_rotate %109 by %c7_i32_41 dim 1 : vector<16x128xf32>, i32 -> vector<16x128xf32>
    %232 = vector.extract_strided_slice %2 {offsets = [2, 0], sizes = [1, 128], strides = [1, 1]} : vector<9x128xf32> to vector<1x128xf32>
    %233 = vector.broadcast %232 : vector<1x128xf32> to vector<16x128xf32>
    %234 = arith.mulf %231, %233 : vector<16x128xf32>
    %235 = vector.extract_strided_slice %3 {offsets = [0, 20], sizes = [16, 1], strides = [1, 1]} : vector<16x45xf32> to vector<16x1xf32>
    %236 = vector.broadcast %235 : vector<16x1xf32> to vector<16x128xf32>
    %237 = arith.mulf %234, %236 : vector<16x128xf32>
    %238 = arith.addf %230, %237 : vector<16x128xf32>
    %c1_i32_42 = arith.constant 1 : i32
    %239 = tpu.dynamic_rotate %109 by %c1_i32_42 dim 1 : vector<16x128xf32>, i32 -> vector<16x128xf32>
    %240 = vector.extract_strided_slice %2 {offsets = [3, 0], sizes = [1, 128], strides = [1, 1]} : vector<9x128xf32> to vector<1x128xf32>
    %241 = vector.broadcast %240 : vector<1x128xf32> to vector<16x128xf32>
    %242 = arith.mulf %239, %241 : vector<16x128xf32>
    %243 = vector.extract_strided_slice %3 {offsets = [0, 21], sizes = [16, 1], strides = [1, 1]} : vector<16x45xf32> to vector<16x1xf32>
    %244 = vector.broadcast %243 : vector<16x1xf32> to vector<16x128xf32>
    %245 = arith.mulf %242, %244 : vector<16x128xf32>
    %246 = arith.addf %238, %245 : vector<16x128xf32>
    %c127_i32_43 = arith.constant 127 : i32
    %247 = tpu.dynamic_rotate %109 by %c127_i32_43 dim 1 : vector<16x128xf32>, i32 -> vector<16x128xf32>
    %248 = vector.extract_strided_slice %2 {offsets = [5, 0], sizes = [1, 128], strides = [1, 1]} : vector<9x128xf32> to vector<1x128xf32>
    %249 = vector.broadcast %248 : vector<1x128xf32> to vector<16x128xf32>
    %250 = arith.mulf %247, %249 : vector<16x128xf32>
    %251 = vector.extract_strided_slice %3 {offsets = [0, 23], sizes = [16, 1], strides = [1, 1]} : vector<16x45xf32> to vector<16x1xf32>
    %252 = vector.broadcast %251 : vector<16x1xf32> to vector<16x128xf32>
    %253 = arith.mulf %250, %252 : vector<16x128xf32>
    %254 = arith.addf %246, %253 : vector<16x128xf32>
    %c121_i32_44 = arith.constant 121 : i32
    %255 = tpu.dynamic_rotate %109 by %c121_i32_44 dim 1 : vector<16x128xf32>, i32 -> vector<16x128xf32>
    %256 = vector.extract_strided_slice %2 {offsets = [6, 0], sizes = [1, 128], strides = [1, 1]} : vector<9x128xf32> to vector<1x128xf32>
    %257 = vector.broadcast %256 : vector<1x128xf32> to vector<16x128xf32>
    %258 = arith.mulf %255, %257 : vector<16x128xf32>
    %259 = vector.extract_strided_slice %3 {offsets = [0, 24], sizes = [16, 1], strides = [1, 1]} : vector<16x45xf32> to vector<16x1xf32>
    %260 = vector.broadcast %259 : vector<16x1xf32> to vector<16x128xf32>
    %261 = arith.mulf %258, %260 : vector<16x128xf32>
    %262 = arith.addf %254, %261 : vector<16x128xf32>
    %c120_i32_45 = arith.constant 120 : i32
    %263 = tpu.dynamic_rotate %109 by %c120_i32_45 dim 1 : vector<16x128xf32>, i32 -> vector<16x128xf32>
    %264 = vector.extract_strided_slice %2 {offsets = [7, 0], sizes = [1, 128], strides = [1, 1]} : vector<9x128xf32> to vector<1x128xf32>
    %265 = vector.broadcast %264 : vector<1x128xf32> to vector<16x128xf32>
    %266 = arith.mulf %263, %265 : vector<16x128xf32>
    %267 = vector.extract_strided_slice %3 {offsets = [0, 25], sizes = [16, 1], strides = [1, 1]} : vector<16x45xf32> to vector<16x1xf32>
    %268 = vector.broadcast %267 : vector<16x1xf32> to vector<16x128xf32>
    %269 = arith.mulf %266, %268 : vector<16x128xf32>
    %270 = arith.addf %262, %269 : vector<16x128xf32>
    %c119_i32_46 = arith.constant 119 : i32
    %271 = tpu.dynamic_rotate %109 by %c119_i32_46 dim 1 : vector<16x128xf32>, i32 -> vector<16x128xf32>
    %272 = vector.extract_strided_slice %2 {offsets = [8, 0], sizes = [1, 128], strides = [1, 1]} : vector<9x128xf32> to vector<1x128xf32>
    %273 = vector.broadcast %272 : vector<1x128xf32> to vector<16x128xf32>
    %274 = arith.mulf %271, %273 : vector<16x128xf32>
    %275 = vector.extract_strided_slice %3 {offsets = [0, 26], sizes = [16, 1], strides = [1, 1]} : vector<16x45xf32> to vector<16x1xf32>
    %276 = vector.broadcast %275 : vector<16x1xf32> to vector<16x128xf32>
    %277 = arith.mulf %274, %276 : vector<16x128xf32>
    %278 = arith.addf %270, %277 : vector<16x128xf32>
    %279 = vector.broadcast %211 : vector<16x1xf32> to vector<16x128xf32>
    %280 = arith.addf %278, %279 : vector<16x128xf32>
    %cst_47 = arith.constant 0.000000e+00 : f32
    %281 = vector.broadcast %cst_47 : f32 to vector<16x128xf32>
    %282 = arith.maximumf %280, %281 : vector<16x128xf32>
    %283 = vector.extract_strided_slice %4 {offsets = [0, 6], sizes = [16, 1], strides = [1, 1]} : vector<16x10xf32> to vector<16x1xf32>
    %284 = vector.broadcast %283 : vector<16x1xf32> to vector<16x128xf32>
    %285 = arith.mulf %282, %284 : vector<16x128xf32>
    %cst_48 = arith.constant dense<0.000000e+00> : vector<128xf32>
    %286 = vector.multi_reduction <add>, %285, %cst_48 [0] : vector<16x128xf32> to vector<128xf32>
    %287 = vector.shape_cast %286 : vector<128xf32> to vector<1x128xf32>
    %288 = arith.negf %287 : vector<1x128xf32>
    %289 = math.exp %288 : vector<1x128xf32>
    %cst_49 = arith.constant 1.000000e+00 : f32
    %290 = vector.broadcast %cst_49 : f32 to vector<1x128xf32>
    %291 = arith.addf %290, %289 : vector<1x128xf32>
    %292 = arith.divf %290, %291 : vector<1x128xf32>
    %293 = vector.broadcast %292 : vector<1x128xf32> to vector<16x128xf32>
    %294 = arith.mulf %109, %293 : vector<16x128xf32>
    %295 = vector.broadcast %5 : vector<1x128xf32> to vector<16x128xf32>
    %296 = arith.mulf %294, %295 : vector<16x128xf32>
    %cst_50 = arith.constant dense<0.000000e+00> : vector<16xf32>
    %297 = vector.multi_reduction <add>, %296, %cst_50 [1] : vector<16x128xf32> to vector<16xf32>
    %298 = vector.shape_cast %297 : vector<16xf32> to vector<16x1xf32>
    %cst_51 = arith.constant 1.562500e-02 : f32
    %299 = vector.broadcast %cst_51 : f32 to vector<16x1xf32>
    %300 = arith.mulf %298, %299 : vector<16x1xf32>
    %c0_52 = arith.constant 0 : index
    %c0_53 = arith.constant 0 : index
    %301 = vector.load %arg10[%c0_52, %c0_53] : memref<16x16xbf16, #tpu.memory_space<vmem>>, vector<16x16xbf16>
    %302 = arith.truncf %300 : vector<16x1xf32> to vector<16x1xbf16>
    %cst_54 = arith.constant dense<0.000000e+00> : vector<16x1xf32>
    %303 = tpu.matmul %301, %302, %cst_54 {dimension_numbers = #tpu.dot_dimension_numbers<[1], [0], [0], [1], [0, 0, 1, 1], [], []>} : vector<16x16xbf16>, vector<16x1xbf16>, vector<16x1xf32> -> vector<16x1xf32>
    %304 = arith.negf %303 : vector<16x1xf32>
    %305 = math.exp %304 : vector<16x1xf32>
    %cst_55 = arith.constant 1.000000e+00 : f32
    %306 = vector.broadcast %cst_55 : f32 to vector<16x1xf32>
    %307 = arith.addf %306, %305 : vector<16x1xf32>
    %308 = arith.divf %306, %307 : vector<16x1xf32>
    %309 = vector.broadcast %308 : vector<16x1xf32> to vector<16x128xf32>
    %310 = arith.mulf %294, %309 : vector<16x128xf32>
    %311 = arith.addf %210, %310 : vector<16x128xf32>
    %312 = vector.extract_strided_slice %4 {offsets = [0, 7], sizes = [16, 1], strides = [1, 1]} : vector<16x10xf32> to vector<16x1xf32>
    %313 = vector.extract_strided_slice %3 {offsets = [0, 31], sizes = [16, 1], strides = [1, 1]} : vector<16x45xf32> to vector<16x1xf32>
    %314 = vector.broadcast %313 : vector<16x1xf32> to vector<16x128xf32>
    %315 = arith.mulf %311, %314 : vector<16x128xf32>
    %c9_i32_56 = arith.constant 9 : i32
    %316 = tpu.dynamic_rotate %311 by %c9_i32_56 dim 1 : vector<16x128xf32>, i32 -> vector<16x128xf32>
    %317 = vector.extract_strided_slice %2 {offsets = [0, 0], sizes = [1, 128], strides = [1, 1]} : vector<9x128xf32> to vector<1x128xf32>
    %318 = vector.broadcast %317 : vector<1x128xf32> to vector<16x128xf32>
    %319 = arith.mulf %316, %318 : vector<16x128xf32>
    %320 = vector.extract_strided_slice %3 {offsets = [0, 27], sizes = [16, 1], strides = [1, 1]} : vector<16x45xf32> to vector<16x1xf32>
    %321 = vector.broadcast %320 : vector<16x1xf32> to vector<16x128xf32>
    %322 = arith.mulf %319, %321 : vector<16x128xf32>
    %323 = arith.addf %315, %322 : vector<16x128xf32>
    %c8_i32_57 = arith.constant 8 : i32
    %324 = tpu.dynamic_rotate %311 by %c8_i32_57 dim 1 : vector<16x128xf32>, i32 -> vector<16x128xf32>
    %325 = vector.extract_strided_slice %2 {offsets = [1, 0], sizes = [1, 128], strides = [1, 1]} : vector<9x128xf32> to vector<1x128xf32>
    %326 = vector.broadcast %325 : vector<1x128xf32> to vector<16x128xf32>
    %327 = arith.mulf %324, %326 : vector<16x128xf32>
    %328 = vector.extract_strided_slice %3 {offsets = [0, 28], sizes = [16, 1], strides = [1, 1]} : vector<16x45xf32> to vector<16x1xf32>
    %329 = vector.broadcast %328 : vector<16x1xf32> to vector<16x128xf32>
    %330 = arith.mulf %327, %329 : vector<16x128xf32>
    %331 = arith.addf %323, %330 : vector<16x128xf32>
    %c7_i32_58 = arith.constant 7 : i32
    %332 = tpu.dynamic_rotate %311 by %c7_i32_58 dim 1 : vector<16x128xf32>, i32 -> vector<16x128xf32>
    %333 = vector.extract_strided_slice %2 {offsets = [2, 0], sizes = [1, 128], strides = [1, 1]} : vector<9x128xf32> to vector<1x128xf32>
    %334 = vector.broadcast %333 : vector<1x128xf32> to vector<16x128xf32>
    %335 = arith.mulf %332, %334 : vector<16x128xf32>
    %336 = vector.extract_strided_slice %3 {offsets = [0, 29], sizes = [16, 1], strides = [1, 1]} : vector<16x45xf32> to vector<16x1xf32>
    %337 = vector.broadcast %336 : vector<16x1xf32> to vector<16x128xf32>
    %338 = arith.mulf %335, %337 : vector<16x128xf32>
    %339 = arith.addf %331, %338 : vector<16x128xf32>
    %c1_i32_59 = arith.constant 1 : i32
    %340 = tpu.dynamic_rotate %311 by %c1_i32_59 dim 1 : vector<16x128xf32>, i32 -> vector<16x128xf32>
    %341 = vector.extract_strided_slice %2 {offsets = [3, 0], sizes = [1, 128], strides = [1, 1]} : vector<9x128xf32> to vector<1x128xf32>
    %342 = vector.broadcast %341 : vector<1x128xf32> to vector<16x128xf32>
    %343 = arith.mulf %340, %342 : vector<16x128xf32>
    %344 = vector.extract_strided_slice %3 {offsets = [0, 30], sizes = [16, 1], strides = [1, 1]} : vector<16x45xf32> to vector<16x1xf32>
    %345 = vector.broadcast %344 : vector<16x1xf32> to vector<16x128xf32>
    %346 = arith.mulf %343, %345 : vector<16x128xf32>
    %347 = arith.addf %339, %346 : vector<16x128xf32>
    %c127_i32_60 = arith.constant 127 : i32
    %348 = tpu.dynamic_rotate %311 by %c127_i32_60 dim 1 : vector<16x128xf32>, i32 -> vector<16x128xf32>
    %349 = vector.extract_strided_slice %2 {offsets = [5, 0], sizes = [1, 128], strides = [1, 1]} : vector<9x128xf32> to vector<1x128xf32>
    %350 = vector.broadcast %349 : vector<1x128xf32> to vector<16x128xf32>
    %351 = arith.mulf %348, %350 : vector<16x128xf32>
    %352 = vector.extract_strided_slice %3 {offsets = [0, 32], sizes = [16, 1], strides = [1, 1]} : vector<16x45xf32> to vector<16x1xf32>
    %353 = vector.broadcast %352 : vector<16x1xf32> to vector<16x128xf32>
    %354 = arith.mulf %351, %353 : vector<16x128xf32>
    %355 = arith.addf %347, %354 : vector<16x128xf32>
    %c121_i32_61 = arith.constant 121 : i32
    %356 = tpu.dynamic_rotate %311 by %c121_i32_61 dim 1 : vector<16x128xf32>, i32 -> vector<16x128xf32>
    %357 = vector.extract_strided_slice %2 {offsets = [6, 0], sizes = [1, 128], strides = [1, 1]} : vector<9x128xf32> to vector<1x128xf32>
    %358 = vector.broadcast %357 : vector<1x128xf32> to vector<16x128xf32>
    %359 = arith.mulf %356, %358 : vector<16x128xf32>
    %360 = vector.extract_strided_slice %3 {offsets = [0, 33], sizes = [16, 1], strides = [1, 1]} : vector<16x45xf32> to vector<16x1xf32>
    %361 = vector.broadcast %360 : vector<16x1xf32> to vector<16x128xf32>
    %362 = arith.mulf %359, %361 : vector<16x128xf32>
    %363 = arith.addf %355, %362 : vector<16x128xf32>
    %c120_i32_62 = arith.constant 120 : i32
    %364 = tpu.dynamic_rotate %311 by %c120_i32_62 dim 1 : vector<16x128xf32>, i32 -> vector<16x128xf32>
    %365 = vector.extract_strided_slice %2 {offsets = [7, 0], sizes = [1, 128], strides = [1, 1]} : vector<9x128xf32> to vector<1x128xf32>
    %366 = vector.broadcast %365 : vector<1x128xf32> to vector<16x128xf32>
    %367 = arith.mulf %364, %366 : vector<16x128xf32>
    %368 = vector.extract_strided_slice %3 {offsets = [0, 34], sizes = [16, 1], strides = [1, 1]} : vector<16x45xf32> to vector<16x1xf32>
    %369 = vector.broadcast %368 : vector<16x1xf32> to vector<16x128xf32>
    %370 = arith.mulf %367, %369 : vector<16x128xf32>
    %371 = arith.addf %363, %370 : vector<16x128xf32>
    %c119_i32_63 = arith.constant 119 : i32
    %372 = tpu.dynamic_rotate %311 by %c119_i32_63 dim 1 : vector<16x128xf32>, i32 -> vector<16x128xf32>
    %373 = vector.extract_strided_slice %2 {offsets = [8, 0], sizes = [1, 128], strides = [1, 1]} : vector<9x128xf32> to vector<1x128xf32>
    %374 = vector.broadcast %373 : vector<1x128xf32> to vector<16x128xf32>
    %375 = arith.mulf %372, %374 : vector<16x128xf32>
    %376 = vector.extract_strided_slice %3 {offsets = [0, 35], sizes = [16, 1], strides = [1, 1]} : vector<16x45xf32> to vector<16x1xf32>
    %377 = vector.broadcast %376 : vector<16x1xf32> to vector<16x128xf32>
    %378 = arith.mulf %375, %377 : vector<16x128xf32>
    %379 = arith.addf %371, %378 : vector<16x128xf32>
    %380 = vector.broadcast %312 : vector<16x1xf32> to vector<16x128xf32>
    %381 = arith.addf %379, %380 : vector<16x128xf32>
    %382 = arith.mulf %381, %110 : vector<16x128xf32>
    %383 = vector.extract_strided_slice %4 {offsets = [0, 8], sizes = [16, 1], strides = [1, 1]} : vector<16x10xf32> to vector<16x1xf32>
    %384 = vector.extract_strided_slice %3 {offsets = [0, 40], sizes = [16, 1], strides = [1, 1]} : vector<16x45xf32> to vector<16x1xf32>
    %385 = vector.broadcast %384 : vector<16x1xf32> to vector<16x128xf32>
    %386 = arith.mulf %382, %385 : vector<16x128xf32>
    %c9_i32_64 = arith.constant 9 : i32
    %387 = tpu.dynamic_rotate %382 by %c9_i32_64 dim 1 : vector<16x128xf32>, i32 -> vector<16x128xf32>
    %388 = vector.extract_strided_slice %2 {offsets = [0, 0], sizes = [1, 128], strides = [1, 1]} : vector<9x128xf32> to vector<1x128xf32>
    %389 = vector.broadcast %388 : vector<1x128xf32> to vector<16x128xf32>
    %390 = arith.mulf %387, %389 : vector<16x128xf32>
    %391 = vector.extract_strided_slice %3 {offsets = [0, 36], sizes = [16, 1], strides = [1, 1]} : vector<16x45xf32> to vector<16x1xf32>
    %392 = vector.broadcast %391 : vector<16x1xf32> to vector<16x128xf32>
    %393 = arith.mulf %390, %392 : vector<16x128xf32>
    %394 = arith.addf %386, %393 : vector<16x128xf32>
    %c8_i32_65 = arith.constant 8 : i32
    %395 = tpu.dynamic_rotate %382 by %c8_i32_65 dim 1 : vector<16x128xf32>, i32 -> vector<16x128xf32>
    %396 = vector.extract_strided_slice %2 {offsets = [1, 0], sizes = [1, 128], strides = [1, 1]} : vector<9x128xf32> to vector<1x128xf32>
    %397 = vector.broadcast %396 : vector<1x128xf32> to vector<16x128xf32>
    %398 = arith.mulf %395, %397 : vector<16x128xf32>
    %399 = vector.extract_strided_slice %3 {offsets = [0, 37], sizes = [16, 1], strides = [1, 1]} : vector<16x45xf32> to vector<16x1xf32>
    %400 = vector.broadcast %399 : vector<16x1xf32> to vector<16x128xf32>
    %401 = arith.mulf %398, %400 : vector<16x128xf32>
    %402 = arith.addf %394, %401 : vector<16x128xf32>
    %c7_i32_66 = arith.constant 7 : i32
    %403 = tpu.dynamic_rotate %382 by %c7_i32_66 dim 1 : vector<16x128xf32>, i32 -> vector<16x128xf32>
    %404 = vector.extract_strided_slice %2 {offsets = [2, 0], sizes = [1, 128], strides = [1, 1]} : vector<9x128xf32> to vector<1x128xf32>
    %405 = vector.broadcast %404 : vector<1x128xf32> to vector<16x128xf32>
    %406 = arith.mulf %403, %405 : vector<16x128xf32>
    %407 = vector.extract_strided_slice %3 {offsets = [0, 38], sizes = [16, 1], strides = [1, 1]} : vector<16x45xf32> to vector<16x1xf32>
    %408 = vector.broadcast %407 : vector<16x1xf32> to vector<16x128xf32>
    %409 = arith.mulf %406, %408 : vector<16x128xf32>
    %410 = arith.addf %402, %409 : vector<16x128xf32>
    %c1_i32_67 = arith.constant 1 : i32
    %411 = tpu.dynamic_rotate %382 by %c1_i32_67 dim 1 : vector<16x128xf32>, i32 -> vector<16x128xf32>
    %412 = vector.extract_strided_slice %2 {offsets = [3, 0], sizes = [1, 128], strides = [1, 1]} : vector<9x128xf32> to vector<1x128xf32>
    %413 = vector.broadcast %412 : vector<1x128xf32> to vector<16x128xf32>
    %414 = arith.mulf %411, %413 : vector<16x128xf32>
    %415 = vector.extract_strided_slice %3 {offsets = [0, 39], sizes = [16, 1], strides = [1, 1]} : vector<16x45xf32> to vector<16x1xf32>
    %416 = vector.broadcast %415 : vector<16x1xf32> to vector<16x128xf32>
    %417 = arith.mulf %414, %416 : vector<16x128xf32>
    %418 = arith.addf %410, %417 : vector<16x128xf32>
    %c127_i32_68 = arith.constant 127 : i32
    %419 = tpu.dynamic_rotate %382 by %c127_i32_68 dim 1 : vector<16x128xf32>, i32 -> vector<16x128xf32>
    %420 = vector.extract_strided_slice %2 {offsets = [5, 0], sizes = [1, 128], strides = [1, 1]} : vector<9x128xf32> to vector<1x128xf32>
    %421 = vector.broadcast %420 : vector<1x128xf32> to vector<16x128xf32>
    %422 = arith.mulf %419, %421 : vector<16x128xf32>
    %423 = vector.extract_strided_slice %3 {offsets = [0, 41], sizes = [16, 1], strides = [1, 1]} : vector<16x45xf32> to vector<16x1xf32>
    %424 = vector.broadcast %423 : vector<16x1xf32> to vector<16x128xf32>
    %425 = arith.mulf %422, %424 : vector<16x128xf32>
    %426 = arith.addf %418, %425 : vector<16x128xf32>
    %c121_i32_69 = arith.constant 121 : i32
    %427 = tpu.dynamic_rotate %382 by %c121_i32_69 dim 1 : vector<16x128xf32>, i32 -> vector<16x128xf32>
    %428 = vector.extract_strided_slice %2 {offsets = [6, 0], sizes = [1, 128], strides = [1, 1]} : vector<9x128xf32> to vector<1x128xf32>
    %429 = vector.broadcast %428 : vector<1x128xf32> to vector<16x128xf32>
    %430 = arith.mulf %427, %429 : vector<16x128xf32>
    %431 = vector.extract_strided_slice %3 {offsets = [0, 42], sizes = [16, 1], strides = [1, 1]} : vector<16x45xf32> to vector<16x1xf32>
    %432 = vector.broadcast %431 : vector<16x1xf32> to vector<16x128xf32>
    %433 = arith.mulf %430, %432 : vector<16x128xf32>
    %434 = arith.addf %426, %433 : vector<16x128xf32>
    %c120_i32_70 = arith.constant 120 : i32
    %435 = tpu.dynamic_rotate %382 by %c120_i32_70 dim 1 : vector<16x128xf32>, i32 -> vector<16x128xf32>
    %436 = vector.extract_strided_slice %2 {offsets = [7, 0], sizes = [1, 128], strides = [1, 1]} : vector<9x128xf32> to vector<1x128xf32>
    %437 = vector.broadcast %436 : vector<1x128xf32> to vector<16x128xf32>
    %438 = arith.mulf %435, %437 : vector<16x128xf32>
    %439 = vector.extract_strided_slice %3 {offsets = [0, 43], sizes = [16, 1], strides = [1, 1]} : vector<16x45xf32> to vector<16x1xf32>
    %440 = vector.broadcast %439 : vector<16x1xf32> to vector<16x128xf32>
    %441 = arith.mulf %438, %440 : vector<16x128xf32>
    %442 = arith.addf %434, %441 : vector<16x128xf32>
    %c119_i32_71 = arith.constant 119 : i32
    %443 = tpu.dynamic_rotate %382 by %c119_i32_71 dim 1 : vector<16x128xf32>, i32 -> vector<16x128xf32>
    %444 = vector.extract_strided_slice %2 {offsets = [8, 0], sizes = [1, 128], strides = [1, 1]} : vector<9x128xf32> to vector<1x128xf32>
    %445 = vector.broadcast %444 : vector<1x128xf32> to vector<16x128xf32>
    %446 = arith.mulf %443, %445 : vector<16x128xf32>
    %447 = vector.extract_strided_slice %3 {offsets = [0, 44], sizes = [16, 1], strides = [1, 1]} : vector<16x45xf32> to vector<16x1xf32>
    %448 = vector.broadcast %447 : vector<16x1xf32> to vector<16x128xf32>
    %449 = arith.mulf %446, %448 : vector<16x128xf32>
    %450 = arith.addf %442, %449 : vector<16x128xf32>
    %451 = vector.broadcast %383 : vector<16x1xf32> to vector<16x128xf32>
    %452 = arith.addf %450, %451 : vector<16x128xf32>
    %453 = arith.addf %101, %452 : vector<16x128xf32>
    %c0_72 = arith.constant 0 : index
    %c0_73 = arith.constant 0 : index
    %454 = vector.load %arg11[%c0_72, %c0_73] : memref<64x16xbf16, #tpu.memory_space<vmem>>, vector<64x16xbf16>
    %455 = arith.truncf %453 : vector<16x128xf32> to vector<16x128xbf16>
    %cst_74 = arith.constant dense<0.000000e+00> : vector<64x128xf32>
    %456 = tpu.matmul %454, %455, %cst_74 {dimension_numbers = #tpu.dot_dimension_numbers<[1], [0], [0], [1], [0, 0, 1, 1], [], []>} : vector<64x16xbf16>, vector<16x128xbf16>, vector<64x128xf32> -> vector<64x128xf32>
    %c0_75 = arith.constant 0 : index
    %c0_76 = arith.constant 0 : index
    %457 = vector.load %arg12[%c0_75, %c0_76] : memref<64x1xf32, #tpu.memory_space<vmem>>, vector<64x1xf32>
    %458 = vector.broadcast %457 : vector<64x1xf32> to vector<64x128xf32>
    %459 = arith.addf %456, %458 : vector<64x128xf32>
    %cst_77 = arith.constant 5.000000e-01 : f32
    %460 = vector.broadcast %cst_77 : f32 to vector<64x128xf32>
    %461 = arith.mulf %460, %459 : vector<64x128xf32>
    %cst_78 = arith.constant 4.471500e-02 : f32
    %462 = vector.broadcast %cst_78 : f32 to vector<64x128xf32>
    %463 = arith.mulf %462, %459 : vector<64x128xf32>
    %464 = arith.mulf %463, %459 : vector<64x128xf32>
    %465 = arith.mulf %464, %459 : vector<64x128xf32>
    %466 = arith.addf %459, %465 : vector<64x128xf32>
    %cst_79 = arith.constant 0.797884583 : f32
    %467 = vector.broadcast %cst_79 : f32 to vector<64x128xf32>
    %468 = arith.mulf %467, %466 : vector<64x128xf32>
    %469 = math.tanh %468 : vector<64x128xf32>
    %cst_80 = arith.constant 1.000000e+00 : f32
    %470 = vector.broadcast %cst_80 : f32 to vector<64x128xf32>
    %471 = arith.addf %470, %469 : vector<64x128xf32>
    %472 = arith.mulf %461, %471 : vector<64x128xf32>
    %c0_81 = arith.constant 0 : index
    %c0_82 = arith.constant 0 : index
    %473 = vector.load %arg13[%c0_81, %c0_82] : memref<16x64xbf16, #tpu.memory_space<vmem>>, vector<16x64xbf16>
    %474 = arith.truncf %472 : vector<64x128xf32> to vector<64x128xbf16>
    %cst_83 = arith.constant dense<0.000000e+00> : vector<16x128xf32>
    %475 = tpu.matmul %473, %474, %cst_83 {dimension_numbers = #tpu.dot_dimension_numbers<[1], [0], [0], [1], [0, 0, 1, 1], [], []>} : vector<16x64xbf16>, vector<64x128xbf16>, vector<16x128xf32> -> vector<16x128xf32>
    %476 = vector.extract_strided_slice %4 {offsets = [0, 9], sizes = [16, 1], strides = [1, 1]} : vector<16x10xf32> to vector<16x1xf32>
    %477 = vector.broadcast %476 : vector<16x1xf32> to vector<16x128xf32>
    %478 = arith.addf %475, %477 : vector<16x128xf32>
    %479 = arith.addf %453, %478 : vector<16x128xf32>
    %480 = arith.truncf %479 : vector<16x128xf32> to vector<16x128xbf16>
    %c0_84 = arith.constant 0 : index
    %c0_85 = arith.constant 0 : index
    %c0_86 = arith.constant 0 : index
    %481 = vector.load %arg14[%c0_84, %c0_85, %c0_86] : memref<1x16x128xbf16, #tpu.memory_space<vmem>>, vector<1x16x128xbf16>
    %482 = vector.shape_cast %481 : vector<1x16x128xbf16> to vector<16x128xbf16>
    %483 = vector.shape_cast %480 : vector<16x128xbf16> to vector<1x16x128xbf16>
    tpu.vector_store %arg14[%c0_84, %c0_85, %c0_86], %483 {strides = array<i32>} : memref<1x16x128xbf16, #tpu.memory_space<vmem>>, vector<1x16x128xbf16>,
    return
  }
  func.func @transform_0(%arg0: i32) -> (i32, i32, i32) {
    %c0_i32 = arith.constant 0 : i32
    %c0_i32_0 = arith.constant 0 : i32
    %c0_i32_1 = arith.constant 0 : i32
    return %arg0, %c0_i32, %c0_i32_0 : i32, i32, i32
  }
  func.func @transform_1(%arg0: i32) -> (i32, i32) {
    %c0_i32 = arith.constant 0 : i32
    %c0_i32_0 = arith.constant 0 : i32
    %c0_i32_1 = arith.constant 0 : i32
    return %c0_i32, %c0_i32_0 : i32, i32
  }
  func.func @transform_2(%arg0: i32) -> (i32, i32) {
    %c0_i32 = arith.constant 0 : i32
    %c0_i32_0 = arith.constant 0 : i32
    %c0_i32_1 = arith.constant 0 : i32
    return %c0_i32, %c0_i32_0 : i32, i32
  }
  func.func @transform_3(%arg0: i32) -> (i32, i32) {
    %c0_i32 = arith.constant 0 : i32
    %c0_i32_0 = arith.constant 0 : i32
    %c0_i32_1 = arith.constant 0 : i32
    return %c0_i32, %c0_i32_0 : i32, i32
  }
  func.func @transform_4(%arg0: i32) -> (i32, i32) {
    %c0_i32 = arith.constant 0 : i32
    %c0_i32_0 = arith.constant 0 : i32
    %c0_i32_1 = arith.constant 0 : i32
    return %c0_i32, %c0_i32_0 : i32, i32
  }
  func.func @transform_5(%arg0: i32) -> (i32, i32) {
    %c0_i32 = arith.constant 0 : i32
    %c0_i32_0 = arith.constant 0 : i32
    %c0_i32_1 = arith.constant 0 : i32
    return %c0_i32, %c0_i32_0 : i32, i32
  }
  func.func @transform_6(%arg0: i32) -> (i32, i32) {
    %c0_i32 = arith.constant 0 : i32
    %c0_i32_0 = arith.constant 0 : i32
    %c0_i32_1 = arith.constant 0 : i32
    return %c0_i32, %c0_i32_0 : i32, i32
  }
  func.func @transform_7(%arg0: i32) -> (i32, i32) {
    %c0_i32 = arith.constant 0 : i32
    %c0_i32_0 = arith.constant 0 : i32
    %c0_i32_1 = arith.constant 0 : i32
    return %c0_i32, %c0_i32_0 : i32, i32
  }
  func.func @transform_8(%arg0: i32) -> (i32, i32) {
    %c0_i32 = arith.constant 0 : i32
    %c0_i32_0 = arith.constant 0 : i32
    %c0_i32_1 = arith.constant 0 : i32
    return %c0_i32, %c0_i32_0 : i32, i32
  }
  func.func @transform_9(%arg0: i32) -> (i32, i32) {
    %c0_i32 = arith.constant 0 : i32
    %c0_i32_0 = arith.constant 0 : i32
    %c0_i32_1 = arith.constant 0 : i32
    return %c0_i32, %c0_i32_0 : i32, i32
  }
  func.func @transform_10(%arg0: i32) -> (i32, i32) {
    %c0_i32 = arith.constant 0 : i32
    %c0_i32_0 = arith.constant 0 : i32
    %c0_i32_1 = arith.constant 0 : i32
    return %c0_i32, %c0_i32_0 : i32, i32
  }
  func.func @transform_11(%arg0: i32) -> (i32, i32) {
    %c0_i32 = arith.constant 0 : i32
    %c0_i32_0 = arith.constant 0 : i32
    %c0_i32_1 = arith.constant 0 : i32
    return %c0_i32, %c0_i32_0 : i32, i32
  }
  func.func @transform_12(%arg0: i32) -> (i32, i32) {
    %c0_i32 = arith.constant 0 : i32
    %c0_i32_0 = arith.constant 0 : i32
    %c0_i32_1 = arith.constant 0 : i32
    return %c0_i32, %c0_i32_0 : i32, i32
  }
  func.func @transform_13(%arg0: i32) -> (i32, i32, i32) {
    %c0_i32 = arith.constant 0 : i32
    %c0_i32_0 = arith.constant 0 : i32
    %c0_i32_1 = arith.constant 0 : i32
    return %arg0, %c0_i32, %c0_i32_0 : i32, i32, i32
  }
}

module attributes {stable_mosaic.version = 11 : i64} {
  func.func @_block_kernel(%arg0: i32, %arg1: memref<1x32x128xbf16, #tpu.memory_space<vmem>>, %arg2: memref<9x128xf32, #tpu.memory_space<vmem>>, %arg3: memref<32x45xf32, #tpu.memory_space<vmem>>, %arg4: memref<32x10xf32, #tpu.memory_space<vmem>>, %arg5: memref<32x32xbf16, #tpu.memory_space<vmem>>, %arg6: memref<32x32xbf16, #tpu.memory_space<vmem>>, %arg7: memref<96x32xbf16, #tpu.memory_space<vmem>>, %arg8: memref<96x1xf32, #tpu.memory_space<vmem>>, %arg9: memref<32x32xbf16, #tpu.memory_space<vmem>>, %arg10: memref<32x32xbf16, #tpu.memory_space<vmem>>, %arg11: memref<128x32xbf16, #tpu.memory_space<vmem>>, %arg12: memref<128x1xf32, #tpu.memory_space<vmem>>, %arg13: memref<32x128xbf16, #tpu.memory_space<vmem>>, %arg14: memref<1x32x128xbf16, #tpu.memory_space<vmem>>) attributes {dimension_semantics = [#tpu.dimension_semantics<parallel>], iteration_bounds = array<i64: 2>, scalar_prefetch = 0 : i64, scratch_operands = 0 : i64, tpu.core_type = #tpu.core_type<tc>, window_params = [{transform_indices = @transform_0, window_bounds = array<i64: 1, 32, 128>}, {pipeline_mode = #tpu.pipeline_mode<synchronous>, transform_indices = @transform_1, window_bounds = array<i64: 9, 128>}, {pipeline_mode = #tpu.pipeline_mode<synchronous>, transform_indices = @transform_2, window_bounds = array<i64: 32, 45>}, {pipeline_mode = #tpu.pipeline_mode<synchronous>, transform_indices = @transform_3, window_bounds = array<i64: 32, 10>}, {pipeline_mode = #tpu.pipeline_mode<synchronous>, transform_indices = @transform_4, window_bounds = array<i64: 32, 32>}, {pipeline_mode = #tpu.pipeline_mode<synchronous>, transform_indices = @transform_5, window_bounds = array<i64: 32, 32>}, {pipeline_mode = #tpu.pipeline_mode<synchronous>, transform_indices = @transform_6, window_bounds = array<i64: 96, 32>}, {pipeline_mode = #tpu.pipeline_mode<synchronous>, transform_indices = @transform_7, window_bounds = array<i64: 96, 1>}, {pipeline_mode = #tpu.pipeline_mode<synchronous>, transform_indices = @transform_8, window_bounds = array<i64: 32, 32>}, {pipeline_mode = #tpu.pipeline_mode<synchronous>, transform_indices = @transform_9, window_bounds = array<i64: 32, 32>}, {pipeline_mode = #tpu.pipeline_mode<synchronous>, transform_indices = @transform_10, window_bounds = array<i64: 128, 32>}, {pipeline_mode = #tpu.pipeline_mode<synchronous>, transform_indices = @transform_11, window_bounds = array<i64: 128, 1>}, {pipeline_mode = #tpu.pipeline_mode<synchronous>, transform_indices = @transform_12, window_bounds = array<i64: 32, 128>}, {transform_indices = @transform_13, window_bounds = array<i64: 1, 32, 128>}]} {
    %c0 = arith.constant 0 : index
    %c0_0 = arith.constant 0 : index
    %c0_1 = arith.constant 0 : index
    %0 = vector.load %arg1[%c0, %c0_0, %c0_1] : memref<1x32x128xbf16, #tpu.memory_space<vmem>>, vector<1x32x128xbf16>
    %1 = vector.shape_cast %0 : vector<1x32x128xbf16> to vector<32x128xbf16>
    %c0_2 = arith.constant 0 : index
    %c0_3 = arith.constant 0 : index
    %2 = vector.load %arg2[%c0_2, %c0_3] : memref<9x128xf32, #tpu.memory_space<vmem>>, vector<9x128xf32>
    %c0_4 = arith.constant 0 : index
    %c0_5 = arith.constant 0 : index
    %3 = vector.load %arg3[%c0_4, %c0_5] : memref<32x45xf32, #tpu.memory_space<vmem>>, vector<32x45xf32>
    %c0_6 = arith.constant 0 : index
    %c0_7 = arith.constant 0 : index
    %4 = vector.load %arg4[%c0_6, %c0_7] : memref<32x10xf32, #tpu.memory_space<vmem>>, vector<32x10xf32>
    %5 = vector.extract_strided_slice %2 {offsets = [4, 0], sizes = [1, 128], strides = [1, 1]} : vector<9x128xf32> to vector<1x128xf32>
    %6 = arith.extf %1 : vector<32x128xbf16> to vector<32x128xf32>
    %c0_8 = arith.constant 0 : index
    %c0_9 = arith.constant 0 : index
    %7 = vector.load %arg5[%c0_8, %c0_9] : memref<32x32xbf16, #tpu.memory_space<vmem>>, vector<32x32xbf16>
    %cst = arith.constant dense<0.000000e+00> : vector<32x128xf32>
    %8 = tpu.matmul %7, %1, %cst {dimension_numbers = #tpu.dot_dimension_numbers<[1], [0], [0], [1], [0, 0, 1, 1], [], []>} : vector<32x32xbf16>, vector<32x128xbf16>, vector<32x128xf32> -> vector<32x128xf32>
    %9 = vector.extract_strided_slice %4 {offsets = [0, 0], sizes = [32, 1], strides = [1, 1]} : vector<32x10xf32> to vector<32x1xf32>
    %10 = vector.broadcast %9 : vector<32x1xf32> to vector<32x128xf32>
    %11 = arith.addf %8, %10 : vector<32x128xf32>
    %12 = vector.extract_strided_slice %4 {offsets = [0, 1], sizes = [32, 1], strides = [1, 1]} : vector<32x10xf32> to vector<32x1xf32>
    %13 = vector.extract_strided_slice %3 {offsets = [0, 4], sizes = [32, 1], strides = [1, 1]} : vector<32x45xf32> to vector<32x1xf32>
    %14 = vector.broadcast %13 : vector<32x1xf32> to vector<32x128xf32>
    %15 = arith.mulf %11, %14 : vector<32x128xf32>
    %c5_i32 = arith.constant 5 : i32
    %16 = tpu.dynamic_rotate %11 by %c5_i32 dim 1 : vector<32x128xf32>, i32 -> vector<32x128xf32>
    %17 = vector.extract_strided_slice %2 {offsets = [0, 0], sizes = [1, 128], strides = [1, 1]} : vector<9x128xf32> to vector<1x128xf32>
    %18 = vector.broadcast %17 : vector<1x128xf32> to vector<32x128xf32>
    %19 = arith.mulf %16, %18 : vector<32x128xf32>
    %20 = vector.extract_strided_slice %3 {offsets = [0, 0], sizes = [32, 1], strides = [1, 1]} : vector<32x45xf32> to vector<32x1xf32>
    %21 = vector.broadcast %20 : vector<32x1xf32> to vector<32x128xf32>
    %22 = arith.mulf %19, %21 : vector<32x128xf32>
    %23 = arith.addf %15, %22 : vector<32x128xf32>
    %c4_i32 = arith.constant 4 : i32
    %24 = tpu.dynamic_rotate %11 by %c4_i32 dim 1 : vector<32x128xf32>, i32 -> vector<32x128xf32>
    %25 = vector.extract_strided_slice %2 {offsets = [1, 0], sizes = [1, 128], strides = [1, 1]} : vector<9x128xf32> to vector<1x128xf32>
    %26 = vector.broadcast %25 : vector<1x128xf32> to vector<32x128xf32>
    %27 = arith.mulf %24, %26 : vector<32x128xf32>
    %28 = vector.extract_strided_slice %3 {offsets = [0, 1], sizes = [32, 1], strides = [1, 1]} : vector<32x45xf32> to vector<32x1xf32>
    %29 = vector.broadcast %28 : vector<32x1xf32> to vector<32x128xf32>
    %30 = arith.mulf %27, %29 : vector<32x128xf32>
    %31 = arith.addf %23, %30 : vector<32x128xf32>
    %c3_i32 = arith.constant 3 : i32
    %32 = tpu.dynamic_rotate %11 by %c3_i32 dim 1 : vector<32x128xf32>, i32 -> vector<32x128xf32>
    %33 = vector.extract_strided_slice %2 {offsets = [2, 0], sizes = [1, 128], strides = [1, 1]} : vector<9x128xf32> to vector<1x128xf32>
    %34 = vector.broadcast %33 : vector<1x128xf32> to vector<32x128xf32>
    %35 = arith.mulf %32, %34 : vector<32x128xf32>
    %36 = vector.extract_strided_slice %3 {offsets = [0, 2], sizes = [32, 1], strides = [1, 1]} : vector<32x45xf32> to vector<32x1xf32>
    %37 = vector.broadcast %36 : vector<32x1xf32> to vector<32x128xf32>
    %38 = arith.mulf %35, %37 : vector<32x128xf32>
    %39 = arith.addf %31, %38 : vector<32x128xf32>
    %c1_i32 = arith.constant 1 : i32
    %40 = tpu.dynamic_rotate %11 by %c1_i32 dim 1 : vector<32x128xf32>, i32 -> vector<32x128xf32>
    %41 = vector.extract_strided_slice %2 {offsets = [3, 0], sizes = [1, 128], strides = [1, 1]} : vector<9x128xf32> to vector<1x128xf32>
    %42 = vector.broadcast %41 : vector<1x128xf32> to vector<32x128xf32>
    %43 = arith.mulf %40, %42 : vector<32x128xf32>
    %44 = vector.extract_strided_slice %3 {offsets = [0, 3], sizes = [32, 1], strides = [1, 1]} : vector<32x45xf32> to vector<32x1xf32>
    %45 = vector.broadcast %44 : vector<32x1xf32> to vector<32x128xf32>
    %46 = arith.mulf %43, %45 : vector<32x128xf32>
    %47 = arith.addf %39, %46 : vector<32x128xf32>
    %c127_i32 = arith.constant 127 : i32
    %48 = tpu.dynamic_rotate %11 by %c127_i32 dim 1 : vector<32x128xf32>, i32 -> vector<32x128xf32>
    %49 = vector.extract_strided_slice %2 {offsets = [5, 0], sizes = [1, 128], strides = [1, 1]} : vector<9x128xf32> to vector<1x128xf32>
    %50 = vector.broadcast %49 : vector<1x128xf32> to vector<32x128xf32>
    %51 = arith.mulf %48, %50 : vector<32x128xf32>
    %52 = vector.extract_strided_slice %3 {offsets = [0, 5], sizes = [32, 1], strides = [1, 1]} : vector<32x45xf32> to vector<32x1xf32>
    %53 = vector.broadcast %52 : vector<32x1xf32> to vector<32x128xf32>
    %54 = arith.mulf %51, %53 : vector<32x128xf32>
    %55 = arith.addf %47, %54 : vector<32x128xf32>
    %c125_i32 = arith.constant 125 : i32
    %56 = tpu.dynamic_rotate %11 by %c125_i32 dim 1 : vector<32x128xf32>, i32 -> vector<32x128xf32>
    %57 = vector.extract_strided_slice %2 {offsets = [6, 0], sizes = [1, 128], strides = [1, 1]} : vector<9x128xf32> to vector<1x128xf32>
    %58 = vector.broadcast %57 : vector<1x128xf32> to vector<32x128xf32>
    %59 = arith.mulf %56, %58 : vector<32x128xf32>
    %60 = vector.extract_strided_slice %3 {offsets = [0, 6], sizes = [32, 1], strides = [1, 1]} : vector<32x45xf32> to vector<32x1xf32>
    %61 = vector.broadcast %60 : vector<32x1xf32> to vector<32x128xf32>
    %62 = arith.mulf %59, %61 : vector<32x128xf32>
    %63 = arith.addf %55, %62 : vector<32x128xf32>
    %c124_i32 = arith.constant 124 : i32
    %64 = tpu.dynamic_rotate %11 by %c124_i32 dim 1 : vector<32x128xf32>, i32 -> vector<32x128xf32>
    %65 = vector.extract_strided_slice %2 {offsets = [7, 0], sizes = [1, 128], strides = [1, 1]} : vector<9x128xf32> to vector<1x128xf32>
    %66 = vector.broadcast %65 : vector<1x128xf32> to vector<32x128xf32>
    %67 = arith.mulf %64, %66 : vector<32x128xf32>
    %68 = vector.extract_strided_slice %3 {offsets = [0, 7], sizes = [32, 1], strides = [1, 1]} : vector<32x45xf32> to vector<32x1xf32>
    %69 = vector.broadcast %68 : vector<32x1xf32> to vector<32x128xf32>
    %70 = arith.mulf %67, %69 : vector<32x128xf32>
    %71 = arith.addf %63, %70 : vector<32x128xf32>
    %c123_i32 = arith.constant 123 : i32
    %72 = tpu.dynamic_rotate %11 by %c123_i32 dim 1 : vector<32x128xf32>, i32 -> vector<32x128xf32>
    %73 = vector.extract_strided_slice %2 {offsets = [8, 0], sizes = [1, 128], strides = [1, 1]} : vector<9x128xf32> to vector<1x128xf32>
    %74 = vector.broadcast %73 : vector<1x128xf32> to vector<32x128xf32>
    %75 = arith.mulf %72, %74 : vector<32x128xf32>
    %76 = vector.extract_strided_slice %3 {offsets = [0, 8], sizes = [32, 1], strides = [1, 1]} : vector<32x45xf32> to vector<32x1xf32>
    %77 = vector.broadcast %76 : vector<32x1xf32> to vector<32x128xf32>
    %78 = arith.mulf %75, %77 : vector<32x128xf32>
    %79 = arith.addf %71, %78 : vector<32x128xf32>
    %80 = vector.broadcast %12 : vector<32x1xf32> to vector<32x128xf32>
    %81 = arith.addf %79, %80 : vector<32x128xf32>
    %cst_10 = arith.constant 5.000000e-01 : f32
    %82 = vector.broadcast %cst_10 : f32 to vector<32x128xf32>
    %83 = arith.mulf %82, %81 : vector<32x128xf32>
    %cst_11 = arith.constant 4.471500e-02 : f32
    %84 = vector.broadcast %cst_11 : f32 to vector<32x128xf32>
    %85 = arith.mulf %84, %81 : vector<32x128xf32>
    %86 = arith.mulf %85, %81 : vector<32x128xf32>
    %87 = arith.mulf %86, %81 : vector<32x128xf32>
    %88 = arith.addf %81, %87 : vector<32x128xf32>
    %cst_12 = arith.constant 0.797884583 : f32
    %89 = vector.broadcast %cst_12 : f32 to vector<32x128xf32>
    %90 = arith.mulf %89, %88 : vector<32x128xf32>
    %91 = math.tanh %90 : vector<32x128xf32>
    %cst_13 = arith.constant 1.000000e+00 : f32
    %92 = vector.broadcast %cst_13 : f32 to vector<32x128xf32>
    %93 = arith.addf %92, %91 : vector<32x128xf32>
    %94 = arith.mulf %83, %93 : vector<32x128xf32>
    %c0_14 = arith.constant 0 : index
    %c0_15 = arith.constant 0 : index
    %95 = vector.load %arg6[%c0_14, %c0_15] : memref<32x32xbf16, #tpu.memory_space<vmem>>, vector<32x32xbf16>
    %96 = arith.truncf %94 : vector<32x128xf32> to vector<32x128xbf16>
    %cst_16 = arith.constant dense<0.000000e+00> : vector<32x128xf32>
    %97 = tpu.matmul %95, %96, %cst_16 {dimension_numbers = #tpu.dot_dimension_numbers<[1], [0], [0], [1], [0, 0, 1, 1], [], []>} : vector<32x32xbf16>, vector<32x128xbf16>, vector<32x128xf32> -> vector<32x128xf32>
    %98 = vector.extract_strided_slice %4 {offsets = [0, 2], sizes = [32, 1], strides = [1, 1]} : vector<32x10xf32> to vector<32x1xf32>
    %99 = vector.broadcast %98 : vector<32x1xf32> to vector<32x128xf32>
    %100 = arith.addf %97, %99 : vector<32x128xf32>
    %101 = arith.addf %6, %100 : vector<32x128xf32>
    %c0_17 = arith.constant 0 : index
    %c0_18 = arith.constant 0 : index
    %102 = vector.load %arg7[%c0_17, %c0_18] : memref<96x32xbf16, #tpu.memory_space<vmem>>, vector<96x32xbf16>
    %103 = arith.truncf %101 : vector<32x128xf32> to vector<32x128xbf16>
    %cst_19 = arith.constant dense<0.000000e+00> : vector<96x128xf32>
    %104 = tpu.matmul %102, %103, %cst_19 {dimension_numbers = #tpu.dot_dimension_numbers<[1], [0], [0], [1], [0, 0, 1, 1], [], []>} : vector<96x32xbf16>, vector<32x128xbf16>, vector<96x128xf32> -> vector<96x128xf32>
    %c0_20 = arith.constant 0 : index
    %c0_21 = arith.constant 0 : index
    %105 = vector.load %arg8[%c0_20, %c0_21] : memref<96x1xf32, #tpu.memory_space<vmem>>, vector<96x1xf32>
    %106 = vector.broadcast %105 : vector<96x1xf32> to vector<96x128xf32>
    %107 = arith.addf %104, %106 : vector<96x128xf32>
    %108 = vector.extract_strided_slice %107 {offsets = [0, 0], sizes = [32, 128], strides = [1, 1]} : vector<96x128xf32> to vector<32x128xf32>
    %109 = vector.extract_strided_slice %107 {offsets = [32, 0], sizes = [32, 128], strides = [1, 1]} : vector<96x128xf32> to vector<32x128xf32>
    %110 = vector.extract_strided_slice %107 {offsets = [64, 0], sizes = [32, 128], strides = [1, 1]} : vector<96x128xf32> to vector<32x128xf32>
    %111 = vector.extract_strided_slice %4 {offsets = [0, 3], sizes = [32, 1], strides = [1, 1]} : vector<32x10xf32> to vector<32x1xf32>
    %112 = vector.extract_strided_slice %3 {offsets = [0, 13], sizes = [32, 1], strides = [1, 1]} : vector<32x45xf32> to vector<32x1xf32>
    %113 = vector.broadcast %112 : vector<32x1xf32> to vector<32x128xf32>
    %114 = arith.mulf %108, %113 : vector<32x128xf32>
    %c5_i32_22 = arith.constant 5 : i32
    %115 = tpu.dynamic_rotate %108 by %c5_i32_22 dim 1 : vector<32x128xf32>, i32 -> vector<32x128xf32>
    %116 = vector.extract_strided_slice %2 {offsets = [0, 0], sizes = [1, 128], strides = [1, 1]} : vector<9x128xf32> to vector<1x128xf32>
    %117 = vector.broadcast %116 : vector<1x128xf32> to vector<32x128xf32>
    %118 = arith.mulf %115, %117 : vector<32x128xf32>
    %119 = vector.extract_strided_slice %3 {offsets = [0, 9], sizes = [32, 1], strides = [1, 1]} : vector<32x45xf32> to vector<32x1xf32>
    %120 = vector.broadcast %119 : vector<32x1xf32> to vector<32x128xf32>
    %121 = arith.mulf %118, %120 : vector<32x128xf32>
    %122 = arith.addf %114, %121 : vector<32x128xf32>
    %c4_i32_23 = arith.constant 4 : i32
    %123 = tpu.dynamic_rotate %108 by %c4_i32_23 dim 1 : vector<32x128xf32>, i32 -> vector<32x128xf32>
    %124 = vector.extract_strided_slice %2 {offsets = [1, 0], sizes = [1, 128], strides = [1, 1]} : vector<9x128xf32> to vector<1x128xf32>
    %125 = vector.broadcast %124 : vector<1x128xf32> to vector<32x128xf32>
    %126 = arith.mulf %123, %125 : vector<32x128xf32>
    %127 = vector.extract_strided_slice %3 {offsets = [0, 10], sizes = [32, 1], strides = [1, 1]} : vector<32x45xf32> to vector<32x1xf32>
    %128 = vector.broadcast %127 : vector<32x1xf32> to vector<32x128xf32>
    %129 = arith.mulf %126, %128 : vector<32x128xf32>
    %130 = arith.addf %122, %129 : vector<32x128xf32>
    %c3_i32_24 = arith.constant 3 : i32
    %131 = tpu.dynamic_rotate %108 by %c3_i32_24 dim 1 : vector<32x128xf32>, i32 -> vector<32x128xf32>
    %132 = vector.extract_strided_slice %2 {offsets = [2, 0], sizes = [1, 128], strides = [1, 1]} : vector<9x128xf32> to vector<1x128xf32>
    %133 = vector.broadcast %132 : vector<1x128xf32> to vector<32x128xf32>
    %134 = arith.mulf %131, %133 : vector<32x128xf32>
    %135 = vector.extract_strided_slice %3 {offsets = [0, 11], sizes = [32, 1], strides = [1, 1]} : vector<32x45xf32> to vector<32x1xf32>
    %136 = vector.broadcast %135 : vector<32x1xf32> to vector<32x128xf32>
    %137 = arith.mulf %134, %136 : vector<32x128xf32>
    %138 = arith.addf %130, %137 : vector<32x128xf32>
    %c1_i32_25 = arith.constant 1 : i32
    %139 = tpu.dynamic_rotate %108 by %c1_i32_25 dim 1 : vector<32x128xf32>, i32 -> vector<32x128xf32>
    %140 = vector.extract_strided_slice %2 {offsets = [3, 0], sizes = [1, 128], strides = [1, 1]} : vector<9x128xf32> to vector<1x128xf32>
    %141 = vector.broadcast %140 : vector<1x128xf32> to vector<32x128xf32>
    %142 = arith.mulf %139, %141 : vector<32x128xf32>
    %143 = vector.extract_strided_slice %3 {offsets = [0, 12], sizes = [32, 1], strides = [1, 1]} : vector<32x45xf32> to vector<32x1xf32>
    %144 = vector.broadcast %143 : vector<32x1xf32> to vector<32x128xf32>
    %145 = arith.mulf %142, %144 : vector<32x128xf32>
    %146 = arith.addf %138, %145 : vector<32x128xf32>
    %c127_i32_26 = arith.constant 127 : i32
    %147 = tpu.dynamic_rotate %108 by %c127_i32_26 dim 1 : vector<32x128xf32>, i32 -> vector<32x128xf32>
    %148 = vector.extract_strided_slice %2 {offsets = [5, 0], sizes = [1, 128], strides = [1, 1]} : vector<9x128xf32> to vector<1x128xf32>
    %149 = vector.broadcast %148 : vector<1x128xf32> to vector<32x128xf32>
    %150 = arith.mulf %147, %149 : vector<32x128xf32>
    %151 = vector.extract_strided_slice %3 {offsets = [0, 14], sizes = [32, 1], strides = [1, 1]} : vector<32x45xf32> to vector<32x1xf32>
    %152 = vector.broadcast %151 : vector<32x1xf32> to vector<32x128xf32>
    %153 = arith.mulf %150, %152 : vector<32x128xf32>
    %154 = arith.addf %146, %153 : vector<32x128xf32>
    %c125_i32_27 = arith.constant 125 : i32
    %155 = tpu.dynamic_rotate %108 by %c125_i32_27 dim 1 : vector<32x128xf32>, i32 -> vector<32x128xf32>
    %156 = vector.extract_strided_slice %2 {offsets = [6, 0], sizes = [1, 128], strides = [1, 1]} : vector<9x128xf32> to vector<1x128xf32>
    %157 = vector.broadcast %156 : vector<1x128xf32> to vector<32x128xf32>
    %158 = arith.mulf %155, %157 : vector<32x128xf32>
    %159 = vector.extract_strided_slice %3 {offsets = [0, 15], sizes = [32, 1], strides = [1, 1]} : vector<32x45xf32> to vector<32x1xf32>
    %160 = vector.broadcast %159 : vector<32x1xf32> to vector<32x128xf32>
    %161 = arith.mulf %158, %160 : vector<32x128xf32>
    %162 = arith.addf %154, %161 : vector<32x128xf32>
    %c124_i32_28 = arith.constant 124 : i32
    %163 = tpu.dynamic_rotate %108 by %c124_i32_28 dim 1 : vector<32x128xf32>, i32 -> vector<32x128xf32>
    %164 = vector.extract_strided_slice %2 {offsets = [7, 0], sizes = [1, 128], strides = [1, 1]} : vector<9x128xf32> to vector<1x128xf32>
    %165 = vector.broadcast %164 : vector<1x128xf32> to vector<32x128xf32>
    %166 = arith.mulf %163, %165 : vector<32x128xf32>
    %167 = vector.extract_strided_slice %3 {offsets = [0, 16], sizes = [32, 1], strides = [1, 1]} : vector<32x45xf32> to vector<32x1xf32>
    %168 = vector.broadcast %167 : vector<32x1xf32> to vector<32x128xf32>
    %169 = arith.mulf %166, %168 : vector<32x128xf32>
    %170 = arith.addf %162, %169 : vector<32x128xf32>
    %c123_i32_29 = arith.constant 123 : i32
    %171 = tpu.dynamic_rotate %108 by %c123_i32_29 dim 1 : vector<32x128xf32>, i32 -> vector<32x128xf32>
    %172 = vector.extract_strided_slice %2 {offsets = [8, 0], sizes = [1, 128], strides = [1, 1]} : vector<9x128xf32> to vector<1x128xf32>
    %173 = vector.broadcast %172 : vector<1x128xf32> to vector<32x128xf32>
    %174 = arith.mulf %171, %173 : vector<32x128xf32>
    %175 = vector.extract_strided_slice %3 {offsets = [0, 17], sizes = [32, 1], strides = [1, 1]} : vector<32x45xf32> to vector<32x1xf32>
    %176 = vector.broadcast %175 : vector<32x1xf32> to vector<32x128xf32>
    %177 = arith.mulf %174, %176 : vector<32x128xf32>
    %178 = arith.addf %170, %177 : vector<32x128xf32>
    %179 = vector.broadcast %111 : vector<32x1xf32> to vector<32x128xf32>
    %180 = arith.addf %178, %179 : vector<32x128xf32>
    %cst_30 = arith.constant 0.000000e+00 : f32
    %181 = vector.broadcast %cst_30 : f32 to vector<32x128xf32>
    %182 = arith.maximumf %180, %181 : vector<32x128xf32>
    %183 = vector.extract_strided_slice %4 {offsets = [0, 4], sizes = [32, 1], strides = [1, 1]} : vector<32x10xf32> to vector<32x1xf32>
    %184 = vector.broadcast %183 : vector<32x1xf32> to vector<32x128xf32>
    %185 = arith.mulf %182, %184 : vector<32x128xf32>
    %cst_31 = arith.constant dense<0.000000e+00> : vector<128xf32>
    %186 = vector.multi_reduction <add>, %185, %cst_31 [0] : vector<32x128xf32> to vector<128xf32>
    %187 = vector.shape_cast %186 : vector<128xf32> to vector<1x128xf32>
    %188 = arith.negf %187 : vector<1x128xf32>
    %189 = math.exp %188 : vector<1x128xf32>
    %cst_32 = arith.constant 1.000000e+00 : f32
    %190 = vector.broadcast %cst_32 : f32 to vector<1x128xf32>
    %191 = arith.addf %190, %189 : vector<1x128xf32>
    %192 = arith.divf %190, %191 : vector<1x128xf32>
    %193 = vector.broadcast %192 : vector<1x128xf32> to vector<32x128xf32>
    %194 = arith.mulf %108, %193 : vector<32x128xf32>
    %195 = vector.broadcast %5 : vector<1x128xf32> to vector<32x128xf32>
    %196 = arith.mulf %194, %195 : vector<32x128xf32>
    %cst_33 = arith.constant dense<0.000000e+00> : vector<32xf32>
    %197 = vector.multi_reduction <add>, %196, %cst_33 [1] : vector<32x128xf32> to vector<32xf32>
    %198 = vector.shape_cast %197 : vector<32xf32> to vector<32x1xf32>
    %cst_34 = arith.constant 6.250000e-02 : f32
    %199 = vector.broadcast %cst_34 : f32 to vector<32x1xf32>
    %200 = arith.mulf %198, %199 : vector<32x1xf32>
    %c0_35 = arith.constant 0 : index
    %c0_36 = arith.constant 0 : index
    %201 = vector.load %arg9[%c0_35, %c0_36] : memref<32x32xbf16, #tpu.memory_space<vmem>>, vector<32x32xbf16>
    %202 = arith.truncf %200 : vector<32x1xf32> to vector<32x1xbf16>
    %cst_37 = arith.constant dense<0.000000e+00> : vector<32x1xf32>
    %203 = tpu.matmul %201, %202, %cst_37 {dimension_numbers = #tpu.dot_dimension_numbers<[1], [0], [0], [1], [0, 0, 1, 1], [], []>} : vector<32x32xbf16>, vector<32x1xbf16>, vector<32x1xf32> -> vector<32x1xf32>
    %204 = arith.negf %203 : vector<32x1xf32>
    %205 = math.exp %204 : vector<32x1xf32>
    %cst_38 = arith.constant 1.000000e+00 : f32
    %206 = vector.broadcast %cst_38 : f32 to vector<32x1xf32>
    %207 = arith.addf %206, %205 : vector<32x1xf32>
    %208 = arith.divf %206, %207 : vector<32x1xf32>
    %209 = vector.broadcast %208 : vector<32x1xf32> to vector<32x128xf32>
    %210 = arith.mulf %194, %209 : vector<32x128xf32>
    %211 = vector.extract_strided_slice %4 {offsets = [0, 5], sizes = [32, 1], strides = [1, 1]} : vector<32x10xf32> to vector<32x1xf32>
    %212 = vector.extract_strided_slice %3 {offsets = [0, 22], sizes = [32, 1], strides = [1, 1]} : vector<32x45xf32> to vector<32x1xf32>
    %213 = vector.broadcast %212 : vector<32x1xf32> to vector<32x128xf32>
    %214 = arith.mulf %109, %213 : vector<32x128xf32>
    %c5_i32_39 = arith.constant 5 : i32
    %215 = tpu.dynamic_rotate %109 by %c5_i32_39 dim 1 : vector<32x128xf32>, i32 -> vector<32x128xf32>
    %216 = vector.extract_strided_slice %2 {offsets = [0, 0], sizes = [1, 128], strides = [1, 1]} : vector<9x128xf32> to vector<1x128xf32>
    %217 = vector.broadcast %216 : vector<1x128xf32> to vector<32x128xf32>
    %218 = arith.mulf %215, %217 : vector<32x128xf32>
    %219 = vector.extract_strided_slice %3 {offsets = [0, 18], sizes = [32, 1], strides = [1, 1]} : vector<32x45xf32> to vector<32x1xf32>
    %220 = vector.broadcast %219 : vector<32x1xf32> to vector<32x128xf32>
    %221 = arith.mulf %218, %220 : vector<32x128xf32>
    %222 = arith.addf %214, %221 : vector<32x128xf32>
    %c4_i32_40 = arith.constant 4 : i32
    %223 = tpu.dynamic_rotate %109 by %c4_i32_40 dim 1 : vector<32x128xf32>, i32 -> vector<32x128xf32>
    %224 = vector.extract_strided_slice %2 {offsets = [1, 0], sizes = [1, 128], strides = [1, 1]} : vector<9x128xf32> to vector<1x128xf32>
    %225 = vector.broadcast %224 : vector<1x128xf32> to vector<32x128xf32>
    %226 = arith.mulf %223, %225 : vector<32x128xf32>
    %227 = vector.extract_strided_slice %3 {offsets = [0, 19], sizes = [32, 1], strides = [1, 1]} : vector<32x45xf32> to vector<32x1xf32>
    %228 = vector.broadcast %227 : vector<32x1xf32> to vector<32x128xf32>
    %229 = arith.mulf %226, %228 : vector<32x128xf32>
    %230 = arith.addf %222, %229 : vector<32x128xf32>
    %c3_i32_41 = arith.constant 3 : i32
    %231 = tpu.dynamic_rotate %109 by %c3_i32_41 dim 1 : vector<32x128xf32>, i32 -> vector<32x128xf32>
    %232 = vector.extract_strided_slice %2 {offsets = [2, 0], sizes = [1, 128], strides = [1, 1]} : vector<9x128xf32> to vector<1x128xf32>
    %233 = vector.broadcast %232 : vector<1x128xf32> to vector<32x128xf32>
    %234 = arith.mulf %231, %233 : vector<32x128xf32>
    %235 = vector.extract_strided_slice %3 {offsets = [0, 20], sizes = [32, 1], strides = [1, 1]} : vector<32x45xf32> to vector<32x1xf32>
    %236 = vector.broadcast %235 : vector<32x1xf32> to vector<32x128xf32>
    %237 = arith.mulf %234, %236 : vector<32x128xf32>
    %238 = arith.addf %230, %237 : vector<32x128xf32>
    %c1_i32_42 = arith.constant 1 : i32
    %239 = tpu.dynamic_rotate %109 by %c1_i32_42 dim 1 : vector<32x128xf32>, i32 -> vector<32x128xf32>
    %240 = vector.extract_strided_slice %2 {offsets = [3, 0], sizes = [1, 128], strides = [1, 1]} : vector<9x128xf32> to vector<1x128xf32>
    %241 = vector.broadcast %240 : vector<1x128xf32> to vector<32x128xf32>
    %242 = arith.mulf %239, %241 : vector<32x128xf32>
    %243 = vector.extract_strided_slice %3 {offsets = [0, 21], sizes = [32, 1], strides = [1, 1]} : vector<32x45xf32> to vector<32x1xf32>
    %244 = vector.broadcast %243 : vector<32x1xf32> to vector<32x128xf32>
    %245 = arith.mulf %242, %244 : vector<32x128xf32>
    %246 = arith.addf %238, %245 : vector<32x128xf32>
    %c127_i32_43 = arith.constant 127 : i32
    %247 = tpu.dynamic_rotate %109 by %c127_i32_43 dim 1 : vector<32x128xf32>, i32 -> vector<32x128xf32>
    %248 = vector.extract_strided_slice %2 {offsets = [5, 0], sizes = [1, 128], strides = [1, 1]} : vector<9x128xf32> to vector<1x128xf32>
    %249 = vector.broadcast %248 : vector<1x128xf32> to vector<32x128xf32>
    %250 = arith.mulf %247, %249 : vector<32x128xf32>
    %251 = vector.extract_strided_slice %3 {offsets = [0, 23], sizes = [32, 1], strides = [1, 1]} : vector<32x45xf32> to vector<32x1xf32>
    %252 = vector.broadcast %251 : vector<32x1xf32> to vector<32x128xf32>
    %253 = arith.mulf %250, %252 : vector<32x128xf32>
    %254 = arith.addf %246, %253 : vector<32x128xf32>
    %c125_i32_44 = arith.constant 125 : i32
    %255 = tpu.dynamic_rotate %109 by %c125_i32_44 dim 1 : vector<32x128xf32>, i32 -> vector<32x128xf32>
    %256 = vector.extract_strided_slice %2 {offsets = [6, 0], sizes = [1, 128], strides = [1, 1]} : vector<9x128xf32> to vector<1x128xf32>
    %257 = vector.broadcast %256 : vector<1x128xf32> to vector<32x128xf32>
    %258 = arith.mulf %255, %257 : vector<32x128xf32>
    %259 = vector.extract_strided_slice %3 {offsets = [0, 24], sizes = [32, 1], strides = [1, 1]} : vector<32x45xf32> to vector<32x1xf32>
    %260 = vector.broadcast %259 : vector<32x1xf32> to vector<32x128xf32>
    %261 = arith.mulf %258, %260 : vector<32x128xf32>
    %262 = arith.addf %254, %261 : vector<32x128xf32>
    %c124_i32_45 = arith.constant 124 : i32
    %263 = tpu.dynamic_rotate %109 by %c124_i32_45 dim 1 : vector<32x128xf32>, i32 -> vector<32x128xf32>
    %264 = vector.extract_strided_slice %2 {offsets = [7, 0], sizes = [1, 128], strides = [1, 1]} : vector<9x128xf32> to vector<1x128xf32>
    %265 = vector.broadcast %264 : vector<1x128xf32> to vector<32x128xf32>
    %266 = arith.mulf %263, %265 : vector<32x128xf32>
    %267 = vector.extract_strided_slice %3 {offsets = [0, 25], sizes = [32, 1], strides = [1, 1]} : vector<32x45xf32> to vector<32x1xf32>
    %268 = vector.broadcast %267 : vector<32x1xf32> to vector<32x128xf32>
    %269 = arith.mulf %266, %268 : vector<32x128xf32>
    %270 = arith.addf %262, %269 : vector<32x128xf32>
    %c123_i32_46 = arith.constant 123 : i32
    %271 = tpu.dynamic_rotate %109 by %c123_i32_46 dim 1 : vector<32x128xf32>, i32 -> vector<32x128xf32>
    %272 = vector.extract_strided_slice %2 {offsets = [8, 0], sizes = [1, 128], strides = [1, 1]} : vector<9x128xf32> to vector<1x128xf32>
    %273 = vector.broadcast %272 : vector<1x128xf32> to vector<32x128xf32>
    %274 = arith.mulf %271, %273 : vector<32x128xf32>
    %275 = vector.extract_strided_slice %3 {offsets = [0, 26], sizes = [32, 1], strides = [1, 1]} : vector<32x45xf32> to vector<32x1xf32>
    %276 = vector.broadcast %275 : vector<32x1xf32> to vector<32x128xf32>
    %277 = arith.mulf %274, %276 : vector<32x128xf32>
    %278 = arith.addf %270, %277 : vector<32x128xf32>
    %279 = vector.broadcast %211 : vector<32x1xf32> to vector<32x128xf32>
    %280 = arith.addf %278, %279 : vector<32x128xf32>
    %cst_47 = arith.constant 0.000000e+00 : f32
    %281 = vector.broadcast %cst_47 : f32 to vector<32x128xf32>
    %282 = arith.maximumf %280, %281 : vector<32x128xf32>
    %283 = vector.extract_strided_slice %4 {offsets = [0, 6], sizes = [32, 1], strides = [1, 1]} : vector<32x10xf32> to vector<32x1xf32>
    %284 = vector.broadcast %283 : vector<32x1xf32> to vector<32x128xf32>
    %285 = arith.mulf %282, %284 : vector<32x128xf32>
    %cst_48 = arith.constant dense<0.000000e+00> : vector<128xf32>
    %286 = vector.multi_reduction <add>, %285, %cst_48 [0] : vector<32x128xf32> to vector<128xf32>
    %287 = vector.shape_cast %286 : vector<128xf32> to vector<1x128xf32>
    %288 = arith.negf %287 : vector<1x128xf32>
    %289 = math.exp %288 : vector<1x128xf32>
    %cst_49 = arith.constant 1.000000e+00 : f32
    %290 = vector.broadcast %cst_49 : f32 to vector<1x128xf32>
    %291 = arith.addf %290, %289 : vector<1x128xf32>
    %292 = arith.divf %290, %291 : vector<1x128xf32>
    %293 = vector.broadcast %292 : vector<1x128xf32> to vector<32x128xf32>
    %294 = arith.mulf %109, %293 : vector<32x128xf32>
    %295 = vector.broadcast %5 : vector<1x128xf32> to vector<32x128xf32>
    %296 = arith.mulf %294, %295 : vector<32x128xf32>
    %cst_50 = arith.constant dense<0.000000e+00> : vector<32xf32>
    %297 = vector.multi_reduction <add>, %296, %cst_50 [1] : vector<32x128xf32> to vector<32xf32>
    %298 = vector.shape_cast %297 : vector<32xf32> to vector<32x1xf32>
    %cst_51 = arith.constant 6.250000e-02 : f32
    %299 = vector.broadcast %cst_51 : f32 to vector<32x1xf32>
    %300 = arith.mulf %298, %299 : vector<32x1xf32>
    %c0_52 = arith.constant 0 : index
    %c0_53 = arith.constant 0 : index
    %301 = vector.load %arg10[%c0_52, %c0_53] : memref<32x32xbf16, #tpu.memory_space<vmem>>, vector<32x32xbf16>
    %302 = arith.truncf %300 : vector<32x1xf32> to vector<32x1xbf16>
    %cst_54 = arith.constant dense<0.000000e+00> : vector<32x1xf32>
    %303 = tpu.matmul %301, %302, %cst_54 {dimension_numbers = #tpu.dot_dimension_numbers<[1], [0], [0], [1], [0, 0, 1, 1], [], []>} : vector<32x32xbf16>, vector<32x1xbf16>, vector<32x1xf32> -> vector<32x1xf32>
    %304 = arith.negf %303 : vector<32x1xf32>
    %305 = math.exp %304 : vector<32x1xf32>
    %cst_55 = arith.constant 1.000000e+00 : f32
    %306 = vector.broadcast %cst_55 : f32 to vector<32x1xf32>
    %307 = arith.addf %306, %305 : vector<32x1xf32>
    %308 = arith.divf %306, %307 : vector<32x1xf32>
    %309 = vector.broadcast %308 : vector<32x1xf32> to vector<32x128xf32>
    %310 = arith.mulf %294, %309 : vector<32x128xf32>
    %311 = arith.addf %210, %310 : vector<32x128xf32>
    %312 = vector.extract_strided_slice %4 {offsets = [0, 7], sizes = [32, 1], strides = [1, 1]} : vector<32x10xf32> to vector<32x1xf32>
    %313 = vector.extract_strided_slice %3 {offsets = [0, 31], sizes = [32, 1], strides = [1, 1]} : vector<32x45xf32> to vector<32x1xf32>
    %314 = vector.broadcast %313 : vector<32x1xf32> to vector<32x128xf32>
    %315 = arith.mulf %311, %314 : vector<32x128xf32>
    %c5_i32_56 = arith.constant 5 : i32
    %316 = tpu.dynamic_rotate %311 by %c5_i32_56 dim 1 : vector<32x128xf32>, i32 -> vector<32x128xf32>
    %317 = vector.extract_strided_slice %2 {offsets = [0, 0], sizes = [1, 128], strides = [1, 1]} : vector<9x128xf32> to vector<1x128xf32>
    %318 = vector.broadcast %317 : vector<1x128xf32> to vector<32x128xf32>
    %319 = arith.mulf %316, %318 : vector<32x128xf32>
    %320 = vector.extract_strided_slice %3 {offsets = [0, 27], sizes = [32, 1], strides = [1, 1]} : vector<32x45xf32> to vector<32x1xf32>
    %321 = vector.broadcast %320 : vector<32x1xf32> to vector<32x128xf32>
    %322 = arith.mulf %319, %321 : vector<32x128xf32>
    %323 = arith.addf %315, %322 : vector<32x128xf32>
    %c4_i32_57 = arith.constant 4 : i32
    %324 = tpu.dynamic_rotate %311 by %c4_i32_57 dim 1 : vector<32x128xf32>, i32 -> vector<32x128xf32>
    %325 = vector.extract_strided_slice %2 {offsets = [1, 0], sizes = [1, 128], strides = [1, 1]} : vector<9x128xf32> to vector<1x128xf32>
    %326 = vector.broadcast %325 : vector<1x128xf32> to vector<32x128xf32>
    %327 = arith.mulf %324, %326 : vector<32x128xf32>
    %328 = vector.extract_strided_slice %3 {offsets = [0, 28], sizes = [32, 1], strides = [1, 1]} : vector<32x45xf32> to vector<32x1xf32>
    %329 = vector.broadcast %328 : vector<32x1xf32> to vector<32x128xf32>
    %330 = arith.mulf %327, %329 : vector<32x128xf32>
    %331 = arith.addf %323, %330 : vector<32x128xf32>
    %c3_i32_58 = arith.constant 3 : i32
    %332 = tpu.dynamic_rotate %311 by %c3_i32_58 dim 1 : vector<32x128xf32>, i32 -> vector<32x128xf32>
    %333 = vector.extract_strided_slice %2 {offsets = [2, 0], sizes = [1, 128], strides = [1, 1]} : vector<9x128xf32> to vector<1x128xf32>
    %334 = vector.broadcast %333 : vector<1x128xf32> to vector<32x128xf32>
    %335 = arith.mulf %332, %334 : vector<32x128xf32>
    %336 = vector.extract_strided_slice %3 {offsets = [0, 29], sizes = [32, 1], strides = [1, 1]} : vector<32x45xf32> to vector<32x1xf32>
    %337 = vector.broadcast %336 : vector<32x1xf32> to vector<32x128xf32>
    %338 = arith.mulf %335, %337 : vector<32x128xf32>
    %339 = arith.addf %331, %338 : vector<32x128xf32>
    %c1_i32_59 = arith.constant 1 : i32
    %340 = tpu.dynamic_rotate %311 by %c1_i32_59 dim 1 : vector<32x128xf32>, i32 -> vector<32x128xf32>
    %341 = vector.extract_strided_slice %2 {offsets = [3, 0], sizes = [1, 128], strides = [1, 1]} : vector<9x128xf32> to vector<1x128xf32>
    %342 = vector.broadcast %341 : vector<1x128xf32> to vector<32x128xf32>
    %343 = arith.mulf %340, %342 : vector<32x128xf32>
    %344 = vector.extract_strided_slice %3 {offsets = [0, 30], sizes = [32, 1], strides = [1, 1]} : vector<32x45xf32> to vector<32x1xf32>
    %345 = vector.broadcast %344 : vector<32x1xf32> to vector<32x128xf32>
    %346 = arith.mulf %343, %345 : vector<32x128xf32>
    %347 = arith.addf %339, %346 : vector<32x128xf32>
    %c127_i32_60 = arith.constant 127 : i32
    %348 = tpu.dynamic_rotate %311 by %c127_i32_60 dim 1 : vector<32x128xf32>, i32 -> vector<32x128xf32>
    %349 = vector.extract_strided_slice %2 {offsets = [5, 0], sizes = [1, 128], strides = [1, 1]} : vector<9x128xf32> to vector<1x128xf32>
    %350 = vector.broadcast %349 : vector<1x128xf32> to vector<32x128xf32>
    %351 = arith.mulf %348, %350 : vector<32x128xf32>
    %352 = vector.extract_strided_slice %3 {offsets = [0, 32], sizes = [32, 1], strides = [1, 1]} : vector<32x45xf32> to vector<32x1xf32>
    %353 = vector.broadcast %352 : vector<32x1xf32> to vector<32x128xf32>
    %354 = arith.mulf %351, %353 : vector<32x128xf32>
    %355 = arith.addf %347, %354 : vector<32x128xf32>
    %c125_i32_61 = arith.constant 125 : i32
    %356 = tpu.dynamic_rotate %311 by %c125_i32_61 dim 1 : vector<32x128xf32>, i32 -> vector<32x128xf32>
    %357 = vector.extract_strided_slice %2 {offsets = [6, 0], sizes = [1, 128], strides = [1, 1]} : vector<9x128xf32> to vector<1x128xf32>
    %358 = vector.broadcast %357 : vector<1x128xf32> to vector<32x128xf32>
    %359 = arith.mulf %356, %358 : vector<32x128xf32>
    %360 = vector.extract_strided_slice %3 {offsets = [0, 33], sizes = [32, 1], strides = [1, 1]} : vector<32x45xf32> to vector<32x1xf32>
    %361 = vector.broadcast %360 : vector<32x1xf32> to vector<32x128xf32>
    %362 = arith.mulf %359, %361 : vector<32x128xf32>
    %363 = arith.addf %355, %362 : vector<32x128xf32>
    %c124_i32_62 = arith.constant 124 : i32
    %364 = tpu.dynamic_rotate %311 by %c124_i32_62 dim 1 : vector<32x128xf32>, i32 -> vector<32x128xf32>
    %365 = vector.extract_strided_slice %2 {offsets = [7, 0], sizes = [1, 128], strides = [1, 1]} : vector<9x128xf32> to vector<1x128xf32>
    %366 = vector.broadcast %365 : vector<1x128xf32> to vector<32x128xf32>
    %367 = arith.mulf %364, %366 : vector<32x128xf32>
    %368 = vector.extract_strided_slice %3 {offsets = [0, 34], sizes = [32, 1], strides = [1, 1]} : vector<32x45xf32> to vector<32x1xf32>
    %369 = vector.broadcast %368 : vector<32x1xf32> to vector<32x128xf32>
    %370 = arith.mulf %367, %369 : vector<32x128xf32>
    %371 = arith.addf %363, %370 : vector<32x128xf32>
    %c123_i32_63 = arith.constant 123 : i32
    %372 = tpu.dynamic_rotate %311 by %c123_i32_63 dim 1 : vector<32x128xf32>, i32 -> vector<32x128xf32>
    %373 = vector.extract_strided_slice %2 {offsets = [8, 0], sizes = [1, 128], strides = [1, 1]} : vector<9x128xf32> to vector<1x128xf32>
    %374 = vector.broadcast %373 : vector<1x128xf32> to vector<32x128xf32>
    %375 = arith.mulf %372, %374 : vector<32x128xf32>
    %376 = vector.extract_strided_slice %3 {offsets = [0, 35], sizes = [32, 1], strides = [1, 1]} : vector<32x45xf32> to vector<32x1xf32>
    %377 = vector.broadcast %376 : vector<32x1xf32> to vector<32x128xf32>
    %378 = arith.mulf %375, %377 : vector<32x128xf32>
    %379 = arith.addf %371, %378 : vector<32x128xf32>
    %380 = vector.broadcast %312 : vector<32x1xf32> to vector<32x128xf32>
    %381 = arith.addf %379, %380 : vector<32x128xf32>
    %382 = arith.mulf %381, %110 : vector<32x128xf32>
    %383 = vector.extract_strided_slice %4 {offsets = [0, 8], sizes = [32, 1], strides = [1, 1]} : vector<32x10xf32> to vector<32x1xf32>
    %384 = vector.extract_strided_slice %3 {offsets = [0, 40], sizes = [32, 1], strides = [1, 1]} : vector<32x45xf32> to vector<32x1xf32>
    %385 = vector.broadcast %384 : vector<32x1xf32> to vector<32x128xf32>
    %386 = arith.mulf %382, %385 : vector<32x128xf32>
    %c5_i32_64 = arith.constant 5 : i32
    %387 = tpu.dynamic_rotate %382 by %c5_i32_64 dim 1 : vector<32x128xf32>, i32 -> vector<32x128xf32>
    %388 = vector.extract_strided_slice %2 {offsets = [0, 0], sizes = [1, 128], strides = [1, 1]} : vector<9x128xf32> to vector<1x128xf32>
    %389 = vector.broadcast %388 : vector<1x128xf32> to vector<32x128xf32>
    %390 = arith.mulf %387, %389 : vector<32x128xf32>
    %391 = vector.extract_strided_slice %3 {offsets = [0, 36], sizes = [32, 1], strides = [1, 1]} : vector<32x45xf32> to vector<32x1xf32>
    %392 = vector.broadcast %391 : vector<32x1xf32> to vector<32x128xf32>
    %393 = arith.mulf %390, %392 : vector<32x128xf32>
    %394 = arith.addf %386, %393 : vector<32x128xf32>
    %c4_i32_65 = arith.constant 4 : i32
    %395 = tpu.dynamic_rotate %382 by %c4_i32_65 dim 1 : vector<32x128xf32>, i32 -> vector<32x128xf32>
    %396 = vector.extract_strided_slice %2 {offsets = [1, 0], sizes = [1, 128], strides = [1, 1]} : vector<9x128xf32> to vector<1x128xf32>
    %397 = vector.broadcast %396 : vector<1x128xf32> to vector<32x128xf32>
    %398 = arith.mulf %395, %397 : vector<32x128xf32>
    %399 = vector.extract_strided_slice %3 {offsets = [0, 37], sizes = [32, 1], strides = [1, 1]} : vector<32x45xf32> to vector<32x1xf32>
    %400 = vector.broadcast %399 : vector<32x1xf32> to vector<32x128xf32>
    %401 = arith.mulf %398, %400 : vector<32x128xf32>
    %402 = arith.addf %394, %401 : vector<32x128xf32>
    %c3_i32_66 = arith.constant 3 : i32
    %403 = tpu.dynamic_rotate %382 by %c3_i32_66 dim 1 : vector<32x128xf32>, i32 -> vector<32x128xf32>
    %404 = vector.extract_strided_slice %2 {offsets = [2, 0], sizes = [1, 128], strides = [1, 1]} : vector<9x128xf32> to vector<1x128xf32>
    %405 = vector.broadcast %404 : vector<1x128xf32> to vector<32x128xf32>
    %406 = arith.mulf %403, %405 : vector<32x128xf32>
    %407 = vector.extract_strided_slice %3 {offsets = [0, 38], sizes = [32, 1], strides = [1, 1]} : vector<32x45xf32> to vector<32x1xf32>
    %408 = vector.broadcast %407 : vector<32x1xf32> to vector<32x128xf32>
    %409 = arith.mulf %406, %408 : vector<32x128xf32>
    %410 = arith.addf %402, %409 : vector<32x128xf32>
    %c1_i32_67 = arith.constant 1 : i32
    %411 = tpu.dynamic_rotate %382 by %c1_i32_67 dim 1 : vector<32x128xf32>, i32 -> vector<32x128xf32>
    %412 = vector.extract_strided_slice %2 {offsets = [3, 0], sizes = [1, 128], strides = [1, 1]} : vector<9x128xf32> to vector<1x128xf32>
    %413 = vector.broadcast %412 : vector<1x128xf32> to vector<32x128xf32>
    %414 = arith.mulf %411, %413 : vector<32x128xf32>
    %415 = vector.extract_strided_slice %3 {offsets = [0, 39], sizes = [32, 1], strides = [1, 1]} : vector<32x45xf32> to vector<32x1xf32>
    %416 = vector.broadcast %415 : vector<32x1xf32> to vector<32x128xf32>
    %417 = arith.mulf %414, %416 : vector<32x128xf32>
    %418 = arith.addf %410, %417 : vector<32x128xf32>
    %c127_i32_68 = arith.constant 127 : i32
    %419 = tpu.dynamic_rotate %382 by %c127_i32_68 dim 1 : vector<32x128xf32>, i32 -> vector<32x128xf32>
    %420 = vector.extract_strided_slice %2 {offsets = [5, 0], sizes = [1, 128], strides = [1, 1]} : vector<9x128xf32> to vector<1x128xf32>
    %421 = vector.broadcast %420 : vector<1x128xf32> to vector<32x128xf32>
    %422 = arith.mulf %419, %421 : vector<32x128xf32>
    %423 = vector.extract_strided_slice %3 {offsets = [0, 41], sizes = [32, 1], strides = [1, 1]} : vector<32x45xf32> to vector<32x1xf32>
    %424 = vector.broadcast %423 : vector<32x1xf32> to vector<32x128xf32>
    %425 = arith.mulf %422, %424 : vector<32x128xf32>
    %426 = arith.addf %418, %425 : vector<32x128xf32>
    %c125_i32_69 = arith.constant 125 : i32
    %427 = tpu.dynamic_rotate %382 by %c125_i32_69 dim 1 : vector<32x128xf32>, i32 -> vector<32x128xf32>
    %428 = vector.extract_strided_slice %2 {offsets = [6, 0], sizes = [1, 128], strides = [1, 1]} : vector<9x128xf32> to vector<1x128xf32>
    %429 = vector.broadcast %428 : vector<1x128xf32> to vector<32x128xf32>
    %430 = arith.mulf %427, %429 : vector<32x128xf32>
    %431 = vector.extract_strided_slice %3 {offsets = [0, 42], sizes = [32, 1], strides = [1, 1]} : vector<32x45xf32> to vector<32x1xf32>
    %432 = vector.broadcast %431 : vector<32x1xf32> to vector<32x128xf32>
    %433 = arith.mulf %430, %432 : vector<32x128xf32>
    %434 = arith.addf %426, %433 : vector<32x128xf32>
    %c124_i32_70 = arith.constant 124 : i32
    %435 = tpu.dynamic_rotate %382 by %c124_i32_70 dim 1 : vector<32x128xf32>, i32 -> vector<32x128xf32>
    %436 = vector.extract_strided_slice %2 {offsets = [7, 0], sizes = [1, 128], strides = [1, 1]} : vector<9x128xf32> to vector<1x128xf32>
    %437 = vector.broadcast %436 : vector<1x128xf32> to vector<32x128xf32>
    %438 = arith.mulf %435, %437 : vector<32x128xf32>
    %439 = vector.extract_strided_slice %3 {offsets = [0, 43], sizes = [32, 1], strides = [1, 1]} : vector<32x45xf32> to vector<32x1xf32>
    %440 = vector.broadcast %439 : vector<32x1xf32> to vector<32x128xf32>
    %441 = arith.mulf %438, %440 : vector<32x128xf32>
    %442 = arith.addf %434, %441 : vector<32x128xf32>
    %c123_i32_71 = arith.constant 123 : i32
    %443 = tpu.dynamic_rotate %382 by %c123_i32_71 dim 1 : vector<32x128xf32>, i32 -> vector<32x128xf32>
    %444 = vector.extract_strided_slice %2 {offsets = [8, 0], sizes = [1, 128], strides = [1, 1]} : vector<9x128xf32> to vector<1x128xf32>
    %445 = vector.broadcast %444 : vector<1x128xf32> to vector<32x128xf32>
    %446 = arith.mulf %443, %445 : vector<32x128xf32>
    %447 = vector.extract_strided_slice %3 {offsets = [0, 44], sizes = [32, 1], strides = [1, 1]} : vector<32x45xf32> to vector<32x1xf32>
    %448 = vector.broadcast %447 : vector<32x1xf32> to vector<32x128xf32>
    %449 = arith.mulf %446, %448 : vector<32x128xf32>
    %450 = arith.addf %442, %449 : vector<32x128xf32>
    %451 = vector.broadcast %383 : vector<32x1xf32> to vector<32x128xf32>
    %452 = arith.addf %450, %451 : vector<32x128xf32>
    %453 = arith.addf %101, %452 : vector<32x128xf32>
    %c0_72 = arith.constant 0 : index
    %c0_73 = arith.constant 0 : index
    %454 = vector.load %arg11[%c0_72, %c0_73] : memref<128x32xbf16, #tpu.memory_space<vmem>>, vector<128x32xbf16>
    %455 = arith.truncf %453 : vector<32x128xf32> to vector<32x128xbf16>
    %cst_74 = arith.constant dense<0.000000e+00> : vector<128x128xf32>
    %456 = tpu.matmul %454, %455, %cst_74 {dimension_numbers = #tpu.dot_dimension_numbers<[1], [0], [0], [1], [0, 0, 1, 1], [], []>} : vector<128x32xbf16>, vector<32x128xbf16>, vector<128x128xf32> -> vector<128x128xf32>
    %c0_75 = arith.constant 0 : index
    %c0_76 = arith.constant 0 : index
    %457 = vector.load %arg12[%c0_75, %c0_76] : memref<128x1xf32, #tpu.memory_space<vmem>>, vector<128x1xf32>
    %458 = vector.broadcast %457 : vector<128x1xf32> to vector<128x128xf32>
    %459 = arith.addf %456, %458 : vector<128x128xf32>
    %cst_77 = arith.constant 5.000000e-01 : f32
    %460 = vector.broadcast %cst_77 : f32 to vector<128x128xf32>
    %461 = arith.mulf %460, %459 : vector<128x128xf32>
    %cst_78 = arith.constant 4.471500e-02 : f32
    %462 = vector.broadcast %cst_78 : f32 to vector<128x128xf32>
    %463 = arith.mulf %462, %459 : vector<128x128xf32>
    %464 = arith.mulf %463, %459 : vector<128x128xf32>
    %465 = arith.mulf %464, %459 : vector<128x128xf32>
    %466 = arith.addf %459, %465 : vector<128x128xf32>
    %cst_79 = arith.constant 0.797884583 : f32
    %467 = vector.broadcast %cst_79 : f32 to vector<128x128xf32>
    %468 = arith.mulf %467, %466 : vector<128x128xf32>
    %469 = math.tanh %468 : vector<128x128xf32>
    %cst_80 = arith.constant 1.000000e+00 : f32
    %470 = vector.broadcast %cst_80 : f32 to vector<128x128xf32>
    %471 = arith.addf %470, %469 : vector<128x128xf32>
    %472 = arith.mulf %461, %471 : vector<128x128xf32>
    %c0_81 = arith.constant 0 : index
    %c0_82 = arith.constant 0 : index
    %473 = vector.load %arg13[%c0_81, %c0_82] : memref<32x128xbf16, #tpu.memory_space<vmem>>, vector<32x128xbf16>
    %474 = arith.truncf %472 : vector<128x128xf32> to vector<128x128xbf16>
    %cst_83 = arith.constant dense<0.000000e+00> : vector<32x128xf32>
    %475 = tpu.matmul %473, %474, %cst_83 {dimension_numbers = #tpu.dot_dimension_numbers<[1], [0], [0], [1], [0, 0, 1, 1], [], []>} : vector<32x128xbf16>, vector<128x128xbf16>, vector<32x128xf32> -> vector<32x128xf32>
    %476 = vector.extract_strided_slice %4 {offsets = [0, 9], sizes = [32, 1], strides = [1, 1]} : vector<32x10xf32> to vector<32x1xf32>
    %477 = vector.broadcast %476 : vector<32x1xf32> to vector<32x128xf32>
    %478 = arith.addf %475, %477 : vector<32x128xf32>
    %479 = arith.addf %453, %478 : vector<32x128xf32>
    %480 = arith.truncf %479 : vector<32x128xf32> to vector<32x128xbf16>
    %c0_84 = arith.constant 0 : index
    %c0_85 = arith.constant 0 : index
    %c0_86 = arith.constant 0 : index
    %481 = vector.load %arg14[%c0_84, %c0_85, %c0_86] : memref<1x32x128xbf16, #tpu.memory_space<vmem>>, vector<1x32x128xbf16>
    %482 = vector.shape_cast %481 : vector<1x32x128xbf16> to vector<32x128xbf16>
    %483 = vector.shape_cast %480 : vector<32x128xbf16> to vector<1x32x128xbf16>
    tpu.vector_store %arg14[%c0_84, %c0_85, %c0_86], %483 {strides = array<i32>} : memref<1x32x128xbf16, #tpu.memory_space<vmem>>, vector<1x32x128xbf16>,
    return
  }
  func.func @transform_0(%arg0: i32) -> (i32, i32, i32) {
    %c0_i32 = arith.constant 0 : i32
    %c0_i32_0 = arith.constant 0 : i32
    %c0_i32_1 = arith.constant 0 : i32
    return %arg0, %c0_i32, %c0_i32_0 : i32, i32, i32
  }
  func.func @transform_1(%arg0: i32) -> (i32, i32) {
    %c0_i32 = arith.constant 0 : i32
    %c0_i32_0 = arith.constant 0 : i32
    %c0_i32_1 = arith.constant 0 : i32
    return %c0_i32, %c0_i32_0 : i32, i32
  }
  func.func @transform_2(%arg0: i32) -> (i32, i32) {
    %c0_i32 = arith.constant 0 : i32
    %c0_i32_0 = arith.constant 0 : i32
    %c0_i32_1 = arith.constant 0 : i32
    return %c0_i32, %c0_i32_0 : i32, i32
  }
  func.func @transform_3(%arg0: i32) -> (i32, i32) {
    %c0_i32 = arith.constant 0 : i32
    %c0_i32_0 = arith.constant 0 : i32
    %c0_i32_1 = arith.constant 0 : i32
    return %c0_i32, %c0_i32_0 : i32, i32
  }
  func.func @transform_4(%arg0: i32) -> (i32, i32) {
    %c0_i32 = arith.constant 0 : i32
    %c0_i32_0 = arith.constant 0 : i32
    %c0_i32_1 = arith.constant 0 : i32
    return %c0_i32, %c0_i32_0 : i32, i32
  }
  func.func @transform_5(%arg0: i32) -> (i32, i32) {
    %c0_i32 = arith.constant 0 : i32
    %c0_i32_0 = arith.constant 0 : i32
    %c0_i32_1 = arith.constant 0 : i32
    return %c0_i32, %c0_i32_0 : i32, i32
  }
  func.func @transform_6(%arg0: i32) -> (i32, i32) {
    %c0_i32 = arith.constant 0 : i32
    %c0_i32_0 = arith.constant 0 : i32
    %c0_i32_1 = arith.constant 0 : i32
    return %c0_i32, %c0_i32_0 : i32, i32
  }
  func.func @transform_7(%arg0: i32) -> (i32, i32) {
    %c0_i32 = arith.constant 0 : i32
    %c0_i32_0 = arith.constant 0 : i32
    %c0_i32_1 = arith.constant 0 : i32
    return %c0_i32, %c0_i32_0 : i32, i32
  }
  func.func @transform_8(%arg0: i32) -> (i32, i32) {
    %c0_i32 = arith.constant 0 : i32
    %c0_i32_0 = arith.constant 0 : i32
    %c0_i32_1 = arith.constant 0 : i32
    return %c0_i32, %c0_i32_0 : i32, i32
  }
  func.func @transform_9(%arg0: i32) -> (i32, i32) {
    %c0_i32 = arith.constant 0 : i32
    %c0_i32_0 = arith.constant 0 : i32
    %c0_i32_1 = arith.constant 0 : i32
    return %c0_i32, %c0_i32_0 : i32, i32
  }
  func.func @transform_10(%arg0: i32) -> (i32, i32) {
    %c0_i32 = arith.constant 0 : i32
    %c0_i32_0 = arith.constant 0 : i32
    %c0_i32_1 = arith.constant 0 : i32
    return %c0_i32, %c0_i32_0 : i32, i32
  }
  func.func @transform_11(%arg0: i32) -> (i32, i32) {
    %c0_i32 = arith.constant 0 : i32
    %c0_i32_0 = arith.constant 0 : i32
    %c0_i32_1 = arith.constant 0 : i32
    return %c0_i32, %c0_i32_0 : i32, i32
  }
  func.func @transform_12(%arg0: i32) -> (i32, i32) {
    %c0_i32 = arith.constant 0 : i32
    %c0_i32_0 = arith.constant 0 : i32
    %c0_i32_1 = arith.constant 0 : i32
    return %c0_i32, %c0_i32_0 : i32, i32
  }
  func.func @transform_13(%arg0: i32) -> (i32, i32, i32) {
    %c0_i32 = arith.constant 0 : i32
    %c0_i32_0 = arith.constant 0 : i32
    %c0_i32_1 = arith.constant 0 : i32
    return %arg0, %c0_i32, %c0_i32_0 : i32, i32, i32
  }
}

</mosaic_0001>

<bundles_post_ra>
// kernel: _lambda_.2
= control target key start
LH: loop header
LB: loop body
LE: loop exit
PB: predicated region body
PF: predicated region fallthrough
CT: control target
= control target key end

     0   :  { %s2666_s25 = smov 0   ;;  %s3571_s0 = inlined_call_operand.vmem [shape: bf16[2,16,128], index: 0, kind: input, shape index: {}]   ;;  %s3572_s1 = inlined_call_operand.vmem [shape: f32[9,128], index: 1, kind: input, shape index: {}]   ;;  %s3573_s2 = inlined_call_operand.vmem [shape: f32[16,45], index: 2, kind: input, shape index: {}]   ;;  %s3574_s3 = inlined_call_operand.vmem [shape: f32[16,10], index: 3, kind: input, shape index: {}]   ;;  %s3575_s4 = inlined_call_operand.vmem [shape: bf16[16,16], index: 4, kind: input, shape index: {}]   ;;  %s3576_s5 = inlined_call_operand.vmem [shape: bf16[16,16], index: 5, kind: input, shape index: {}]   ;;  %s3577_s6 = inlined_call_operand.vmem [shape: bf16[48,16], index: 6, kind: input, shape index: {}]   ;;  %s3578_s7 = inlined_call_operand.vmem [shape: f32[48,1], index: 7, kind: input, shape index: {}]   ;;  %s3579_s8 = inlined_call_operand.vmem [shape: bf16[16,16], index: 8, kind: input, shape index: {}]   ;;  %s3580_s9 = inlined_call_operand.vmem [shape: bf16[16,16], index: 9, kind: input, shape index: {}]   ;;  %s3581_s10 = inlined_call_operand.vmem [shape: bf16[64,16], index: 10, kind: input, shape index: {}]   ;;  %s3582_s11 = inlined_call_operand.vmem [shape: f32[64,1], index: 11, kind: input, shape index: {}]   ;;  %s3583_s12 = inlined_call_operand.vmem [shape: bf16[16,64], index: 12, kind: input, shape index: {}]   ;;  %s3584_s13 = inlined_call_operand.vmem [shape: bf16[2,16,128], index: 13, kind: output, shape index: {}]  }
   0x1 LB: > { %s2167_s26 = sadd.s32 4294967295, %s2539_s25   ;;  %p2171_p0 = scmp.ge.s32.totalorder %s2539_s25, 1  ;;  %s2539_s25 = sphi %s2666_s25, %s23_s25  }
   0x2   : > { %p387_p1 = scmp.lt.s32.totalorder %s2539_s25, 3 }
   0x4   : > { %p388_p2 = pnand %p2171_p0, %p387_p1 }
   0x6   : > { %391 = sbr.rel (%p388_p2) target bundleno = 2366 (0x93e), region = 72 }
   0xb   : > { %p431_p3 = scmp.lt.s32.totalorder %s2167_s26, 1  ;;  %v3596_v0 = vmov 0.0   ;;  %vm2542_vm0 = vmmov 0   ;;  %v2680_v1 = vld [vmem:[%s3574_s3] sm:$0xff]  ;;  %v3594_v2 = vmov 0   ;;  %v2690_v3 = vld [vmem:[%s3574_s3 + $0x8] sm:$0xff]  ;;  %v536_v45 = vlaneseq }
   0xc   : > { %2243 = vmatprep.subr.bf16.mxu0 %v3596_v0  ;;  %2245 = vmatprep.mubr.msk.bf16.mxu0 %vm2542_vm0, %v3596_v0  ;;  %v2695_v4 = vld [vmem:[%s3573_s2] sm:$0xff]  ;;  %v2544_v5 = vmov 4   ;;  %v2703_v6 = vld [vmem:[%s3573_s2 + $0x8] sm:$0xff]  ;;  %vm475_vm1 = vcmask 130048   ;;  %v2545_v9 = vmov 2   ;;  %v2546_v10 = vmov 1  }
   0xd   : > { %s3640_s26 = smov (!%p431_p3, %s2167_s26), 1  ;;  %2366 = vset.pattern.permute.xlu0 %v3594_v2  ;;  %2249 = vmatprep.subr.bf16.mxu1 %v3596_v0  ;;  %v2471_v8 = vld [vmem:[%s3575_s4] sm:$0xff]   ;;  %v2547_v11 = vmov 3   ;;  %v2548_v12 = vmov 5   ;;  %v2549_v13 = vmov 6   ;;  %v3592_v14 = vmov 7  }
   0xe   : > { %456 = vperm.xlu0 %2366, %v2680_v1   ;;  %2367 = vset.pattern.permute.xlu1 %v2544_v5  ;;  %s3585_s16 = sshll.u32 %s3640_s26, 3  ;;  %v3590_v15 = vmov 8   ;;  %s2552_s24 = smov 9   ;;  %v2816_v48 = vshrl.u32 %v536_v45, 7  ;;  %v2822_v51 = vld [vmem:[%s3572_s1] sm:$0xff]  ;;  %vm2055_vm2 = vcmask 523264  }
   0xf   : > { %522 = vperm.xlu1 %2367, %v2695_v4   ;;  %2251 = vmatprep.mubr.msk.bf16.mxu1 %vm2542_vm0, %v3596_v0  ;;  %s435_s21 = scalar_lea.vmem %s3571_s0, %s3585_s16  ;;  %s2553_s27 = smov 8   ;;  %3603 = vst [vmem:[#allocation3_spill] sm:$0xff] %v2822_v51 }
  0x10   : > { %v2712_v7 = vld [vmem:[%s435_s21] sm:$0xff]   ;;  %s2554_s28 = smov 7   ;;  %s2555_s29 = smov 1   ;;  %3602 = vst [vmem:[#allocation2_spill] sm:$0xff] %v2816_v48  ;;  %v538_v50 = vsub.s32 0, %v2816_v48  ;;  %v582_v55 = vsub.s32 2, %v2816_v48 }
  0x11   : > { %2244 = vmatpush3.bf16.msra.mxu0 %v2712_v7  ;;  %s2556_s30 = smov 127   ;;  %s3586_s14 = smov 120   ;;  %v560_v56 = vsub.s32 1, %v2816_v48  ;;  %v626_v61 = vsub.s32 5, %v2816_v48 }
  0x12   : > { %461 = vperm.xlu0 %2366, %v2690_v3   ;;  %2255 = vmatprep.subr.bf16.mxu0 %v3596_v0  ;;  %s2558_s15 = smov 121   ;;  %s2559_s17 = smov 119   ;;  %v2825_v54 = vrot.slane %v2822_v51, %v538_v50  ;;  %v2831_v60 = vrot.slane %v2822_v51, %v582_v55 }
  0x13   : > { %527 = vperm.xlu1 %2367, %v2703_v6   ;;  %v2835_v62 = vrot.slane %v2822_v51, %v560_v56  ;;  %s3606_s20 = smov 120   ;;  %s3638_s23 = sshll.u32 %s3640_s26, 3 }
  0x14   : > { %2246 = vmatmul.mubr.msk.bf16.vlgmr.msra.gmra.mxu0 %vm475_vm1, %v2471_v8  ;;  %v604_v8 = vsub.s32 3, %v2816_v48  ;;  %s440_s18 = scalar_lea.vmem %s3584_s13, %s3638_s23 }
  0x15   : > { %2257 = vmatprep.mubr.msk.bf16.mxu0 %vm2542_vm0, %v3596_v0 }
  0x16   : > { %543 = vperm.xlu0 %2366, %v2695_v4  }
  0x17   : > { %2368 = vset.pattern.permute.xlu1 %v3594_v2 }
  0x18   : > { %547 = vperm.xlu1 %2368, %v2703_v6  }
  0x1a   : > { %2371 = vset.pattern.permute.xlu0 %v2545_v9 }
  0x1b   : > { %591 = vperm.xlu0 %2371, %v2703_v6  }
  0x1c   : > { %2369 = vset.pattern.permute.xlu1 %v2546_v10 }
  0x1d   : > { %569 = vperm.xlu1 %2369, %v2703_v6  }
  0x1f   : > { %2372 = vset.pattern.permute.xlu0 %v2547_v11 }
  0x20   : > { %609 = vperm.xlu0 %2372, %v2695_v4  }
  0x21   : > { %2370 = vset.pattern.permute.xlu1 %v2545_v9 }
  0x22   : > { %587 = vperm.xlu1 %2370, %v2695_v4  }
  0x24   : > { %2375 = vset.pattern.permute.xlu0 %v2548_v12 }
  0x25   : > { %635 = vperm.xlu0 %2375, %v2703_v6  }
  0x26   : > { %2373 = vset.pattern.permute.xlu1 %v2547_v11 }
  0x27   : > { %613 = vperm.xlu1 %2373, %v2703_v6  }
  0x29   : > { %2376 = vset.pattern.permute.xlu0 %v2549_v13 }
  0x2a   : > { %653 = vperm.xlu0 %2376, %v2695_v4  }
  0x2b   : > { %2374 = vset.pattern.permute.xlu1 %v2548_v12 }
  0x2c   : > { %631 = vperm.xlu1 %2374, %v2695_v4  }
  0x2e   : > { %2379 = vset.pattern.permute.xlu0 %v3592_v14 }
  0x2f   : > { %679 = vperm.xlu0 %2379, %v2703_v6  }
  0x30   : > { %2377 = vset.pattern.permute.xlu1 %v2549_v13 }
  0x31   : > { %657 = vperm.xlu1 %2377, %v2703_v6  }
  0x33   : > { %2380 = vset.pattern.permute.xlu0 %v3590_v15 }
  0x34   : > { %697 = vperm.xlu0 %2380, %v2695_v4  }
  0x35   : > { %2378 = vset.pattern.permute.xlu1 %v3592_v14 }
  0x36   : > { %675 = vperm.xlu1 %2378, %v2695_v4  }
  0x38   : > { %2381 = vset.pattern.permute.xlu0 %v2546_v10 }
  0x39   : > { %565 = vperm.xlu0 %2381, %v2695_v4  }
  0x3a   : > { %2382 = vset.pattern.permute.xlu1 %v3590_v15 }
  0x3b   : > { %701 = vperm.xlu1 %2382, %v2703_v6  }
  0x3f   : > { %2383 = vset.pattern.permute.xlu1 %v2546_v10 }
  0x89   : > { %v457_v16 = vpop.permute.xlu0 %456 }
  0x8a   : > { %v2795_v24 = vpop.permute.xlu1 %522 }
  0x8d   : > { %v462_v20 = vpop.permute.xlu0 %461 }
  0x8e   : > { %v528_v25 = vpop.permute.xlu1 %527 }
  0x91   : > { %v544_v29 = vpop.permute.xlu0 %543 }
  0x93   : > { %v548_v26 = vpop.permute.xlu1 %547 }
  0x96   : > { %v592_v30 = vpop.permute.xlu0 %591 }
  0x98   : > { %v570_v27 = vpop.permute.xlu1 %569 }
  0x9b   : > { %v2800_v32 = vpop.permute.xlu0 %609 }
  0x9d   : > { %v2798_v28 = vpop.permute.xlu1 %587 }
  0xa0   : > { %v636_v34 = vpop.permute.xlu0 %635 }
  0xa2   : > { %v614_v31 = vpop.permute.xlu1 %613 }
  0xa5   : > { %v2806_v36 = vpop.permute.xlu0 %653 }
  0xa7   : > { %v2802_v33 = vpop.permute.xlu1 %631 }
  0xaa   : > { %v2810_v38 = vpop.permute.xlu0 %679 }
  0xac   : > { %v2804_v35 = vpop.permute.xlu1 %657 }
  0xaf   : > { %v2814_v40 = vpop.permute.xlu0 %697 }
  0xb1   : > { %v2808_v37 = vpop.permute.xlu1 %675 }
  0xb4   : > { %v566_v43 = vpop.permute.xlu0 %565 }
  0xb6   : > { %v2812_v39 = vpop.permute.xlu1 %701 }
  0xd4   : > { %v513_v17 = vpop.f32.mrf.mxu0 }
  0xd5   : > { %v2753_v18 = vadd.f32 %v513_v17, %v457_v16 }
  0xd6   : > { %v2247_v19 = vpop.f32.mrf.mxu0 }
  0xd7   : > { %532 = vrot.lane.b32.xlu1 %v2753_v18, %s2552_s24  ;;  %v2842_v19 = vrot.slane %v2822_v51, %v626_v61 }
  0xd8   : > { %v516_v21 = vpop.f32.mrf.mxu0 }
  0xd9   : > { %v2757_v22 = vadd.f32 %v516_v21, %v462_v20 }
  0xda   : > { %v2248_v23 = vpop.f32.mrf.mxu0 }
  0xdb   : > { %554 = vrot.lane.b32.xlu1 %v2753_v18, %s2553_s27  ;;  %534 = vrot.lane.b32.xlu0 %v2757_v22, %s2552_s24  ;;  %v531_v16 = vmul.f32 %v528_v25, %v2757_v22 }
  0xdf   : > { %576 = vrot.lane.b32.xlu1 %v2753_v18, %s2554_s28  ;;  %578 = vrot.lane.b32.xlu0 %v2757_v22, %s2554_s28 }
  0xe3   : > { %598 = vrot.lane.b32.xlu1 %v2753_v18, %s2555_s29  ;;  %622 = vrot.lane.b32.xlu0 %v2757_v22, %s2556_s30 }
  0xe7   : > { %620 = vrot.lane.b32.xlu1 %v2753_v18, %s2556_s30  ;;  %666 = vrot.lane.b32.xlu0 %v2757_v22, %s3586_s14 }
  0xeb   : > { %642 = vrot.lane.b32.xlu1 %v2753_v18, %s2558_s15  ;;  %688 = vrot.lane.b32.xlu0 %v2757_v22, %s2559_s17 }
  0xef   : > { %664 = vrot.lane.b32.xlu1 %v2753_v18, %s3586_s14  ;;  %713 = vperm.xlu0 %2381, %v2690_v3  }
  0xf3   : > { %556 = vrot.lane.b32.xlu1 %v2757_v22, %s2553_s27  ;;  %2385 = vset.pattern.permute.xlu0 %v3594_v2 }
  0xf7   : > { %600 = vrot.lane.b32.xlu1 %v2757_v22, %s2555_s29 }
  0xfb   : > { %644 = vrot.lane.b32.xlu1 %v2757_v22, %s2558_s15 }
  0xff   : > { %686 = vrot.lane.b32.xlu1 %v2753_v18, %s2559_s17 }
 0x103   : > { %709 = vperm.xlu1 %2383, %v2680_v1  }
 0x107   : > { %2384 = vset.pattern.permute.xlu1 %v2545_v9  ;;  %v670_v9 = vsub.s32 7, %v2816_v48 }
 0x108   : > { %740 = vperm.xlu1 %2384, %v2680_v1  }
 0x109   : > { %v2852_v22 = vrot.slane %v2822_v51, %v670_v9 }
 0x10c   : > { %744 = vperm.xlu1 %2384, %v2690_v3  }
 0x110   : > { %2386 = vset.pattern.permute.xlu1 %v3594_v2 }
 0x149   : > { %v533_v41 = vpop.permute.xlu1 %532 }
 0x14a   : > { %v540_v21 = vmul.f32 %v2825_v54, %v533_v41 }
 0x14c   : > { %v550_v61 = vmul.f32 %v544_v29, %v540_v21 }
 0x14d   : > { %v555_v42 = vpop.permute.xlu1 %554  ;;  %v535_v46 = vpop.permute.xlu0 %534 }
 0x14e   : > { %v541_v57 = vmul.f32 %v2825_v54, %v535_v46  ;;  %v648_v46 = vsub.s32 6, %v2816_v48  ;;  %v562_v55 = vmul.f32 %v2835_v62, %v555_v42  ;;  %v530_v42 = vmul.f32 %v2795_v24, %v2753_v18 }
 0x150   : > { %v551_v63 = vmul.f32 %v548_v26, %v541_v57  ;;  %v2847_v26 = vrot.slane %v2822_v51, %v604_v8  ;;  %v2858_v8 = vrot.slane %v2822_v51, %v648_v46  ;;  %v572_v9 = vmul.f32 %v566_v43, %v562_v55 }
 0x151   : > { %v577_v44 = vpop.permute.xlu1 %576  ;;  %v579_v52 = vpop.permute.xlu0 %578 }
 0x152   : > { %v585_v17 = vmul.f32 %v2831_v60, %v579_v52  ;;  %v553_v45 = vadd.f32 %v551_v63, %v531_v16  ;;  %v584_v63 = vmul.f32 %v2831_v60, %v577_v44 }
 0x154   : > { %v595_v52 = vmul.f32 %v592_v30, %v585_v17  ;;  %v2866_v30 = vld [vmem:[%s3572_s1 + $0x8] ss:$0 sm:$0xff] }
 0x155   : > { %v599_v47 = vpop.permute.xlu1 %598  ;;  %v623_v58 = vpop.permute.xlu0 %622 }
 0x156   : > { %v629_v56 = vmul.f32 %v2842_v19, %v623_v58  ;;  %v606_v16 = vmul.f32 %v2847_v26, %v599_v47 }
 0x158   : > { %v639_v17 = vmul.f32 %v636_v34, %v629_v56 }
 0x159   : > { %v621_v49 = vpop.permute.xlu1 %620  ;;  %v667_v23 = vpop.permute.xlu0 %666 }
 0x15a   : > { %v673_v44 = vmul.f32 %v2852_v22, %v667_v23  ;;  %v628_v18 = vmul.f32 %v2842_v19, %v621_v49 }
 0x15c   : > { %v683_v23 = vmul.f32 %v2810_v38, %v673_v44  ;;  %v638_v56 = vmul.f32 %v2802_v33, %v628_v18 }
 0x15d   : > { %v643_v53 = vpop.permute.xlu1 %642  ;;  %v689_v58 = vpop.permute.xlu0 %688 }
 0x15e   : > { %v695_v24 = vmul.f32 %v2866_v30, %v689_v58  ;;  %v650_v34 = vmul.f32 %v2858_v8, %v643_v53 }
 0x160   : > { %v705_v49 = vmul.f32 %v2812_v39, %v695_v24 }
 0x161   : > { %v665_v59 = vpop.permute.xlu1 %664 }
 0x165   : > { %v557_v10 = vpop.permute.xlu1 %556 }
 0x166   : > { %v563_v20 = vmul.f32 %v2835_v62, %v557_v10 }
 0x168   : > { %v573_v50 = vmul.f32 %v570_v27, %v563_v20 }
 0x169   : > { %v601_v25 = vpop.permute.xlu1 %600 }
 0x16a   : > { %v575_v57 = vadd.f32 %v573_v50, %v553_v45  ;;  %v607_v41 = vmul.f32 %v2847_v26, %v601_v25  ;;  %v594_v45 = vmul.f32 %v2798_v28, %v584_v63  ;;  %v616_v50 = vmul.f32 %v2800_v32, %v606_v16  ;;  %v714_v38 = vpop.permute.xlu0 %713 }
 0x16b   : > { %v672_v28 = vmul.f32 %v2852_v22, %v665_v59 }
 0x16c   : > { %v597_v10 = vadd.f32 %v595_v52, %v575_v57  ;;  %v617_v27 = vmul.f32 %v614_v31, %v607_v41  ;;  %v552_v31 = vadd.f32 %v550_v61, %v530_v42 }
 0x16d   : > { %v645_v29 = vpop.permute.xlu1 %644  ;;  %v682_v53 = vmul.f32 %v2808_v37, %v672_v28  ;;  %v2560_v28 = vmov 13  }
 0x16e   : > { %v619_v20 = vadd.f32 %v617_v27, %v597_v10  ;;  %v651_v21 = vmul.f32 %v2858_v8, %v645_v29  ;;  %v574_v46 = vadd.f32 %v572_v9, %v552_v31 }
 0x170   : > { %v641_v43 = vadd.f32 %v639_v17, %v619_v20  ;;  %v661_v47 = vmul.f32 %v2804_v35, %v651_v21  ;;  %v596_v52 = vadd.f32 %v594_v45, %v574_v46  ;;  %v660_v35 = vmul.f32 %v2806_v36, %v650_v34 }
 0x171   : > { %v687_v25 = vpop.permute.xlu1 %686 }
 0x172   : > { %v663_v55 = vadd.f32 %v661_v47, %v641_v43  ;;  %v618_v41 = vadd.f32 %v616_v50, %v596_v52  ;;  %v694_v61 = vmul.f32 %v2866_v30, %v687_v25  ;;  %v805_v25 = vld [vmem:[%s3578_s7] sm:$0xff]  ;;  %v807_v52 = vld [vmem:[%s3578_s7 + $0x10] sm:$0xff] }
 0x173   : > { %813 = vperm.xlu0 %2385, %v805_v25  }
 0x174   : > { %v685_v57 = vadd.f32 %v683_v23, %v663_v55  ;;  %v640_v63 = vadd.f32 %v638_v56, %v618_v41  ;;  %v704_v42 = vmul.f32 %v2814_v40, %v694_v61  ;;  %v2472_v23 = vld [vmem:[%s3576_s5] sm:$0xff]   ;;  %v806_v55 = vld [vmem:[%s3578_s7 + $0x8] sm:$0xff]  ;;  %v808_v56 = vld [vmem:[%s3578_s7 + $0x18] sm:$0xff]  ;;  %v2563_v41 = vmov 11  }
 0x175   : > { %818 = vperm.xlu1 %2386, %v806_v55   ;;  %v2565_v61 = vmov 14  }
 0x176   : > { %v707_v32 = vadd.f32 %v705_v49, %v685_v57  ;;  %v662_v27 = vadd.f32 %v660_v35, %v640_v63  ;;  %v3588_v49 = vmov 9   ;;  %v2562_v57 = vmov 10  }
 0x177   : > { %828 = vperm.xlu0 %2385, %v808_v56   ;;  %v2564_v35 = vmov 12   ;;  %v2567_v63 = vmov 15  }
 0x178   : > { %v717_v10 = vadd.f32 %v714_v38, %v707_v32  ;;  %v684_v9 = vadd.f32 %v682_v53, %v662_v27  ;;  %v2566_v32 = vmov 18   ;;  %v2568_v53 = vmov 22  }
 0x179   : > { %823 = vperm.xlu1 %2386, %v807_v52   ;;  %v2569_v38 = vmov 16   ;;  %v2571_v27 = vmov 17  }
 0x17a   : > { %v721_v33 = vmul.f32 0.044715, %v717_v10  ;;  %v706_v16 = vadd.f32 %v704_v42, %v684_v9  ;;  %v719_v43 = vmul.f32 0.5, %v717_v10  ;;  %v2572_v42 = vmov 21  }
 0x17b   : > { %2388 = vset.pattern.permute.xlu0 %v2560_v28  ;;  %v2574_v9 = vmov 23  }
 0x17c   : > { %v723_v59 = vmul.f32 %v721_v33, %v717_v10  ;;  %927 = vperm.xlu0 %2388, %v2703_v6   ;;  %v2573_v33 = vmov 19  }
 0x17d   : > { %2387 = vset.pattern.permute.xlu1 %v2560_v28 }
 0x17e   : > { %v710_v39 = vpop.permute.xlu1 %709  ;;  %v725_v58 = vmul.f32 %v723_v59, %v717_v10  ;;  %923 = vperm.xlu1 %2387, %v2695_v4   ;;  %v2575_v59 = vmov 25  }
 0x17f   : > { %v716_v29 = vadd.f32 %v710_v39, %v706_v16  ;;  %v2576_v16 = vmov 24  }
 0x180   : > { %v727_v17 = vadd.f32 %v725_v58, %v717_v10  ;;  %2390 = vset.pattern.permute.xlu0 %v2562_v57  ;;  %v2570_v10 = vmov 20  }
 0x181   : > { %v720_v36 = vmul.f32 0.044715, %v716_v29  ;;  %v718_v40 = vmul.f32 0.5, %v716_v29  ;;  %957 = vperm.xlu0 %2390, %v2695_v4  }
 0x182   : > { %v729_v20 = vmul.f32 0.7978846, %v727_v17  ;;  %2389 = vset.pattern.permute.xlu1 %v3588_v49  ;;  %v450_v17 = vunpack.c.l.bf16 %v2712_v7 }
 0x183   : > { %v722_v44 = vmul.f32 %v720_v36, %v716_v29  ;;  %939 = vperm.xlu1 %2389, %v2695_v4   ;;  %v741_v39 = vpop.permute.xlu1 %740  ;;  %v451_v36 = vunpack.c.h.bf16 %v2712_v7  ;;  %v2473_v7 = vld [vmem:[%s3577_s6] sm:$0xff]  }
 0x184   : > { %2484 = vtanh.f32 %v729_v20 }
 0x185   : > { %v724_v21 = vmul.f32 %v722_v44, %v716_v29  ;;  %2393 = vset.pattern.permute.xlu0 %v2563_v41 }
 0x186   : > { %979 = vperm.xlu0 %2393, %v2703_v6  }
 0x187   : > { %v726_v31 = vadd.f32 %v724_v21, %v716_v29  ;;  %943 = vperm.xlu1 %2389, %v2703_v6   ;;  %v745_v20 = vpop.permute.xlu1 %744 }
 0x189   : > { %v728_v37 = vmul.f32 0.7978846, %v726_v31 }
 0x18a   : > { %2394 = vset.pattern.permute.xlu0 %v2564_v35 }
 0x18b   : > { %2486 = vtanh.f32 %v728_v37  ;;  %2391 = vset.pattern.permute.xlu1 %v2562_v57  ;;  %993 = vperm.xlu0 %2394, %v2695_v4  }
 0x18c   : > { %961 = vperm.xlu1 %2391, %v2703_v6  }
 0x18f   : > { %2397 = vset.pattern.permute.xlu0 %v2565_v61 }
 0x190   : > { %2392 = vset.pattern.permute.xlu1 %v2563_v41  ;;  %1015 = vperm.xlu0 %2397, %v2703_v6  }
 0x191   : > { %v2485_v45 = vpop.eup %2484  ;;  %975 = vperm.xlu1 %2392, %v2695_v4  }
 0x192   : > { %v733_v18 = vadd.f32 1.0, %v2485_v45 }
 0x194   : > { %v735_v50 = vmul.f32 %v733_v18, %v719_v43  ;;  %2399 = vset.pattern.permute.xlu0 %v2566_v32 }
 0x195   : > { %2395 = vset.pattern.permute.xlu1 %v2564_v35  ;;  %1218 = vperm.xlu0 %2399, %v2695_v4  }
 0x196   : > { %997 = vperm.xlu1 %2395, %v2703_v6  }
 0x198   : > { %v2487_v24 = vpop.eup %2486 }
 0x199   : > { %v732_v47 = vadd.f32 1.0, %v2487_v24  ;;  %2402 = vset.pattern.permute.xlu0 %v2567_v63  ;;  %v2577_v24 = vmov 26  }
 0x19a   : > { %2396 = vset.pattern.permute.xlu1 %v2565_v61  ;;  %1033 = vperm.xlu0 %2402, %v2703_v6  }
 0x19b   : > { %v734_v46 = vmul.f32 %v732_v47, %v718_v40  ;;  %1011 = vperm.xlu1 %2396, %v2695_v4  }
 0x19d   : > { %v738_v34 = vpack.c.bf16 %v735_v50, %v734_v46 }
 0x19e   : > { %2404 = vset.pattern.permute.xlu0 %v2569_v38 }
 0x19f   : > { %2250 = vmatpush3.bf16.msra.mxu1 %v738_v34  ;;  %2398 = vset.pattern.permute.xlu1 %v2568_v53 }
 0x1a0   : > { %2269 = vmatprep.subr.bf16.mxu1 %v3596_v0  ;;  %1202 = vperm.xlu1 %2398, %v2695_v4  }
 0x1a1   : > { %1047 = vperm.xlu0 %2404, %v2695_v4  }
 0x1a2   : > { %2252 = vmatmul.mubr.msk.bf16.vlgmr.msra.gmra.mxu1 %vm475_vm1, %v2472_v23 }
 0x1a3   : > { %2271 = vmatprep.mubr.msk.bf16.mxu1 %vm2542_vm0, %v3596_v0 }
 0x1a4   : > { %1206 = vperm.xlu1 %2398, %v2703_v6  }
 0x1a5   : > { %2407 = vset.pattern.permute.xlu0 %v2570_v10 }
 0x1a6   : > { %1258 = vperm.xlu0 %2407, %v2703_v6  }
 0x1a8   : > { %2400 = vset.pattern.permute.xlu1 %v2566_v32 }
 0x1a9   : > { %1222 = vperm.xlu1 %2400, %v2703_v6  }
 0x1aa   : > { %2408 = vset.pattern.permute.xlu0 %v2571_v27 }
 0x1ab   : > { %1065 = vperm.xlu0 %2408, %v2695_v4  }
 0x1ad   : > { %2401 = vset.pattern.permute.xlu1 %v2567_v63 }
 0x1ae   : > { %1029 = vperm.xlu1 %2401, %v2695_v4  }
 0x1af   : > { %2411 = vset.pattern.permute.xlu0 %v2572_v42 }
 0x1b0   : > { %1276 = vperm.xlu0 %2411, %v2703_v6  }
 0x1b2   : > { %2403 = vset.pattern.permute.xlu1 %v2573_v33 }
 0x1b3   : > { %1236 = vperm.xlu1 %2403, %v2695_v4  }
 0x1b4   : > { %2412 = vset.pattern.permute.xlu0 %v2574_v9 }
 0x1b5   : > { %1290 = vperm.xlu0 %2412, %v2695_v4  }
 0x1b7   : > { %1240 = vperm.xlu1 %2403, %v2703_v6  }
 0x1b9   : > { %2415 = vset.pattern.permute.xlu0 %v2547_v11 }
 0x1ba   : > { %1081 = vperm.xlu0 %2415, %v2690_v3  }
 0x1bb   : > { %2405 = vset.pattern.permute.xlu1 %v2569_v38 }
 0x1bc   : > { %1051 = vperm.xlu1 %2405, %v2703_v6  }
 0x1be   : > { %2417 = vset.pattern.permute.xlu0 %v2575_v59 }
 0x1bf   : > { %1326 = vperm.xlu0 %2417, %v2695_v4  }
 0x1c0   : > { %2406 = vset.pattern.permute.xlu1 %v2570_v10 }
 0x1c1   : > { %1254 = vperm.xlu1 %2406, %v2695_v4  }
 0x1c3   : > { %2420 = vset.pattern.permute.xlu0 %v2544_v5 }
 0x1c4   : > { %1093 = vperm.xlu0 %2420, %v2690_v3  }
 0x1c5   : > { %2409 = vset.pattern.permute.xlu1 %v2571_v27 }
 0x1c6   : > { %1069 = vperm.xlu1 %2409, %v2703_v6  }
 0x1c8   : > { %2422 = vset.pattern.permute.xlu0 %v2548_v12 }
 0x1ca   : > { %2410 = vset.pattern.permute.xlu1 %v2572_v42 }
 0x1cb   : > { %1272 = vperm.xlu1 %2410, %v2695_v4  }
 0x1cf   : > { %2413 = vset.pattern.permute.xlu1 %v2574_v9 }
 0x1d0   : > { %1294 = vperm.xlu1 %2413, %v2703_v6  }
 0x1d4   : > { %2414 = vset.pattern.permute.xlu1 %v2547_v11 }
 0x1d5   : > { %1077 = vperm.xlu1 %2414, %v2680_v1  }
 0x1d9   : > { %2416 = vset.pattern.permute.xlu1 %v2576_v16 }
 0x1da   : > { %1308 = vperm.xlu1 %2416, %v2695_v4  }
 0x1de   : > { %1312 = vperm.xlu1 %2416, %v2703_v6  }
 0x1e2   : > { %2418 = vset.pattern.permute.xlu1 %v2575_v59 }
 0x1e3   : > { %1330 = vperm.xlu1 %2418, %v2703_v6  }
 0x1e7   : > { %2419 = vset.pattern.permute.xlu1 %v2544_v5  ;;  %v2474_v5 = vld [vmem:[%s3577_s6 + $0x8] sm:$0xff]  }
 0x1e8   : > { %1089 = vperm.xlu1 %2419, %v2680_v1  }
 0x1ec   : > { %2421 = vset.pattern.permute.xlu1 %v2577_v24 }
 0x1ed   : > { %1344 = vperm.xlu1 %2421, %v2695_v4  }
 0x1f0   : > { %v819_v40 = vpop.permute.xlu1 %818 }
 0x1f1   : > { %1348 = vperm.xlu1 %2421, %v2703_v6   ;;  %v814_v6 = vpop.permute.xlu0 %813 }
 0x1f4   : > { %v824_v43 = vpop.permute.xlu1 %823 }
 0x1f5   : > { %2423 = vset.pattern.permute.xlu1 %v2548_v12  ;;  %v829_v27 = vpop.permute.xlu0 %828 }
 0x1f9   : > { %v2971_v47 = vpop.permute.xlu1 %923  ;;  %v3025_v42 = vpop.permute.xlu0 %927 }
 0x1fd   : > { %v3033_v9 = vpop.permute.xlu0 %957 }
 0x1fe   : > { %v2973_v46 = vpop.permute.xlu1 %939 }
 0x201   : > { %v3045_v16 = vpop.permute.xlu0 %979 }
 0x202   : > { %v2975_v4 = vpop.permute.xlu1 %943 }
 0x207   : > { %v2977_v50 = vpop.permute.xlu1 %961 }
 0x20c   : > { %v2979_v34 = vpop.permute.xlu1 %975 }
 0x211   : > { %v2983_v12 = vpop.permute.xlu1 %997 }
 0x216   : > { %v2991_v57 = vpop.permute.xlu1 %1011 }
 0x21b   : > { %v3001_v32 = vpop.permute.xlu1 %1202 }
 0x21f   : > { %v3007_v53 = vpop.permute.xlu1 %1206 }
 0x224   : > { %v3019_v10 = vpop.permute.xlu1 %1222 }
 0x229   : > { %v3027_v33 = vpop.permute.xlu1 %1029 }
 0x22e   : > { %v3039_v59 = vpop.permute.xlu1 %1236 }
 0x262   : > { %v789_v58 = vpop.f32.mrf.mxu1 }
 0x263   : > { %v790_v44 = vadd.f32 %v789_v58, %v741_v39  ;;  %v3047_v39 = vpop.permute.xlu1 %1240 }
 0x264   : > { %v2253_v29 = vpop.f32.mrf.mxu1 }
 0x265   : > { %v2947_v37 = vadd.f32 %v790_v44, %v450_v17  ;;  %v994_v17 = vpop.permute.xlu0 %993 }
 0x266   : > { %v792_v21 = vpop.f32.mrf.mxu1 }
 0x267   : > { %v793_v11 = vadd.f32 %v792_v21, %v745_v20  ;;  %3604 = vst [vmem:[#allocation4_spill] sm:$0xff] %v2947_v37  ;;  %v3055_v29 = vpop.permute.xlu1 %1051 }
 0x268   : > { %v2254_v31 = vpop.f32.mrf.mxu1 }
 0x269   : > { %v2949_v45 = vadd.f32 %v793_v11, %v451_v36  ;;  %v3067_v44 = vpop.permute.xlu0 %1015 }
 0x26b   : > { %3605 = vst [vmem:[#allocation5_spill] sm:$0xff] %v2949_v45  ;;  %v804_v18 = vpack.c.bf16 %v2949_v45, %v2947_v37  ;;  %v3065_v36 = vpop.permute.xlu1 %1254 }
 0x26d   : > { %2256 = vmatpush3.bf16.msra.mxu0 %v804_v18  ;;  %v3074_v21 = vpop.permute.xlu0 %1218 }
 0x26e   : > { %2291 = vmatprep.subr.bf16.mxu0 %v3596_v0 }
 0x26f   : > { %v3072_v20 = vpop.permute.xlu1 %1069 }
 0x270   : > { %2258 = vmatmul.mubr.msk.bf16.vlgmr.msra.gmra.mxu0 %vm475_vm1, %v2473_v7 }
 0x271   : > { %2261 = vmatprep.mubr.msk.bf16.mxu0 %vm2542_vm0, %v3596_v0  ;;  %v3084_v31 = vpop.permute.xlu0 %1033 }
 0x273   : > { %v3082_v11 = vpop.permute.xlu1 %1272 }
 0x274   : > { %3607 = vst [vmem:[#allocation6_spill] sm:$0xff] %v3082_v11 }
 0x275   : > { %v3090_v7 = vpop.permute.xlu0 %1047 }
 0x277   : > { %v3088_v18 = vpop.permute.xlu1 %1294 }
 0x278   : > { %2262 = vmatmul.mubr.msk.bf16.gmra.mxu0 %vm475_vm1, %v2474_v5  ;;  %3608 = vst [vmem:[#allocation7_spill] sm:$0xff] %v3088_v18 }
 0x279   : > { %2265 = vmatprep.mubr.msk.bf16.mxu0 %vm2542_vm0, %v3596_v0  ;;  %v3098_v5 = vpop.permute.xlu0 %1258 }
 0x27a   : > { %3609 = vst [vmem:[#allocation8_spill] sm:$0xff] %v3098_v5 }
 0x27b   : > { %v3096_v24 = vpop.permute.xlu1 %1077 }
 0x330   : > { %v899_v23 = vpop.f32.mrf.mxu0 }
 0x331   : > { %v2981_v55 = vadd.f32 %v899_v23, %v814_v6 }
 0x332   : > { %v2259_v25 = vpop.f32.mrf.mxu0 }
 0x333   : > { %1004 = vrot.lane.b32.xlu0 %v2981_v55, %s2556_s30  ;;  %932 = vrot.lane.b32.xlu1 %v2981_v55, %s2552_s24 }
 0x334   : > { %v902_v52 = vpop.f32.mrf.mxu0 }
 0x335   : > { %v2989_v56 = vadd.f32 %v902_v52, %v819_v40  ;;  %v3101_v40 = vpop.permute.xlu1 %1308 }
 0x336   : > { %v2260_v28 = vpop.f32.mrf.mxu0  ;;  %3610 = vst [vmem:[#allocation9_spill] sm:$0xff] %v3101_v40 }
 0x337   : > { %950 = vrot.lane.b32.xlu1 %v2981_v55, %s2553_s27  ;;  %934 = vrot.lane.b32.xlu0 %v2989_v56, %s2552_s24 }
 0x338   : > { %v907_v41 = vpop.f32.mrf.mxu0 }
 0x339   : > { %v3013_v38 = vadd.f32 %v907_v41, %v824_v43  ;;  %v3103_v43 = vpop.permute.xlu0 %1065  ;;  %v3107_v6 = vpop.permute.xlu1 %1312 }
 0x33a   : > { %v2263_v35 = vpop.f32.mrf.mxu0  ;;  %3611 = vst [vmem:[#allocation10_spill] sm:$0xff] %v3107_v6 }
 0x33b   : > { %968 = vrot.lane.b32.xlu1 %v2981_v55, %s2554_s28  ;;  %970 = vrot.lane.b32.xlu0 %v2989_v56, %s2554_s28 }
 0x33c   : > { %v910_v61 = vpop.f32.mrf.mxu0 }
 0x33d   : > { %v3053_v58 = vadd.f32 %v910_v61, %v829_v27  ;;  %v3109_v23 = vpop.permute.xlu0 %1276  ;;  %v3111_v25 = vpop.permute.xlu1 %1330 }
 0x33e   : > { %v2264_v63 = vpop.f32.mrf.mxu0  ;;  %3612 = vst [vmem:[#allocation11_spill] sm:$0xff] %v3109_v23  ;;  %3613 = vst [vmem:[#allocation12_spill] sm:$0xff] %v3111_v25  ;;  %v930_v25 = vmul.f32 %v2971_v47, %v2981_v55 }
 0x33f   : > { %986 = vrot.lane.b32.xlu1 %v2981_v55, %s2555_s29  ;;  %988 = vrot.lane.b32.xlu0 %v2989_v56, %s2555_s29 }
 0x341   : > { %v3113_v52 = vpop.permute.xlu0 %1290  ;;  %v3115_v28 = vpop.permute.xlu1 %1089 }
 0x342   : > { %3614 = vst [vmem:[#allocation13_spill] sm:$0xff] %v3113_v52 }
 0x343   : > { %1022 = vrot.lane.b32.xlu1 %v2981_v55, %s2558_s15  ;;  %1060 = vrot.lane.b32.xlu0 %v2989_v56, %s2559_s17 }
 0x345   : > { %v3117_v41 = vpop.permute.xlu0 %1081 }
 0x347   : > { %1040 = vrot.lane.b32.xlu1 %v2981_v55, %s3606_s20  ;;  %1211 = vrot.lane.b32.xlu0 %v3013_v38, %s2552_s24 }
 0x349   : > { %v3121_v35 = vpop.permute.xlu0 %1326 }
 0x34a   : > { %3616 = vst [vmem:[#allocation15_spill] sm:$0xff] %v3121_v35 }
 0x34b   : > { %1058 = vrot.lane.b32.xlu1 %v2981_v55, %s2559_s17  ;;  %1229 = vrot.lane.b32.xlu0 %v3013_v38, %s2553_s27 }
 0x34f   : > { %952 = vrot.lane.b32.xlu1 %v2989_v56, %s2553_s27  ;;  %1247 = vrot.lane.b32.xlu0 %v3013_v38, %s2554_s28 }
 0x353   : > { %1006 = vrot.lane.b32.xlu1 %v2989_v56, %s2556_s30  ;;  %1283 = vrot.lane.b32.xlu0 %v3013_v38, %s2556_s30 }
 0x357   : > { %1024 = vrot.lane.b32.xlu1 %v2989_v56, %s2558_s15  ;;  %1319 = vrot.lane.b32.xlu0 %v3013_v38, %s3606_s20 }
 0x35b   : > { %1042 = vrot.lane.b32.xlu1 %v2989_v56, %s3606_s20  ;;  %1337 = vrot.lane.b32.xlu0 %v3013_v38, %s2559_s17 }
 0x35f   : > { %1265 = vrot.lane.b32.xlu1 %v3013_v38, %s2555_s29  ;;  %1267 = vrot.lane.b32.xlu0 %v3053_v58, %s2555_s29 }
 0x363   : > { %1301 = vrot.lane.b32.xlu1 %v3013_v38, %s2558_s15  ;;  %1303 = vrot.lane.b32.xlu0 %v3053_v58, %s2558_s15 }
 0x367   : > { %1356 = vperm.xlu0 %2422, %v2680_v1   ;;  %1213 = vrot.lane.b32.xlu1 %v3053_v58, %s2552_s24 }
 0x36b   : > { %1231 = vrot.lane.b32.xlu1 %v3053_v58, %s2553_s27  ;;  %2425 = vset.pattern.permute.xlu0 %v2549_v13 }
 0x36c   : > { %1372 = vperm.xlu0 %2425, %v2690_v3  }
 0x36f   : > { %1249 = vrot.lane.b32.xlu1 %v3053_v58, %s2554_s28 }
 0x373   : > { %1285 = vrot.lane.b32.xlu1 %v3053_v58, %s2556_s30 }
 0x377   : > { %1321 = vrot.lane.b32.xlu1 %v3053_v58, %s3606_s20 }
 0x37b   : > { %1339 = vrot.lane.b32.xlu1 %v3053_v58, %s2559_s17 }
 0x37f   : > { %1360 = vperm.xlu1 %2423, %v2690_v3   ;;  %v3119_v3 = vpop.permute.xlu1 %1344 }
 0x380   : > { %3615 = vst [vmem:[#allocation14_spill] sm:$0xff] %v3119_v3 }
 0x383   : > { %2424 = vset.pattern.permute.xlu1 %v2549_v13  ;;  %v3123_v61 = vpop.permute.xlu1 %1348  ;;  %v3125_v13 = vpop.permute.xlu0 %1093 }
 0x384   : > { %1368 = vperm.xlu1 %2424, %v2680_v1   ;;  %3617 = vst [vmem:[#allocation16_spill] sm:$0xff] %v3123_v61 }
 0x3a5   : > { %v1005_v1 = vpop.permute.xlu0 %1004  ;;  %v933_v63 = vpop.permute.xlu1 %932 }
 0x3a6   : > { %v936_v45 = vmul.f32 %v933_v63, %v2825_v54 }
 0x3a8   : > { %v946_v48 = vmul.f32 %v2973_v46, %v936_v45 }
 0x3a9   : > { %v951_v27 = vpop.permute.xlu1 %950  ;;  %v935_v49 = vpop.permute.xlu0 %934 }
 0x3aa   : > { %v954_v37 = vmul.f32 %v951_v27, %v2835_v62  ;;  %v948_v18 = vadd.f32 %v946_v48, %v930_v25  ;;  %v937_v63 = vmul.f32 %v935_v49, %v2825_v54 }
 0x3ac   : > { %v964_v35 = vmul.f32 %v3033_v9, %v954_v37  ;;  %v947_v11 = vmul.f32 %v2975_v4, %v937_v63 }
 0x3ad   : > { %v969_v15 = vpop.permute.xlu1 %968  ;;  %v971_v14 = vpop.permute.xlu0 %970 }
 0x3ae   : > { %v972_v3 = vmul.f32 %v969_v15, %v2831_v60  ;;  %v966_v27 = vadd.f32 %v964_v35, %v948_v18  ;;  %v1008_v15 = vmul.f32 %v1005_v1, %v2842_v19  ;;  %v973_v48 = vmul.f32 %v971_v14, %v2831_v60 }
 0x3b0   : > { %v982_v52 = vmul.f32 %v2979_v34, %v972_v3  ;;  %v1018_v34 = vmul.f32 %v2991_v57, %v1008_v15 }
 0x3b1   : > { %v987_v2 = vpop.permute.xlu1 %986  ;;  %v989_v0 = vpop.permute.xlu0 %988 }
 0x3b2   : > { %v990_v6 = vmul.f32 %v987_v2, %v2847_v26  ;;  %v984_v46 = vadd.f32 %v982_v52, %v966_v27  ;;  %v931_v2 = vmul.f32 %v3025_v42, %v2989_v56  ;;  %v991_v18 = vmul.f32 %v989_v0, %v2847_v26 }
 0x3b3   : > { %v983_v42 = vmul.f32 %v3045_v16, %v973_v48 }
 0x3b4   : > { %v1000_v23 = vmul.f32 %v994_v17, %v990_v6  ;;  %v949_v17 = vadd.f32 %v947_v11, %v931_v2  ;;  %v1001_v57 = vmul.f32 %v2983_v12, %v991_v18 }
 0x3b5   : > { %v1023_v51 = vpop.permute.xlu1 %1022  ;;  %v1061_v61 = vpop.permute.xlu0 %1060 }
 0x3b6   : > { %v1002_v47 = vadd.f32 %v1000_v23, %v984_v46  ;;  %v1026_v37 = vmul.f32 %v1023_v51, %v2858_v8  ;;  %v1063_v12 = vmul.f32 %v2866_v30, %v1061_v61 }
 0x3b8   : > { %v1020_v23 = vadd.f32 %v1018_v34, %v1002_v47  ;;  %v1036_v51 = vmul.f32 %v3027_v33, %v1026_v37 }
 0x3b9   : > { %v1041_v40 = vpop.permute.xlu1 %1040  ;;  %v1212_v45 = vpop.permute.xlu0 %1211 }
 0x3ba   : > { %v1044_v6 = vmul.f32 %v1041_v40, %v2852_v22  ;;  %v1038_v40 = vadd.f32 %v1036_v51, %v1020_v23  ;;  %v1215_v51 = vmul.f32 %v1212_v45, %v2825_v54 }
 0x3bc   : > { %v1054_v0 = vmul.f32 %v3090_v7, %v1044_v6 }
 0x3bd   : > { %v1059_v5 = vpop.permute.xlu1 %1058  ;;  %v1230_v25 = vpop.permute.xlu0 %1229 }
 0x3be   : > { %v1062_v14 = vmul.f32 %v2866_v30, %v1059_v5  ;;  %v1056_v15 = vadd.f32 %v1054_v0, %v1038_v40  ;;  %v1210_v40 = vmul.f32 %v3007_v53, %v3053_v58 }
 0x3c1   : > { %v953_v9 = vpop.permute.xlu1 %952  ;;  %v1248_v63 = vpop.permute.xlu0 %1247 }
 0x3c2   : > { %v955_v49 = vmul.f32 %v953_v9, %v2835_v62 }
 0x3c4   : > { %v965_v4 = vmul.f32 %v2977_v50, %v955_v49  ;;  %v1072_v50 = vmul.f32 %v3103_v43, %v1062_v14  ;;  %v1073_v49 = vmul.f32 %v3072_v20, %v1063_v12  ;;  %v1233_v20 = vmul.f32 %v1230_v25, %v2835_v62 }
 0x3c5   : > { %v1007_v52 = vpop.permute.xlu1 %1006  ;;  %v1284_v9 = vpop.permute.xlu0 %1283 }
 0x3c6   : > { %v967_v3 = vadd.f32 %v965_v4, %v949_v17  ;;  %v1009_v35 = vmul.f32 %v1007_v52, %v2842_v19  ;;  %v1074_v37 = vadd.f32 %v1072_v50, %v1056_v15 }
 0x3c8   : > { %v985_v11 = vadd.f32 %v983_v42, %v967_v3  ;;  %v1019_v33 = vmul.f32 %v3067_v44, %v1009_v35  ;;  %v1084_v44 = vadd.f32 %v3096_v24, %v1074_v37  ;;  %v1225_v35 = vmul.f32 %v3074_v21, %v1215_v51 }
 0x3c9   : > { %v1025_v1 = vpop.permute.xlu1 %1024 }
 0x3ca   : > { %v1003_v27 = vadd.f32 %v1001_v57, %v985_v11  ;;  %v1027_v16 = vmul.f32 %v1025_v1, %v2858_v8  ;;  %v1086_v6 = vmax.f32 %v1084_v44, 0.0  ;;  %v1251_v57 = vmul.f32 %v1248_v63, %v2831_v60 }
 0x3cc   : > { %v1021_v5 = vadd.f32 %v1019_v33, %v1003_v27  ;;  %v1037_v46 = vmul.f32 %v3084_v31, %v1027_v16  ;;  %v1320_v31 = vpop.permute.xlu0 %1319  ;;  %v1096_v52 = vmul.f32 %v3115_v28, %v1086_v6  ;;  %v1209_v28 = vmul.f32 %v3001_v32, %v3013_v38 }
 0x3cd   : > { %v1043_v47 = vpop.permute.xlu1 %1042  ;;  %v1261_v63 = vmul.f32 %v3065_v36, %v1251_v57 }
 0x3ce   : > { %v1045_v7 = vmul.f32 %v1043_v47, %v2852_v22  ;;  %v1039_v2 = vadd.f32 %v1037_v46, %v1021_v5  ;;  %v1227_v50 = vadd.f32 %v1225_v35, %v1209_v28  ;;  %v3619_v46 = vld [vmem:[#allocation8_spill] sm:$0xff]  ;;  %v1323_v35 = vmul.f32 %v1320_v31, %v2852_v22  ;;  %v3628_v31 = vld [vmem:[#allocation14_spill] sm:$0xff] }
 0x3d0   : > { %v1055_v43 = vmul.f32 %v3055_v29, %v1045_v7  ;;  %v1338_v14 = vpop.permute.xlu0 %1337  ;;  %v1287_v7 = vmul.f32 %v1284_v9, %v2842_v19 }
 0x3d1   : > { %v1266_v48 = vpop.permute.xlu1 %1265 }
 0x3d2   : > { %v1057_v34 = vadd.f32 %v1055_v43, %v1039_v2  ;;  %v1269_v25 = vmul.f32 %v1266_v48, %v2847_v26 }
 0x3d4   : > { %v1075_v17 = vadd.f32 %v1073_v49, %v1057_v34  ;;  %v1268_v33 = vpop.permute.xlu0 %1267  ;;  %v3620_v34 = vld [vmem:[#allocation11_spill] sm:$0xff] }
 0x3d5   : > { %v1302_v18 = vpop.permute.xlu1 %1301  ;;  %v1270_v12 = vmul.f32 %v1268_v33, %v2847_v26 }
 0x3d6   : > { %v1085_v4 = vadd.f32 %v3117_v41, %v1075_v17  ;;  %v1305_v44 = vmul.f32 %v1302_v18, %v2858_v8 }
 0x3d7   : > { %v1280_v17 = vmul.f32 %v3620_v34, %v1270_v12 }
 0x3d8   : > { %v1087_v61 = vmax.f32 %v1085_v4, 0.0  ;;  %v3621_v4 = vld [vmem:[#allocation13_spill] sm:$0xff]  ;;  %v1304_v51 = vpop.permute.xlu0 %1303 }
 0x3d9   : > { %v1214_v23 = vpop.permute.xlu1 %1213 }
 0x3da   : > { %v1097_v29 = vmul.f32 %v3125_v13, %v1087_v61  ;;  %v1216_v42 = vmul.f32 %v1214_v23, %v2825_v54  ;;  %v1243_v13 = vmul.f32 %v3039_v59, %v1233_v20  ;;  %v3618_v59 = vld [vmem:[#allocation6_spill] sm:$0xff]  ;;  %v1297_v61 = vmul.f32 %v3621_v4, %v1287_v7  ;;  %v3623_v20 = vld [vmem:[#allocation9_spill] sm:$0xff] }
 0x3db   : > { %v1279_v5 = vmul.f32 %v3618_v59, %v1269_v25 }
 0x3dc   : > { %v1098_v24 = vadd.f32 %v1097_v29, %v1096_v52  ;;  %v1226_v45 = vmul.f32 %v3019_v10, %v1216_v42  ;;  %v1245_v32 = vadd.f32 %v1243_v13, %v1227_v50  ;;  %v3622_v29 = vld [vmem:[#allocation7_spill] sm:$0xff] }
 0x3dd   : > { %v1232_v3 = vpop.permute.xlu1 %1231 }
 0x3de   : > { %v1099_v41 = vrot.slane %v1098_v24, 4  ;;  %v1234_v0 = vmul.f32 %v1232_v3, %v2835_v62  ;;  %v1228_v16 = vadd.f32 %v1226_v45, %v1210_v40  ;;  %v1306_v3 = vmul.f32 %v1304_v51, %v2858_v8  ;;  %v3624_v45 = vld [vmem:[#allocation10_spill] sm:$0xff] }
 0x3df   : > { %v1341_v40 = vmul.f32 %v2866_v30, %v1338_v14 }
 0x3e0   : > { %v1100_v11 = vadd.f32 %v1099_v41, %v1098_v24  ;;  %v1244_v21 = vmul.f32 %v3047_v39, %v1234_v0  ;;  %v1263_v39 = vadd.f32 %v1261_v63, %v1245_v32  ;;  %v1315_v24 = vmul.f32 %v3623_v20, %v1305_v44 }
 0x3e1   : > { %v1250_v1 = vpop.permute.xlu1 %1249  ;;  %v1316_v28 = vmul.f32 %v3624_v45, %v1306_v3 }
 0x3e2   : > { %v1101_v27 = vrot.slane %v1100_v11, 2  ;;  %v1252_v10 = vmul.f32 %v1250_v1, %v2831_v60  ;;  %v1246_v53 = vadd.f32 %v1244_v21, %v1228_v16  ;;  %v1281_v49 = vadd.f32 %v1279_v5, %v1263_v39  ;;  %v3626_v21 = vld [vmem:[#allocation12_spill] sm:$0xff]  ;;  %v1357_v16 = vpop.permute.xlu0 %1356 }
 0x3e4   : > { %v1102_v15 = vadd.f32 %v1101_v27, %v1100_v11  ;;  %v1262_v47 = vmul.f32 %v3619_v46, %v1252_v10  ;;  %v1299_v9 = vadd.f32 %v1297_v61, %v1281_v49  ;;  %v3625_v11 = vld [vmem:[#allocation15_spill] sm:$0xff]  ;;  %v3627_v27 = vld [vmem:[#allocation16_spill] sm:$0xff]  ;;  %v1351_v10 = vmul.f32 %v3628_v31, %v1341_v40 }
 0x3e5   : > { %v1286_v37 = vpop.permute.xlu1 %1285  ;;  %v1333_v25 = vmul.f32 %v3625_v11, %v1323_v35  ;;  %v3631_v40 = vmov 0.0   ;;  %v2579_v31 = vmov 27  }
 0x3e6   : > { %v1103_v2 = vrot.slane %v1102_v15, 1  ;;  %v1264_v36 = vadd.f32 %v1262_v47, %v1246_v53  ;;  %v1288_v43 = vmul.f32 %v1286_v37, %v2842_v19  ;;  %v1317_v0 = vadd.f32 %v1315_v24, %v1299_v9 }
 0x3e7   : > { %v1373_v37 = vpop.permute.xlu0 %1372 }
 0x3e8   : > { %v1104_v48 = vadd.f32 %v1103_v2, %v1102_v15  ;;  %v1282_v52 = vadd.f32 %v1280_v17, %v1264_v36  ;;  %v1298_v42 = vmul.f32 %v3622_v29, %v1288_v43  ;;  %v1335_v63 = vadd.f32 %v1333_v25, %v1317_v0  ;;  %v3630_v17 = vld [vmem:[#allocation3_spill] sm:$0xff]  ;;  %v3223_v0 = vld [vmem:[%s3573_s2] sm:$0xff] }
 0x3e9   : > { %v1322_v6 = vpop.permute.xlu1 %1321  ;;  %v2475_v25 = vld [vmem:[%s3579_s8] sm:$0xff]  }
 0x3ea   : > { %v2188_v23 = vmul.f32 -1.442695, %v1104_v48  ;;  %v1300_v18 = vadd.f32 %v1298_v42, %v1282_v52  ;;  %v1324_v41 = vmul.f32 %v1322_v6, %v2852_v22  ;;  %v1353_v15 = vadd.f32 %v1351_v10, %v1335_v63  ;;  %v3629_v48 = vld [vmem:[#allocation2_spill] sm:$0xff] }
 0x3eb   : > { %v1115_v49 = vsub.s32 4, %v3629_v48  ;;  %v2580_v10 = vmov 28  }
 0x3ec   : > { %2488 = vpow2.f32 %v2188_v23  ;;  %v1334_v1 = vmul.f32 %v3626_v21, %v1324_v41  ;;  %v1318_v50 = vadd.f32 %v1316_v28, %v1300_v18  ;;  %v1363_v46 = vadd.f32 %v1357_v16, %v1353_v15  ;;  %v2477_v15 = vld [vmem:[%s3577_s6 + $0x10] sm:$0xff]  }
 0x3ed   : > { %v1340_v57 = vpop.permute.xlu1 %1339  ;;  %v1116_v6 = vrot.slane %v3630_v17, %v1115_v49  ;;  %v2578_v41 = vmov 31   ;;  %v2581_v16 = vmov 29   ;;  %2266 = vmatmul.mubr.msk.bf16.gmra.mxu0 %vm475_vm1, %v2477_v15  ;;  %v2582_v49 = vmov 30  }
 0x3ee   : > { %v1342_v13 = vmul.f32 %v2866_v30, %v1340_v57  ;;  %v1336_v32 = vadd.f32 %v1334_v1, %v1318_v50  ;;  %v1365_v14 = vmax.f32 %v1363_v46, 0.0  ;;  %2426 = vset.pattern.permute.xlu1 %v2578_v41  ;;  %2429 = vset.pattern.permute.xlu0 %v2581_v16  ;;  %v3280_v41 = vld [vmem:[%s3574_s3] sm:$0xff] }
 0x3ef   : > { %2299 = vmatprep.mubr.msk.bf16.mxu0 %vm2542_vm0, %v3631_v40 }
 0x3f0   : > { %v1352_v33 = vmul.f32 %v3627_v27, %v1342_v13 }
 0x3f2   : > { %v1354_v5 = vadd.f32 %v1352_v33, %v1336_v32  ;;  %v2476_v33 = vld [vmem:[%s3580_s9] sm:$0xff]   ;;  %v3632_v32 = vmov 0  }
 0x3f9   : > { %v2489_v59 = vpop.eup %2488 }
 0x3fa   : > { %v1361_v47 = vpop.permute.xlu1 %1360  ;;  %v1108_v12 = vadd.f32 1.0, %v2489_v59 }
 0x3fb   : > { %v1364_v53 = vadd.f32 %v1361_v47, %v1354_v5 }
 0x3fc   : > { %2490 = vrcp.f32 %v1108_v12 }
 0x3fd   : > { %v1366_v30 = vmax.f32 %v1364_v53, 0.0 }
 0x3ff   : > { %v1376_v39 = vmul.f32 %v1373_v37, %v1366_v30  ;;  %v1369_v7 = vpop.permute.xlu1 %1368 }
 0x400   : > { %v1375_v2 = vmul.f32 %v1369_v7, %v1365_v14 }
 0x402   : > { %v1377_v36 = vadd.f32 %v1376_v39, %v1375_v2 }
 0x404   : > { %v1378_v43 = vrot.slane %v1377_v36, 4 }
 0x406   : > { %v1379_v44 = vadd.f32 %v1378_v43, %v1377_v36 }
 0x408   : > { %v1380_v34 = vrot.slane %v1379_v44, 2 }
 0x409   : > { %v2491_v4 = vpop.eup %2490 }
 0x40a   : > { %v1381_v61 = vadd.f32 %v1380_v34, %v1379_v44  ;;  %v3205_v23 = vmul.f32 %v2491_v4, %v2989_v56  ;;  %v3208_v51 = vmul.f32 %v2491_v4, %v2981_v55  ;;  %v2584_v4 = vmov 33  }
 0x40c   : > { %v1382_v52 = vrot.slane %v1381_v61, 1  ;;  %v1118_v29 = vmul.f32 %v1116_v6, %v3205_v23  ;;  %v1117_v42 = vmul.f32 %v1116_v6, %v3208_v51 }
 0x40e   : > { %v1383_v9 = vadd.f32 %v1382_v52, %v1381_v61  ;;  %1121 = vadd.xlane.f32.xlu0 %v1118_v29  ;;  %1119 = vadd.xlane.f32.xlu1 %v1117_v42  ;;  %v2585_v29 = vmov 34  }
 0x410   : > { %v2193_v20 = vmul.f32 -1.442695, %v1383_v9 }
 0x412   : > { %2492 = vpow2.f32 %v2193_v20  ;;  %v2586_v20 = vmov 35  }
 0x41f   : > { %v2493_v24 = vpop.eup %2492 }
 0x420   : > { %v1387_v3 = vadd.f32 1.0, %v2493_v24  ;;  %v809_v24 = vld [vmem:[%s3578_s7 + $0x20] sm:$0xff] }
 0x422   : > { %2494 = vrcp.f32 %v1387_v3 }
 0x42f   : > { %v2495_v35 = vpop.eup %2494 }
 0x430   : > { %v3213_v56 = vmul.f32 %v2495_v35, %v3053_v58  ;;  %v3216_v55 = vmul.f32 %v2495_v35, %v3013_v38  ;;  %v3229_v38 = vld [vmem:[%s3573_s2 + $0x8] sm:$0xff]  ;;  %v3633_v35 = vmov 7  }
 0x432   : > { %v1393_v57 = vmul.f32 %v3213_v56, %v1116_v6  ;;  %v1392_v18 = vmul.f32 %v3216_v55, %v1116_v6  ;;  %v2583_v6 = vmov 32  }
 0x434   : > { %1396 = vadd.xlane.f32.xlu0 %v1393_v57  ;;  %1394 = vadd.xlane.f32.xlu1 %v1392_v18  ;;  %v810_v18 = vld [vmem:[%s3578_s7 + $0x28] sm:$0xff] }
 0x445   : > { %1479 = vperm.xlu1 %2426, %v3223_v0  }
 0x449   : > { %1483 = vperm.xlu1 %2426, %v3229_v38  }
 0x44a   : > { %1531 = vperm.xlu0 %2429, %v3223_v0  }
 0x44d   : > { %2427 = vset.pattern.permute.xlu1 %v2579_v31 }
 0x44e   : > { %1495 = vperm.xlu1 %2427, %v3223_v0   ;;  %2432 = vset.pattern.permute.xlu0 %v3632_v32 }
 0x452   : > { %1499 = vperm.xlu1 %2427, %v3229_v38  }
 0x456   : > { %2428 = vset.pattern.permute.xlu1 %v2580_v10 }
 0x457   : > { %1513 = vperm.xlu1 %2428, %v3223_v0  }
 0x45b   : > { %1517 = vperm.xlu1 %2428, %v3229_v38  }
 0x45f   : > { %2430 = vset.pattern.permute.xlu1 %v2581_v16 }
 0x460   : > { %1535 = vperm.xlu1 %2430, %v3229_v38  }
 0x464   : > { %2431 = vset.pattern.permute.xlu1 %v3632_v32 }
 0x497   : > { %v1122_v58 = vpop.xlane.xlu0 %1121  ;;  %v1120_v45 = vpop.xlane.xlu1 %1119 }
 0x498   : > { %v1124_v28 = vmul.f32 0.015625, %v1122_v58  ;;  %v1123_v13 = vmul.f32 0.015625, %v1120_v45  ;;  %v2587_v58 = vmov 40  }
 0x49a   : > { %v1127_v11 = vpack.c.bf16 %v1124_v28, %v1123_v13 }
 0x49c   : > { %2270 = vmatpush3.bf16.msra.mxu1 %v1127_v11 }
 0x49d   : > { %2275 = vmatprep.subr.bf16.mxu1 %v3631_v40 }
 0x49f   : > { %2272 = vmatmul.mubr.msk.bf16.vlgmr.msra.gmra.mxu1 %vm475_vm1, %v2475_v25 }
 0x4a0   : > { %2277 = vmatprep.mubr.msk.bf16.mxu1 %vm2542_vm0, %v3631_v40 }
 0x4ad   : > { %v3283_v45 = vpop.f32.mrf.mxu0 }
 0x4af   : > { %v2267_v28 = vpop.f32.mrf.mxu0 }
 0x4b1   : > { %v3285_v13 = vpop.f32.mrf.mxu0 }
 0x4b3   : > { %v2268_v11 = vpop.f32.mrf.mxu0 }
 0x4bd   : > { %v1397_v21 = vpop.xlane.xlu0 %1396  ;;  %v1395_v1 = vpop.xlane.xlu1 %1394 }
 0x4be   : > { %v1399_v50 = vmul.f32 0.015625, %v1397_v21  ;;  %v1398_v63 = vmul.f32 0.015625, %v1395_v1 }
 0x4c0   : > { %v1402_v27 = vpack.c.bf16 %v1399_v50, %v1398_v63 }
 0x4c1   : > { %v3287_v25 = vpop.permute.xlu1 %1479 }
 0x4c2   : > { %2276 = vmatpush3.bf16.msra.mxu1 %v1402_v27 }
 0x4c5   : > { %2278 = vmatmul.mubr.msk.bf16.vlgmr.msra.gmra.mxu1 %vm475_vm1, %v2476_v33  ;;  %v3289_v21 = vpop.permute.xlu1 %1483  ;;  %v3301_v10 = vpop.permute.xlu0 %1531 }
 0x4c9   : > { %v3291_v1 = vpop.permute.xlu1 %1495 }
 0x4cd   : > { %v3293_v50 = vpop.permute.xlu1 %1499 }
 0x4d2   : > { %v3295_v63 = vpop.permute.xlu1 %1513 }
 0x4d6   : > { %v3297_v27 = vpop.permute.xlu1 %1517 }
 0x4db   : > { %v3299_v33 = vpop.permute.xlu1 %1535 }
 0x55f   : > { %v1170_v59 = vpop.f32.mrf.mxu1 }
 0x560   : > { %v2191_v5 = vmul.f32 -1.442695, %v1170_v59 }
 0x561   : > { %v2273_v46 = vpop.f32.mrf.mxu1 }
 0x562   : > { %2496 = vpow2.f32 %v2191_v5 }
 0x563   : > { %v1173_v47 = vpop.f32.mrf.mxu1 }
 0x564   : > { %v2192_v12 = vmul.f32 -1.442695, %v1173_v47 }
 0x565   : > { %v2274_v53 = vpop.f32.mrf.mxu1 }
 0x566   : > { %2498 = vpow2.f32 %v2192_v12 }
 0x56f   : > { %v2497_v37 = vpop.eup %2496 }
 0x570   : > { %v1183_v30 = vadd.f32 1.0, %v2497_v37  ;;  %v2590_v37 = vmov 38  }
 0x572   : > { %2500 = vrcp.f32 %v1183_v30  ;;  %v2591_v30 = vmov 39  }
 0x573   : > { %v2499_v14 = vpop.eup %2498 }
 0x574   : > { %v1184_v39 = vadd.f32 1.0, %v2499_v14  ;;  %v2592_v14 = vmov 41  }
 0x576   : > { %2502 = vrcp.f32 %v1184_v39  ;;  %v2593_v39 = vmov 42  }
 0x57f   : > { %v2501_v7 = vpop.eup %2500 }
 0x580   : > { %1191 = vperm.xlu1 %2431, %v2501_v7   ;;  %v2594_v7 = vmov 43  }
 0x583   : > { %v2503_v2 = vpop.eup %2502 }
 0x584   : > { %1196 = vperm.xlu0 %2432, %v2503_v2   ;;  %v2595_v2 = vmov 44  }
 0x585   : > { %v1445_v36 = vpop.f32.mrf.mxu1 }
 0x586   : > { %v2196_v43 = vmul.f32 -1.442695, %v1445_v36  ;;  %v3634_v36 = vmov 8  }
 0x587   : > { %v2279_v48 = vpop.f32.mrf.mxu1 }
 0x588   : > { %2504 = vpow2.f32 %v2196_v43  ;;  %2434 = vset.pattern.permute.xlu0 %v2582_v49 }
 0x589   : > { %v1448_v44 = vpop.f32.mrf.mxu1  ;;  %1553 = vperm.xlu0 %2434, %v3229_v38  }
 0x58a   : > { %v2197_v34 = vmul.f32 -1.442695, %v1448_v44 }
 0x58b   : > { %v2280_v17 = vpop.f32.mrf.mxu1 }
 0x58c   : > { %2506 = vpow2.f32 %v2197_v34 }
 0x58d   : > { %2435 = vset.pattern.permute.xlu0 %v2583_v6 }
 0x58e   : > { %1567 = vperm.xlu0 %2435, %v3223_v0  }
 0x592   : > { %2438 = vset.pattern.permute.xlu0 %v2584_v4 }
 0x593   : > { %1589 = vperm.xlu0 %2438, %v3229_v38  }
 0x595   : > { %v2505_v61 = vpop.eup %2504 }
 0x596   : > { %v1458_v52 = vadd.f32 1.0, %v2505_v61 }
 0x597   : > { %2439 = vset.pattern.permute.xlu0 %v2585_v29 }
 0x598   : > { %2508 = vrcp.f32 %v1458_v52  ;;  %1603 = vperm.xlu0 %2439, %v3223_v0  }
 0x599   : > { %v2507_v42 = vpop.eup %2506 }
 0x59a   : > { %v1459_v9 = vadd.f32 1.0, %v2507_v42 }
 0x59c   : > { %2510 = vrcp.f32 %v1459_v9  ;;  %2442 = vset.pattern.permute.xlu0 %v2586_v20 }
 0x59d   : > { %1625 = vperm.xlu0 %2442, %v3229_v38  }
 0x5a1   : > { %2443 = vset.pattern.permute.xlu0 %v3632_v32 }
 0x5a2   : > { %833 = vperm.xlu0 %2443, %v809_v24  }
 0x5a5   : > { %v2509_v3 = vpop.eup %2508 }
 0x5a6   : > { %1466 = vperm.xlu1 %2431, %v2509_v3   ;;  %2446 = vset.pattern.permute.xlu0 %v3633_v35 }
 0x5a9   : > { %v2511_v57 = vpop.eup %2510 }
 0x5aa   : > { %1471 = vperm.xlu1 %2431, %v2511_v57  }
 0x5ae   : > { %2433 = vset.pattern.permute.xlu1 %v2582_v49 }
 0x5af   : > { %1549 = vperm.xlu1 %2433, %v3223_v0  }
 0x5b3   : > { %2436 = vset.pattern.permute.xlu1 %v2583_v6 }
 0x5b4   : > { %1571 = vperm.xlu1 %2436, %v3229_v38  }
 0x5b8   : > { %2437 = vset.pattern.permute.xlu1 %v2584_v4 }
 0x5b9   : > { %1585 = vperm.xlu1 %2437, %v3223_v0  }
 0x5bd   : > { %2440 = vset.pattern.permute.xlu1 %v2585_v29 }
 0x5be   : > { %1607 = vperm.xlu1 %2440, %v3229_v38  }
 0x5c2   : > { %2441 = vset.pattern.permute.xlu1 %v2586_v20 }
 0x5c3   : > { %1621 = vperm.xlu1 %2441, %v3223_v0  }
 0x5c7   : > { %2444 = vset.pattern.permute.xlu1 %v3632_v32 }
 0x5c8   : > { %838 = vperm.xlu1 %2444, %v810_v18  }
 0x5cc   : > { %2445 = vset.pattern.permute.xlu1 %v3633_v35 }
 0x5cd   : > { %1633 = vperm.xlu1 %2445, %v3280_v41  }
 0x5d1   : > { %2447 = vset.pattern.permute.xlu1 %v2587_v58 }
 0x5fb   : > { %v1192_v31 = vpop.permute.xlu1 %1191 }
 0x5fc   : > { %v1199_v15 = vmul.f32 %v1192_v31, %v3208_v51 }
 0x5ff   : > { %v1197_v47 = vpop.permute.xlu0 %1196 }
 0x600   : > { %v1200_v53 = vmul.f32 %v1197_v47, %v3205_v23  ;;  %v3336_v23 = vld [vmem:[%s3574_s3 + $0x8] sm:$0xff] }
 0x604   : > { %v3366_v48 = vpop.permute.xlu0 %1553 }
 0x609   : > { %v1568_v44 = vpop.permute.xlu0 %1567 }
 0x60e   : > { %v3372_v17 = vpop.permute.xlu0 %1589 }
 0x613   : > { %v1604_v4 = vpop.permute.xlu0 %1603 }
 0x618   : > { %v3377_v52 = vpop.permute.xlu0 %1625 }
 0x61d   : > { %v834_v42 = vpop.permute.xlu0 %833 }
 0x621   : > { %v1467_v16 = vpop.permute.xlu1 %1466 }
 0x622   : > { %v1474_v59 = vmul.f32 %v1467_v16, %v3216_v55  ;;  %v2589_v55 = vmov 37  }
 0x624   : > { %v3305_v5 = vadd.f32 %v1474_v59, %v1199_v15 }
 0x625   : > { %v1472_v46 = vpop.permute.xlu1 %1471 }
 0x626   : > { %1506 = vrot.lane.b32.xlu1 %v3305_v5, %s2553_s27  ;;  %1488 = vrot.lane.b32.xlu0 %v3305_v5, %s2552_s24  ;;  %v1475_v12 = vmul.f32 %v1472_v46, %v3213_v56  ;;  %v2588_v56 = vmov 36   ;;  %v1486_v35 = vmul.f32 %v3287_v25, %v3305_v5 }
 0x628   : > { %v3317_v51 = vadd.f32 %v1475_v12, %v1200_v53 }
 0x62a   : > { %1524 = vrot.lane.b32.xlu1 %v3305_v5, %s2554_s28  ;;  %1614 = vrot.lane.b32.xlu0 %v3305_v5, %s2559_s17  ;;  %v1550_v43 = vpop.permute.xlu1 %1549 }
 0x62e   : > { %1542 = vrot.lane.b32.xlu1 %v3305_v5, %s2555_s29  ;;  %1508 = vrot.lane.b32.xlu0 %v3317_v51, %s2553_s27 }
 0x62f   : > { %v3368_v49 = vpop.permute.xlu1 %1571 }
 0x632   : > { %1560 = vrot.lane.b32.xlu1 %v3305_v5, %s2556_s30  ;;  %1544 = vrot.lane.b32.xlu0 %v3317_v51, %s2555_s29 }
 0x634   : > { %v1586_v34 = vpop.permute.xlu1 %1585 }
 0x636   : > { %1578 = vrot.lane.b32.xlu1 %v3305_v5, %s2558_s15  ;;  %1580 = vrot.lane.b32.xlu0 %v3317_v51, %s2558_s15 }
 0x639   : > { %v3374_v6 = vpop.permute.xlu1 %1607 }
 0x63a   : > { %1596 = vrot.lane.b32.xlu1 %v3305_v5, %s3606_s20  ;;  %1637 = vperm.xlu0 %2446, %v3336_v23  }
 0x63e   : > { %1490 = vrot.lane.b32.xlu1 %v3317_v51, %s2552_s24  ;;  %2448 = vset.pattern.permute.xlu0 %v2588_v56  ;;  %v1622_v61 = vpop.permute.xlu1 %1621 }
 0x63f   : > { %1661 = vperm.xlu0 %2448, %v3223_v0  }
 0x642   : > { %1526 = vrot.lane.b32.xlu1 %v3317_v51, %s2554_s28 }
 0x643   : > { %2451 = vset.pattern.permute.xlu0 %v2589_v55  ;;  %v3379_v29 = vpop.permute.xlu1 %838 }
 0x644   : > { %1683 = vperm.xlu0 %2451, %v3229_v38  }
 0x646   : > { %1562 = vrot.lane.b32.xlu1 %v3317_v51, %s2556_s30 }
 0x648   : > { %2452 = vset.pattern.permute.xlu0 %v2590_v37  ;;  %v1634_v9 = vpop.permute.xlu1 %1633 }
 0x649   : > { %1697 = vperm.xlu0 %2452, %v3223_v0  }
 0x64a   : > { %1645 = vperm.xlu1 %2447, %v3223_v0  }
 0x64d   : > { %2455 = vset.pattern.permute.xlu0 %v2591_v30 }
 0x64e   : > { %1649 = vperm.xlu1 %2447, %v3229_v38   ;;  %1719 = vperm.xlu0 %2455, %v3229_v38  }
 0x652   : > { %1598 = vrot.lane.b32.xlu1 %v3317_v51, %s3606_s20  ;;  %2456 = vset.pattern.permute.xlu0 %v2592_v14 }
 0x653   : > { %2449 = vset.pattern.permute.xlu1 %v2588_v56  ;;  %1733 = vperm.xlu0 %2456, %v3223_v0  }
 0x656   : > { %1616 = vrot.lane.b32.xlu1 %v3317_v51, %s2559_s17 }
 0x657   : > { %2459 = vset.pattern.permute.xlu0 %v2593_v39 }
 0x658   : > { %1755 = vperm.xlu0 %2459, %v3229_v38  }
 0x65a   : > { %1665 = vperm.xlu1 %2449, %v3229_v38  }
 0x65c   : > { %2460 = vset.pattern.permute.xlu0 %v2594_v7 }
 0x65d   : > { %1769 = vperm.xlu0 %2460, %v3223_v0  }
 0x65e   : > { %2450 = vset.pattern.permute.xlu1 %v2589_v55 }
 0x65f   : > { %1679 = vperm.xlu1 %2450, %v3223_v0  }
 0x661   : > { %2463 = vset.pattern.permute.xlu0 %v2595_v2 }
 0x662   : > { %1791 = vperm.xlu0 %2463, %v3229_v38  }
 0x663   : > { %2453 = vset.pattern.permute.xlu1 %v2590_v37 }
 0x664   : > { %1701 = vperm.xlu1 %2453, %v3229_v38  }
 0x666   : > { %2464 = vset.pattern.permute.xlu0 %v3634_v36 }
 0x668   : > { %2454 = vset.pattern.permute.xlu1 %v2591_v30 }
 0x669   : > { %1715 = vperm.xlu1 %2454, %v3223_v0  }
 0x66d   : > { %2457 = vset.pattern.permute.xlu1 %v2592_v14 }
 0x66e   : > { %1737 = vperm.xlu1 %2457, %v3229_v38  }
 0x672   : > { %2458 = vset.pattern.permute.xlu1 %v2593_v39 }
 0x673   : > { %1751 = vperm.xlu1 %2458, %v3223_v0  }
 0x677   : > { %2461 = vset.pattern.permute.xlu1 %v2594_v7 }
 0x678   : > { %1773 = vperm.xlu1 %2461, %v3229_v38  }
 0x67c   : > { %2462 = vset.pattern.permute.xlu1 %v2595_v2 }
 0x67d   : > { %1787 = vperm.xlu1 %2462, %v3223_v0  }
 0x681   : > { %2465 = vset.pattern.permute.xlu1 %v3634_v36 }
 0x698   : > { %v1489_v38 = vpop.permute.xlu0 %1488  ;;  %v1507_v20 = vpop.permute.xlu1 %1506 }
 0x699   : > { %v1492_v24 = vmul.f32 %v1489_v38, %v2825_v54  ;;  %v1510_v57 = vmul.f32 %v1507_v20, %v2835_v62 }
 0x69b   : > { %v1502_v0 = vmul.f32 %v3291_v1, %v1492_v24  ;;  %v1520_v11 = vmul.f32 %v3295_v63, %v1510_v57  ;;  %v3395_v63 = vld [vmem:[%s3572_s1 + $0x8] ss:$0 sm:$0xff] }
 0x69c   : > { %v1525_v3 = vpop.permute.xlu1 %1524  ;;  %v1615_v1 = vpop.permute.xlu0 %1614 }
 0x69d   : > { %v1504_v58 = vadd.f32 %v1502_v0, %v1486_v35  ;;  %v1528_v28 = vmul.f32 %v1525_v3, %v2831_v60  ;;  %v1487_v3 = vmul.f32 %v3289_v21, %v3317_v51  ;;  %v916_v35 = vadd.f32 %v3283_v45, %v834_v42 }
 0x69f   : > { %v1522_v15 = vadd.f32 %v1520_v11, %v1504_v58  ;;  %v1538_v59 = vmul.f32 %v3301_v10, %v1528_v28  ;;  %v1618_v10 = vmul.f32 %v3395_v63, %v1615_v1 }
 0x6a0   : > { %v1543_v18 = vpop.permute.xlu1 %1542  ;;  %v1509_v37 = vpop.permute.xlu0 %1508 }
 0x6a1   : > { %v1546_v31 = vmul.f32 %v1543_v18, %v2847_v26  ;;  %v1540_v25 = vadd.f32 %v1538_v59, %v1522_v15  ;;  %v1511_v36 = vmul.f32 %v1509_v37, %v2835_v62 }
 0x6a3   : > { %v1556_v47 = vmul.f32 %v1550_v43, %v1546_v31  ;;  %v1521_v57 = vmul.f32 %v3297_v27, %v1511_v36  ;;  %v1824_v36 = vld [vmem:[%s3582_s11 + $0x28] sm:$0xff] }
 0x6a4   : > { %v1561_v16 = vpop.permute.xlu1 %1560  ;;  %v1545_v20 = vpop.permute.xlu0 %1544 }
 0x6a5   : > { %v1564_v46 = vmul.f32 %v1561_v16, %v2842_v19  ;;  %v1558_v56 = vadd.f32 %v1556_v47, %v1540_v25 }
 0x6a7   : > { %v1574_v5 = vmul.f32 %v1568_v44, %v1564_v46  ;;  %v1628_v44 = vmul.f32 %v1622_v61, %v1618_v10  ;;  %v919_v10 = vadd.f32 %v3285_v13, %v3379_v29  ;;  %v2478_v13 = vld [vmem:[%s3581_s10] sm:$0xff]   ;;  %v1826_v29 = vld [vmem:[%s3582_s11 + $0x38] sm:$0xff] }
 0x6a8   : > { %v1579_v12 = vpop.permute.xlu1 %1578  ;;  %2283 = vmatprep.mubr.msk.bf16.mxu1 %vm475_vm1, %v2478_v13 }
 0x6a9   : > { %v1582_v53 = vmul.f32 %v1579_v12, %v2858_v8  ;;  %v1576_v14 = vadd.f32 %v1574_v5, %v1558_v56 }
 0x6ab   : > { %v1592_v55 = vmul.f32 %v1586_v34, %v1582_v53 }
 0x6ac   : > { %v1597_v30 = vpop.permute.xlu1 %1596 }
 0x6ad   : > { %v1600_v39 = vmul.f32 %v1597_v30, %v2852_v22  ;;  %v1594_v7 = vadd.f32 %v1592_v55, %v1576_v14 }
 0x6af   : > { %v1610_v2 = vmul.f32 %v1604_v4, %v1600_v39  ;;  %v1547_v4 = vmul.f32 %v1545_v20, %v2847_v26  ;;  %v1820_v20 = vld [vmem:[%s3582_s11 + $0x8] sm:$0xff] }
 0x6b0   : > { %v1491_v43 = vpop.permute.xlu1 %1490 }
 0x6b1   : > { %v1612_v38 = vadd.f32 %v1610_v2, %v1594_v7  ;;  %v1493_v34 = vmul.f32 %v1491_v43, %v2825_v54  ;;  %v1557_v15 = vmul.f32 %v3366_v48, %v1547_v4  ;;  %v1823_v7 = vld [vmem:[%s3582_s11 + $0x20] sm:$0xff] }
 0x6b2   : > { %v1819_v43 = vld [vmem:[%s3582_s11] sm:$0xff] }
 0x6b3   : > { %v1630_v24 = vadd.f32 %v1628_v44, %v1612_v38  ;;  %v1503_v0 = vmul.f32 %v3293_v50, %v1493_v34  ;;  %v1822_v38 = vld [vmem:[%s3582_s11 + $0x18] sm:$0xff]  ;;  %v3635_v34 = vmov 9  }
 0x6b4   : > { %v1527_v18 = vpop.permute.xlu1 %1526 }
 0x6b5   : > { %v1640_v58 = vadd.f32 %v1634_v9, %v1630_v24  ;;  %v1505_v28 = vadd.f32 %v1503_v0, %v1487_v3  ;;  %v1529_v61 = vmul.f32 %v1527_v18, %v2831_v60  ;;  %v1581_v9 = vpop.permute.xlu0 %1580 }
 0x6b6   : > { %v1583_v59 = vmul.f32 %v1581_v9, %v2858_v8 }
 0x6b7   : > { %v1642_v11 = vmul.f32 %v1640_v58, %v916_v35  ;;  %v1523_v31 = vadd.f32 %v1521_v57, %v1505_v28  ;;  %v1539_v16 = vmul.f32 %v3299_v33, %v1529_v61 }
 0x6b8   : > { %v1563_v45 = vpop.permute.xlu1 %1562  ;;  %v1593_v12 = vmul.f32 %v3372_v17, %v1583_v59 }
 0x6b9   : > { %v1541_v21 = vadd.f32 %v1539_v16, %v1523_v31  ;;  %1654 = vrot.lane.b32.xlu1 %v1642_v11, %s2552_s24  ;;  %v1565_v51 = vmul.f32 %v1563_v45, %v2842_v19  ;;  %v1638_v37 = vpop.permute.xlu0 %1637 }
 0x6bb   : > { %v1559_v50 = vadd.f32 %v1557_v15, %v1541_v21  ;;  %v1575_v48 = vmul.f32 %v3368_v49, %v1565_v51 }
 0x6bd   : > { %1672 = vrot.lane.b32.xlu1 %v1642_v11, %s2553_s27  ;;  %v1577_v1 = vadd.f32 %v1575_v48, %v1559_v50  ;;  %v1662_v35 = vpop.permute.xlu0 %1661 }
 0x6bf   : > { %v1595_v56 = vadd.f32 %v1593_v12, %v1577_v1 }
 0x6c1   : > { %1690 = vrot.lane.b32.xlu1 %v1642_v11, %s2554_s28  ;;  %v1684_v18 = vpop.permute.xlu0 %1683 }
 0x6c5   : > { %v1646_v27 = vpop.permute.xlu1 %1645  ;;  %1708 = vrot.lane.b32.xlu1 %v1642_v11, %s2555_s29  ;;  %v1698_v58 = vpop.permute.xlu0 %1697 }
 0x6c6   : > { %v3415_v42 = vmul.f32 %v1646_v27, %v1642_v11 }
 0x6c9   : > { %v1650_v33 = vpop.permute.xlu1 %1649  ;;  %1726 = vrot.lane.b32.xlu1 %v1642_v11, %s2556_s30 }
 0x6cd   : > { %v1599_v46 = vpop.permute.xlu1 %1598  ;;  %1744 = vrot.lane.b32.xlu1 %v1642_v11, %s2558_s15 }
 0x6ce   : > { %v1601_v47 = vmul.f32 %v1599_v46, %v2852_v22 }
 0x6d0   : > { %v1611_v25 = vmul.f32 %v3374_v6, %v1601_v47 }
 0x6d1   : > { %v1617_v5 = vpop.permute.xlu1 %1616  ;;  %1762 = vrot.lane.b32.xlu1 %v1642_v11, %s3606_s20 }
 0x6d2   : > { %v1619_v53 = vmul.f32 %v3395_v63, %v1617_v5  ;;  %v1613_v55 = vadd.f32 %v1611_v25, %v1595_v56 }
 0x6d4   : > { %v1629_v49 = vmul.f32 %v3377_v52, %v1619_v53  ;;  %v1825_v52 = vld [vmem:[%s3582_s11 + $0x30] sm:$0xff] }
 0x6d5   : > { %v1666_v6 = vpop.permute.xlu1 %1665 }
 0x6d6   : > { %v1631_v30 = vadd.f32 %v1629_v49, %v1613_v55 }
 0x6d8   : > { %v1641_v14 = vadd.f32 %v1638_v37, %v1631_v30 }
 0x6da   : > { %v1643_v39 = vmul.f32 %v1641_v14, %v919_v10  ;;  %v1680_v2 = vpop.permute.xlu1 %1679 }
 0x6dc   : > { %1674 = vrot.lane.b32.xlu0 %v1643_v39, %s2553_s27  ;;  %1656 = vrot.lane.b32.xlu1 %v1643_v39, %s2552_s24  ;;  %v3431_v17 = vmul.f32 %v1650_v33, %v1643_v39 }
 0x6df   : > { %v1702_v44 = vpop.permute.xlu1 %1701 }
 0x6e0   : > { %1710 = vrot.lane.b32.xlu0 %v1643_v39, %s2555_s29  ;;  %1692 = vrot.lane.b32.xlu1 %v1643_v39, %s2554_s28 }
 0x6e4   : > { %1746 = vrot.lane.b32.xlu0 %v1643_v39, %s2558_s15  ;;  %1728 = vrot.lane.b32.xlu1 %v1643_v39, %s2556_s30  ;;  %v1716_v24 = vpop.permute.xlu1 %1715 }
 0x6e8   : > { %1780 = vrot.lane.b32.xlu0 %v1642_v11, %s2559_s17  ;;  %1764 = vrot.lane.b32.xlu1 %v1643_v39, %s3606_s20  ;;  %v1720_v11 = vpop.permute.xlu0 %1719 }
 0x6e9   : > { %v1738_v3 = vpop.permute.xlu1 %1737 }
 0x6ec   : > { %1799 = vperm.xlu0 %2464, %v3280_v41   ;;  %1782 = vrot.lane.b32.xlu1 %v1643_v39, %s2559_s17 }
 0x6ee   : > { %v1752_v0 = vpop.permute.xlu1 %1751 }
 0x6f0   : > { %1803 = vperm.xlu1 %2465, %v3336_v23   ;;  %2467 = vset.pattern.permute.xlu0 %v3632_v32 }
 0x6f1   : > { %1864 = vperm.xlu0 %2467, %v1826_v29  }
 0x6f3   : > { %v3476_v57 = vpop.permute.xlu1 %1773 }
 0x6f4   : > { %2466 = vset.pattern.permute.xlu1 %v3632_v32  ;;  %v1821_v32 = vld [vmem:[%s3582_s11 + $0x10] sm:$0xff] }
 0x6f5   : > { %1859 = vperm.xlu1 %2466, %v1825_v52   ;;  %1839 = vperm.xlu0 %2467, %v1821_v32  }
 0x6f8   : > { %v3478_v4 = vpop.permute.xlu1 %1787 }
 0x6f9   : > { %1849 = vperm.xlu1 %2466, %v1823_v7   ;;  %1829 = vperm.xlu0 %2467, %v1819_v43  }
 0x6fd   : > { %1854 = vperm.xlu1 %2466, %v1824_v36   ;;  %2468 = vset.pattern.permute.xlu0 %v3635_v34 }
 0x6fe   : > { %2043 = vperm.xlu0 %2468, %v3280_v41   ;;  %v1734_v41 = vpop.permute.xlu0 %1733 }
 0x701   : > { %1844 = vperm.xlu1 %2466, %v1822_v38  }
 0x702   : > { %v1756_v15 = vpop.permute.xlu0 %1755 }
 0x705   : > { %1834 = vperm.xlu1 %2466, %v1820_v20  }
 0x706   : > { %v1770_v50 = vpop.permute.xlu0 %1769 }
 0x709   : > { %2469 = vset.pattern.permute.xlu1 %v3635_v34 }
 0x70a   : > { %2047 = vperm.xlu1 %2469, %v3336_v23   ;;  %v1792_v27 = vpop.permute.xlu0 %1791 }
 0x72b   : > { %v1655_v28 = vpop.permute.xlu1 %1654 }
 0x72c   : > { %v1658_v59 = vmul.f32 %v1655_v28, %v2825_v54 }
 0x72e   : > { %v1668_v56 = vmul.f32 %v1662_v35, %v1658_v59  ;;  %v3636_v59 = vld [vmem:[#allocation4_spill] sm:$0xff] }
 0x72f   : > { %v1673_v61 = vpop.permute.xlu1 %1672 }
 0x730   : > { %v1676_v12 = vmul.f32 %v1673_v61, %v2835_v62 }
 0x732   : > { %v1686_v14 = vmul.f32 %v1680_v2, %v1676_v12 }
 0x733   : > { %v1691_v31 = vpop.permute.xlu1 %1690 }
 0x734   : > { %v1694_v49 = vmul.f32 %v1691_v31, %v2831_v60 }
 0x737   : > { %v1709_v16 = vpop.permute.xlu1 %1708 }
 0x73b   : > { %v1727_v21 = vpop.permute.xlu1 %1726 }
 0x73c   : > { %v1730_v52 = vmul.f32 %v1727_v21, %v2842_v19 }
 0x73f   : > { %v1745_v45 = vpop.permute.xlu1 %1744 }
 0x740   : > { %v1748_v36 = vmul.f32 %v1745_v45, %v2858_v8 }
 0x743   : > { %v1763_v23 = vpop.permute.xlu1 %1762 }
 0x744   : > { %v1766_v34 = vmul.f32 %v1763_v23, %v2852_v22 }
 0x746   : > { %v1776_v61 = vmul.f32 %v1770_v50, %v1766_v34 }
 0x74e   : > { %v1675_v51 = vpop.permute.xlu0 %1674  ;;  %v1657_v9 = vpop.permute.xlu1 %1656 }
 0x74f   : > { %v1677_v33 = vmul.f32 %v1675_v51, %v2835_v62  ;;  %v1659_v48 = vmul.f32 %v1657_v9, %v2825_v54  ;;  %v1712_v54 = vmul.f32 %v1709_v16, %v2847_v26 }
 0x751   : > { %v1669_v46 = vmul.f32 %v1666_v6, %v1659_v48  ;;  %v1687_v25 = vmul.f32 %v1684_v18, %v1677_v33  ;;  %v1670_v6 = vadd.f32 %v1668_v56, %v3415_v42  ;;  %v1722_v32 = vmul.f32 %v1716_v24, %v1712_v54 }
 0x752   : > { %v1711_v1 = vpop.permute.xlu0 %1710  ;;  %v1693_v47 = vpop.permute.xlu1 %1692  ;;  %v1758_v18 = vmul.f32 %v1752_v0, %v1748_v36 }
 0x753   : > { %v1671_v5 = vadd.f32 %v1669_v46, %v3431_v17  ;;  %v1695_v53 = vmul.f32 %v1693_v47, %v2831_v60  ;;  %v1713_v30 = vmul.f32 %v1711_v1, %v2847_v26  ;;  %v1704_v17 = vmul.f32 %v1698_v58, %v1694_v49  ;;  %v2481_v46 = vld [vmem:[%s3581_s10 + $0x18] sm:$0xff]  }
 0x754   : > { %v1688_v60 = vadd.f32 %v1686_v14, %v1670_v6  ;;  %v1740_v26 = vmul.f32 %v1734_v41, %v1730_v52 }
 0x755   : > { %v1689_v55 = vadd.f32 %v1687_v25, %v1671_v5  ;;  %v1705_v37 = vmul.f32 %v1702_v44, %v1695_v53  ;;  %v1723_v29 = vmul.f32 %v1720_v11, %v1713_v30 }
 0x756   : > { %v1729_v10 = vpop.permute.xlu1 %1728  ;;  %v1747_v39 = vpop.permute.xlu0 %1746  ;;  %v1706_v2 = vadd.f32 %v1704_v17, %v1688_v60 }
 0x757   : > { %v1707_v13 = vadd.f32 %v1705_v37, %v1689_v55  ;;  %v1731_v62 = vmul.f32 %v1729_v10, %v2842_v19  ;;  %v1749_v20 = vmul.f32 %v1747_v39, %v2858_v8 }
 0x758   : > { %v1724_v35 = vadd.f32 %v1722_v32, %v1706_v2 }
 0x759   : > { %v1725_v43 = vadd.f32 %v1723_v29, %v1707_v13  ;;  %v1741_v44 = vmul.f32 %v1738_v3, %v1731_v62  ;;  %v1759_v11 = vmul.f32 %v1756_v15, %v1749_v20  ;;  %v3637_v15 = vld [vmem:[#allocation5_spill] sm:$0xff] }
 0x75a   : > { %v1765_v7 = vpop.permute.xlu1 %1764  ;;  %v1781_v38 = vpop.permute.xlu0 %1780  ;;  %v1742_v24 = vadd.f32 %v1740_v26, %v1724_v35 }
 0x75b   : > { %v1743_v58 = vadd.f32 %v1741_v44, %v1725_v43  ;;  %v1784_v19 = vmul.f32 %v3395_v63, %v1781_v38  ;;  %v1767_v28 = vmul.f32 %v1765_v7, %v2852_v22 }
 0x75c   : > { %v1760_v31 = vadd.f32 %v1758_v18, %v1742_v24 }
 0x75d   : > { %v1794_v41 = vmul.f32 %v3478_v4, %v1784_v19  ;;  %v1777_v16 = vmul.f32 %v3476_v57, %v1767_v28  ;;  %v1761_v21 = vadd.f32 %v1759_v11, %v1743_v58  ;;  %v2479_v57 = vld [vmem:[%s3581_s10 + $0x8] sm:$0xff]  }
 0x75e   : > { %v1783_v42 = vpop.permute.xlu1 %1782  ;;  %v1778_v8 = vadd.f32 %v1776_v61, %v1760_v31 }
 0x75f   : > { %v1785_v3 = vmul.f32 %v3395_v63, %v1783_v42  ;;  %v1779_v51 = vadd.f32 %v1777_v16, %v1761_v21 }
 0x760   : > { %v1796_v0 = vadd.f32 %v1794_v41, %v1778_v8 }
 0x761   : > { %v1795_v45 = vmul.f32 %v1792_v27, %v1785_v3  ;;  %v2480_v27 = vld [vmem:[%s3581_s10 + $0x10] sm:$0xff]  }
 0x763   : > { %v1797_v33 = vadd.f32 %v1795_v45, %v1779_v51 }
 0x767   : > { %v1800_v23 = vpop.permute.xlu0 %1799 }
 0x768   : > { %v1806_v9 = vadd.f32 %v1800_v23, %v1796_v0 }
 0x76a   : > { %v3501_v50 = vadd.f32 %v1806_v9, %v3636_v59 }
 0x76b   : > { %v1804_v48 = vpop.permute.xlu1 %1803 }
 0x76c   : > { %v1807_v22 = vadd.f32 %v1804_v48, %v1797_v33  ;;  %v1865_v25 = vpop.permute.xlu0 %1864 }
 0x76e   : > { %v3504_v63 = vadd.f32 %v1807_v22, %v3637_v15 }
 0x770   : > { %v1818_v4 = vpack.c.bf16 %v3504_v63, %v3501_v50  ;;  %v1860_v1 = vpop.permute.xlu1 %1859  ;;  %v1840_v56 = vpop.permute.xlu0 %1839 }
 0x772   : > { %2281 = vmatprep.subr.bf16.mxu1 %v1818_v4 }
 0x773   : > { %2282 = vmatpush3.bf16.msra.mxu1 %v1818_v4 }
 0x774   : > { %v1850_v47 = vpop.permute.xlu1 %1849  ;;  %v1830_v54 = vpop.permute.xlu0 %1829 }
 0x776   : > { %2284 = vmatmul.mubr.msk.bf16.vlgmr.msra.gmra.mxu1 %vm475_vm1, %v2479_v57 }
 0x777   : > { %2287 = vmatprep.mubr.msk.bf16.mxu1 %vm475_vm1, %v2480_v27 }
 0x778   : > { %v1855_v12 = vpop.permute.xlu1 %1854 }
 0x77c   : > { %v1845_v5 = vpop.permute.xlu1 %1844 }
 0x77e   : > { %2288 = vmatmul.mubr.msk.bf16.gmra.mxu1 %vm475_vm1, %v2481_v46 }
 0x780   : > { %v1835_v10 = vpop.permute.xlu1 %1834 }
 0x836   : > { %v2285_v53 = vpop.f32.mrf.mxu1 }
 0x837   : > { %v3520_v37 = vadd.f32 %v2285_v53, %v1840_v56 }
 0x838   : > { %v1933_v49 = vpop.f32.mrf.mxu1 }
 0x839   : > { %v1974_v6 = vmul.f32 0.044715, %v3520_v37  ;;  %v3528_v17 = vadd.f32 %v1933_v49, %v1830_v54 }
 0x83a   : > { %v2286_v55 = vpop.f32.mrf.mxu1 }
 0x83b   : > { %v3522_v30 = vadd.f32 %v2286_v55, %v1845_v5  ;;  %v1982_v44 = vmul.f32 %v1974_v6, %v3520_v37  ;;  %v1972_v2 = vmul.f32 0.044715, %v3528_v17 }
 0x83c   : > { %v1936_v14 = vpop.f32.mrf.mxu1 }
 0x83d   : > { %v1975_v39 = vmul.f32 0.044715, %v3522_v30  ;;  %v3525_v13 = vadd.f32 %v1936_v14, %v1835_v10  ;;  %v1990_v24 = vmul.f32 %v1982_v44, %v3520_v37  ;;  %v1980_v11 = vmul.f32 %v1972_v2, %v3528_v17 }
 0x83e   : > { %v2289_v62 = vpop.f32.mrf.mxu1 }
 0x83f   : > { %v1958_v52 = vadd.f32 %v2289_v62, %v1860_v1  ;;  %v1983_v7 = vmul.f32 %v1975_v39, %v3522_v30  ;;  %v1973_v60 = vmul.f32 0.044715, %v3525_v13  ;;  %v1998_v51 = vadd.f32 %v1990_v24, %v3520_v37 }
 0x840   : > { %v1949_v29 = vpop.f32.mrf.mxu1  ;;  %v1988_v33 = vmul.f32 %v1980_v11, %v3528_v17 }
 0x841   : > { %v1978_v32 = vmul.f32 0.044715, %v1958_v52  ;;  %v3532_v36 = vadd.f32 %v1949_v29, %v1850_v47  ;;  %v1991_v35 = vmul.f32 %v1983_v7, %v3522_v30  ;;  %v1981_v18 = vmul.f32 %v1973_v60, %v3525_v13 }
 0x842   : > { %v2290_v43 = vpop.f32.mrf.mxu1  ;;  %v2006_v46 = vmul.f32 0.7978846, %v1998_v51  ;;  %v1996_v1 = vadd.f32 %v1988_v33, %v3528_v17  ;;  %v1970_v55 = vmul.f32 0.5, %v1958_v52 }
 0x843   : > { %v1986_v38 = vmul.f32 %v1978_v32, %v1958_v52  ;;  %v1976_v26 = vmul.f32 0.044715, %v3532_v36  ;;  %v1961_v34 = vadd.f32 %v2290_v43, %v1865_v25  ;;  %v1999_v16 = vadd.f32 %v1991_v35, %v3522_v30 }
 0x844   : > { %v1952_v20 = vpop.f32.mrf.mxu1  ;;  %v1989_v8 = vmul.f32 %v1981_v18, %v3525_v13  ;;  %v1968_v43 = vmul.f32 0.5, %v3532_v36  ;;  %v1966_v18 = vmul.f32 0.5, %v3520_v37  ;;  %v2482_v37 = vld [vmem:[%s3583_s12] sm:$0xff]  }
 0x845   : > { %v1953_v42 = vadd.f32 %v1952_v20, %v1855_v12  ;;  %v1994_v58 = vmul.f32 %v1986_v38, %v1958_v52  ;;  %v1984_v19 = vmul.f32 %v1976_v26, %v3532_v36  ;;  %v1979_v28 = vmul.f32 0.044715, %v1961_v34 }
 0x846   : > { %v2007_v15 = vmul.f32 0.7978846, %v1999_v16  ;;  %v1997_v4 = vadd.f32 %v1989_v8, %v3525_v13  ;;  %v2004_v12 = vmul.f32 0.7978846, %v1996_v1  ;;  %v1971_v10 = vmul.f32 0.5, %v1961_v34  ;;  %v2048_v16 = vpop.permute.xlu1 %2047 }
 0x847   : > { %v1977_v61 = vmul.f32 0.044715, %v1953_v42  ;;  %v2002_v3 = vadd.f32 %v1994_v58, %v1958_v52  ;;  %v1992_v31 = vmul.f32 %v1984_v19, %v3532_v36  ;;  %v1987_v41 = vmul.f32 %v1979_v28, %v1961_v34 }
 0x848   : > { %v2005_v47 = vmul.f32 0.7978846, %v1997_v4  ;;  %v1969_v29 = vmul.f32 0.5, %v1953_v42  ;;  %v1967_v20 = vmul.f32 0.5, %v3522_v30 }
 0x849   : > { %v1985_v21 = vmul.f32 %v1977_v61, %v1953_v42  ;;  %v2010_v45 = vmul.f32 0.7978846, %v2002_v3  ;;  %v2000_v23 = vadd.f32 %v1992_v31, %v3532_v36  ;;  %v1995_v0 = vmul.f32 %v1987_v41, %v1961_v34 }
 0x84a   : > { %v1965_v36 = vmul.f32 0.5, %v3525_v13  ;;  %v1964_v61 = vmul.f32 0.5, %v3528_v17  ;;  %v2044_v13 = vpop.permute.xlu0 %2043 }
 0x84b   : > { %v1993_v9 = vmul.f32 %v1985_v21, %v1953_v42  ;;  %2512 = vtanh.f32 %v2010_v45  ;;  %v2008_v48 = vmul.f32 0.7978846, %v2000_v23  ;;  %v2003_v22 = vadd.f32 %v1995_v0, %v1961_v34 }
 0x84d   : > { %v2001_v59 = vadd.f32 %v1993_v9, %v1953_v42  ;;  %v2011_v57 = vmul.f32 0.7978846, %v2003_v22  ;;  %2514 = vtanh.f32 %v2008_v48 }
 0x84f   : > { %v2009_v27 = vmul.f32 0.7978846, %v2001_v59  ;;  %2516 = vtanh.f32 %v2011_v57 }
 0x851   : > { %2518 = vtanh.f32 %v2009_v27 }
 0x852   : > { %2520 = vtanh.f32 %v2007_v15 }
 0x853   : > { %2522 = vtanh.f32 %v2006_v46 }
 0x854   : > { %2524 = vtanh.f32 %v2005_v47 }
 0x855   : > { %2526 = vtanh.f32 %v2004_v12 }
 0x858   : > { %v2513_v25 = vpop.eup %2512 }
 0x859   : > { %v2026_v53 = vadd.f32 1.0, %v2513_v25 }
 0x85a   : > { %v2515_v5 = vpop.eup %2514 }
 0x85b   : > { %v2034_v62 = vmul.f32 %v2026_v53, %v1970_v55  ;;  %v2024_v7 = vadd.f32 1.0, %v2515_v5 }
 0x85c   : > { %v2517_v56 = vpop.eup %2516 }
 0x85d   : > { %v2027_v14 = vadd.f32 1.0, %v2517_v56  ;;  %v2032_v26 = vmul.f32 %v2024_v7, %v1968_v43 }
 0x85e   : > { %v2519_v49 = vpop.eup %2518 }
 0x85f   : > { %v2521_v54 = vpop.eup %2520  ;;  %v2025_v39 = vadd.f32 1.0, %v2519_v49  ;;  %v2035_v6 = vmul.f32 %v2027_v14, %v1971_v10 }
 0x860   : > { %v2523_v60 = vpop.eup %2522  ;;  %v2023_v2 = vadd.f32 1.0, %v2521_v54 }
 0x861   : > { %v2041_v32 = vpack.c.bf16 %v2035_v6, %v2034_v62  ;;  %v2033_v44 = vmul.f32 %v2025_v39, %v1969_v29  ;;  %v2525_v38 = vpop.eup %2524  ;;  %v2022_v52 = vadd.f32 1.0, %v2523_v60 }
 0x862   : > { %v2527_v34 = vpop.eup %2526  ;;  %v2031_v42 = vmul.f32 %v2023_v2, %v1967_v20  ;;  %v2021_v58 = vadd.f32 1.0, %v2525_v38 }
 0x863   : > { %2292 = vmatpush3.bf16.msra.mxu0 %v2041_v32  ;;  %v2040_v35 = vpack.c.bf16 %v2033_v44, %v2032_v26  ;;  %v2030_v19 = vmul.f32 %v2022_v52, %v1966_v18  ;;  %v2020_v28 = vadd.f32 1.0, %v2527_v34 }
 0x864   : > { %2293 = vmatprep.subr.bf16.mxu0 %v3631_v40  ;;  %v2029_v30 = vmul.f32 %v2021_v58, %v1965_v36 }
 0x865   : > { %v2039_v24 = vpack.c.bf16 %v2031_v42, %v2030_v19  ;;  %v2028_v11 = vmul.f32 %v2020_v28, %v1964_v61 }
 0x867   : > { %2294 = vmatpush3.bf16.msra.mxu0 %v2040_v35  ;;  %v2038_v3 = vpack.c.bf16 %v2029_v30, %v2028_v11 }
 0x868   : > { %2295 = vmatprep.subr.bf16.mxu0 %v3631_v40 }
 0x86b   : > { %2296 = vmatpush3.bf16.msra.mxu0 %v2039_v24 }
 0x86c   : > { %2297 = vmatprep.subr.bf16.mxu0 %v3631_v40 }
 0x86f   : > { %2298 = vmatpush3.bf16.msra.mxu0 %v2038_v3 }
 0x872   : > { %2300 = vmatmul.mubr.msk.bf16.vlgmr.msra.gmra.mxu0 %vm2055_vm2, %v2482_v37 }
 0x932   : > { %v2093_v31 = vpop.f32.mrf.mxu0 }
 0x933   : > { %v2094_v21 = vadd.f32 %v2093_v31, %v2044_v13 }
 0x934   : > { %v2301_v41 = vpop.f32.mrf.mxu0 }
 0x935   : > { %v2100_v23 = vadd.f32 %v2094_v21, %v3501_v50 }
 0x936   : > { %v2096_v17 = vpop.f32.mrf.mxu0 }
 0x937   : > { %v2097_v8 = vadd.f32 %v2096_v17, %v2048_v16 }
 0x938   : > { %v2302_v45 = vpop.f32.mrf.mxu0 }
 0x939   : > { %v2101_v40 = vadd.f32 %v2097_v8, %v3504_v63 }
 0x93b   : > { %v2219_v0 = vpack.c.bf16 %v2101_v40, %v2100_v23 }
 0x93d   : > { %2220 = vst [vmem:[%s440_s18] sm:$0xff] %v2219_v0  }
 0x93e PF: > { %s23_s25 = sadd.s32 1, %s2539_s25  }
 0x93f   : > { %p20_p4 = scmp.ge.s32.totalorder %s23_s25, 4  }
 0x941   :  { %22 = sbr.rel (!%p20_p4) target bundleno = 1 (0x1), region = 102 }

// kernel: _lambda_.3
= control target key start
LH: loop header
LB: loop body
LE: loop exit
PB: predicated region body
PF: predicated region fallthrough
CT: control target
= control target key end

     0   :  { %s4245_s25 = smov 0   ;;  %s6411_s0 = inlined_call_operand.vmem [shape: bf16[2,32,128], index: 0, kind: input, shape index: {}]   ;;  %s6412_s1 = inlined_call_operand.vmem [shape: f32[9,128], index: 1, kind: input, shape index: {}]   ;;  %s6413_s2 = inlined_call_operand.vmem [shape: f32[32,45], index: 2, kind: input, shape index: {}]   ;;  %s6414_s3 = inlined_call_operand.vmem [shape: f32[32,10], index: 3, kind: input, shape index: {}]   ;;  %s6415_s4 = inlined_call_operand.vmem [shape: bf16[32,32], index: 4, kind: input, shape index: {}]   ;;  %s6416_s5 = inlined_call_operand.vmem [shape: bf16[32,32], index: 5, kind: input, shape index: {}]   ;;  %s6417_s6 = inlined_call_operand.vmem [shape: bf16[96,32], index: 6, kind: input, shape index: {}]   ;;  %s6418_s7 = inlined_call_operand.vmem [shape: f32[96,1], index: 7, kind: input, shape index: {}]   ;;  %s6419_s8 = inlined_call_operand.vmem [shape: bf16[32,32], index: 8, kind: input, shape index: {}]   ;;  %s6420_s9 = inlined_call_operand.vmem [shape: bf16[32,32], index: 9, kind: input, shape index: {}]   ;;  %s6421_s10 = inlined_call_operand.vmem [shape: bf16[128,32], index: 10, kind: input, shape index: {}]   ;;  %s6422_s11 = inlined_call_operand.vmem [shape: f32[128,1], index: 11, kind: input, shape index: {}]   ;;  %s6423_s12 = inlined_call_operand.vmem [shape: bf16[32,128], index: 12, kind: input, shape index: {}]   ;;  %s6424_s13 = inlined_call_operand.vmem [shape: bf16[2,32,128], index: 13, kind: output, shape index: {}]  }
   0x1 LB: > { %s3539_s26 = sadd.s32 4294967295, %s4120_s25   ;;  %p3543_p0 = scmp.ge.s32.totalorder %s4120_s25, 1  ;;  %s4120_s25 = sphi %s4245_s25, %s23_s25  }
   0x2   : > { %p387_p1 = scmp.lt.s32.totalorder %s4120_s25, 3 }
   0x4   : > { %p388_p2 = pnand %p3543_p0, %p387_p1 }
   0x6   : > { %391 = sbr.rel (%p388_p2) target bundleno = 2586 (0xa1a), region = 72 }
   0xb   : > { %p431_p3 = scmp.lt.s32.totalorder %s3539_s26, 1  ;;  %v3983_v0 = vld [vmem:[%s6415_s4] sm:$0xff]   ;;  %vm506_vm0 = vcmask 261120   ;;  %v4262_v1 = vld [vmem:[%s6413_s2 + $0x10] sm:$0xff]  ;;  %v6436_v3 = vmov 4   ;;  %v6428_v4 = vmov 0  }
   0xc   : > { %3678 = vmatprep.mubr.msk.bf16.mxu0 %vm506_vm0, %v3983_v0  ;;  %v4267_v2 = vld [vmem:[%s6414_s3] sm:$0xff]  ;;  %3824 = vset.pattern.permute.xlu0 %v6436_v3  ;;  %v4289_v6 = vld [vmem:[%s6414_s3 + $0x8] sm:$0xff]  ;;  %v4298_v9 = vld [vmem:[%s6414_s3 + $0x10] sm:$0xff]  ;;  %v4124_v14 = vmov 1   ;;  %v4125_v15 = vmov 2   ;;  %v6438_v16 = vmov 3  }
   0xd   : > { %s6708_s26 = smov (!%p431_p3, %s3539_s26), 1  ;;  %3823 = vset.pattern.permute.xlu1 %v6428_v4  ;;  %574 = vperm.xlu0 %3824, %v4262_v1   ;;  %v4277_v5 = vld [vmem:[%s6413_s2] sm:$0xff]  ;;  %v4303_v10 = vld [vmem:[%s6413_s2 + $0x18] sm:$0xff]  ;;  %v3984_v11 = vld [vmem:[%s6415_s4 + $0x8] sm:$0xff]   ;;  %v6434_v17 = vmov 5   ;;  %v6432_v18 = vmov 6  }
   0xe   : > { %s6425_s16 = sshll.u32 %s6708_s26, 4  ;;  %466 = vperm.xlu1 %3823, %v4267_v2   ;;  %v4313_v12 = vld [vmem:[%s6414_s3 + $0x18] sm:$0xff]  ;;  %v4325_v13 = vld [vmem:[%s6413_s2 + $0x8] sm:$0xff]  ;;  %v6430_v19 = vmov 7   ;;  %v6426_v20 = vmov 8   ;;  %s6444_s20 = smov 123  }
   0xf   : > { %s4284_s21 = scalar_lea.vmem %s6411_s0, %s6425_s16  ;;  %s4132_s22 = smov 5  }
  0x10   : > { %v444_v7 = vld [vmem:[%s4284_s21 + $0x8] sm:$0xff]   ;;  %v442_v8 = vld [vmem:[%s4284_s21] sm:$0xff]   ;;  %s4133_s23 = smov 4   ;;  %s4134_s24 = smov 3  }
  0x11   : > { %564 = vperm.xlu0 %3824, %v4277_v5   ;;  %3674 = vmatprep.subr.bf16.mxu0 %v444_v7  ;;  %s4135_s27 = smov 1   ;;  %s4136_s28 = smov 127  }
  0x12   : > { %471 = vperm.xlu1 %3823, %v4289_v6   ;;  %3675 = vmatpush3.bf16.msra.mxu0 %v444_v7  ;;  %s4137_s29 = smov 125   ;;  %s4138_s30 = smov 124  }
  0x13   : > { %3676 = vmatprep.subr.bf16.mxu0 %v442_v8  ;;  %s6523_s14 = smov 123  }
  0x15   : > { %3828 = vset.pattern.permute.xlu0 %v6428_v4 }
  0x16   : > { %3825 = vset.pattern.permute.xlu1 %v6436_v3  ;;  %476 = vperm.xlu0 %3828, %v4298_v9  }
  0x17   : > { %579 = vperm.xlu1 %3825, %v4303_v10   ;;  %3677 = vmatpush3.bf16.msra.mxu0 %v442_v8 }
  0x1a   : > { %3679 = vmatmul.mubr.msk.bf16.vlgmr.msra.gmra.mxu0 %vm506_vm0, %v3984_v11  ;;  %481 = vperm.xlu0 %3828, %v4313_v12  }
  0x1b   : > { %3826 = vset.pattern.permute.xlu1 %v6428_v4 }
  0x1c   : > { %611 = vperm.xlu1 %3826, %v4262_v1  }
  0x1e   : > { %615 = vperm.xlu0 %3828, %v4303_v10  }
  0x20   : > { %3827 = vset.pattern.permute.xlu1 %v4124_v14 }
  0x21   : > { %651 = vperm.xlu1 %3827, %v4262_v1  }
  0x22   : > { %607 = vperm.xlu0 %3828, %v4325_v13  }
  0x25   : > { %655 = vperm.xlu1 %3827, %v4303_v10  }
  0x26   : > { %3834 = vset.pattern.permute.xlu0 %v4125_v15 }
  0x27   : > { %683 = vperm.xlu0 %3834, %v4277_v5  }
  0x29   : > { %3829 = vset.pattern.permute.xlu1 %v6436_v3 }
  0x2a   : > { %569 = vperm.xlu1 %3829, %v4325_v13  }
  0x2b   : > { %3835 = vset.pattern.permute.xlu0 %v6438_v16 }
  0x2c   : > { %735 = vperm.xlu0 %3835, %v4303_v10  }
  0x2e   : > { %3830 = vset.pattern.permute.xlu1 %v6428_v4 }
  0x2f   : > { %603 = vperm.xlu1 %3830, %v4277_v5  }
  0x30   : > { %723 = vperm.xlu0 %3835, %v4277_v5  }
  0x33   : > { %3831 = vset.pattern.permute.xlu1 %v4125_v15 }
  0x34   : > { %691 = vperm.xlu1 %3831, %v4262_v1   ;;  %3838 = vset.pattern.permute.xlu0 %v6434_v17 }
  0x35   : > { %775 = vperm.xlu0 %3838, %v4303_v10  }
  0x38   : > { %695 = vperm.xlu1 %3831, %v4303_v10  }
  0x39   : > { %763 = vperm.xlu0 %3838, %v4277_v5  }
  0x3c   : > { %3832 = vset.pattern.permute.xlu1 %v4124_v14 }
  0x3d   : > { %647 = vperm.xlu1 %3832, %v4325_v13   ;;  %3841 = vset.pattern.permute.xlu0 %v6432_v18 }
  0x3e   : > { %815 = vperm.xlu0 %3841, %v4303_v10  }
  0x41   : > { %3833 = vset.pattern.permute.xlu1 %v6438_v16 }
  0x42   : > { %731 = vperm.xlu1 %3833, %v4262_v1   ;;  %803 = vperm.xlu0 %3841, %v4277_v5  }
  0x46   : > { %3836 = vset.pattern.permute.xlu1 %v4125_v15  ;;  %3844 = vset.pattern.permute.xlu0 %v6430_v19 }
  0x47   : > { %687 = vperm.xlu1 %3836, %v4325_v13   ;;  %855 = vperm.xlu0 %3844, %v4303_v10  }
  0x4b   : > { %3837 = vset.pattern.permute.xlu1 %v6434_v17  ;;  %843 = vperm.xlu0 %3844, %v4277_v5  }
  0x4c   : > { %771 = vperm.xlu1 %3837, %v4262_v1  }
  0x4f   : > { %3847 = vset.pattern.permute.xlu0 %v6426_v20 }
  0x50   : > { %3839 = vset.pattern.permute.xlu1 %v6438_v16  ;;  %895 = vperm.xlu0 %3847, %v4303_v10  }
  0x51   : > { %727 = vperm.xlu1 %3839, %v4325_v13  }
  0x54   : > { %887 = vperm.xlu0 %3847, %v4325_v13  }
  0x55   : > { %3840 = vset.pattern.permute.xlu1 %v6432_v18 }
  0x56   : > { %811 = vperm.xlu1 %3840, %v4262_v1  }
  0x58   : > { %3850 = vset.pattern.permute.xlu0 %v4124_v14 }
  0x59   : > { %643 = vperm.xlu0 %3850, %v4277_v5  }
  0x5a   : > { %3842 = vset.pattern.permute.xlu1 %v6434_v17 }
  0x5b   : > { %767 = vperm.xlu1 %3842, %v4325_v13  }
  0x5f   : > { %3843 = vset.pattern.permute.xlu1 %v6430_v19 }
  0x60   : > { %851 = vperm.xlu1 %3843, %v4262_v1  }
  0x64   : > { %3845 = vset.pattern.permute.xlu1 %v6432_v18 }
  0x65   : > { %807 = vperm.xlu1 %3845, %v4325_v13  }
  0x69   : > { %3846 = vset.pattern.permute.xlu1 %v6426_v20 }
  0x6a   : > { %891 = vperm.xlu1 %3846, %v4262_v1  }
  0x6e   : > { %3848 = vset.pattern.permute.xlu1 %v6430_v19 }
  0x6f   : > { %847 = vperm.xlu1 %3848, %v4325_v13  }
  0x73   : > { %3849 = vset.pattern.permute.xlu1 %v6426_v20 }
  0x74   : > { %883 = vperm.xlu1 %3849, %v4277_v5  }
  0x78   : > { %3851 = vset.pattern.permute.xlu1 %v4124_v14 }
  0x79   : > { %915 = vperm.xlu1 %3851, %v4298_v9  }
  0x7d   : > { %919 = vperm.xlu1 %3851, %v4313_v12  }
  0x88   : > { %v4380_v23 = vpop.permute.xlu0 %574 }
  0x89   : > { %v467_v21 = vpop.permute.xlu1 %466 }
  0x8c   : > { %v4384_v25 = vpop.permute.xlu0 %564 }
  0x8d   : > { %v472_v22 = vpop.permute.xlu1 %471 }
  0x91   : > { %v477_v27 = vpop.permute.xlu0 %476 }
  0x92   : > { %v4382_v24 = vpop.permute.xlu1 %579 }
  0x95   : > { %v482_v38 = vpop.permute.xlu0 %481 }
  0x97   : > { %v4386_v26 = vpop.permute.xlu1 %611 }
  0x99   : > { %v4440_v43 = vpop.permute.xlu0 %615 }
  0x9c   : > { %v4388_v29 = vpop.permute.xlu1 %651 }
  0x9d   : > { %v4454_v46 = vpop.permute.xlu0 %607 }
  0x9e   : > { %6467 = vst [vmem:[#allocation5_spill] sm:$0xff] %v4454_v46  ;;  %v6446_v46 = vmov 9  }
  0xa0   : > { %v4398_v33 = vpop.permute.xlu1 %655 }
  0xa2   : > { %v4462_v48 = vpop.permute.xlu0 %683 }
  0xa5   : > { %v4408_v34 = vpop.permute.xlu1 %569 }
  0xa6   : > { %6464 = vst [vmem:[#allocation2_spill] sm:$0xff] %v4408_v34 }
  0xa7   : > { %v4471_v50 = vpop.permute.xlu0 %735 }
  0xaa   : > { %v4414_v35 = vpop.permute.xlu1 %603 }
  0xab   : > { %v4480_v52 = vpop.permute.xlu0 %723 }
  0xaf   : > { %v4424_v36 = vpop.permute.xlu1 %691 }
  0xb0   : > { %v4488_v54 = vpop.permute.xlu0 %775 }
  0xb3   : > { %v4432_v40 = vpop.permute.xlu1 %695 }
  0xb4   : > { %v4494_v56 = vpop.permute.xlu0 %763 }
  0xb8   : > { %v4438_v41 = vpop.permute.xlu1 %647 }
  0xb9   : > { %6465 = vst [vmem:[#allocation3_spill] sm:$0xff] %v4438_v41  ;;  %v4502_v58 = vpop.permute.xlu0 %815 }
  0xbd   : > { %v4452_v45 = vpop.permute.xlu1 %731  ;;  %v4508_v60 = vpop.permute.xlu0 %803 }
  0xc2   : > { %v4460_v47 = vpop.permute.xlu1 %687  ;;  %v4515_v62 = vpop.permute.xlu0 %855 }
  0xc3   : > { %6468 = vst [vmem:[#allocation6_spill] sm:$0xff] %v4460_v47 }
  0xc6   : > { %v4521_v0 = vpop.permute.xlu0 %843 }
  0xc7   : > { %v4469_v49 = vpop.permute.xlu1 %771  ;;  %6473 = vst [vmem:[#allocation11_spill] sm:$0xff] %v4521_v0 }
  0xcb   : > { %v4526_v8 = vpop.permute.xlu0 %895 }
  0xcc   : > { %v4478_v51 = vpop.permute.xlu1 %727 }
  0xcd   : > { %6469 = vst [vmem:[#allocation7_spill] sm:$0xff] %v4478_v51 }
  0xd1   : > { %v4486_v53 = vpop.permute.xlu1 %811 }
  0xd6   : > { %v4492_v55 = vpop.permute.xlu1 %767 }
  0xd7   : > { %6470 = vst [vmem:[#allocation8_spill] sm:$0xff] %v4492_v55 }
  0xda   : > { %v3680_v28 = vpop.f32.mrf.mxu0 }
  0xdb   : > { %v4390_v30 = vadd.f32 %v3680_v28, %v477_v27  ;;  %v4500_v57 = vpop.permute.xlu1 %851 }
  0xdc   : > { %v547_v31 = vpop.f32.mrf.mxu0 }
  0xdd   : > { %870 = vrot.lane.b32.xlu1 %v4390_v30, %s6444_s20  ;;  %590 = vrot.lane.b32.xlu0 %v4390_v30, %s4132_s22  ;;  %v4396_v32 = vadd.f32 %v547_v31, %v467_v21  ;;  %v1069_v31 = vld [vmem:[%s6418_s7 + $0x10] sm:$0xff] }
  0xde   : > { %v3681_v37 = vpop.f32.mrf.mxu0 }
  0xdf   : > { %v4430_v39 = vadd.f32 %v3681_v37, %v482_v38 }
  0xe0   : > { %v550_v42 = vpop.f32.mrf.mxu0  ;;  %v4506_v59 = vpop.permute.xlu1 %807 }
  0xe1   : > { %630 = vrot.lane.b32.xlu0 %v4390_v30, %s4133_s23  ;;  %586 = vrot.lane.b32.xlu1 %v4396_v32, %s4132_s22  ;;  %v4446_v44 = vadd.f32 %v550_v42, %v472_v22  ;;  %6471 = vst [vmem:[#allocation9_spill] sm:$0xff] %v4506_v59  ;;  %v594_v22 = vlaneseq }
  0xe3   : > { %6466 = vst [vmem:[#allocation4_spill] sm:$0xff] %v4446_v44  ;;  %v4552_v37 = vshrl.u32 %v594_v22, 7 }
  0xe5   : > { %670 = vrot.lane.b32.xlu0 %v4390_v30, %s4134_s24  ;;  %626 = vrot.lane.b32.xlu1 %v4396_v32, %s4133_s23  ;;  %v4513_v61 = vpop.permute.xlu1 %891  ;;  %6476 = vst [vmem:[#allocation14_spill] sm:$0xff] %v4552_v37  ;;  %v596_v20 = vsub.s32 0, %v4552_v37  ;;  %v676_v17 = vsub.s32 2, %v4552_v37  ;;  %v716_v16 = vsub.s32 3, %v4552_v37  ;;  %v796_v47 = vsub.s32 6, %v4552_v37 }
  0xe9   : > { %710 = vrot.lane.b32.xlu0 %v4390_v30, %s4135_s27  ;;  %666 = vrot.lane.b32.xlu1 %v4396_v32, %s4134_s24 }
  0xea   : > { %v4519_v63 = vpop.permute.xlu1 %847 }
  0xeb   : > { %6472 = vst [vmem:[#allocation10_spill] sm:$0xff] %v4519_v63 }
  0xed   : > { %750 = vrot.lane.b32.xlu0 %v4390_v30, %s4136_s28  ;;  %706 = vrot.lane.b32.xlu1 %v4396_v32, %s4135_s27 }
  0xef   : > { %v4524_v7 = vpop.permute.xlu1 %883 }
  0xf0   : > { %6474 = vst [vmem:[#allocation12_spill] sm:$0xff] %v4524_v7 }
  0xf1   : > { %790 = vrot.lane.b32.xlu0 %v4390_v30, %s4137_s29  ;;  %746 = vrot.lane.b32.xlu1 %v4396_v32, %s4136_s28 }
  0xf4   : > { %v4530_v11 = vpop.permute.xlu1 %915 }
  0xf5   : > { %830 = vrot.lane.b32.xlu0 %v4390_v30, %s4138_s30  ;;  %786 = vrot.lane.b32.xlu1 %v4396_v32, %s4137_s29 }
  0xf8   : > { %v4534_v14 = vpop.permute.xlu1 %919 }
  0xf9   : > { %826 = vrot.lane.b32.xlu0 %v4396_v32, %s4138_s30  ;;  %592 = vrot.lane.b32.xlu1 %v4430_v39, %s4132_s22 }
  0xfd   : > { %872 = vrot.lane.b32.xlu0 %v4430_v39, %s6444_s20  ;;  %632 = vrot.lane.b32.xlu1 %v4430_v39, %s4133_s23 }
 0x101   : > { %788 = vrot.lane.b32.xlu0 %v4446_v44, %s4137_s29  ;;  %672 = vrot.lane.b32.xlu1 %v4430_v39, %s4134_s24 }
 0x105   : > { %866 = vrot.lane.b32.xlu0 %v4396_v32, %s6444_s20  ;;  %712 = vrot.lane.b32.xlu1 %v4430_v39, %s4135_s27 }
 0x109   : > { %907 = vperm.xlu0 %3850, %v4267_v2   ;;  %752 = vrot.lane.b32.xlu1 %v4430_v39, %s4136_s28 }
 0x10d   : > { %792 = vrot.lane.b32.xlu1 %v4430_v39, %s4137_s29  ;;  %3853 = vset.pattern.permute.xlu0 %v4125_v15 }
 0x10e   : > { %981 = vperm.xlu0 %3853, %v4313_v12   ;;  %v4532_v12 = vpop.permute.xlu0 %887 }
 0x10f   : > { %6475 = vst [vmem:[#allocation13_spill] sm:$0xff] %v4532_v12  ;;  %v756_v12 = vsub.s32 5, %v4552_v37 }
 0x111   : > { %832 = vrot.lane.b32.xlu1 %v4430_v39, %s4138_s30 }
 0x112   : > { %3854 = vset.pattern.permute.xlu0 %v6428_v4 }
 0x115   : > { %588 = vrot.lane.b32.xlu1 %v4446_v44, %s4132_s22 }
 0x119   : > { %628 = vrot.lane.b32.xlu1 %v4446_v44, %s4133_s23 }
 0x11d   : > { %668 = vrot.lane.b32.xlu1 %v4446_v44, %s4134_s24 }
 0x121   : > { %708 = vrot.lane.b32.xlu1 %v4446_v44, %s4135_s27 }
 0x125   : > { %748 = vrot.lane.b32.xlu1 %v4446_v44, %s4136_s28 }
 0x129   : > { %828 = vrot.lane.b32.xlu1 %v4446_v44, %s4138_s30 }
 0x12d   : > { %868 = vrot.lane.b32.xlu1 %v4446_v44, %s6444_s20 }
 0x131   : > { %911 = vperm.xlu1 %3851, %v4289_v6  }
 0x135   : > { %3852 = vset.pattern.permute.xlu1 %v4125_v15 }
 0x136   : > { %977 = vperm.xlu1 %3852, %v4298_v9   ;;  %v4536_v9 = vpop.permute.xlu0 %643 }
 0x13a   : > { %969 = vperm.xlu1 %3852, %v4267_v2   ;;  %v3985_v2 = vld [vmem:[%s6416_s5] sm:$0xff]  }
 0x13b   : > { %3686 = vmatprep.mubr.msk.bf16.mxu1 %vm506_vm0, %v3985_v2  ;;  %v1071_v2 = vld [vmem:[%s6418_s7 + $0x20] sm:$0xff] }
 0x13e   : > { %973 = vperm.xlu1 %3852, %v4289_v6   ;;  %v1068_v6 = vld [vmem:[%s6418_s7 + $0x8] sm:$0xff] }
 0x142   : > { %3855 = vset.pattern.permute.xlu1 %v6428_v4  ;;  %v636_v4 = vsub.s32 1, %v4552_v37 }
 0x143   : > { %1086 = vperm.xlu1 %3855, %v1068_v6   ;;  %v446_v6 = vld [vmem:[%s6412_s1] sm:$0xff] }
 0x144   : > { %v4569_v18 = vrot.slane %v446_v6, %v596_v20  ;;  %v4572_v3 = vrot.slane %v446_v6, %v636_v4  ;;  %v4579_v55 = vrot.slane %v446_v6, %v676_v17  ;;  %v4582_v20 = vrot.slane %v446_v6, %v716_v16 }
 0x145   : > { %v6440_v4 = vmov 13   ;;  %v4586_v41 = vrot.slane %v446_v6, %v756_v12  ;;  %v584_v16 = vmul.f32 %v4380_v23, %v4390_v30  ;;  %v4598_v12 = vrot.slane %v446_v6, %v796_v47 }
 0x147   : > { %1091 = vperm.xlu1 %3855, %v1069_v31   ;;  %v1073_v31 = vld [vmem:[%s6418_s7 + $0x30] sm:$0xff] }
 0x14b   : > { %1101 = vperm.xlu1 %3855, %v1071_v2  }
 0x14f   : > { %v4541_v15 = vpop.permute.xlu1 %870  ;;  %v591_v21 = vpop.permute.xlu0 %590  ;;  %1111 = vperm.xlu1 %3855, %v1073_v31  }
 0x150   : > { %v600_v59 = vmul.f32 %v4569_v18, %v591_v21 }
 0x152   : > { %v620_v21 = vmul.f32 %v4386_v26, %v600_v59 }
 0x153   : > { %v631_v27 = vpop.permute.xlu0 %630  ;;  %v4547_v28 = vpop.permute.xlu1 %586  ;;  %3856 = vset.pattern.permute.xlu1 %v6440_v4 }
 0x154   : > { %v640_v51 = vmul.f32 %v4572_v3, %v631_v27  ;;  %1269 = vperm.xlu1 %3856, %v4277_v5   ;;  %v836_v27 = vsub.s32 7, %v4552_v37  ;;  %v624_v0 = vadd.f32 %v620_v21, %v584_v16 }
 0x156   : > { %v660_v34 = vmul.f32 %v4388_v29, %v640_v51 }
 0x157   : > { %v671_v38 = vpop.permute.xlu0 %670  ;;  %v4554_v42 = vpop.permute.xlu1 %626 }
 0x158   : > { %v680_v17 = vmul.f32 %v4579_v55, %v671_v38  ;;  %3858 = vset.pattern.permute.xlu1 %v6446_v46  ;;  %v4605_v38 = vrot.slane %v446_v6, %v836_v27  ;;  %v664_v29 = vadd.f32 %v660_v34, %v624_v0  ;;  %v4617_v6 = vld [vmem:[%s6412_s1 + $0x8] ss:$0 sm:$0xff] }
 0x159   : > { %1301 = vperm.xlu1 %3858, %v4277_v5  }
 0x15a   : > { %v700_v26 = vmul.f32 %v4424_v36, %v680_v17 }
 0x15b   : > { %v711_v19 = vpop.permute.xlu0 %710  ;;  %v4564_v22 = vpop.permute.xlu1 %666 }
 0x15c   : > { %v720_v4 = vmul.f32 %v4582_v20, %v711_v19  ;;  %v704_v51 = vadd.f32 %v700_v26, %v664_v29  ;;  %v585_v29 = vmul.f32 %v4382_v24, %v4430_v39 }
 0x15d   : > { %1305 = vperm.xlu1 %3858, %v4325_v13  }
 0x15e   : > { %v740_v19 = vmul.f32 %v4452_v45, %v720_v4 }
 0x15f   : > { %v751_v63 = vpop.permute.xlu0 %750  ;;  %v4576_v2 = vpop.permute.xlu1 %706 }
 0x160   : > { %v760_v59 = vmul.f32 %v4586_v41, %v751_v63  ;;  %v744_v36 = vadd.f32 %v740_v19, %v704_v51 }
 0x161   : > { %1309 = vperm.xlu1 %3858, %v4262_v1  }
 0x162   : > { %v780_v37 = vmul.f32 %v4469_v49, %v760_v59  ;;  %v880_v49 = vmul.f32 %v4617_v6, %v4541_v15 }
 0x163   : > { %v791_v31 = vpop.permute.xlu0 %790  ;;  %v4588_v7 = vpop.permute.xlu1 %746 }
 0x164   : > { %v800_v30 = vmul.f32 %v4598_v12, %v791_v31  ;;  %v784_v45 = vadd.f32 %v780_v37, %v744_v36  ;;  %v900_v16 = vmul.f32 %v4513_v61, %v880_v49 }
 0x166   : > { %v820_v63 = vmul.f32 %v4486_v53, %v800_v30  ;;  %v4141_v53 = vmov 10  }
 0x167   : > { %v4600_v44 = vpop.permute.xlu1 %786  ;;  %v831_v23 = vpop.permute.xlu0 %830  ;;  %3860 = vset.pattern.permute.xlu1 %v4141_v53 }
 0x168   : > { %v840_v21 = vmul.f32 %v4605_v38, %v831_v23  ;;  %v824_v4 = vadd.f32 %v820_v63, %v784_v45  ;;  %1341 = vperm.xlu1 %3860, %v4325_v13   ;;  %v6477_v23 = vmov 13  }
 0x16a   : > { %v860_v0 = vmul.f32 %v4500_v57, %v840_v21 }
 0x16b   : > { %v593_v47 = vpop.permute.xlu1 %592  ;;  %v827_v61 = vpop.permute.xlu0 %826 }
 0x16c   : > { %v864_v17 = vadd.f32 %v860_v0, %v824_v4  ;;  %v601_v27 = vmul.f32 %v4569_v18, %v593_v47  ;;  %3861 = vset.pattern.permute.xlu1 %v6477_v23 }
 0x16d   : > { %1281 = vperm.xlu1 %3861, %v4303_v10  }
 0x16e   : > { %v904_v26 = vadd.f32 %v900_v16, %v864_v17  ;;  %v621_v59 = vmul.f32 %v4440_v43, %v601_v27  ;;  %v598_v16 = vmul.f32 %v4569_v18, %v4547_v28  ;;  %v582_v28 = vmul.f32 %v4384_v25, %v4396_v32 }
 0x16f   : > { %v633_v34 = vpop.permute.xlu1 %632  ;;  %v873_v0 = vpop.permute.xlu0 %872 }
 0x170   : > { %v641_v37 = vmul.f32 %v4572_v3, %v633_v34  ;;  %v4637_v51 = vadd.f32 %v4530_v11, %v904_v26  ;;  %v625_v21 = vadd.f32 %v621_v59, %v585_v29  ;;  %v618_v29 = vmul.f32 %v4414_v35, %v598_v16  ;;  %v6481_v16 = vld [vmem:[#allocation2_spill] sm:$0xff] }
 0x171   : > { %3863 = vset.pattern.permute.xlu1 %v4141_v53 }
 0x172   : > { %v661_v19 = vmul.f32 %v4398_v33, %v641_v37  ;;  %1345 = vperm.xlu1 %3863, %v4262_v1   ;;  %v932_v11 = vmul.f32 0.044715, %v4637_v51  ;;  %v622_v35 = vadd.f32 %v618_v29, %v582_v28  ;;  %v6484_v28 = vld [vmem:[#allocation6_spill] sm:$0xff] }
 0x173   : > { %v673_v31 = vpop.permute.xlu1 %672 }
 0x174   : > { %v681_v15 = vmul.f32 %v4579_v55, %v673_v31  ;;  %v665_v63 = vadd.f32 %v661_v19, %v625_v21  ;;  %v881_v31 = vmul.f32 %v4617_v6, %v873_v0  ;;  %v936_v27 = vmul.f32 %v932_v11, %v4637_v51 }
 0x175   : > { %v678_v19 = vmul.f32 %v4579_v55, %v4564_v22  ;;  %v758_v22 = vmul.f32 %v4586_v41, %v4588_v7 }
 0x176   : > { %v701_v43 = vmul.f32 %v4432_v40, %v681_v15  ;;  %v940_v15 = vmul.f32 %v936_v27, %v4637_v51  ;;  %v6480_v27 = vld [vmem:[#allocation4_spill] sm:$0xff] }
 0x177   : > { %v713_v57 = vpop.permute.xlu1 %712 }
 0x178   : > { %v721_v30 = vmul.f32 %v4582_v20, %v713_v57  ;;  %v705_v33 = vadd.f32 %v701_v43, %v665_v63  ;;  %v638_v57 = vmul.f32 %v4572_v3, %v4554_v42  ;;  %v718_v42 = vmul.f32 %v4582_v20, %v4576_v2 }
 0x179   : > { %v944_v43 = vadd.f32 %v940_v15, %v4637_v51 }
 0x17a   : > { %v741_v34 = vmul.f32 %v4471_v50, %v721_v30  ;;  %v789_v30 = vpop.permute.xlu0 %788  ;;  %v738_v32 = vmul.f32 %v4480_v52, %v718_v42 }
 0x17b   : > { %v753_v47 = vpop.permute.xlu1 %752 }
 0x17c   : > { %v761_v36 = vmul.f32 %v4586_v41, %v753_v47  ;;  %v745_v49 = vadd.f32 %v741_v34, %v705_v33 }
 0x17e   : > { %v781_v39 = vmul.f32 %v4488_v54, %v761_v36  ;;  %v698_v36 = vmul.f32 %v4462_v48, %v678_v19  ;;  %v867_v34 = vpop.permute.xlu0 %866  ;;  %v838_v48 = vmul.f32 %v4605_v38, %v827_v61 }
 0x17f   : > { %v793_v24 = vpop.permute.xlu1 %792  ;;  %v878_v0 = vmul.f32 %v4617_v6, %v867_v34  ;;  %v799_v34 = vmul.f32 %v4598_v12, %v789_v30 }
 0x180   : > { %v801_v45 = vmul.f32 %v4598_v12, %v793_v24  ;;  %v785_v50 = vadd.f32 %v781_v39, %v745_v49  ;;  %v948_v24 = vmul.f32 0.7978846, %v944_v43  ;;  %v778_v39 = vmul.f32 %v4494_v56, %v758_v22 }
 0x182   : > { %v821_v40 = vmul.f32 %v4502_v58, %v801_v45  ;;  %v901_v58 = vmul.f32 %v4526_v8, %v881_v31  ;;  %4009 = vtanh.f32 %v948_v24  ;;  %v6478_v31 = vld [vmem:[#allocation11_spill] sm:$0xff] }
 0x183   : > { %v833_v4 = vpop.permute.xlu1 %832  ;;  %v858_v56 = vmul.f32 %v6478_v31, %v838_v48 }
 0x184   : > { %v841_v17 = vmul.f32 %v4605_v38, %v833_v4  ;;  %v825_v54 = vadd.f32 %v821_v40, %v785_v50  ;;  %v6479_v50 = vld [vmem:[#allocation5_spill] sm:$0xff] }
 0x186   : > { %v861_v37 = vmul.f32 %v4515_v62, %v841_v17  ;;  %v658_v62 = vmul.f32 %v4536_v9, %v638_v57  ;;  %v798_v9 = vmul.f32 %v4598_v12, %v4600_v44  ;;  %v6482_v57 = vld [vmem:[#allocation12_spill] sm:$0xff] }
 0x187   : > { %v589_v26 = vpop.permute.xlu1 %588 }
 0x188   : > { %v865_v59 = vadd.f32 %v861_v37, %v825_v54  ;;  %v662_v25 = vadd.f32 %v658_v62, %v622_v35  ;;  %v599_v7 = vmul.f32 %v4569_v18, %v589_v26  ;;  %v818_v52 = vmul.f32 %v4508_v60, %v798_v9  ;;  %v6486_v9 = vld [vmem:[#allocation8_spill] sm:$0xff] }
 0x189   : > { %v583_v54 = vmul.f32 %v6481_v16, %v6480_v27  ;;  %v898_v26 = vmul.f32 %v6482_v57, %v878_v0 }
 0x18a   : > { %v905_v47 = vadd.f32 %v901_v58, %v865_v59  ;;  %v702_v33 = vadd.f32 %v698_v36, %v662_v25  ;;  %v619_v61 = vmul.f32 %v6479_v50, %v599_v7  ;;  %v6483_v58 = vld [vmem:[#allocation3_spill] sm:$0xff] }
 0x18b   : > { %v629_v21 = vpop.permute.xlu1 %628  ;;  %v6485_v36 = vld [vmem:[#allocation7_spill] sm:$0xff] }
 0x18c   : > { %v4667_v8 = vadd.f32 %v4534_v14, %v905_v47  ;;  %v742_v11 = vadd.f32 %v738_v32, %v702_v33  ;;  %v639_v44 = vmul.f32 %v4572_v3, %v629_v21  ;;  %v623_v47 = vadd.f32 %v619_v61, %v583_v54  ;;  %v908_v21 = vpop.permute.xlu0 %907  ;;  %v6489_v61 = vld [vmem:[#allocation13_spill] sm:$0xff] }
 0x18e   : > { %v933_v63 = vmul.f32 0.044715, %v4667_v8  ;;  %v782_v4 = vadd.f32 %v778_v39, %v742_v11  ;;  %v659_v59 = vmul.f32 %v6483_v58, %v639_v44  ;;  %v929_v30 = vmul.f32 0.5, %v4667_v8 }
 0x18f   : > { %v669_v2 = vpop.permute.xlu1 %668  ;;  %v4010_v33 = vpop.eup %4009 }
 0x190   : > { %v937_v14 = vmul.f32 %v933_v63, %v4667_v8  ;;  %v679_v17 = vmul.f32 %v4579_v55, %v669_v2  ;;  %v822_v60 = vadd.f32 %v818_v52, %v782_v4  ;;  %v663_v35 = vadd.f32 %v659_v59, %v623_v47 }
 0x191   : > { %v956_v0 = vadd.f32 1.0, %v4010_v33  ;;  %v1072_v33 = vld [vmem:[%s6418_s7 + $0x28] sm:$0xff] }
 0x192   : > { %v941_v45 = vmul.f32 %v937_v14, %v4667_v8  ;;  %v862_v19 = vadd.f32 %v858_v56, %v822_v60  ;;  %v699_v62 = vmul.f32 %v6484_v28, %v679_v17  ;;  %v928_v56 = vmul.f32 0.5, %v4637_v51 }
 0x193   : > { %v709_v49 = vpop.permute.xlu1 %708 }
 0x194   : > { %v945_v40 = vadd.f32 %v941_v45, %v4667_v8  ;;  %v719_v15 = vmul.f32 %v4582_v20, %v709_v49  ;;  %v902_v43 = vadd.f32 %v898_v26, %v862_v19  ;;  %v703_v32 = vadd.f32 %v699_v62, %v663_v35  ;;  %v6487_v45 = vld [vmem:[#allocation9_spill] sm:$0xff] }
 0x195   : > { %v819_v11 = vmul.f32 %v6487_v45, %v799_v34  ;;  %v960_v27 = vmul.f32 %v956_v0, %v928_v56  ;;  %v1067_v34 = vld [vmem:[%s6418_s7] sm:$0xff]  ;;  %v4746_v45 = vld [vmem:[%s6413_s2 + $0x10] sm:$0xff] }
 0x196   : > { %v949_v37 = vmul.f32 0.7978846, %v945_v40  ;;  %v739_v22 = vmul.f32 %v6485_v36, %v719_v15  ;;  %v922_v25 = vadd.f32 %v908_v21, %v902_v43  ;;  %v6488_v40 = vld [vmem:[#allocation10_spill] sm:$0xff]  ;;  %1081 = vperm.xlu0 %3854, %v1067_v34   ;;  %v6495_v34 = vmov 4  }
 0x197   : > { %v749_v29 = vpop.permute.xlu1 %748 }
 0x198   : > { %4011 = vtanh.f32 %v949_v37  ;;  %v759_v42 = vmul.f32 %v4586_v41, %v749_v29  ;;  %v743_v14 = vadd.f32 %v739_v22, %v703_v32  ;;  %v930_v39 = vmul.f32 0.044715, %v922_v25 }
 0x199   : > { %v4142_v32 = vmov 11  }
 0x19a   : > { %v779_v2 = vmul.f32 %v6486_v9, %v759_v42  ;;  %v934_v49 = vmul.f32 %v930_v39, %v922_v25  ;;  %v926_v42 = vmul.f32 0.5, %v922_v25  ;;  %3864 = vset.pattern.permute.xlu1 %v4142_v32  ;;  %v3987_v9 = vld [vmem:[%s6417_s6] sm:$0xff]   ;;  %v1074_v39 = vld [vmem:[%s6418_s7 + $0x38] sm:$0xff] }
 0x19b   : > { %v829_v63 = vpop.permute.xlu1 %828  ;;  %1373 = vperm.xlu1 %3864, %v4277_v5   ;;  %3694 = vmatprep.mubr.msk.bf16.mxu0 %vm506_vm0, %v3987_v9 }
 0x19c   : > { %v783_v48 = vadd.f32 %v779_v2, %v743_v14  ;;  %v839_v7 = vmul.f32 %v4605_v38, %v829_v63  ;;  %v938_v54 = vmul.f32 %v934_v49, %v922_v25  ;;  %v3986_v63 = vld [vmem:[%s6416_s5 + $0x8] sm:$0xff]   ;;  %v4144_v2 = vmov 14  }
 0x19d   : > { %v4145_v14 = vmov 22  }
 0x19e   : > { %v859_v4 = vmul.f32 %v6488_v40, %v839_v7  ;;  %v823_v31 = vadd.f32 %v819_v11, %v783_v48  ;;  %v942_v58 = vadd.f32 %v938_v54, %v922_v25  ;;  %v4143_v25 = vmov 12   ;;  %v4774_v11 = vld [vmem:[%s6413_s2 + $0x18] sm:$0xff] }
 0x19f   : > { %v869_v24 = vpop.permute.xlu1 %868  ;;  %3865 = vset.pattern.permute.xlu1 %v4141_v53  ;;  %v4146_v48 = vmov 18   ;;  %v4147_v7 = vmov 15  }
 0x1a0   : > { %v879_v52 = vmul.f32 %v4617_v6, %v869_v24  ;;  %v863_v37 = vadd.f32 %v859_v4, %v823_v31  ;;  %v946_v29 = vmul.f32 0.7978846, %v942_v58  ;;  %1349 = vperm.xlu1 %3865, %v4303_v10   ;;  %v1070_v24 = vld [vmem:[%s6418_s7 + $0x18] sm:$0xff]  ;;  %v982_v4 = vpop.permute.xlu0 %981  ;;  %v4153_v31 = vmov 23  }
 0x1a1   : > { %1096 = vperm.xlu0 %3854, %v1070_v24  }
 0x1a2   : > { %v899_v17 = vmul.f32 %v6489_v61, %v879_v52  ;;  %4013 = vtanh.f32 %v946_v29  ;;  %v4152_v52 = vmov 21  }
 0x1a4   : > { %v903_v57 = vadd.f32 %v899_v17, %v863_v37  ;;  %3866 = vset.pattern.permute.xlu1 %v4143_v25  ;;  %v4093_v17 = vld [vmem:[%s4284_s21] sm:$0xff]  }
 0x1a5   : > { %v4012_v44 = vpop.eup %4011  ;;  %1409 = vperm.xlu1 %3866, %v4277_v5   ;;  %1106 = vperm.xlu0 %3854, %v1072_v33   ;;  %v457_v37 = vunpack.c.h.bf16 %v4093_v17  ;;  %v6496_v33 = vmov 5  }
 0x1a6   : > { %v957_v50 = vadd.f32 1.0, %v4012_v44 }
 0x1a8   : > { %v961_v16 = vmul.f32 %v957_v50, %v929_v30 }
 0x1a9   : > { %1417 = vperm.xlu1 %3866, %v4262_v1   ;;  %1116 = vperm.xlu0 %3854, %v1074_v39  }
 0x1aa   : > { %v967_v60 = vpack.c.bf16 %v961_v16, %v960_v27  ;;  %v456_v27 = vunpack.c.l.bf16 %v4093_v17 }
 0x1ac   : > { %3682 = vmatprep.subr.bf16.mxu1 %v967_v60  ;;  %v912_v6 = vpop.permute.xlu1 %911 }
 0x1ad   : > { %v923_v26 = vadd.f32 %v912_v6, %v903_v57  ;;  %3683 = vmatpush3.bf16.msra.mxu1 %v967_v60  ;;  %3869 = vset.pattern.permute.xlu1 %v4144_v2 }
 0x1ae   : > { %1445 = vperm.xlu1 %3869, %v4277_v5   ;;  %3857 = vset.pattern.permute.xlu0 %v6477_v23  ;;  %v4148_v23 = vmov 19  }
 0x1af   : > { %v931_v59 = vmul.f32 0.044715, %v923_v26  ;;  %v4014_v47 = vpop.eup %4013  ;;  %v927_v21 = vmul.f32 0.5, %v923_v26  ;;  %1273 = vperm.xlu0 %3857, %v4325_v13  }
 0x1b0   : > { %v954_v28 = vadd.f32 1.0, %v4014_v47  ;;  %v4813_v47 = vld [vmem:[%s6414_s3] sm:$0xff] }
 0x1b1   : > { %v935_v15 = vmul.f32 %v931_v59, %v923_v26  ;;  %v978_v0 = vpop.permute.xlu1 %977  ;;  %v4094_v59 = vld [vmem:[%s6413_s2 + $0x8] sm:$0xff] }
 0x1b2   : > { %v958_v35 = vmul.f32 %v954_v28, %v926_v42  ;;  %3870 = vset.pattern.permute.xlu1 %v4145_v14  ;;  %v3988_v28 = vld [vmem:[%s6417_s6 + $0x8] sm:$0xff]  }
 0x1b3   : > { %v939_v51 = vmul.f32 %v935_v15, %v923_v26  ;;  %1779 = vperm.xlu1 %3870, %v4277_v5   ;;  %1277 = vperm.xlu0 %3857, %v4262_v1   ;;  %v4149_v1 = vmov 16   ;;  %v4826_v42 = vld [vmem:[%s6414_s3 + $0x8] sm:$0xff] }
 0x1b5   : > { %v943_v19 = vadd.f32 %v939_v51, %v923_v26  ;;  %v970_v44 = vpop.permute.xlu1 %969 }
 0x1b7   : > { %v947_v8 = vmul.f32 0.7978846, %v943_v19  ;;  %1783 = vperm.xlu1 %3870, %v4325_v13   ;;  %3859 = vset.pattern.permute.xlu0 %v4141_v53  ;;  %v4758_v53 = vld [vmem:[%s6413_s2] sm:$0xff] }
 0x1b8   : > { %1337 = vperm.xlu0 %3859, %v4277_v5  }
 0x1b9   : > { %4015 = vtanh.f32 %v947_v8  ;;  %v974_v60 = vpop.permute.xlu1 %973  ;;  %v6494_v8 = vmov 3  }
 0x1bb   : > { %3872 = vset.pattern.permute.xlu1 %v4146_v48 }
 0x1bc   : > { %1815 = vperm.xlu1 %3872, %v4325_v13   ;;  %3862 = vset.pattern.permute.xlu0 %v6446_v46 }
 0x1bd   : > { %1313 = vperm.xlu0 %3862, %v4303_v10  }
 0x1c0   : > { %3873 = vset.pattern.permute.xlu1 %v4143_v25 }
 0x1c1   : > { %1421 = vperm.xlu1 %3873, %v4303_v10   ;;  %3867 = vset.pattern.permute.xlu0 %v4143_v25 }
 0x1c2   : > { %1413 = vperm.xlu0 %3867, %v4325_v13  }
 0x1c5   : > { %3874 = vset.pattern.permute.xlu1 %v4147_v7 }
 0x1c6   : > { %v4016_v62 = vpop.eup %4015  ;;  %1481 = vperm.xlu1 %3874, %v4277_v5   ;;  %3868 = vset.pattern.permute.xlu0 %v4142_v32 }
 0x1c7   : > { %v955_v43 = vadd.f32 1.0, %v4016_v62  ;;  %1377 = vperm.xlu0 %3868, %v4325_v13   ;;  %v3989_v62 = vld [vmem:[%s6417_s6 + $0x10] sm:$0xff]  }
 0x1c9   : > { %v959_v36 = vmul.f32 %v955_v43, %v927_v21  ;;  %v4154_v21 = vmov 25   ;;  %v3990_v43 = vld [vmem:[%s6417_s6 + $0x18] sm:$0xff]  }
 0x1ca   : > { %1485 = vperm.xlu1 %3874, %v4325_v13  }
 0x1cb   : > { %v966_v22 = vpack.c.bf16 %v959_v36, %v958_v35  ;;  %1381 = vperm.xlu0 %3868, %v4746_v45   ;;  %v4155_v35 = vmov 24   ;;  %v4837_v36 = vpop.permute.xlu1 %1086 }
 0x1cd   : > { %3684 = vmatprep.subr.bf16.mxu1 %v966_v22 }
 0x1ce   : > { %3685 = vmatpush3.bf16.msra.mxu1 %v966_v22  ;;  %3877 = vset.pattern.permute.xlu1 %v4146_v48  ;;  %v4845_v22 = vld [vmem:[%s6414_s3 + $0x10] sm:$0xff] }
 0x1cf   : > { %1819 = vperm.xlu1 %3877, %v4746_v45   ;;  %1385 = vperm.xlu0 %3868, %v4303_v10   ;;  %v4855_v32 = vpop.permute.xlu1 %1091 }
 0x1d1   : > { %3687 = vmatmul.mubr.msk.bf16.vlgmr.msra.gmra.mxu1 %vm506_vm0, %v3986_v63  ;;  %v4852_v63 = vld [vmem:[%s6414_s3 + $0x18] sm:$0xff] }
 0x1d3   : > { %3878 = vset.pattern.permute.xlu1 %v4148_v23  ;;  %3871 = vset.pattern.permute.xlu0 %v4146_v48  ;;  %v4858_v25 = vpop.permute.xlu1 %1101 }
 0x1d4   : > { %1847 = vperm.xlu1 %3878, %v4277_v5   ;;  %1811 = vperm.xlu0 %3871, %v4758_v53   ;;  %v4150_v5 = vmov 20  }
 0x1d7   : > { %v4861_v9 = vpop.permute.xlu1 %1111 }
 0x1d8   : > { %3880 = vset.pattern.permute.xlu1 %v4147_v7  ;;  %3875 = vset.pattern.permute.xlu0 %v4145_v14 }
 0x1d9   : > { %1489 = vperm.xlu1 %3880, %v4746_v45   ;;  %1787 = vperm.xlu0 %3875, %v4746_v45  }
 0x1dd   : > { %3881 = vset.pattern.permute.xlu1 %v4149_v1  ;;  %3876 = vset.pattern.permute.xlu0 %v4144_v2  ;;  %v4156_v2 = vmov 26  }
 0x1de   : > { %1517 = vperm.xlu1 %3881, %v4758_v53   ;;  %1449 = vperm.xlu0 %3876, %v4325_v13  }
 0x1e2   : > { %3882 = vset.pattern.permute.xlu1 %v4145_v14  ;;  %1453 = vperm.xlu0 %3876, %v4746_v45   ;;  %v4865_v14 = vpop.permute.xlu1 %1269 }
 0x1e3   : > { %1791 = vperm.xlu1 %3882, %v4303_v10  }
 0x1e6   : > { %1457 = vperm.xlu0 %3876, %v4774_v11   ;;  %v4870_v24 = vpop.permute.xlu1 %1301 }
 0x1e7   : > { %3883 = vset.pattern.permute.xlu1 %v4146_v48 }
 0x1e8   : > { %1823 = vperm.xlu1 %3883, %v4303_v10   ;;  %v4151_v10 = vmov 17  }
 0x1ea   : > { %3879 = vset.pattern.permute.xlu0 %v4148_v23  ;;  %v4875_v39 = vpop.permute.xlu1 %1305 }
 0x1eb   : > { %1851 = vperm.xlu0 %3879, %v4325_v13  }
 0x1ec   : > { %3884 = vset.pattern.permute.xlu1 %v4150_v5 }
 0x1ed   : > { %1883 = vperm.xlu1 %3884, %v4758_v53  }
 0x1ee   : > { %v4879_v48 = vpop.permute.xlu1 %1309 }
 0x1ef   : > { %1855 = vperm.xlu0 %3879, %v4746_v45  }
 0x1f1   : > { %1887 = vperm.xlu1 %3884, %v4325_v13  }
 0x1f3   : > { %1859 = vperm.xlu0 %3879, %v4774_v11  }
 0x1f5   : > { %3885 = vset.pattern.permute.xlu1 %v4147_v7  ;;  %v4881_v7 = vpop.permute.xlu1 %1341 }
 0x1f6   : > { %1493 = vperm.xlu1 %3885, %v4774_v11  }
 0x1f7   : > { %3887 = vset.pattern.permute.xlu0 %v4149_v1 }
 0x1f8   : > { %1521 = vperm.xlu0 %3887, %v4325_v13  }
 0x1f9   : > { %v4885_v23 = vpop.permute.xlu1 %1281 }
 0x1fa   : > { %3886 = vset.pattern.permute.xlu1 %v4151_v10 }
 0x1fb   : > { %1553 = vperm.xlu1 %3886, %v4758_v53  }
 0x1fc   : > { %1525 = vperm.xlu0 %3887, %v4746_v45  }
 0x1fd   : > { %v4888_v1 = vpop.permute.xlu1 %1345 }
 0x1ff   : > { %1557 = vperm.xlu1 %3886, %v4325_v13   ;;  %v4092_v13 = vld [vmem:[%s4284_s21 + $0x8] sm:$0xff]  }
 0x200   : > { %1529 = vperm.xlu0 %3887, %v4774_v11   ;;  %v458_v56 = vunpack.c.l.bf16 %v4092_v13  ;;  %v459_v30 = vunpack.c.h.bf16 %v4092_v13 }
 0x203   : > { %3888 = vset.pattern.permute.xlu1 %v4150_v5 }
 0x204   : > { %1891 = vperm.xlu1 %3888, %v4746_v45   ;;  %3893 = vset.pattern.permute.xlu0 %v4151_v10 }
 0x205   : > { %1565 = vperm.xlu0 %3893, %v4774_v11  }
 0x208   : > { %3889 = vset.pattern.permute.xlu1 %v4152_v52 }
 0x209   : > { %1919 = vperm.xlu1 %3889, %v4758_v53   ;;  %3894 = vset.pattern.permute.xlu0 %v4152_v52 }
 0x20a   : > { %1923 = vperm.xlu0 %3894, %v4094_v59  }
 0x20d   : > { %3890 = vset.pattern.permute.xlu1 %v4151_v10 }
 0x20e   : > { %1561 = vperm.xlu1 %3890, %v4746_v45   ;;  %1927 = vperm.xlu0 %3894, %v4746_v45  }
 0x212   : > { %3891 = vset.pattern.permute.xlu1 %v4150_v5  ;;  %1931 = vperm.xlu0 %3894, %v4774_v11  }
 0x213   : > { %1895 = vperm.xlu1 %3891, %v4774_v11  }
 0x216   : > { %3900 = vset.pattern.permute.xlu0 %v4154_v21  ;;  %v4890_v5 = vpop.permute.xlu1 %1373 }
 0x217   : > { %3892 = vset.pattern.permute.xlu1 %v4153_v31  ;;  %2027 = vperm.xlu0 %3900, %v4758_v53  }
 0x218   : > { %1955 = vperm.xlu1 %3892, %v4758_v53  }
 0x21b   : > { %3901 = vset.pattern.permute.xlu0 %v6494_v8 }
 0x21c   : > { %1959 = vperm.xlu1 %3892, %v4094_v59   ;;  %1585 = vperm.xlu0 %3901, %v4845_v22  }
 0x220   : > { %3895 = vset.pattern.permute.xlu1 %v6494_v8  ;;  %1589 = vperm.xlu0 %3901, %v4852_v63  }
 0x221   : > { %1577 = vperm.xlu1 %3895, %v4813_v47  }
 0x224   : > { %3903 = vset.pattern.permute.xlu0 %v4155_v35 }
 0x225   : > { %1581 = vperm.xlu1 %3895, %v4826_v42   ;;  %1995 = vperm.xlu0 %3903, %v4094_v59  }
 0x229   : > { %3896 = vset.pattern.permute.xlu1 %v4153_v31  ;;  %2003 = vperm.xlu0 %3903, %v4774_v11  }
 0x22a   : > { %1963 = vperm.xlu1 %3896, %v4746_v45  }
 0x22d   : > { %3907 = vset.pattern.permute.xlu0 %v4156_v2 }
 0x22e   : > { %3897 = vset.pattern.permute.xlu1 %v4155_v35  ;;  %2067 = vperm.xlu0 %3907, %v4094_v59  }
 0x22f   : > { %1991 = vperm.xlu1 %3897, %v4758_v53  }
 0x232   : > { %3908 = vset.pattern.permute.xlu0 %v6495_v34 }
 0x233   : > { %3898 = vset.pattern.permute.xlu1 %v4153_v31  ;;  %1609 = vperm.xlu0 %3908, %v4845_v22  }
 0x234   : > { %1967 = vperm.xlu1 %3898, %v4774_v11  }
 0x237   : > { %1613 = vperm.xlu0 %3908, %v4852_v63  }
 0x238   : > { %3899 = vset.pattern.permute.xlu1 %v4155_v35 }
 0x239   : > { %1999 = vperm.xlu1 %3899, %v4746_v45  }
 0x23b   : > { %3911 = vset.pattern.permute.xlu0 %v6496_v33 }
 0x23d   : > { %3902 = vset.pattern.permute.xlu1 %v4154_v21 }
 0x23e   : > { %2031 = vperm.xlu1 %3902, %v4094_v59  }
 0x242   : > { %3904 = vset.pattern.permute.xlu1 %v6495_v34 }
 0x243   : > { %1601 = vperm.xlu1 %3904, %v4813_v47  }
 0x247   : > { %1605 = vperm.xlu1 %3904, %v4826_v42  }
 0x24b   : > { %3905 = vset.pattern.permute.xlu1 %v4154_v21 }
 0x24c   : > { %2035 = vperm.xlu1 %3905, %v4746_v45  }
 0x250   : > { %3906 = vset.pattern.permute.xlu1 %v4156_v2 }
 0x251   : > { %2063 = vperm.xlu1 %3906, %v4758_v53   ;;  %v4892_v53 = vpop.permute.xlu1 %1349 }
 0x255   : > { %3909 = vset.pattern.permute.xlu1 %v4154_v21  ;;  %v4894_v10 = vpop.permute.xlu1 %1409 }
 0x256   : > { %2039 = vperm.xlu1 %3909, %v4774_v11  }
 0x259   : > { %v4896_v52 = vpop.permute.xlu1 %1417 }
 0x25a   : > { %3910 = vset.pattern.permute.xlu1 %v4156_v2 }
 0x25b   : > { %2071 = vperm.xlu1 %3910, %v4746_v45   ;;  %v1082_v45 = vpop.permute.xlu0 %1081 }
 0x25f   : > { %2075 = vperm.xlu1 %3910, %v4774_v11  }
 0x263   : > { %3912 = vset.pattern.permute.xlu1 %v6496_v33 }
 0x291   : > { %v3688_v49 = vpop.f32.mrf.mxu1 }
 0x292   : > { %v1043_v50 = vadd.f32 %v3688_v49, %v978_v0  ;;  %v4898_v0 = vpop.permute.xlu1 %1445 }
 0x293   : > { %v1034_v40 = vpop.f32.mrf.mxu1 }
 0x294   : > { %v1035_v16 = vadd.f32 %v1034_v40, %v970_v44  ;;  %v4794_v6 = vadd.f32 %v1043_v50, %v458_v56  ;;  %v1097_v40 = vpop.permute.xlu0 %1096 }
 0x295   : > { %v3689_v61 = vpop.f32.mrf.mxu1 }
 0x296   : > { %v1046_v54 = vadd.f32 %v3689_v61, %v982_v4  ;;  %6490 = vst [vmem:[#allocation11_spill] sm:$0xff] %v4794_v6  ;;  %v4801_v15 = vadd.f32 %v1035_v16, %v456_v27  ;;  %v4900_v44 = vpop.permute.xlu1 %1779 }
 0x297   : > { %v1037_v57 = vpop.f32.mrf.mxu1  ;;  %6497 = vst [vmem:[#allocation12_spill] sm:$0xff] %v4900_v44 }
 0x298   : > { %v4796_v26 = vadd.f32 %v1046_v54, %v459_v30  ;;  %v1038_v58 = vadd.f32 %v1037_v57, %v974_v60  ;;  %6492 = vst [vmem:[#allocation4_spill] sm:$0xff] %v4801_v15  ;;  %v4908_v31 = vpop.permute.xlu0 %1106 }
 0x29a   : > { %6491 = vst [vmem:[#allocation5_spill] sm:$0xff] %v4796_v26  ;;  %v4803_v29 = vadd.f32 %v1038_v58, %v457_v37  ;;  %v1066_v51 = vpack.c.bf16 %v4796_v26, %v4794_v6  ;;  %v4902_v11 = vpop.permute.xlu1 %1783 }
 0x29b   : > { %6498 = vst [vmem:[#allocation3_spill] sm:$0xff] %v4902_v11 }
 0x29c   : > { %6493 = vst [vmem:[#allocation2_spill] sm:$0xff] %v4803_v29  ;;  %3690 = vmatprep.subr.bf16.mxu0 %v1066_v51  ;;  %v1065_v19 = vpack.c.bf16 %v4803_v29, %v4801_v15  ;;  %v4912_v56 = vpop.permute.xlu0 %1116 }
 0x29d   : > { %3691 = vmatpush3.bf16.msra.mxu0 %v1066_v51 }
 0x29e   : > { %3692 = vmatprep.subr.bf16.mxu0 %v1065_v19  ;;  %v4904_v49 = vpop.permute.xlu1 %1815 }
 0x29f   : > { %6499 = vst [vmem:[#allocation6_spill] sm:$0xff] %v4904_v49 }
 0x2a0   : > { %v4916_v50 = vpop.permute.xlu0 %1273 }
 0x2a1   : > { %3693 = vmatpush3.bf16.msra.mxu0 %v1065_v19 }
 0x2a2   : > { %v4906_v4 = vpop.permute.xlu1 %1421 }
 0x2a4   : > { %3695 = vmatmul.mubr.msk.bf16.vlgmr.msra.gmra.mxu0 %vm506_vm0, %v3988_v28  ;;  %v4920_v17 = vpop.permute.xlu0 %1277 }
 0x2a5   : > { %3698 = vmatprep.mubr.msk.bf16.mxu0 %vm506_vm0, %v3989_v62 }
 0x2a6   : > { %v4910_v13 = vpop.permute.xlu1 %1481 }
 0x2a8   : > { %v4924_v16 = vpop.permute.xlu0 %1337 }
 0x2aa   : > { %v4914_v30 = vpop.permute.xlu1 %1485 }
 0x2ab   : > { %6500 = vst [vmem:[#allocation7_spill] sm:$0xff] %v4914_v30 }
 0x2ac   : > { %3699 = vmatmul.mubr.msk.bf16.gmra.mxu0 %vm506_vm0, %v3990_v43  ;;  %v4928_v37 = vpop.permute.xlu0 %1313 }
 0x2ae   : > { %v4918_v61 = vpop.permute.xlu1 %1819 }
 0x2af   : > { %6501 = vst [vmem:[#allocation8_spill] sm:$0xff] %v4918_v61 }
 0x2b0   : > { %v4932_v57 = vpop.permute.xlu0 %1413 }
 0x2b1   : > { %6505 = vst [vmem:[#allocation15_spill] sm:$0xff] %v4932_v57 }
 0x2b2   : > { %v4922_v27 = vpop.permute.xlu1 %1847 }
 0x2b3   : > { %6502 = vst [vmem:[#allocation9_spill] sm:$0xff] %v4922_v27 }
 0x2b4   : > { %v4936_v59 = vpop.permute.xlu0 %1377 }
 0x2b6   : > { %v4926_v54 = vpop.permute.xlu1 %1489 }
 0x2b7   : > { %6503 = vst [vmem:[#allocation10_spill] sm:$0xff] %v4926_v54 }
 0x2b8   : > { %v4940_v19 = vpop.permute.xlu0 %1381 }
 0x2ba   : > { %v4930_v60 = vpop.permute.xlu1 %1517 }
 0x2bb   : > { %6504 = vst [vmem:[#allocation13_spill] sm:$0xff] %v4930_v60 }
 0x2bc   : > { %v4944_v28 = vpop.permute.xlu0 %1385 }
 0x2be   : > { %v4934_v58 = vpop.permute.xlu1 %1791 }
 0x2bf   : > { %6506 = vst [vmem:[#allocation16_spill] sm:$0xff] %v4934_v58 }
 0x2c0   : > { %v4948_v21 = vpop.permute.xlu0 %1811 }
 0x2c1   : > { %6510 = vst [vmem:[#allocation20_spill] sm:$0xff] %v4948_v21 }
 0x2c2   : > { %v4938_v51 = vpop.permute.xlu1 %1823 }
 0x2c3   : > { %6507 = vst [vmem:[#allocation17_spill] sm:$0xff] %v4938_v51 }
 0x2c4   : > { %v4952_v35 = vpop.permute.xlu0 %1787 }
 0x2c5   : > { %6512 = vst [vmem:[#allocation22_spill] sm:$0xff] %v4952_v35 }
 0x2c6   : > { %v4942_v8 = vpop.permute.xlu1 %1883 }
 0x2c7   : > { %6508 = vst [vmem:[#allocation18_spill] sm:$0xff] %v4942_v8 }
 0x2c8   : > { %v4956_v34 = vpop.permute.xlu0 %1449 }
 0x2c9   : > { %6514 = vst [vmem:[#allocation24_spill] sm:$0xff] %v4956_v34 }
 0x2ca   : > { %v4946_v62 = vpop.permute.xlu1 %1887 }
 0x2cb   : > { %6509 = vst [vmem:[#allocation19_spill] sm:$0xff] %v4946_v62 }
 0x2cc   : > { %v4960_v46 = vpop.permute.xlu0 %1453 }
 0x2ce   : > { %v4950_v43 = vpop.permute.xlu1 %1493 }
 0x2cf   : > { %6511 = vst [vmem:[#allocation21_spill] sm:$0xff] %v4950_v43 }
 0x2d0   : > { %v4971_v62 = vpop.permute.xlu0 %1457 }
 0x2d2   : > { %v4954_v2 = vpop.permute.xlu1 %1553 }
 0x2d3   : > { %6513 = vst [vmem:[#allocation23_spill] sm:$0xff] %v4954_v2 }
 0x2d6   : > { %v4958_v33 = vpop.permute.xlu1 %1557 }
 0x2d7   : > { %6515 = vst [vmem:[#allocation25_spill] sm:$0xff] %v4958_v33 }
 0x2da   : > { %v4962_v29 = vpop.permute.xlu1 %1891 }
 0x2db   : > { %6516 = vst [vmem:[#allocation26_spill] sm:$0xff] %v4962_v29 }
 0x2de   : > { %v4975_v11 = vpop.permute.xlu1 %1919 }
 0x2df   : > { %6517 = vst [vmem:[#allocation27_spill] sm:$0xff] %v4975_v11 }
 0x364   : > { %v3696_v15 = vpop.f32.mrf.mxu0 }
 0x365   : > { %v4965_v26 = vadd.f32 %v3696_v15, %v4855_v32  ;;  %v4981_v15 = vpop.permute.xlu0 %1851  ;;  %v4987_v32 = vpop.permute.xlu1 %1561 }
 0x366   : > { %v1221_v6 = vpop.f32.mrf.mxu0  ;;  %6518 = vst [vmem:[#allocation28_spill] sm:$0xff] %v4981_v15  ;;  %6519 = vst [vmem:[#allocation29_spill] sm:$0xff] %v4987_v32 }
 0x367   : > { %1364 = vrot.lane.b32.xlu0 %v4965_v26, %s4134_s24  ;;  %1292 = vrot.lane.b32.xlu1 %v4965_v26, %s4132_s22  ;;  %v4973_v49 = vadd.f32 %v1221_v6, %v1082_v45 }
 0x368   : > { %v3697_v29 = vpop.f32.mrf.mxu0 }
 0x369   : > { %v4993_v6 = vpop.permute.xlu0 %1855  ;;  %v4995_v45 = vpop.permute.xlu1 %1895 }
 0x36a   : > { %6520 = vst [vmem:[#allocation30_spill] sm:$0xff] %v4993_v6  ;;  %6521 = vst [vmem:[#allocation31_spill] sm:$0xff] %v4995_v45  ;;  %v5009_v6 = vadd.f32 %v3697_v29, %v1097_v40  ;;  %v1224_v51 = vpop.f32.mrf.mxu0 }
 0x36b   : > { %1328 = vrot.lane.b32.xlu1 %v4965_v26, %s4133_s23  ;;  %1360 = vrot.lane.b32.xlu0 %v4973_v49, %s4134_s24  ;;  %v5024_v29 = vadd.f32 %v1224_v51, %v4837_v36 }
 0x36c   : > { %v3700_v51 = vpop.f32.mrf.mxu0 }
 0x36d   : > { %v5001_v15 = vpop.permute.xlu0 %1859  ;;  %v5007_v11 = vpop.permute.xlu1 %1955  ;;  %v5047_v58 = vadd.f32 %v3700_v51, %v4861_v9 }
 0x36e   : > { %6522 = vst [vmem:[#allocation32_spill] sm:$0xff] %v5001_v15  ;;  %6524 = vst [vmem:[#allocation33_spill] sm:$0xff] %v5007_v11  ;;  %v1237_v35 = vpop.f32.mrf.mxu0 }
 0x36f   : > { %1400 = vrot.lane.b32.xlu1 %v4965_v26, %s4135_s27  ;;  %1432 = vrot.lane.b32.xlu0 %v4973_v49, %s4136_s28  ;;  %6531 = vst [vmem:[#allocation40_spill] sm:$0xff] %v5047_v58  ;;  %v5058_v27 = vadd.f32 %v1237_v35, %v4858_v25 }
 0x371   : > { %v5015_v45 = vpop.permute.xlu0 %1521  ;;  %v5017_v15 = vpop.permute.xlu1 %1959  ;;  %6534 = vst [vmem:[#allocation43_spill] sm:$0xff] %v5058_v27 }
 0x372   : > { %6525 = vst [vmem:[#allocation34_spill] sm:$0xff] %v5015_v45  ;;  %6526 = vst [vmem:[#allocation35_spill] sm:$0xff] %v5017_v15 }
 0x373   : > { %1436 = vrot.lane.b32.xlu1 %v4965_v26, %s4136_s28  ;;  %1468 = vrot.lane.b32.xlu0 %v4973_v49, %s4137_s29 }
 0x375   : > { %v5026_v40 = vpop.permute.xlu0 %1525  ;;  %v5032_v11 = vpop.permute.xlu1 %1577 }
 0x376   : > { %6527 = vst [vmem:[#allocation36_spill] sm:$0xff] %v5026_v40  ;;  %6528 = vst [vmem:[#allocation37_spill] sm:$0xff] %v5032_v11 }
 0x377   : > { %1472 = vrot.lane.b32.xlu1 %v4965_v26, %s4137_s29  ;;  %1504 = vrot.lane.b32.xlu0 %v4973_v49, %s4138_s30 }
 0x379   : > { %v5038_v15 = vpop.permute.xlu0 %1529  ;;  %v5040_v36 = vpop.permute.xlu1 %1581 }
 0x37a   : > { %6529 = vst [vmem:[#allocation38_spill] sm:$0xff] %v5038_v15  ;;  %6530 = vst [vmem:[#allocation39_spill] sm:$0xff] %v5040_v36 }
 0x37b   : > { %1508 = vrot.lane.b32.xlu1 %v4965_v26, %s4138_s30  ;;  %1540 = vrot.lane.b32.xlu0 %v4973_v49, %s6523_s14 }
 0x37d   : > { %v5049_v61 = vpop.permute.xlu0 %1565  ;;  %v5051_v8 = vpop.permute.xlu1 %1963 }
 0x37e   : > { %6532 = vst [vmem:[#allocation41_spill] sm:$0xff] %v5049_v61  ;;  %6533 = vst [vmem:[#allocation42_spill] sm:$0xff] %v5051_v8 }
 0x37f   : > { %1544 = vrot.lane.b32.xlu1 %v4965_v26, %s6523_s14  ;;  %1402 = vrot.lane.b32.xlu0 %v5009_v6, %s4135_s27 }
 0x381   : > { %v5064_v9 = vpop.permute.xlu0 %1923  ;;  %v5066_v51 = vpop.permute.xlu1 %1991 }
 0x382   : > { %6535 = vst [vmem:[#allocation44_spill] sm:$0xff] %v5064_v9  ;;  %6536 = vst [vmem:[#allocation45_spill] sm:$0xff] %v5066_v51  ;;  %v3701_v51 = vpop.f32.mrf.mxu0 }
 0x383   : > { %1474 = vrot.lane.b32.xlu0 %v5009_v6, %s4137_s29  ;;  %1288 = vrot.lane.b32.xlu1 %v4973_v49, %s4132_s22 }
 0x385   : > { %v5072_v8 = vpop.permute.xlu0 %1927  ;;  %v5074_v25 = vpop.permute.xlu1 %1967 }
 0x386   : > { %6537 = vst [vmem:[#allocation46_spill] sm:$0xff] %v5072_v8  ;;  %6538 = vst [vmem:[#allocation47_spill] sm:$0xff] %v5074_v25 }
 0x387   : > { %1290 = vrot.lane.b32.xlu0 %v5024_v29, %s4132_s22  ;;  %1324 = vrot.lane.b32.xlu1 %v4973_v49, %s4133_s23 }
 0x389   : > { %v5084_v35 = vpop.permute.xlu0 %1931  ;;  %v5086_v9 = vpop.permute.xlu1 %1999 }
 0x38a   : > { %6539 = vst [vmem:[#allocation48_spill] sm:$0xff] %v5084_v35  ;;  %6540 = vst [vmem:[#allocation49_spill] sm:$0xff] %v5086_v9 }
 0x38b   : > { %1326 = vrot.lane.b32.xlu0 %v5024_v29, %s4133_s23  ;;  %1396 = vrot.lane.b32.xlu1 %v4973_v49, %s4135_s27 }
 0x38d   : > { %v5092_v8 = vpop.permute.xlu0 %2027  ;;  %v5094_v25 = vpop.permute.xlu1 %2031 }
 0x38e   : > { %6541 = vst [vmem:[#allocation50_spill] sm:$0xff] %v5092_v8  ;;  %6542 = vst [vmem:[#allocation51_spill] sm:$0xff] %v5094_v25  ;;  %v5109_v8 = vadd.f32 %v3701_v51, %v4912_v56 }
 0x38f   : > { %1398 = vrot.lane.b32.xlu0 %v5024_v29, %s4135_s27  ;;  %1294 = vrot.lane.b32.xlu1 %v5009_v6, %s4132_s22 }
 0x390   : > { %6545 = vst [vmem:[#allocation54_spill] sm:$0xff] %v5109_v8 }
 0x391   : > { %v5104_v9 = vpop.permute.xlu0 %1585  ;;  %v5106_v35 = vpop.permute.xlu1 %1601 }
 0x392   : > { %6543 = vst [vmem:[#allocation52_spill] sm:$0xff] %v5104_v9  ;;  %6544 = vst [vmem:[#allocation53_spill] sm:$0xff] %v5106_v35  ;;  %v1240_v35 = vpop.f32.mrf.mxu0 }
 0x393   : > { %1802 = vrot.lane.b32.xlu0 %v5047_v58, %s4132_s22  ;;  %1330 = vrot.lane.b32.xlu1 %v5009_v6, %s4133_s23 }
 0x395   : > { %v5115_v25 = vpop.permute.xlu0 %1589  ;;  %v5117_v44 = vpop.permute.xlu1 %1605 }
 0x396   : > { %6546 = vst [vmem:[#allocation55_spill] sm:$0xff] %v5115_v25  ;;  %6547 = vst [vmem:[#allocation56_spill] sm:$0xff] %v5117_v44 }
 0x397   : > { %1798 = vrot.lane.b32.xlu0 %v5058_v27, %s4132_s22  ;;  %1366 = vrot.lane.b32.xlu1 %v5009_v6, %s4134_s24 }
 0x399   : > { %v5127_v56 = vpop.permute.xlu0 %1995  ;;  %v5129_v51 = vpop.permute.xlu1 %2035 }
 0x39a   : > { %6548 = vst [vmem:[#allocation57_spill] sm:$0xff] %v5127_v56  ;;  %6549 = vst [vmem:[#allocation58_spill] sm:$0xff] %v5129_v51  ;;  %v5144_v56 = vadd.f32 %v1240_v35, %v4908_v31  ;;  %v6557_v31 = vmov 6  }
 0x39b   : > { %1870 = vrot.lane.b32.xlu0 %v5058_v27, %s4134_s24  ;;  %1438 = vrot.lane.b32.xlu1 %v5009_v6, %s4136_s28 }
 0x39c   : > { %6552 = vst [vmem:[#allocation61_spill] sm:$0xff] %v5144_v56 }
 0x39d   : > { %v5135_v21 = vpop.permute.xlu0 %2003  ;;  %v5137_v44 = vpop.permute.xlu1 %2063 }
 0x39e   : > { %6550 = vst [vmem:[#allocation59_spill] sm:$0xff] %v5135_v21  ;;  %6551 = vst [vmem:[#allocation60_spill] sm:$0xff] %v5137_v44 }
 0x39f   : > { %1906 = vrot.lane.b32.xlu0 %v5058_v27, %s4135_s27  ;;  %1510 = vrot.lane.b32.xlu1 %v5009_v6, %s4138_s30 }
 0x3a1   : > { %v5150_v51 = vpop.permute.xlu0 %2067  ;;  %v5152_v21 = vpop.permute.xlu1 %2039 }
 0x3a2   : > { %6553 = vst [vmem:[#allocation62_spill] sm:$0xff] %v5150_v51  ;;  %6554 = vst [vmem:[#allocation63_spill] sm:$0xff] %v5152_v21 }
 0x3a3   : > { %1942 = vrot.lane.b32.xlu0 %v5058_v27, %s4136_s28  ;;  %1546 = vrot.lane.b32.xlu1 %v5009_v6, %s6523_s14 }
 0x3a5   : > { %v5157_v44 = vpop.permute.xlu0 %1609  ;;  %v5159_v36 = vpop.permute.xlu1 %2071 }
 0x3a6   : > { %6555 = vst [vmem:[#allocation64_spill] sm:$0xff] %v5157_v44  ;;  %6556 = vst [vmem:[#allocation65_spill] sm:$0xff] %v5159_v36 }
 0x3a7   : > { %1978 = vrot.lane.b32.xlu0 %v5058_v27, %s4137_s29  ;;  %1362 = vrot.lane.b32.xlu1 %v5024_v29, %s4134_s24 }
 0x3a9   : > { %v5170_v35 = vpop.permute.xlu0 %1613  ;;  %v5172_v51 = vpop.permute.xlu1 %2075 }
 0x3aa   : > { %6558 = vst [vmem:[#allocation66_spill] sm:$0xff] %v5170_v35  ;;  %6559 = vst [vmem:[#allocation67_spill] sm:$0xff] %v5172_v51 }
 0x3ab   : > { %2014 = vrot.lane.b32.xlu0 %v5058_v27, %s4138_s30  ;;  %1434 = vrot.lane.b32.xlu1 %v5024_v29, %s4136_s28 }
 0x3af   : > { %2050 = vrot.lane.b32.xlu0 %v5058_v27, %s6523_s14  ;;  %1470 = vrot.lane.b32.xlu1 %v5024_v29, %s4137_s29 }
 0x3b3   : > { %1804 = vrot.lane.b32.xlu0 %v5109_v8, %s4132_s22  ;;  %1506 = vrot.lane.b32.xlu1 %v5024_v29, %s4138_s30 }
 0x3b7   : > { %1840 = vrot.lane.b32.xlu0 %v5109_v8, %s4133_s23  ;;  %1542 = vrot.lane.b32.xlu1 %v5024_v29, %s6523_s14 }
 0x3bb   : > { %1876 = vrot.lane.b32.xlu0 %v5109_v8, %s4134_s24  ;;  %1838 = vrot.lane.b32.xlu1 %v5047_v58, %s4133_s23 }
 0x3bf   : > { %1912 = vrot.lane.b32.xlu0 %v5109_v8, %s4135_s27  ;;  %1874 = vrot.lane.b32.xlu1 %v5047_v58, %s4134_s24 }
 0x3c3   : > { %1984 = vrot.lane.b32.xlu0 %v5109_v8, %s4137_s29  ;;  %1910 = vrot.lane.b32.xlu1 %v5047_v58, %s4135_s27 }
 0x3c7   : > { %1836 = vrot.lane.b32.xlu0 %v5144_v56, %s4133_s23  ;;  %1946 = vrot.lane.b32.xlu1 %v5047_v58, %s4136_s28 }
 0x3cb   : > { %2087 = vperm.xlu0 %3911, %v4813_v47   ;;  %1982 = vrot.lane.b32.xlu1 %v5047_v58, %s4137_s29 }
 0x3cf   : > { %2054 = vrot.lane.b32.xlu0 %v5047_v58, %s6523_s14  ;;  %2018 = vrot.lane.b32.xlu1 %v5047_v58, %s4138_s30 }
 0x3d0   : > { %3913 = vset.pattern.permute.xlu0 %v6557_v31 }
 0x3d3   : > { %2056 = vrot.lane.b32.xlu0 %v5109_v8, %s6523_s14  ;;  %1834 = vrot.lane.b32.xlu1 %v5058_v27, %s4133_s23 }
 0x3d7   : > { %1948 = vrot.lane.b32.xlu1 %v5109_v8, %s4136_s28  ;;  %2111 = vperm.xlu0 %3913, %v4813_v47  }
 0x3d9   : > { %v5177_v36 = vpop.permute.xlu0 %1364  ;;  %v1293_v21 = vpop.permute.xlu1 %1292 }
 0x3db   : > { %1800 = vrot.lane.b32.xlu1 %v5144_v56, %s4132_s22  ;;  %2123 = vperm.xlu0 %3913, %v4852_v63  }
 0x3dd   : > { %v1329_v58 = vpop.permute.xlu1 %1328  ;;  %v1361_v44 = vpop.permute.xlu0 %1360 }
 0x3df   : > { %2091 = vperm.xlu1 %3912, %v4826_v42  }
 0x3e1   : > { %v5183_v27 = vpop.permute.xlu1 %1400  ;;  %v1433_v51 = vpop.permute.xlu0 %1432 }
 0x3e3   : > { %2020 = vrot.lane.b32.xlu1 %v5109_v8, %s4138_s30 }
 0x3e5   : > { %v5187_v35 = vpop.permute.xlu1 %1436  ;;  %v5190_v47 = vpop.permute.xlu0 %1468 }
 0x3e7   : > { %2095 = vperm.xlu1 %3912, %v4845_v22  }
 0x3e9   : > { %v5192_v25 = vpop.permute.xlu1 %1472  ;;  %v5197_v33 = vpop.permute.xlu0 %1504 }
 0x3eb   : > { %2099 = vperm.xlu1 %3912, %v4852_v63  }
 0x3ed   : > { %v5195_v9 = vpop.permute.xlu1 %1508  ;;  %v5206_v11 = vpop.permute.xlu0 %1540 }
 0x3ee   : > { %6560 = vst [vmem:[#allocation68_spill] sm:$0xff] %v5195_v9  ;;  %6562 = vst [vmem:[#allocation70_spill] sm:$0xff] %v5206_v11 }
 0x3ef   : > { %1872 = vrot.lane.b32.xlu1 %v5144_v56, %s4134_s24 }
 0x3f0   : > { %3914 = vset.pattern.permute.xlu1 %v6557_v31 }
 0x3f1   : > { %v5202_v8 = vpop.permute.xlu1 %1544  ;;  %v1403_v61 = vpop.permute.xlu0 %1402 }
 0x3f2   : > { %6561 = vst [vmem:[#allocation69_spill] sm:$0xff] %v5202_v8  ;;  %v1284_v8 = vmul.f32 %v4865_v14, %v4973_v49 }
 0x3f3   : > { %1908 = vrot.lane.b32.xlu1 %v5144_v56, %s4135_s27 }
 0x3f5   : > { %v1289_v45 = vpop.permute.xlu1 %1288  ;;  %v5214_v31 = vpop.permute.xlu0 %1474 }
 0x3f6   : > { %6563 = vst [vmem:[#allocation71_spill] sm:$0xff] %v5214_v31  ;;  %v1296_v2 = vmul.f32 %v1289_v45, %v4569_v18  ;;  %v1368_v45 = vmul.f32 %v1361_v44, %v4579_v55 }
 0x3f7   : > { %1944 = vrot.lane.b32.xlu1 %v5144_v56, %s4136_s28 }
 0x3f8   : > { %v1316_v57 = vmul.f32 %v4870_v24, %v1296_v2 }
 0x3f9   : > { %v1325_v63 = vpop.permute.xlu1 %1324  ;;  %v1291_v34 = vpop.permute.xlu0 %1290 }
 0x3fa   : > { %v1332_v43 = vmul.f32 %v1325_v63, %v4572_v3  ;;  %v1320_v31 = vadd.f32 %v1316_v57, %v1284_v8  ;;  %v1334_v63 = vmul.f32 %v1329_v58, %v4572_v3  ;;  %v1286_v57 = vmul.f32 %v4920_v17, %v4965_v26 }
 0x3fb   : > { %1980 = vrot.lane.b32.xlu1 %v5144_v56, %s4137_s29  ;;  %v1297_v8 = vmul.f32 %v1291_v34, %v4569_v18  ;;  %v1406_v34 = vmul.f32 %v5183_v27, %v4582_v20 }
 0x3fc   : > { %v1352_v11 = vmul.f32 %v4924_v16, %v1332_v43  ;;  %v1388_v16 = vmul.f32 %v4890_v5, %v1368_v45  ;;  %v1354_v58 = vmul.f32 %v4888_v1, %v1334_v63 }
 0x3fd   : > { %v1397_v30 = vpop.permute.xlu1 %1396  ;;  %v1327_v60 = vpop.permute.xlu0 %1326 }
 0x3fe   : > { %v1356_v9 = vadd.f32 %v1352_v11, %v1320_v31  ;;  %v1404_v24 = vmul.f32 %v1397_v30, %v4582_v20  ;;  %v1287_v30 = vmul.f32 %v4885_v23, %v5009_v6  ;;  %v1333_v1 = vmul.f32 %v1327_v60, %v4572_v3 }
 0x3ff   : > { %2016 = vrot.lane.b32.xlu1 %v5144_v56, %s4138_s30  ;;  %v1476_v60 = vmul.f32 %v5190_v47, %v4598_v12 }
 0x400   : > { %v1424_v43 = vmul.f32 %v4894_v10, %v1404_v24  ;;  %v1407_v10 = vmul.f32 %v1403_v61, %v4582_v20  ;;  %v1353_v27 = vmul.f32 %v4881_v7, %v1333_v1  ;;  %v1478_v7 = vmul.f32 %v5192_v25, %v4598_v12  ;;  %v6569_v1 = vld [vmem:[#allocation69_spill] sm:$0xff] }
 0x401   : > { %v1295_v15 = vpop.permute.xlu1 %1294  ;;  %v1399_v11 = vpop.permute.xlu0 %1398 }
 0x402   : > { %v1427_v47 = vmul.f32 %v4906_v4, %v1407_v10 }
 0x403   : > { %2052 = vrot.lane.b32.xlu1 %v5144_v56, %s6523_s14  ;;  %v1298_v56 = vmul.f32 %v1293_v21, %v4569_v18 }
 0x405   : > { %v1331_v32 = vpop.permute.xlu1 %1330  ;;  %v1318_v14 = vmul.f32 %v4879_v48, %v1298_v56  ;;  %v1392_v48 = vadd.f32 %v1388_v16, %v1356_v9  ;;  %v5261_v45 = vpop.permute.xlu0 %1802  ;;  %v1496_v16 = vmul.f32 %v4910_v13, %v1476_v60  ;;  %v6565_v13 = vld [vmem:[#allocation71_spill] sm:$0xff]  ;;  %v6572_v60 = vld [vmem:[#allocation21_spill] sm:$0xff] }
 0x407   : > { %2115 = vperm.xlu1 %3914, %v4826_v42   ;;  %v1299_v42 = vmul.f32 %v1295_v15, %v4569_v18  ;;  %v1322_v15 = vadd.f32 %v1318_v14, %v1286_v57  ;;  %v1428_v9 = vadd.f32 %v1424_v43, %v1392_v48 }
 0x409   : > { %v1367_v40 = vpop.permute.xlu1 %1366  ;;  %v1319_v21 = vmul.f32 %v4928_v37, %v1299_v42  ;;  %v1370_v37 = vmul.f32 %v5177_v36, %v4579_v55  ;;  %v1358_v23 = vadd.f32 %v1354_v58, %v1322_v15  ;;  %v6564_v58 = vld [vmem:[#allocation68_spill] sm:$0xff] }
 0x40a   : > { %v1371_v44 = vmul.f32 %v1367_v40, %v4579_v55 }
 0x40b   : > { %2119 = vperm.xlu1 %3914, %v4845_v22   ;;  %v1335_v22 = vmul.f32 %v1331_v32, %v4572_v3  ;;  %v1440_v32 = vmul.f32 %v1433_v51, %v4586_v41  ;;  %v1323_v40 = vadd.f32 %v1319_v21, %v1287_v30  ;;  %v1390_v36 = vmul.f32 %v4940_v19, %v1370_v37  ;;  %v6567_v37 = vld [vmem:[#allocation13_spill] sm:$0xff] }
 0x40c   : > { %v1391_v56 = vmul.f32 %v4944_v28, %v1371_v44  ;;  %v1285_v28 = vmul.f32 %v4916_v50, %v5024_v29  ;;  %v1426_v19 = vmul.f32 %v4896_v52, %v1406_v34  ;;  %v1405_v52 = vmul.f32 %v1399_v11, %v4582_v20 }
 0x40d   : > { %v1439_v54 = vpop.permute.xlu1 %1438  ;;  %v1355_v5 = vmul.f32 %v4892_v53, %v1335_v22  ;;  %v1317_v53 = vmul.f32 %v4875_v39, %v1297_v8  ;;  %v1460_v51 = vmul.f32 %v4898_v0, %v1440_v32  ;;  %v1394_v24 = vadd.f32 %v1390_v36, %v1358_v23  ;;  %v5283_v8 = vpop.permute.xlu0 %1798  ;;  %v6570_v23 = vld [vmem:[#allocation15_spill] sm:$0xff]  ;;  %v6571_v36 = vld [vmem:[#allocation36_spill] sm:$0xff] }
 0x40e   : > { %v1443_v39 = vmul.f32 %v1439_v54, %v4586_v41  ;;  %v1442_v0 = vmul.f32 %v5187_v35, %v4586_v41  ;;  %v1512_v54 = vmul.f32 %v5197_v33, %v4605_v38  ;;  %v1479_v30 = vmul.f32 %v6565_v13, %v4598_v12 }
 0x40f   : > { %v1359_v31 = vadd.f32 %v1355_v5, %v1323_v40  ;;  %v1321_v22 = vadd.f32 %v1317_v53, %v1285_v28  ;;  %v1464_v50 = vadd.f32 %v1460_v51, %v1428_v9  ;;  %v1430_v25 = vadd.f32 %v1426_v19, %v1394_v24  ;;  %v6566_v5 = vld [vmem:[#allocation10_spill] sm:$0xff]  ;;  %v6574_v19 = vld [vmem:[#allocation23_spill] sm:$0xff] }
 0x410   : > { %v1463_v35 = vmul.f32 %v4971_v62, %v1443_v39  ;;  %v1462_v4 = vmul.f32 %v4960_v46, %v1442_v0  ;;  %v1498_v11 = vmul.f32 %v6566_v5, %v1478_v7  ;;  %v1532_v15 = vmul.f32 %v6567_v37, %v1512_v54  ;;  %v5291_v46 = vld [vmem:[%s6412_s1 + $0x8] ss:$0 sm:$0xff]  ;;  %v6568_v62 = vld [vmem:[#allocation70_spill] sm:$0xff]  ;;  %v6573_v39 = vld [vmem:[#allocation24_spill] sm:$0xff] }
 0x411   : > { %v5233_v2 = vpop.permute.xlu1 %1510  ;;  %v1395_v61 = vadd.f32 %v1391_v56, %v1359_v31  ;;  %v1357_v44 = vadd.f32 %v1353_v27, %v1321_v22  ;;  %v1500_v48 = vadd.f32 %v1496_v16, %v1464_v50  ;;  %v1548_v32 = vmul.f32 %v5291_v46, %v6568_v62  ;;  %v5307_v50 = vpop.permute.xlu0 %1870  ;;  %v6576_v16 = vld [vmem:[#allocation38_spill] sm:$0xff]  ;;  %v6577_v54 = vld [vmem:[#allocation7_spill] sm:$0xff]  ;;  %v6580_v5 = vld [vmem:[#allocation37_spill] sm:$0xff] }
 0x412   : > { %v1550_v40 = vmul.f32 %v5291_v46, %v6569_v1  ;;  %v1425_v34 = vmul.f32 %v6570_v23, %v1405_v52  ;;  %v1515_v53 = vmul.f32 %v5233_v2, %v4605_v38  ;;  %v1466_v31 = vadd.f32 %v1462_v4, %v1430_v25  ;;  %v6581_v62 = vld [vmem:[#allocation25_spill] sm:$0xff] }
 0x413   : > { %v1431_v57 = vadd.f32 %v1427_v47, %v1395_v61  ;;  %v1499_v28 = vmul.f32 %v6572_v60, %v1479_v30  ;;  %v1568_v0 = vmul.f32 %v6574_v19, %v1548_v32  ;;  %v6575_v47 = vld [vmem:[#allocation29_spill] sm:$0xff]  ;;  %v6587_v19 = vld [vmem:[#allocation64_spill] sm:$0xff] }
 0x414   : > { %v1502_v24 = vadd.f32 %v1498_v11, %v1466_v31  ;;  %v1570_v22 = vmul.f32 %v6575_v47, %v1550_v40  ;;  %v1535_v7 = vmul.f32 %v6576_v16, %v1515_v53  ;;  %v6582_v40 = vld [vmem:[#allocation52_spill] sm:$0xff]  ;;  %v6584_v53 = vld [vmem:[#allocation39_spill] sm:$0xff] }
 0x415   : > { %v1547_v17 = vpop.permute.xlu1 %1546  ;;  %v1467_v10 = vadd.f32 %v1463_v35, %v1431_v57  ;;  %v6578_v57 = vld [vmem:[#allocation41_spill] sm:$0xff] }
 0x416   : > { %v1551_v27 = vmul.f32 %v5291_v46, %v1547_v17 }
 0x418   : > { %v1571_v35 = vmul.f32 %v6578_v57, %v1551_v27  ;;  %v6585_v27 = vld [vmem:[#allocation53_spill] sm:$0xff] }
 0x419   : > { %v1363_v42 = vpop.permute.xlu1 %1362 }
 0x41a   : > { %v1369_v63 = vmul.f32 %v1363_v42, %v4579_v55  ;;  %v1536_v42 = vadd.f32 %v1532_v15, %v1500_v48 }
 0x41c   : > { %v1389_v14 = vmul.f32 %v4936_v59, %v1369_v63  ;;  %v1514_v59 = vmul.f32 %v6564_v58, %v4605_v38  ;;  %v1572_v17 = vadd.f32 %v1568_v0, %v1536_v42  ;;  %v6579_v58 = vld [vmem:[#allocation34_spill] sm:$0xff] }
 0x41d   : > { %v1435_v21 = vpop.permute.xlu1 %1434 }
 0x41e   : > { %v1393_v33 = vadd.f32 %v1389_v14, %v1357_v44  ;;  %v1441_v43 = vmul.f32 %v1435_v21, %v4586_v41  ;;  %v1534_v51 = vmul.f32 %v6571_v36, %v1514_v59  ;;  %v1503_v14 = vadd.f32 %v1499_v28, %v1467_v10 }
 0x41f   : > { %v1592_v11 = vadd.f32 %v6580_v5, %v1572_v17 }
 0x420   : > { %v1429_v61 = vadd.f32 %v1425_v34, %v1393_v33  ;;  %v1461_v63 = vmul.f32 %v6573_v39, %v1441_v43  ;;  %v1538_v52 = vadd.f32 %v1534_v51, %v1502_v24  ;;  %v1539_v25 = vadd.f32 %v1535_v7, %v1503_v14  ;;  %v5315_v43 = vpop.permute.xlu0 %1906  ;;  %v6583_v34 = vld [vmem:[#allocation55_spill] sm:$0xff]  ;;  %v6586_v39 = vld [vmem:[#allocation56_spill] sm:$0xff] }
 0x421   : > { %v1471_v56 = vpop.permute.xlu1 %1470  ;;  %v1596_v31 = vmax.f32 %v1592_v11, 0.0 }
 0x422   : > { %v1477_v9 = vmul.f32 %v1471_v56, %v4598_v12  ;;  %v1465_v4 = vadd.f32 %v1461_v63, %v1429_v61  ;;  %v1574_v30 = vadd.f32 %v1570_v22, %v1538_v52  ;;  %v1575_v37 = vadd.f32 %v1571_v35, %v1539_v25 }
 0x423   : > { %v1616_v61 = vmul.f32 %v6585_v27, %v1596_v31  ;;  %v6591_v31 = vld [vmem:[#allocation12_spill] sm:$0xff] }
 0x424   : > { %v1497_v21 = vmul.f32 %v6577_v54, %v1477_v9  ;;  %v1594_v56 = vadd.f32 %v6582_v40, %v1574_v30  ;;  %v1595_v10 = vadd.f32 %v6583_v34, %v1575_v37  ;;  %v5324_v36 = vpop.permute.xlu0 %1942  ;;  %v1806_v40 = vmul.f32 %v5283_v8, %v4569_v18 }
 0x425   : > { %v1507_v2 = vpop.permute.xlu1 %1506  ;;  %v1878_v8 = vmul.f32 %v5307_v50, %v4579_v55 }
 0x426   : > { %v1513_v44 = vmul.f32 %v1507_v2, %v4605_v38  ;;  %v1501_v48 = vadd.f32 %v1497_v21, %v1465_v4  ;;  %v1598_v60 = vmax.f32 %v1594_v56, 0.0  ;;  %v1599_v42 = vmax.f32 %v1595_v10, 0.0  ;;  %v6588_v2 = vld [vmem:[#allocation66_spill] sm:$0xff]  ;;  %v6589_v10 = vld [vmem:[#allocation20_spill] sm:$0xff] }
 0x428   : > { %v1533_v59 = vmul.f32 %v6579_v58, %v1513_v44  ;;  %v1618_v0 = vmul.f32 %v6587_v19, %v1598_v60  ;;  %v5333_v22 = vpop.permute.xlu0 %1978  ;;  %v1619_v14 = vmul.f32 %v6588_v2, %v1599_v42  ;;  %v6592_v42 = vld [vmem:[#allocation9_spill] sm:$0xff] }
 0x429   : > { %v1543_v13 = vpop.permute.xlu1 %1542 }
 0x42a   : > { %v1549_v33 = vmul.f32 %v5291_v46, %v1543_v13  ;;  %v1537_v15 = vadd.f32 %v1533_v59, %v1501_v48 }
 0x42c   : > { %v1569_v32 = vmul.f32 %v6581_v62, %v1549_v33  ;;  %v5338_v44 = vpop.permute.xlu0 %2014 }
 0x42d   : > { %v5319_v1 = vpop.permute.xlu1 %1838 }
 0x42e   : > { %v1573_v23 = vadd.f32 %v1569_v32, %v1537_v15 }
 0x430   : > { %v1593_v9 = vadd.f32 %v6584_v53, %v1573_v23  ;;  %v5342_v4 = vpop.permute.xlu0 %2050  ;;  %v1826_v53 = vmul.f32 %v6589_v10, %v1806_v40  ;;  %v6598_v40 = vld [vmem:[#allocation54_spill] sm:$0xff] }
 0x431   : > { %v5326_v51 = vpop.permute.xlu1 %1874 }
 0x432   : > { %v1597_v28 = vmax.f32 %v1593_v9, 0.0  ;;  %v6590_v9 = vld [vmem:[#allocation43_spill] sm:$0xff] }
 0x433   : > { %v1794_v60 = vmul.f32 %v6591_v31, %v6590_v9 }
 0x434   : > { %v1617_v63 = vmul.f32 %v6586_v39, %v1597_v28  ;;  %v1805_v25 = vpop.permute.xlu0 %1804  ;;  %v6593_v39 = vld [vmem:[#allocation14_spill] sm:$0xff] }
 0x435   : > { %v5330_v24 = vpop.permute.xlu1 %1910  ;;  %v1830_v19 = vadd.f32 %v1826_v53, %v1794_v60  ;;  %v6600_v53 = vld [vmem:[#allocation17_spill] sm:$0xff] }
 0x436   : > { %v1620_v47 = vadd.f32 %v1617_v63, %v1616_v61  ;;  %v1641_v63 = vsub.s32 4, %v6593_v39  ;;  %v6601_v39 = vld [vmem:[#allocation27_spill] sm:$0xff] }
 0x438   : > { %v1621_v16 = vadd.f32 %v1620_v47, %v1618_v0  ;;  %v1841_v33 = vpop.permute.xlu0 %1840  ;;  %v1808_v0 = vmul.f32 %v5261_v45, %v4569_v18  ;;  %v1809_v47 = vmul.f32 %v1805_v25, %v4569_v18  ;;  %v1914_v45 = vmul.f32 %v5315_v43, %v4582_v20 }
 0x439   : > { %v5336_v7 = vpop.permute.xlu1 %1946 }
 0x43a   : > { %v1622_v54 = vadd.f32 %v1621_v16, %v1619_v14  ;;  %v4100_v16 = vld [vmem:[%s6412_s1] sm:$0xff]  ;;  %v1829_v31 = vmul.f32 %v6600_v53, %v1809_v47 }
 0x43c   : > { %v1623_v21 = vrot.slane %v1622_v54, 4  ;;  %v1877_v11 = vpop.permute.xlu0 %1876 }
 0x43d   : > { %v5340_v17 = vpop.permute.xlu1 %1982  ;;  %v1881_v60 = vmul.f32 %v1877_v11, %v4579_v55 }
 0x43e   : > { %v1624_v52 = vadd.f32 %v1623_v21, %v1622_v54  ;;  %v5374_v54 = vrot.slane %v4100_v16, %v1641_v63  ;;  %v1934_v63 = vmul.f32 %v6601_v39, %v1914_v45  ;;  %v6605_v45 = vld [vmem:[#allocation31_spill] sm:$0xff]  ;;  %v6610_v39 = vld [vmem:[#allocation50_spill] sm:$0xff] }
 0x440   : > { %v1625_v57 = vrot.slane %v1624_v52, 2  ;;  %v1913_v56 = vpop.permute.xlu0 %1912 }
 0x441   : > { %v5344_v59 = vpop.permute.xlu1 %2018 }
 0x442   : > { %v1626_v35 = vadd.f32 %v1625_v57, %v1624_v52  ;;  %v6594_v52 = vld [vmem:[#allocation40_spill] sm:$0xff]  ;;  %v6595_v57 = vld [vmem:[#allocation22_spill] sm:$0xff] }
 0x444   : > { %v1627_v58 = vrot.slane %v1626_v35, 1  ;;  %v5358_v28 = vpop.permute.xlu0 %1984 }
 0x445   : > { %v1835_v48 = vpop.permute.xlu1 %1834 }
 0x446   : > { %v1628_v13 = vadd.f32 %v1627_v58, %v1626_v35  ;;  %v1842_v23 = vmul.f32 %v1835_v48, %v4572_v3  ;;  %v1796_v35 = vmul.f32 %v6595_v57, %v6594_v52  ;;  %v6596_v58 = vld [vmem:[#allocation18_spill] sm:$0xff]  ;;  %v1845_v48 = vmul.f32 %v1841_v33, %v4572_v3  ;;  %v6604_v57 = vld [vmem:[#allocation32_spill] sm:$0xff] }
 0x447   : > { %v1898_v50 = vmul.f32 %v6596_v58, %v1878_v8  ;;  %v6602_v8 = vld [vmem:[#allocation61_spill] sm:$0xff] }
 0x448   : > { %v3571_v30 = vmul.f32 -1.442695, %v1628_v13  ;;  %v1862_v27 = vmul.f32 %v6592_v42, %v1842_v23  ;;  %v1837_v13 = vpop.permute.xlu0 %1836  ;;  %v6599_v23 = vld [vmem:[#allocation16_spill] sm:$0xff]  ;;  %v1865_v58 = vmul.f32 %v6604_v57, %v1845_v48  ;;  %v6606_v48 = vld [vmem:[#allocation33_spill] sm:$0xff] }
 0x449   : > { %v5346_v5 = vpop.permute.xlu1 %1948  ;;  %v1797_v10 = vmul.f32 %v6599_v23, %v6598_v40 }
 0x44a   : > { %4017 = vpow2.f32 %v3571_v30  ;;  %v1866_v2 = vadd.f32 %v1862_v27, %v1830_v19  ;;  %v6597_v30 = vld [vmem:[#allocation8_spill] sm:$0xff]  ;;  %v1950_v19 = vmul.f32 %v5324_v36, %v4586_v41  ;;  %v2022_v36 = vmul.f32 %v5338_v44, %v4605_v38 }
 0x44b   : > { %v1828_v25 = vmul.f32 %v6597_v30, %v1808_v0  ;;  %v6603_v0 = vld [vmem:[#allocation3_spill] sm:$0xff]  ;;  %v1901_v30 = vmul.f32 %v6605_v45, %v1881_v60  ;;  %v1953_v44 = vmul.f32 %v5346_v5, %v4586_v41  ;;  %v6608_v60 = vld [vmem:[#allocation48_spill] sm:$0xff]  ;;  %v2058_v5 = vmul.f32 %v5291_v46, %v5342_v4 }
 0x44c   : > { %v1902_v42 = vadd.f32 %v1898_v50, %v1866_v2  ;;  %v5406_v11 = vpop.permute.xlu0 %2087  ;;  %v1795_v47 = vmul.f32 %v6603_v0, %v6602_v8  ;;  %v1970_v23 = vmul.f32 %v6606_v48, %v1950_v19  ;;  %v6614_v48 = vld [vmem:[#allocation28_spill] sm:$0xff] }
 0x44d   : > { %v1801_v37 = vpop.permute.xlu1 %1800  ;;  %v1832_v16 = vadd.f32 %v1828_v25, %v1796_v35 }
 0x44e   : > { %v1807_v2 = vmul.f32 %v1801_v37, %v4569_v18  ;;  %v1938_v50 = vadd.f32 %v1934_v63, %v1902_v42  ;;  %v1844_v37 = vmul.f32 %v5319_v1, %v4572_v3  ;;  %v1843_v42 = vmul.f32 %v1837_v13, %v4572_v3 }
 0x44f   : > { %v2042_v63 = vmul.f32 %v6610_v39, %v2022_v36 }
 0x450   : > { %v1974_v19 = vadd.f32 %v1970_v23, %v1938_v50  ;;  %v2055_v0 = vpop.permute.xlu0 %2054  ;;  %v1863_v4 = vmul.f32 %v6614_v48, %v1843_v42  ;;  %v6615_v23 = vld [vmem:[#allocation19_spill] sm:$0xff] }
 0x454   : > { %v2057_v42 = vpop.permute.xlu0 %2056 }
 0x457   : > { %v4018_v15 = vpop.eup %4017 }
 0x458   : > { %v1632_v62 = vadd.f32 1.0, %v4018_v15 }
 0x45a   : > { %4019 = vrcp.f32 %v1632_v62  ;;  %v5348_v32 = vpop.permute.xlu1 %2091 }
 0x45e   : > { %v5353_v34 = vpop.permute.xlu1 %2020 }
 0x462   : > { %v5361_v61 = vpop.permute.xlu1 %2095 }
 0x466   : > { %v5369_v14 = vpop.permute.xlu1 %2099 }
 0x467   : > { %v4020_v21 = vpop.eup %4019 }
 0x468   : > { %v5384_v15 = vmul.f32 %v4020_v21, %v5009_v6  ;;  %v5387_v62 = vmul.f32 %v4020_v21, %v4965_v26  ;;  %v5398_v6 = vmul.f32 %v4020_v21, %v5024_v29  ;;  %v5401_v26 = vmul.f32 %v4020_v21, %v4973_v49 }
 0x469   : > { %v1917_v29 = vmul.f32 %v1913_v56, %v4582_v20  ;;  %v1986_v49 = vmul.f32 %v5333_v22, %v4598_v12  ;;  %v1833_v21 = vadd.f32 %v1829_v31, %v1797_v10  ;;  %v1880_v22 = vmul.f32 %v5326_v51, %v4579_v55  ;;  %v6607_v10 = vld [vmem:[#allocation6_spill] sm:$0xff] }
 0x46a   : > { %v1873_v43 = vpop.permute.xlu1 %1872  ;;  %v1646_v27 = vmul.f32 %v5374_v54, %v5384_v15  ;;  %v1645_v33 = vmul.f32 %v5374_v54, %v5387_v62  ;;  %v1644_v25 = vmul.f32 %v5374_v54, %v5398_v6  ;;  %v1643_v56 = vmul.f32 %v5374_v54, %v5401_v26 }
 0x46b   : > { %v1827_v53 = vmul.f32 %v6607_v10, %v1807_v2  ;;  %v1869_v31 = vadd.f32 %v1865_v58, %v1833_v21  ;;  %v1937_v1 = vmul.f32 %v6608_v60, %v1917_v29  ;;  %v1879_v51 = vmul.f32 %v1873_v43, %v4579_v55  ;;  %v6611_v2 = vld [vmem:[#allocation30_spill] sm:$0xff] }
 0x46c   : > { %1653 = vadd.xlane.f32.xlu0 %v1646_v27  ;;  %1651 = vadd.xlane.f32.xlu1 %v1645_v33  ;;  %v6609_v27 = vld [vmem:[#allocation45_spill] sm:$0xff]  ;;  %v1864_v58 = vmul.f32 %v6611_v2, %v1844_v37  ;;  %v1916_v29 = vmul.f32 %v5330_v24, %v4582_v20  ;;  %v6612_v21 = vld [vmem:[#allocation26_spill] sm:$0xff]  ;;  %v1989_v43 = vmul.f32 %v5358_v28, %v4598_v12 }
 0x46d   : > { %v2006_v33 = vmul.f32 %v6609_v27, %v1986_v49  ;;  %v1905_v57 = vadd.f32 %v1901_v30, %v1869_v31  ;;  %v1900_v45 = vmul.f32 %v6612_v21, %v1880_v22  ;;  %v1952_v30 = vmul.f32 %v5336_v7, %v4586_v41  ;;  %v6618_v27 = vld [vmem:[#allocation44_spill] sm:$0xff] }
 0x46e   : > { %v1909_v35 = vpop.permute.xlu1 %1908  ;;  %v2025_v24 = vmul.f32 %v5353_v34, %v4605_v38  ;;  %v1899_v22 = vmul.f32 %v6615_v23, %v1879_v51  ;;  %v1988_v28 = vmul.f32 %v5340_v17, %v4598_v12 }
 0x46f   : > { %v1915_v36 = vmul.f32 %v1909_v35, %v4582_v20  ;;  %v1941_v50 = vadd.f32 %v1937_v1, %v1905_v57  ;;  %v2010_v37 = vadd.f32 %v2006_v33, %v1974_v19  ;;  %v1868_v35 = vadd.f32 %v1864_v58, %v1832_v16  ;;  %v6619_v19 = vld [vmem:[#allocation59_spill] sm:$0xff]  ;;  %v6620_v57 = vld [vmem:[#allocation42_spill] sm:$0xff] }
 0x470   : > { %1649 = vadd.xlane.f32.xlu1 %v1644_v25  ;;  %1647 = vadd.xlane.f32.xlu0 %v1643_v56  ;;  %v6613_v25 = vld [vmem:[#allocation47_spill] sm:$0xff]  ;;  %v1831_v56 = vadd.f32 %v1827_v53, %v1795_v47  ;;  %v6616_v47 = vld [vmem:[#allocation60_spill] sm:$0xff]  ;;  %v6617_v53 = vld [vmem:[#allocation46_spill] sm:$0xff]  ;;  %v2009_v51 = vmul.f32 %v6619_v19, %v1989_v43  ;;  %v1972_v2 = vmul.f32 %v6620_v57, %v1952_v30 }
 0x471   : > { %v1973_v49 = vmul.f32 %v6613_v25, %v1953_v44  ;;  %v2078_v10 = vmul.f32 %v6616_v47, %v2058_v5  ;;  %v1936_v31 = vmul.f32 %v6617_v53, %v1916_v29  ;;  %v1935_v33 = vmul.f32 %v6618_v27, %v1915_v36  ;;  %v6621_v58 = vld [vmem:[#allocation63_spill] sm:$0xff]  ;;  %v3991_v27 = vld [vmem:[%s6419_s8] sm:$0xff]  }
 0x472   : > { %v1945_v13 = vpop.permute.xlu1 %1944  ;;  %v1867_v7 = vadd.f32 %v1863_v4, %v1831_v56  ;;  %v1904_v39 = vadd.f32 %v1900_v45, %v1868_v35  ;;  %v2024_v16 = vmul.f32 %v5344_v59, %v4605_v38  ;;  %v2046_v5 = vadd.f32 %v2042_v63, %v2010_v37  ;;  %v6624_v4 = vld [vmem:[#allocation57_spill] sm:$0xff]  ;;  %v6625_v37 = vld [vmem:[#allocation58_spill] sm:$0xff]  ;;  %v6626_v47 = vld [vmem:[#allocation51_spill] sm:$0xff]  ;;  %3710 = vmatprep.mubr.msk.bf16.mxu1 %vm506_vm0, %v3991_v27 }
 0x473   : > { %v1951_v44 = vmul.f32 %v1945_v13, %v4586_v41  ;;  %v1977_v1 = vadd.f32 %v1973_v49, %v1941_v50  ;;  %v2045_v29 = vmul.f32 %v6621_v58, %v2025_v24  ;;  %v6622_v13 = vld [vmem:[#allocation35_spill] sm:$0xff]  ;;  %v6623_v49 = vld [vmem:[#allocation49_spill] sm:$0xff]  ;;  %v2060_v36 = vmul.f32 %v5291_v46, %v2055_v0  ;;  %v6629_v19 = vld [vmem:[#allocation62_spill] sm:$0xff] }
 0x474   : > { %v1903_v17 = vadd.f32 %v1899_v22, %v1867_v7  ;;  %v1940_v25 = vadd.f32 %v1936_v31, %v1904_v39  ;;  %v2008_v56 = vmul.f32 %v6623_v49, %v1988_v28  ;;  %v2061_v45 = vmul.f32 %v5291_v46, %v2057_v42  ;;  %v6627_v0 = vld [vmem:[#allocation65_spill] sm:$0xff]  ;;  %v5537_v27 = vld [vmem:[%s6413_s2] sm:$0xff] }
 0x475   : > { %v1971_v21 = vmul.f32 %v6622_v13, %v1951_v44  ;;  %v2013_v43 = vadd.f32 %v2009_v51, %v1977_v1  ;;  %v2044_v24 = vmul.f32 %v6625_v37, %v2024_v16  ;;  %v2082_v23 = vadd.f32 %v2078_v10, %v2046_v5 }
 0x476   : > { %v1981_v60 = vpop.permute.xlu1 %1980  ;;  %v1939_v48 = vadd.f32 %v1935_v33, %v1903_v17  ;;  %v1976_v63 = vadd.f32 %v1972_v2, %v1940_v25  ;;  %v2080_v28 = vmul.f32 %v6627_v0, %v2060_v36  ;;  %v4157_v5 = vmov 31  }
 0x477   : > { %v1987_v34 = vmul.f32 %v1981_v60, %v4598_v12  ;;  %v2049_v22 = vadd.f32 %v2045_v29, %v2013_v43  ;;  %v6628_v60 = vld [vmem:[#allocation67_spill] sm:$0xff]  ;;  %v2102_v10 = vadd.f32 %v5406_v11, %v2082_v23  ;;  %3915 = vset.pattern.permute.xlu1 %v4157_v5  ;;  %3916 = vset.pattern.permute.xlu0 %v4157_v5  ;;  %v2112_v11 = vpop.permute.xlu0 %2111 }
 0x478   : > { %v1975_v44 = vadd.f32 %v1971_v21, %v1939_v48  ;;  %v2012_v53 = vadd.f32 %v2008_v56, %v1976_v63  ;;  %v2081_v42 = vmul.f32 %v6628_v60, %v2061_v45  ;;  %v5506_v60 = vld [vmem:[%s6413_s2 + $0x10] sm:$0xff] }
 0x479   : > { %v2007_v30 = vmul.f32 %v6624_v4, %v1987_v34 }
 0x47a   : > { %v2017_v50 = vpop.permute.xlu1 %2016  ;;  %v2048_v33 = vadd.f32 %v2044_v24, %v2012_v53  ;;  %v2085_v34 = vadd.f32 %v2081_v42, %v2049_v22  ;;  %v5521_v42 = vld [vmem:[%s6413_s2 + $0x18] sm:$0xff] }
 0x47b   : > { %v2023_v59 = vmul.f32 %v2017_v50, %v4605_v38  ;;  %v2011_v1 = vadd.f32 %v2007_v30, %v1975_v44  ;;  %v2124_v45 = vpop.permute.xlu0 %2123 }
 0x47c   : > { %v2084_v2 = vadd.f32 %v2080_v28, %v2048_v33  ;;  %v2105_v29 = vadd.f32 %v5369_v14, %v2085_v34  ;;  %v4160_v33 = vmov 29  }
 0x47d   : > { %v2043_v35 = vmul.f32 %v6626_v47, %v2023_v59 }
 0x47e   : > { %v2053_v31 = vpop.permute.xlu1 %2052  ;;  %v2104_v58 = vadd.f32 %v5361_v61, %v2084_v2  ;;  %v2109_v56 = vmax.f32 %v2105_v29, 0.0 }
 0x47f   : > { %v2059_v7 = vmul.f32 %v5291_v46, %v2053_v31  ;;  %v2047_v39 = vadd.f32 %v2043_v35, %v2011_v1  ;;  %v2106_v46 = vmax.f32 %v2102_v10, 0.0  ;;  %v5528_v1 = vld [vmem:[%s6413_s2 + $0x8] sm:$0xff] }
 0x480   : > { %v2108_v49 = vmax.f32 %v2104_v58, 0.0  ;;  %v2129_v48 = vmul.f32 %v2124_v45, %v2109_v56  ;;  %v4162_v58 = vmov 32   ;;  %v5572_v56 = vld [vmem:[%s6414_s3 + $0x10] sm:$0xff]  ;;  %v4167_v45 = vmov 36  }
 0x481   : > { %v2079_v51 = vmul.f32 %v6629_v19, %v2059_v7  ;;  %v2126_v25 = vmul.f32 %v2112_v11, %v2106_v46  ;;  %v4159_v7 = vmov 28   ;;  %v3993_v11 = vld [vmem:[%s6420_s9] sm:$0xff]  }
 0x482   : > { %v2116_v57 = vpop.permute.xlu1 %2115 }
 0x483   : > { %v2083_v16 = vadd.f32 %v2079_v51, %v2047_v39  ;;  %v4161_v39 = vmov 30  }
 0x485   : > { %v2103_v17 = vadd.f32 %v5348_v32, %v2083_v16 }
 0x486   : > { %v2120_v21 = vpop.permute.xlu1 %2119 }
 0x487   : > { %v2107_v13 = vmax.f32 %v2103_v17, 0.0  ;;  %v2128_v43 = vmul.f32 %v2120_v21, %v2108_v49  ;;  %v3992_v17 = vld [vmem:[%s6419_s8 + $0x8] sm:$0xff]   ;;  %v4164_v21 = vmov 35   ;;  %v6630_v49 = vmov 7  }
 0x489   : > { %v2127_v36 = vmul.f32 %v2116_v57, %v2107_v13  ;;  %v4163_v13 = vmov 33  }
 0x48b   : > { %v2130_v50 = vadd.f32 %v2127_v36, %v2126_v25  ;;  %v4165_v25 = vmov 34   ;;  %v4166_v36 = vmov 40  }
 0x48d   : > { %v2131_v4 = vadd.f32 %v2130_v50, %v2128_v43  ;;  %v4168_v50 = vmov 37   ;;  %v1077_v43 = vld [vmem:[%s6418_s7 + $0x50] sm:$0xff] }
 0x48f   : > { %v2132_v30 = vadd.f32 %v2131_v4, %v2129_v48  ;;  %v6631_v48 = vmov 0   ;;  %v5597_v4 = vld [vmem:[%s6414_s3 + $0x18] sm:$0xff] }
 0x491   : > { %v2133_v59 = vrot.slane %v2132_v30, 4 }
 0x493   : > { %v2134_v63 = vadd.f32 %v2133_v59, %v2132_v30  ;;  %v1075_v30 = vld [vmem:[%s6418_s7 + $0x40] sm:$0xff] }
 0x495   : > { %v2135_v61 = vrot.slane %v2134_v63, 2 }
 0x497   : > { %v2136_v37 = vadd.f32 %v2135_v61, %v2134_v63 }
 0x499   : > { %v2137_v14 = vrot.slane %v2136_v37, 1 }
 0x49b   : > { %v2138_v24 = vadd.f32 %v2137_v14, %v2136_v37 }
 0x49d   : > { %v3580_v32 = vmul.f32 -1.442695, %v2138_v24 }
 0x49f   : > { %4021 = vpow2.f32 %v3580_v32 }
 0x4ac   : > { %v4022_v23 = vpop.eup %4021 }
 0x4ad   : > { %v2142_v22 = vadd.f32 1.0, %v4022_v23 }
 0x4af   : > { %4023 = vrcp.f32 %v2142_v22 }
 0x4bc   : > { %v4024_v44 = vpop.eup %4023 }
 0x4bd   : > { %v5484_v47 = vmul.f32 %v4024_v44, %v6598_v40  ;;  %v5487_v35 = vmul.f32 %v4024_v44, %v6594_v52  ;;  %v5494_v0 = vmul.f32 %v4024_v44, %v6602_v8  ;;  %v5497_v28 = vmul.f32 %v4024_v44, %v6590_v9  ;;  %v3995_v9 = vld [vmem:[%s6417_s6 + $0x20] sm:$0xff]   ;;  %v3996_v8 = vld [vmem:[%s6417_s6 + $0x28] sm:$0xff]  }
 0x4be   : > { %3702 = vmatprep.mubr.msk.bf16.mxu0 %vm506_vm0, %v3995_v9  ;;  %v5608_v44 = vld [vmem:[%s6414_s3] sm:$0xff]  ;;  %v1076_v9 = vld [vmem:[%s6418_s7 + $0x48] sm:$0xff] }
 0x4bf   : > { %v2152_v53 = vmul.f32 %v5484_v47, %v5374_v54  ;;  %v2151_v31 = vmul.f32 %v5487_v35, %v5374_v54  ;;  %v2150_v40 = vmul.f32 %v5494_v0, %v5374_v54  ;;  %v2149_v52 = vmul.f32 %v5497_v28, %v5374_v54  ;;  %3703 = vmatmul.mubr.msk.bf16.gmra.mxu0 %vm506_vm0, %v3996_v8 }
 0x4c0   : > { %v4158_v54 = vmov 27   ;;  %6632 = vst [vmem:[#allocation68_spill] sm:$0xff] %v5608_v44  ;;  %v4169_v8 = vmov 38  }
 0x4c1   : > { %2159 = vadd.xlane.f32.xlu1 %v2152_v53  ;;  %2157 = vadd.xlane.f32.xlu0 %v2151_v31  ;;  %v3994_v31 = vld [vmem:[%s6420_s9 + $0x8] sm:$0xff]  }
 0x4c5   : > { %2155 = vadd.xlane.f32.xlu1 %v2150_v40  ;;  %2153 = vadd.xlane.f32.xlu0 %v2149_v52  ;;  %v5617_v40 = vld [vmem:[%s6414_s3 + $0x8] sm:$0xff]  ;;  %v1078_v52 = vld [vmem:[%s6418_s7 + $0x58] sm:$0xff] }
 0x4c6   : > { %6633 = vst [vmem:[#allocation71_spill] sm:$0xff] %v5617_v40 }
 0x4d6   : > { %2297 = vperm.xlu1 %3915, %v5506_v60  }
 0x4da   : > { %3917 = vset.pattern.permute.xlu1 %v4158_v54 }
 0x4db   : > { %2329 = vperm.xlu1 %3917, %v5506_v60   ;;  %2301 = vperm.xlu0 %3916, %v5521_v42  }
 0x4df   : > { %2333 = vperm.xlu1 %3917, %v5521_v42   ;;  %2293 = vperm.xlu0 %3916, %v5528_v1  }
 0x4e3   : > { %3918 = vset.pattern.permute.xlu1 %v4159_v7  ;;  %3920 = vset.pattern.permute.xlu0 %v4159_v7 }
 0x4e4   : > { %2369 = vperm.xlu1 %3918, %v5521_v42   ;;  %2365 = vperm.xlu0 %3920, %v5506_v60  }
 0x4e8   : > { %3919 = vset.pattern.permute.xlu1 %v4157_v5  ;;  %2361 = vperm.xlu0 %3920, %v5528_v1  }
 0x4e9   : > { %2289 = vperm.xlu1 %3919, %v5537_v27  }
 0x4ec   : > { %3924 = vset.pattern.permute.xlu0 %v4160_v33 }
 0x4ed   : > { %3921 = vset.pattern.permute.xlu1 %v4158_v54  ;;  %2401 = vperm.xlu0 %3924, %v5506_v60   ;;  %v4170_v54 = vmov 39  }
 0x4ee   : > { %2321 = vperm.xlu1 %3921, %v5537_v27  }
 0x4f1   : > { %2393 = vperm.xlu0 %3924, %v5537_v27  }
 0x4f2   : > { %2325 = vperm.xlu1 %3921, %v5528_v1  }
 0x4f5   : > { %v1654_v10 = vpop.xlane.xlu0 %1653  ;;  %v1652_v34 = vpop.xlane.xlu1 %1651  ;;  %3928 = vset.pattern.permute.xlu0 %v4161_v39 }
 0x4f6   : > { %v1658_v19 = vmul.f32 0.0625, %v1654_v10  ;;  %v1657_v51 = vmul.f32 0.0625, %v1652_v34  ;;  %3922 = vset.pattern.permute.xlu1 %v4160_v33  ;;  %2429 = vperm.xlu0 %3928, %v5537_v27  }
 0x4f7   : > { %2405 = vperm.xlu1 %3922, %v5521_v42  }
 0x4f8   : > { %v1664_v57 = vpack.c.bf16 %v1658_v19, %v1657_v51 }
 0x4f9   : > { %v1650_v2 = vpop.xlane.xlu1 %1649  ;;  %v1648_v16 = vpop.xlane.xlu0 %1647 }
 0x4fa   : > { %v1656_v5 = vmul.f32 0.0625, %v1650_v2  ;;  %v1655_v46 = vmul.f32 0.0625, %v1648_v16  ;;  %3706 = vmatprep.subr.bf16.mxu1 %v1664_v57  ;;  %3929 = vset.pattern.permute.xlu0 %v4162_v58 }
 0x4fb   : > { %3707 = vmatpush3.bf16.msra.mxu1 %v1664_v57  ;;  %3923 = vset.pattern.permute.xlu1 %v4159_v7  ;;  %v4171_v7 = vmov 41  }
 0x4fc   : > { %v1663_v29 = vpack.c.bf16 %v1656_v5, %v1655_v46  ;;  %2357 = vperm.xlu1 %3923, %v5537_v27   ;;  %2477 = vperm.xlu0 %3929, %v5521_v42  }
 0x4fe   : > { %3708 = vmatprep.subr.bf16.mxu1 %v1663_v29 }
 0x4ff   : > { %3709 = vmatpush3.bf16.msra.mxu1 %v1663_v29 }
 0x500   : > { %3925 = vset.pattern.permute.xlu1 %v4161_v39  ;;  %2465 = vperm.xlu0 %3929, %v5537_v27  }
 0x501   : > { %2437 = vperm.xlu1 %3925, %v5506_v60  }
 0x502   : > { %3711 = vmatmul.mubr.msk.bf16.vlgmr.msra.gmra.mxu1 %vm506_vm0, %v3992_v17 }
 0x503   : > { %3718 = vmatprep.mubr.msk.bf16.mxu1 %vm506_vm0, %v3993_v11 }
 0x504   : > { %3932 = vset.pattern.permute.xlu0 %v4163_v13 }
 0x505   : > { %2441 = vperm.xlu1 %3925, %v5521_v42   ;;  %2513 = vperm.xlu0 %3932, %v5521_v42  }
 0x509   : > { %3926 = vset.pattern.permute.xlu1 %v4160_v33  ;;  %2501 = vperm.xlu0 %3932, %v5537_v27   ;;  %v6460_v33 = vmov 42  }
 0x50a   : > { %2397 = vperm.xlu1 %3926, %v5528_v1  }
 0x50d   : > { %3937 = vset.pattern.permute.xlu0 %v4164_v21 }
 0x50e   : > { %3927 = vset.pattern.permute.xlu1 %v4162_v58  ;;  %2585 = vperm.xlu0 %3937, %v5521_v42  }
 0x50f   : > { %2473 = vperm.xlu1 %3927, %v5506_v60  }
 0x512   : > { %3938 = vset.pattern.permute.xlu0 %v4165_v25 }
 0x513   : > { %3930 = vset.pattern.permute.xlu1 %v4161_v39  ;;  %2549 = vperm.xlu0 %3938, %v5521_v42  }
 0x514   : > { %2433 = vperm.xlu1 %3930, %v5528_v1  }
 0x517   : > { %2537 = vperm.xlu0 %3938, %v5537_v27  }
 0x518   : > { %3931 = vset.pattern.permute.xlu1 %v4163_v13 }
 0x519   : > { %2509 = vperm.xlu1 %3931, %v5506_v60  }
 0x51b   : > { %3942 = vset.pattern.permute.xlu0 %v6630_v49 }
 0x51c   : > { %2605 = vperm.xlu0 %3942, %v5572_v56  }
 0x51d   : > { %3933 = vset.pattern.permute.xlu1 %v4162_v58 }
 0x51e   : > { %2469 = vperm.xlu1 %3933, %v5528_v1  }
 0x520   : > { %3946 = vset.pattern.permute.xlu0 %v4166_v36 }
 0x521   : > { %2629 = vperm.xlu0 %3946, %v5506_v60  }
 0x522   : > { %3934 = vset.pattern.permute.xlu1 %v4165_v25 }
 0x523   : > { %2545 = vperm.xlu1 %3934, %v5506_v60  }
 0x525   : > { %2621 = vperm.xlu0 %3946, %v5537_v27  }
 0x527   : > { %3935 = vset.pattern.permute.xlu1 %v4163_v13 }
 0x528   : > { %2505 = vperm.xlu1 %3935, %v5528_v1  }
 0x529   : > { %3950 = vset.pattern.permute.xlu0 %v4167_v45 }
 0x52a   : > { %2665 = vperm.xlu0 %3950, %v5521_v42  }
 0x52c   : > { %3936 = vset.pattern.permute.xlu1 %v4164_v21 }
 0x52d   : > { %2581 = vperm.xlu1 %3936, %v5506_v60  }
 0x52e   : > { %2657 = vperm.xlu0 %3950, %v5528_v1  }
 0x531   : > { %3939 = vset.pattern.permute.xlu1 %v4165_v25 }
 0x532   : > { %2541 = vperm.xlu1 %3939, %v5528_v1   ;;  %3954 = vset.pattern.permute.xlu0 %v4168_v50 }
 0x533   : > { %2689 = vperm.xlu0 %3954, %v5537_v27  }
 0x536   : > { %3940 = vset.pattern.permute.xlu1 %v6631_v48 }
 0x537   : > { %1131 = vperm.xlu1 %3940, %v1077_v43   ;;  %3955 = vset.pattern.permute.xlu0 %v6631_v48 }
 0x538   : > { %1136 = vperm.xlu0 %3955, %v1078_v52  }
 0x53b   : > { %3941 = vset.pattern.permute.xlu1 %v4164_v21 }
 0x53c   : > { %2573 = vperm.xlu1 %3941, %v5537_v27   ;;  %1126 = vperm.xlu0 %3955, %v1076_v9  }
 0x540   : > { %2577 = vperm.xlu1 %3941, %v5528_v1  }
 0x544   : > { %3943 = vset.pattern.permute.xlu1 %v6630_v49 }
 0x545   : > { %2609 = vperm.xlu1 %3943, %v5597_v4  }
 0x549   : > { %3944 = vset.pattern.permute.xlu1 %v6631_v48 }
 0x54a   : > { %v2160_v59 = vpop.xlane.xlu1 %2159  ;;  %v2158_v63 = vpop.xlane.xlu0 %2157  ;;  %1121 = vperm.xlu1 %3944, %v1075_v30  }
 0x54b   : > { %v2164_v61 = vmul.f32 0.0625, %v2160_v59  ;;  %v2163_v37 = vmul.f32 0.0625, %v2158_v63 }
 0x54d   : > { %v2170_v14 = vpack.c.bf16 %v2164_v61, %v2163_v37 }
 0x54e   : > { %v2156_v24 = vpop.xlane.xlu1 %2155  ;;  %v2154_v32 = vpop.xlane.xlu0 %2153  ;;  %3945 = vset.pattern.permute.xlu1 %v6630_v49 }
 0x54f   : > { %v2162_v23 = vmul.f32 0.0625, %v2156_v24  ;;  %v2161_v22 = vmul.f32 0.0625, %v2154_v32  ;;  %3714 = vmatprep.subr.bf16.mxu1 %v2170_v14  ;;  %2597 = vperm.xlu1 %3945, %v5608_v44  }
 0x550   : > { %3715 = vmatpush3.bf16.msra.mxu1 %v2170_v14 }
 0x551   : > { %v2169_v53 = vpack.c.bf16 %v2162_v23, %v2161_v22 }
 0x552   : > { %v5646_v10 = vpop.permute.xlu1 %2297 }
 0x553   : > { %3716 = vmatprep.subr.bf16.mxu1 %v2169_v53  ;;  %2601 = vperm.xlu1 %3945, %v5617_v40  }
 0x554   : > { %3717 = vmatpush3.bf16.msra.mxu1 %v2169_v53 }
 0x556   : > { %v5648_v34 = vpop.permute.xlu1 %2329 }
 0x557   : > { %3719 = vmatmul.mubr.msk.bf16.vlgmr.msra.gmra.mxu1 %vm506_vm0, %v3994_v31  ;;  %3947 = vset.pattern.permute.xlu1 %v4166_v36 }
 0x558   : > { %2633 = vperm.xlu1 %3947, %v5521_v42  }
 0x55a   : > { %v5650_v39 = vpop.permute.xlu1 %2333 }
 0x55c   : > { %3948 = vset.pattern.permute.xlu1 %v4167_v45 }
 0x55d   : > { %2661 = vperm.xlu1 %3948, %v5506_v60  }
 0x55f   : > { %v5652_v19 = vpop.permute.xlu1 %2369 }
 0x561   : > { %3949 = vset.pattern.permute.xlu1 %v4168_v50 }
 0x562   : > { %2697 = vperm.xlu1 %3949, %v5506_v60  }
 0x564   : > { %v5654_v5 = vpop.permute.xlu1 %2289 }
 0x566   : > { %2701 = vperm.xlu1 %3949, %v5521_v42  }
 0x569   : > { %v5656_v11 = vpop.permute.xlu1 %2321 }
 0x56a   : > { %3951 = vset.pattern.permute.xlu1 %v4166_v36 }
 0x56b   : > { %2625 = vperm.xlu1 %3951, %v5528_v1  }
 0x56d   : > { %v5658_v13 = vpop.permute.xlu1 %2325 }
 0x56e   : > { %6634 = vst [vmem:[#allocation10_spill] sm:$0xff] %v5658_v13 }
 0x56f   : > { %3952 = vset.pattern.permute.xlu1 %v4167_v45 }
 0x570   : > { %2653 = vperm.xlu1 %3952, %v5537_v27  }
 0x572   : > { %v5660_v43 = vpop.permute.xlu1 %2405 }
 0x574   : > { %3953 = vset.pattern.permute.xlu1 %v4169_v8 }
 0x575   : > { %2733 = vperm.xlu1 %3953, %v5506_v60  }
 0x577   : > { %v5662_v63 = vpop.permute.xlu1 %2357 }
 0x579   : > { %2737 = vperm.xlu1 %3953, %v5521_v42  }
 0x57c   : > { %v5664_v37 = vpop.permute.xlu1 %2437 }
 0x57d   : > { %3956 = vset.pattern.permute.xlu1 %v4168_v50 }
 0x57e   : > { %2693 = vperm.xlu1 %3956, %v5528_v1  }
 0x580   : > { %v5667_v32 = vpop.permute.xlu1 %2441 }
 0x582   : > { %3957 = vset.pattern.permute.xlu1 %v4170_v54 }
 0x583   : > { %2769 = vperm.xlu1 %3957, %v5506_v60  }
 0x585   : > { %v5670_v22 = vpop.permute.xlu1 %2397 }
 0x586   : > { %6635 = vst [vmem:[#allocation13_spill] sm:$0xff] %v5670_v22 }
 0x587   : > { %3960 = vset.pattern.permute.xlu1 %v4169_v8 }
 0x588   : > { %2729 = vperm.xlu1 %3960, %v5528_v1  }
 0x58a   : > { %v5673_v53 = vpop.permute.xlu1 %2473 }
 0x58c   : > { %3961 = vset.pattern.permute.xlu1 %v4171_v7 }
 0x58d   : > { %2805 = vperm.xlu1 %3961, %v5506_v60  }
 0x58f   : > { %v5678_v31 = vpop.permute.xlu1 %2433 }
 0x590   : > { %6636 = vst [vmem:[#allocation70_spill] sm:$0xff] %v5678_v31 }
 0x591   : > { %3963 = vset.pattern.permute.xlu1 %v4170_v54 }
 0x592   : > { %2765 = vperm.xlu1 %3963, %v5528_v1  }
 0x594   : > { %v5681_v52 = vpop.permute.xlu1 %2509 }
 0x596   : > { %3964 = vset.pattern.permute.xlu1 %v6460_v33 }
 0x597   : > { %2841 = vperm.xlu1 %3964, %v5506_v60  }
 0x599   : > { %v5683_v9 = vpop.permute.xlu1 %2469 }
 0x59a   : > { %6637 = vst [vmem:[#allocation69_spill] sm:$0xff] %v5683_v9 }
 0x59b   : > { %3965 = vset.pattern.permute.xlu1 %v6631_v48 }
 0x5c2   : > { %v3712_v51 = vpop.f32.mrf.mxu1 }
 0x5c3   : > { %v3578_v57 = vmul.f32 -1.442695, %v3712_v51 }
 0x5c4   : > { %v1715_v2 = vpop.f32.mrf.mxu1 }
 0x5c5   : > { %4025 = vpow2.f32 %v3578_v57  ;;  %v3576_v16 = vmul.f32 -1.442695, %v1715_v2 }
 0x5c6   : > { %v3713_v46 = vpop.f32.mrf.mxu1 }
 0x5c7   : > { %4027 = vpow2.f32 %v3576_v16  ;;  %v3579_v58 = vmul.f32 -1.442695, %v3713_v46 }
 0x5c8   : > { %v1718_v29 = vpop.f32.mrf.mxu1 }
 0x5c9   : > { %4029 = vpow2.f32 %v3579_v58  ;;  %v3577_v17 = vmul.f32 -1.442695, %v1718_v29 }
 0x5cb   : > { %4031 = vpow2.f32 %v3577_v17 }
 0x5d2   : > { %v4026_v21 = vpop.eup %4025 }
 0x5d3   : > { %v1744_v25 = vadd.f32 1.0, %v4026_v21 }
 0x5d4   : > { %v4028_v49 = vpop.eup %4027 }
 0x5d5   : > { %4033 = vrcp.f32 %v1744_v25  ;;  %v1742_v36 = vadd.f32 1.0, %v4028_v49 }
 0x5d6   : > { %v4030_v45 = vpop.eup %4029 }
 0x5d7   : > { %4035 = vrcp.f32 %v1742_v36  ;;  %v1745_v50 = vadd.f32 1.0, %v4030_v45 }
 0x5d8   : > { %v4032_v30 = vpop.eup %4031 }
 0x5d9   : > { %4037 = vrcp.f32 %v1745_v50  ;;  %v1743_v59 = vadd.f32 1.0, %v4032_v30 }
 0x5db   : > { %4039 = vrcp.f32 %v1743_v59 }
 0x5e2   : > { %v4034_v61 = vpop.eup %4033 }
 0x5e3   : > { %1766 = vperm.xlu0 %3955, %v4034_v61  }
 0x5e4   : > { %v4036_v14 = vpop.eup %4035 }
 0x5e5   : > { %1756 = vperm.xlu1 %3965, %v4036_v14   ;;  %v5697_v14 = vpop.permute.xlu0 %2301 }
 0x5e6   : > { %v4038_v24 = vpop.eup %4037 }
 0x5e7   : > { %3958 = vset.pattern.permute.xlu0 %v4169_v8  ;;  %v5685_v8 = vpop.permute.xlu1 %2545 }
 0x5e8   : > { %2725 = vperm.xlu0 %3958, %v5537_v27   ;;  %v4040_v23 = vpop.eup %4039 }
 0x5e9   : > { %1771 = vperm.xlu1 %3965, %v4038_v24  }
 0x5ec   : > { %3959 = vset.pattern.permute.xlu0 %v4170_v54  ;;  %v5687_v54 = vpop.permute.xlu1 %2505 }
 0x5ed   : > { %1761 = vperm.xlu1 %3965, %v4040_v23   ;;  %2773 = vperm.xlu0 %3959, %v5521_v42   ;;  %6638 = vst [vmem:[#allocation15_spill] sm:$0xff] %v5687_v54 }
 0x5f0   : > { %v5689_v2 = vpop.permute.xlu1 %2581 }
 0x5f1   : > { %2761 = vperm.xlu0 %3959, %v5537_v27  }
 0x5f4   : > { %v5691_v25 = vpop.permute.xlu1 %2541 }
 0x5f5   : > { %3962 = vset.pattern.permute.xlu0 %v4171_v7  ;;  %6639 = vst [vmem:[#allocation36_spill] sm:$0xff] %v5691_v25 }
 0x5f6   : > { %2809 = vperm.xlu0 %3962, %v5521_v42  }
 0x5f8   : > { %v5693_v49 = vpop.permute.xlu1 %1131 }
 0x5fa   : > { %2797 = vperm.xlu0 %3962, %v5537_v27  }
 0x5fc   : > { %v5695_v61 = vpop.permute.xlu1 %2573 }
 0x5fe   : > { %3966 = vset.pattern.permute.xlu0 %v6460_v33 }
 0x617   : > { %v3720_v51 = vpop.f32.mrf.mxu1 }
 0x618   : > { %v3587_v57 = vmul.f32 -1.442695, %v3720_v51  ;;  %v5699_v51 = vpop.permute.xlu1 %2577 }
 0x619   : > { %v2221_v16 = vpop.f32.mrf.mxu1  ;;  %6640 = vst [vmem:[#allocation21_spill] sm:$0xff] %v5699_v51 }
 0x61a   : > { %4041 = vpow2.f32 %v3587_v57  ;;  %v3585_v46 = vmul.f32 -1.442695, %v2221_v16  ;;  %v5701_v16 = vpop.permute.xlu0 %2293 }
 0x61b   : > { %v3721_v58 = vpop.f32.mrf.mxu1  ;;  %6641 = vst [vmem:[#allocation24_spill] sm:$0xff] %v5701_v16 }
 0x61c   : > { %4043 = vpow2.f32 %v3585_v46  ;;  %v3588_v29 = vmul.f32 -1.442695, %v3721_v58  ;;  %v5703_v58 = vpop.permute.xlu1 %2609 }
 0x61d   : > { %v2224_v17 = vpop.f32.mrf.mxu1  ;;  %6642 = vst [vmem:[#allocation23_spill] sm:$0xff] %v5703_v58 }
 0x61e   : > { %4045 = vpow2.f32 %v3588_v29  ;;  %v3586_v21 = vmul.f32 -1.442695, %v2224_v17  ;;  %v5705_v29 = vpop.permute.xlu0 %2365 }
 0x620   : > { %4047 = vpow2.f32 %v3586_v21  ;;  %v5707_v21 = vpop.permute.xlu1 %1121 }
 0x627   : > { %v4042_v36 = vpop.eup %4041 }
 0x628   : > { %v2250_v45 = vadd.f32 1.0, %v4042_v36 }
 0x629   : > { %v4044_v50 = vpop.eup %4043 }
 0x62a   : > { %4049 = vrcp.f32 %v2250_v45  ;;  %v2248_v30 = vadd.f32 1.0, %v4044_v50  ;;  %v5709_v45 = vpop.permute.xlu0 %2361 }
 0x62b   : > { %v4046_v59 = vpop.eup %4045  ;;  %6643 = vst [vmem:[#allocation29_spill] sm:$0xff] %v5709_v45 }
 0x62c   : > { %4051 = vrcp.f32 %v2248_v30  ;;  %v2251_v24 = vadd.f32 1.0, %v4046_v59  ;;  %v5711_v30 = vpop.permute.xlu1 %2597 }
 0x62d   : > { %v4048_v23 = vpop.eup %4047 }
 0x62e   : > { %4053 = vrcp.f32 %v2251_v24  ;;  %v2249_v57 = vadd.f32 1.0, %v4048_v23  ;;  %v5713_v59 = vpop.permute.xlu0 %2401 }
 0x630   : > { %4055 = vrcp.f32 %v2249_v57  ;;  %v5716_v24 = vpop.permute.xlu1 %2601 }
 0x631   : > { %6644 = vst [vmem:[#allocation38_spill] sm:$0xff] %v5716_v24 }
 0x632   : > { %v5718_v23 = vpop.permute.xlu0 %2393 }
 0x634   : > { %v5720_v57 = vpop.permute.xlu1 %2633 }
 0x635   : > { %6645 = vst [vmem:[#allocation7_spill] sm:$0xff] %v5720_v57 }
 0x637   : > { %v4050_v46 = vpop.eup %4049 }
 0x638   : > { %2272 = vperm.xlu1 %3965, %v4050_v46   ;;  %v5722_v46 = vpop.permute.xlu0 %2429 }
 0x639   : > { %v4052_v17 = vpop.eup %4051 }
 0x63b   : > { %v4054_v36 = vpop.eup %4053 }
 0x63c   : > { %2262 = vperm.xlu1 %3965, %v4052_v17   ;;  %v5724_v17 = vpop.permute.xlu1 %2661  ;;  %v5726_v33 = vpop.permute.xlu0 %2477 }
 0x63d   : > { %v4056_v50 = vpop.eup %4055  ;;  %6646 = vst [vmem:[#allocation41_spill] sm:$0xff] %v5724_v17 }
 0x640   : > { %2277 = vperm.xlu1 %3965, %v4054_v36   ;;  %v5728_v36 = vpop.permute.xlu1 %2697  ;;  %v5730_v40 = vpop.permute.xlu0 %2465 }
 0x641   : > { %6647 = vst [vmem:[#allocation34_spill] sm:$0xff] %v5728_v36 }
 0x644   : > { %2267 = vperm.xlu1 %3965, %v4056_v50   ;;  %v5732_v50 = vpop.permute.xlu1 %2701  ;;  %v5734_v48 = vpop.permute.xlu0 %2513 }
 0x645   : > { %6648 = vst [vmem:[#allocation37_spill] sm:$0xff] %v5732_v50 }
 0x648   : > { %3967 = vset.pattern.permute.xlu1 %v4171_v7  ;;  %v5736_v7 = vpop.permute.xlu1 %2625  ;;  %v5738_v44 = vpop.permute.xlu0 %2501 }
 0x649   : > { %6649 = vst [vmem:[#allocation25_spill] sm:$0xff] %v5736_v7 }
 0x64c   : > { %v5740_v24 = vpop.permute.xlu1 %2653  ;;  %v5742_v57 = vpop.permute.xlu0 %2585 }
 0x64d   : > { %6650 = vst [vmem:[#allocation52_spill] sm:$0xff] %v5740_v24  ;;  %6651 = vst [vmem:[#allocation55_spill] sm:$0xff] %v5742_v57 }
 0x650   : > { %v5744_v51 = vpop.permute.xlu1 %2733  ;;  %v5746_v17 = vpop.permute.xlu0 %2549 }
 0x651   : > { %6652 = vst [vmem:[#allocation39_spill] sm:$0xff] %v5744_v51 }
 0x654   : > { %v5748_v25 = vpop.permute.xlu1 %2737  ;;  %v5750_v36 = vpop.permute.xlu0 %2537 }
 0x655   : > { %6653 = vst [vmem:[#allocation53_spill] sm:$0xff] %v5748_v25 }
 0x658   : > { %v5752_v54 = vpop.permute.xlu1 %2693  ;;  %v5754_v50 = vpop.permute.xlu0 %2605 }
 0x659   : > { %6654 = vst [vmem:[#allocation56_spill] sm:$0xff] %v5752_v54 }
 0x65c   : > { %v5756_v9 = vpop.permute.xlu1 %2769  ;;  %v5758_v7 = vpop.permute.xlu0 %2629 }
 0x65d   : > { %6655 = vst [vmem:[#allocation64_spill] sm:$0xff] %v5756_v9  ;;  %6656 = vst [vmem:[#allocation66_spill] sm:$0xff] %v5758_v7 }
 0x660   : > { %v5760_v31 = vpop.permute.xlu1 %2729  ;;  %v5762_v24 = vpop.permute.xlu0 %2621 }
 0x661   : > { %6657 = vst [vmem:[#allocation20_spill] sm:$0xff] %v5760_v31  ;;  %6658 = vst [vmem:[#allocation43_spill] sm:$0xff] %v5762_v24 }
 0x664   : > { %v5764_v22 = vpop.permute.xlu1 %2805  ;;  %v5766_v51 = vpop.permute.xlu0 %2665 }
 0x665   : > { %6659 = vst [vmem:[#allocation12_spill] sm:$0xff] %v5764_v22  ;;  %6660 = vst [vmem:[#allocation9_spill] sm:$0xff] %v5766_v51 }
 0x668   : > { %v5768_v45 = vpop.permute.xlu1 %2765  ;;  %v5770_v25 = vpop.permute.xlu0 %2657 }
 0x669   : > { %6661 = vst [vmem:[#allocation14_spill] sm:$0xff] %v5768_v45  ;;  %6662 = vst [vmem:[#allocation40_spill] sm:$0xff] %v5770_v25 }
 0x66c   : > { %v5772_v16 = vpop.permute.xlu1 %2841  ;;  %v5774_v54 = vpop.permute.xlu0 %2689 }
 0x66d   : > { %6663 = vst [vmem:[#allocation22_spill] sm:$0xff] %v5774_v54 }
 0x670   : > { %v1757_v13 = vpop.permute.xlu1 %1756  ;;  %v5776_v9 = vpop.permute.xlu0 %1136 }
 0x674   : > { %v1772_v7 = vpop.permute.xlu1 %1771  ;;  %v5778_v58 = vpop.permute.xlu0 %1126 }
 0x678   : > { %v1762_v31 = vpop.permute.xlu1 %1761  ;;  %v1767_v24 = vpop.permute.xlu0 %1766 }
 0x679   : > { %v1776_v22 = vmul.f32 %v1767_v24, %v5387_v62  ;;  %v1774_v62 = vmul.f32 %v1757_v13, %v5401_v26 }
 0x6b3   : > { %v2273_v57 = vpop.permute.xlu1 %2272 }
 0x6b4   : > { %v2282_v51 = vmul.f32 %v2273_v57, %v5487_v35 }
 0x6b6   : > { %v5782_v45 = vadd.f32 %v2282_v51, %v1776_v22  ;;  %v5869_v51 = vpop.permute.xlu0 %2725 }
 0x6b7   : > { %v2263_v25 = vpop.permute.xlu1 %2262 }
 0x6b8   : > { %2384 = vrot.lane.b32.xlu0 %v5782_v45, %s4134_s24  ;;  %2312 = vrot.lane.b32.xlu1 %v5782_v45, %s4132_s22  ;;  %v2280_v54 = vmul.f32 %v2263_v25, %v5497_v28  ;;  %v1777_v28 = vmul.f32 %v1772_v7, %v5384_v15 }
 0x6ba   : > { %v5798_v35 = vadd.f32 %v2280_v54, %v1774_v62  ;;  %v5873_v24 = vpop.permute.xlu0 %2773 }
 0x6bb   : > { %v2278_v22 = vpop.permute.xlu1 %2277 }
 0x6bc   : > { %2420 = vrot.lane.b32.xlu0 %v5782_v45, %s4135_s27  ;;  %2348 = vrot.lane.b32.xlu1 %v5782_v45, %s4133_s23  ;;  %v2283_v26 = vmul.f32 %v2278_v22, %v5484_v47  ;;  %v1775_v47 = vmul.f32 %v1762_v31, %v5398_v6  ;;  %v4173_v6 = vmov 43   ;;  %v6664_v31 = vmov 8  }
 0x6be   : > { %v5814_v13 = vadd.f32 %v2283_v26, %v1777_v28  ;;  %v5876_v57 = vpop.permute.xlu0 %2761 }
 0x6bf   : > { %v2268_v54 = vpop.permute.xlu1 %2267 }
 0x6c0   : > { %2456 = vrot.lane.b32.xlu0 %v5782_v45, %s4136_s28  ;;  %2564 = vrot.lane.b32.xlu1 %v5782_v45, %s6523_s14  ;;  %v2281_v15 = vmul.f32 %v2268_v54, %v5494_v0  ;;  %v4174_v0 = vmov 44  }
 0x6c2   : > { %v5830_v25 = vadd.f32 %v2281_v15, %v1775_v47  ;;  %v5879_v7 = vpop.permute.xlu0 %2809  ;;  %v2306_v15 = vmul.f32 %v5646_v10, %v5782_v45 }
 0x6c4   : > { %2492 = vrot.lane.b32.xlu0 %v5782_v45, %s4137_s29  ;;  %2344 = vrot.lane.b32.xlu1 %v5798_v35, %s4133_s23 }
 0x6c6   : > { %v5883_v62 = vpop.permute.xlu0 %2797 }
 0x6c7   : > { %6666 = vst [vmem:[#allocation18_spill] sm:$0xff] %v5883_v62 }
 0x6c8   : > { %2528 = vrot.lane.b32.xlu0 %v5782_v45, %s4138_s30  ;;  %2380 = vrot.lane.b32.xlu1 %v5798_v35, %s4134_s24 }
 0x6cc   : > { %2308 = vrot.lane.b32.xlu0 %v5798_v35, %s4132_s22  ;;  %2416 = vrot.lane.b32.xlu1 %v5798_v35, %s4135_s27 }
 0x6d0   : > { %2314 = vrot.lane.b32.xlu0 %v5814_v13, %s4132_s22  ;;  %2452 = vrot.lane.b32.xlu1 %v5798_v35, %s4136_s28 }
 0x6d4   : > { %2350 = vrot.lane.b32.xlu0 %v5814_v13, %s4133_s23  ;;  %2488 = vrot.lane.b32.xlu1 %v5798_v35, %s4137_s29 }
 0x6d8   : > { %2566 = vrot.lane.b32.xlu0 %v5814_v13, %s6523_s14  ;;  %2524 = vrot.lane.b32.xlu1 %v5798_v35, %s4138_s30 }
 0x6dc   : > { %2490 = vrot.lane.b32.xlu0 %v5830_v25, %s4137_s29  ;;  %2560 = vrot.lane.b32.xlu1 %v5798_v35, %s6523_s14 }
 0x6e0   : > { %2526 = vrot.lane.b32.xlu0 %v5830_v25, %s4138_s30  ;;  %2386 = vrot.lane.b32.xlu1 %v5814_v13, %s4134_s24 }
 0x6e4   : > { %2562 = vrot.lane.b32.xlu0 %v5830_v25, %s6523_s14  ;;  %2422 = vrot.lane.b32.xlu1 %v5814_v13, %s4135_s27 }
 0x6e8   : > { %2458 = vrot.lane.b32.xlu1 %v5814_v13, %s4136_s28  ;;  %2845 = vperm.xlu0 %3966, %v5521_v42  }
 0x6ec   : > { %2494 = vrot.lane.b32.xlu1 %v5814_v13, %s4137_s29  ;;  %2833 = vperm.xlu0 %3966, %v5537_v27  }
 0x6f0   : > { %2530 = vrot.lane.b32.xlu1 %v5814_v13, %s4138_s30  ;;  %3969 = vset.pattern.permute.xlu0 %v4173_v6 }
 0x6f1   : > { %2881 = vperm.xlu0 %3969, %v5521_v42  }
 0x6f4   : > { %2310 = vrot.lane.b32.xlu1 %v5830_v25, %s4132_s22 }
 0x6f5   : > { %2869 = vperm.xlu0 %3969, %v5537_v27  }
 0x6f8   : > { %2346 = vrot.lane.b32.xlu1 %v5830_v25, %s4133_s23 }
 0x6f9   : > { %3972 = vset.pattern.permute.xlu0 %v4174_v0 }
 0x6fa   : > { %2917 = vperm.xlu0 %3972, %v5521_v42   ;;  %v6665_v42 = vmov 42  }
 0x6fc   : > { %2382 = vrot.lane.b32.xlu1 %v5830_v25, %s4134_s24 }
 0x6fe   : > { %2909 = vperm.xlu0 %3972, %v5528_v1  }
 0x700   : > { %2418 = vrot.lane.b32.xlu1 %v5830_v25, %s4135_s27 }
 0x702   : > { %3976 = vset.pattern.permute.xlu0 %v6664_v31 }
 0x704   : > { %2454 = vrot.lane.b32.xlu1 %v5830_v25, %s4136_s28 }
 0x708   : > { %2801 = vperm.xlu1 %3967, %v5528_v1  }
 0x70c   : > { %3968 = vset.pattern.permute.xlu1 %v4173_v6 }
 0x70d   : > { %2877 = vperm.xlu1 %3968, %v5506_v60  }
 0x711   : > { %3970 = vset.pattern.permute.xlu1 %v6665_v42 }
 0x712   : > { %2837 = vperm.xlu1 %3970, %v5528_v1  }
 0x716   : > { %3971 = vset.pattern.permute.xlu1 %v4174_v0 }
 0x717   : > { %2913 = vperm.xlu1 %3971, %v5506_v60  }
 0x71b   : > { %3973 = vset.pattern.permute.xlu1 %v4173_v6 }
 0x71c   : > { %2873 = vperm.xlu1 %3973, %v5528_v1  }
 0x720   : > { %3974 = vset.pattern.permute.xlu1 %v4174_v0 }
 0x721   : > { %2905 = vperm.xlu1 %3974, %v5537_v27  }
 0x725   : > { %3975 = vset.pattern.permute.xlu1 %v6664_v31 }
 0x726   : > { %2937 = vperm.xlu1 %3975, %v5572_v56  }
 0x72a   : > { %v2313_v22 = vpop.permute.xlu1 %2312  ;;  %v2385_v26 = vpop.permute.xlu0 %2384  ;;  %2941 = vperm.xlu1 %3975, %v5597_v4  }
 0x72b   : > { %v2318_v60 = vmul.f32 %v2313_v22, %v4569_v18  ;;  %v2390_v27 = vmul.f32 %v2385_v26, %v4579_v55 }
 0x72d   : > { %v2338_v28 = vmul.f32 %v5648_v34, %v2318_v60  ;;  %v2410_v42 = vmul.f32 %v5713_v59, %v2390_v27  ;;  %v5904_v59 = vld [vmem:[%s6412_s1 + $0x8] ss:$0 sm:$0xff] }
 0x72e   : > { %v2349_v1 = vpop.permute.xlu1 %2348  ;;  %v2421_v54 = vpop.permute.xlu0 %2420 }
 0x72f   : > { %v2354_v47 = vmul.f32 %v2349_v1, %v4572_v3  ;;  %v2342_v6 = vadd.f32 %v2338_v28, %v2306_v15  ;;  %v2426_v0 = vmul.f32 %v2421_v54, %v4582_v20 }
 0x731   : > { %v2374_v56 = vmul.f32 %v5705_v29, %v2354_v47  ;;  %v2446_v62 = vmul.f32 %v5664_v37, %v2426_v0  ;;  %v3704_v0 = vpop.f32.mrf.mxu0 }
 0x732   : > { %v2565_v31 = vpop.permute.xlu1 %2564  ;;  %v2457_v4 = vpop.permute.xlu0 %2456 }
 0x733   : > { %v2378_v22 = vadd.f32 %v2374_v56, %v2342_v6  ;;  %v2462_v34 = vmul.f32 %v2457_v4, %v4586_v41  ;;  %v2570_v27 = vmul.f32 %v5904_v59, %v2565_v31  ;;  %v2304_v31 = vmul.f32 %v5654_v5, %v5798_v35 }
 0x735   : > { %v2414_v60 = vadd.f32 %v2410_v42, %v2378_v22  ;;  %v2482_v1 = vmul.f32 %v5673_v53, %v2462_v34  ;;  %v2590_v4 = vmul.f32 %v5689_v2, %v2570_v27 }
 0x736   : > { %v2345_v10 = vpop.permute.xlu1 %2344  ;;  %v2493_v45 = vpop.permute.xlu0 %2492 }
 0x737   : > { %v2450_v26 = vadd.f32 %v2446_v62, %v2414_v60  ;;  %v2498_v28 = vmul.f32 %v2493_v45, %v4598_v12 }
 0x739   : > { %v2486_v29 = vadd.f32 %v2482_v1, %v2450_v26  ;;  %v2518_v54 = vmul.f32 %v5681_v52, %v2498_v28  ;;  %v2352_v52 = vmul.f32 %v2345_v10, %v4572_v3 }
 0x73a   : > { %v2381_v15 = vpop.permute.xlu1 %2380  ;;  %v2529_v47 = vpop.permute.xlu0 %2528 }
 0x73b   : > { %v2534_v37 = vmul.f32 %v2529_v47, %v4605_v38  ;;  %v2522_v6 = vadd.f32 %v2518_v54, %v2486_v29  ;;  %v2388_v34 = vmul.f32 %v2381_v15, %v4579_v55  ;;  %v2372_v1 = vmul.f32 %v5662_v63, %v2352_v52 }
 0x73d   : > { %v2554_v62 = vmul.f32 %v5685_v8, %v2534_v37  ;;  %v1262_v8 = vadd.f32 %v3704_v0, %v5693_v49  ;;  %v2408_v29 = vmul.f32 %v5718_v23, %v2388_v34 }
 0x73e   : > { %v2417_v53 = vpop.permute.xlu1 %2416  ;;  %v2309_v56 = vpop.permute.xlu0 %2308 }
 0x73f   : > { %v2558_v42 = vadd.f32 %v2554_v62, %v2522_v6  ;;  %v2316_v22 = vmul.f32 %v2309_v56, %v4569_v18  ;;  %v2424_v10 = vmul.f32 %v2417_v53, %v4582_v20 }
 0x741   : > { %v2594_v60 = vadd.f32 %v2590_v4, %v2558_v42  ;;  %v2336_v45 = vmul.f32 %v5656_v11, %v2316_v22  ;;  %v2444_v11 = vmul.f32 %v5722_v46, %v2424_v10 }
 0x742   : > { %v2453_v26 = vpop.permute.xlu1 %2452  ;;  %v2315_v62 = vpop.permute.xlu0 %2314 }
 0x743   : > { %v2614_v2 = vadd.f32 %v5754_v50, %v2594_v60  ;;  %v2340_v28 = vadd.f32 %v2336_v45, %v2304_v31  ;;  %v2460_v47 = vmul.f32 %v2453_v26, %v4586_v41  ;;  %v2319_v22 = vmul.f32 %v2315_v62, %v4569_v18 }
 0x745   : > { %v5921_v54 = vmul.f32 %v2614_v2, %v1262_v8  ;;  %v2376_v15 = vadd.f32 %v2372_v1, %v2340_v28  ;;  %v2480_v23 = vmul.f32 %v5730_v40, %v2460_v47  ;;  %v1253_v40 = vpop.f32.mrf.mxu0  ;;  %v2339_v8 = vmul.f32 %v5650_v39, %v2319_v22 }
 0x746   : > { %v2489_v5 = vpop.permute.xlu1 %2488  ;;  %v2307_v1 = vmul.f32 %v5697_v14, %v5814_v13 }
 0x747   : > { %v2412_v35 = vadd.f32 %v2408_v29, %v2376_v15  ;;  %v2496_v49 = vmul.f32 %v2489_v5, %v4598_v12  ;;  %2896 = vrot.lane.b32.xlu1 %v5921_v54, %s6523_s14  ;;  %2644 = vrot.lane.b32.xlu0 %v5921_v54, %s4132_s22  ;;  %v3705_v62 = vpop.f32.mrf.mxu0 }
 0x748   : > { %v2343_v10 = vadd.f32 %v2339_v8, %v2307_v1  ;;  %v6672_v1 = vld [vmem:[#allocation13_spill] sm:$0xff] }
 0x749   : > { %v2448_v63 = vadd.f32 %v2444_v11, %v2412_v35  ;;  %v2516_v37 = vmul.f32 %v5738_v44, %v2496_v49  ;;  %v2351_v44 = vpop.permute.xlu0 %2350 }
 0x74a   : > { %v2525_v50 = vpop.permute.xlu1 %2524  ;;  %v2355_v60 = vmul.f32 %v2351_v44, %v4572_v3 }
 0x74b   : > { %v2484_v27 = vadd.f32 %v2480_v23, %v2448_v63  ;;  %v2532_v6 = vmul.f32 %v2525_v50, %v4605_v38  ;;  %2680 = vrot.lane.b32.xlu0 %v5921_v54, %s4133_s23 }
 0x74c   : > { %v2375_v2 = vmul.f32 %v5652_v19, %v2355_v60  ;;  %v6671_v60 = vld [vmem:[#allocation29_spill] sm:$0xff] }
 0x74d   : > { %v2520_v46 = vadd.f32 %v2516_v37, %v2484_v27  ;;  %v2552_v53 = vmul.f32 %v5750_v36, %v2532_v6  ;;  %v1254_v36 = vadd.f32 %v1253_v40, %v5707_v21  ;;  %v2567_v5 = vpop.permute.xlu0 %2566 }
 0x74e   : > { %v2561_v56 = vpop.permute.xlu1 %2560  ;;  %v2379_v29 = vadd.f32 %v2375_v2, %v2343_v10  ;;  %v2571_v35 = vmul.f32 %v5904_v59, %v2567_v5  ;;  %v6673_v10 = vld [vmem:[#allocation70_spill] sm:$0xff] }
 0x74f   : > { %v2568_v0 = vmul.f32 %v5904_v59, %v2561_v56  ;;  %2716 = vrot.lane.b32.xlu0 %v5921_v54, %s4134_s24  ;;  %v2556_v4 = vadd.f32 %v2552_v53, %v2520_v46  ;;  %v1265_v53 = vadd.f32 %v3705_v62, %v5776_v9  ;;  %v6668_v56 = vld [vmem:[#allocation23_spill] sm:$0xff]  ;;  %v6670_v9 = vld [vmem:[#allocation24_spill] sm:$0xff]  ;;  %v6678_v62 = vld [vmem:[#allocation38_spill] sm:$0xff] }
 0x751   : > { %v2588_v52 = vmul.f32 %v5695_v61, %v2568_v0 }
 0x752   : > { %v2387_v42 = vpop.permute.xlu1 %2386 }
 0x753   : > { %v2592_v34 = vadd.f32 %v2588_v52, %v2556_v4  ;;  %2752 = vrot.lane.b32.xlu0 %v5921_v54, %s4135_s27  ;;  %v2391_v61 = vmul.f32 %v2387_v42, %v4579_v55  ;;  %v6669_v42 = vld [vmem:[#allocation10_spill] sm:$0xff] }
 0x755   : > { %v2612_v31 = vadd.f32 %v5711_v30, %v2592_v34  ;;  %v2411_v39 = vmul.f32 %v5660_v43, %v2391_v61 }
 0x756   : > { %v2423_v45 = vpop.permute.xlu1 %2422 }
 0x757   : > { %v5947_v26 = vmul.f32 %v2612_v31, %v1254_v36  ;;  %2788 = vrot.lane.b32.xlu0 %v5921_v54, %s4136_s28  ;;  %v2427_v21 = vmul.f32 %v2423_v45, %v4582_v20  ;;  %v2415_v14 = vadd.f32 %v2411_v39, %v2379_v29  ;;  %v2305_v36 = vmul.f32 %v6670_v9, %v5830_v25  ;;  %v6681_v9 = vld [vmem:[#allocation71_spill] sm:$0xff] }
 0x759   : > { %2640 = vrot.lane.b32.xlu1 %v5947_v26, %s4132_s22  ;;  %v2447_v15 = vmul.f32 %v5667_v32, %v2427_v21 }
 0x75a   : > { %v2459_v30 = vpop.permute.xlu1 %2458 }
 0x75b   : > { %v2463_v28 = vmul.f32 %v2459_v30, %v4586_v41  ;;  %2824 = vrot.lane.b32.xlu0 %v5921_v54, %s4137_s29  ;;  %v2451_v43 = vadd.f32 %v2447_v15, %v2415_v14 }
 0x75d   : > { %2676 = vrot.lane.b32.xlu1 %v5947_v26, %s4133_s23  ;;  %v2483_v13 = vmul.f32 %v5726_v33, %v2463_v28 }
 0x75e   : > { %v2495_v19 = vpop.permute.xlu1 %2494 }
 0x75f   : > { %v2499_v47 = vmul.f32 %v2495_v19, %v4598_v12  ;;  %2860 = vrot.lane.b32.xlu0 %v5921_v54, %s4138_s30  ;;  %v2487_v49 = vadd.f32 %v2483_v13, %v2451_v43  ;;  %v6675_v43 = vld [vmem:[#allocation15_spill] sm:$0xff] }
 0x761   : > { %v2519_v11 = vmul.f32 %v5734_v48, %v2499_v47  ;;  %2712 = vrot.lane.b32.xlu1 %v5947_v26, %s4134_s24  ;;  %v6667_v48 = vld [vmem:[#allocation55_spill] sm:$0xff]  ;;  %v6674_v47 = vld [vmem:[#allocation69_spill] sm:$0xff] }
 0x762   : > { %v2531_v32 = vpop.permute.xlu1 %2530  ;;  %v2591_v27 = vmul.f32 %v6667_v48, %v2571_v35 }
 0x763   : > { %v2535_v63 = vmul.f32 %v2531_v32, %v4605_v38  ;;  %2856 = vrot.lane.b32.xlu0 %v5947_v26, %s4138_s30  ;;  %v2523_v33 = vadd.f32 %v2519_v11, %v2487_v49  ;;  %v6676_v49 = vld [vmem:[#allocation36_spill] sm:$0xff] }
 0x765   : > { %v2555_v23 = vmul.f32 %v5746_v17, %v2535_v63  ;;  %2748 = vrot.lane.b32.xlu1 %v5947_v26, %s4135_s27  ;;  %v2491_v17 = vpop.permute.xlu0 %2490 }
 0x766   : > { %v2311_v50 = vpop.permute.xlu1 %2310  ;;  %v2497_v25 = vmul.f32 %v2491_v17, %v4598_v12 }
 0x767   : > { %v2559_v37 = vadd.f32 %v2555_v23, %v2523_v33  ;;  %v2317_v40 = vmul.f32 %v2311_v50, %v4569_v18  ;;  %v6677_v23 = vld [vmem:[#allocation21_spill] sm:$0xff] }
 0x768   : > { %v2517_v11 = vmul.f32 %v6675_v43, %v2497_v25  ;;  %v6684_v43 = vld [vmem:[#allocation34_spill] sm:$0xff] }
 0x769   : > { %v2595_v6 = vadd.f32 %v2591_v27, %v2559_v37  ;;  %2784 = vrot.lane.b32.xlu1 %v5947_v26, %s4136_s28  ;;  %v2337_v22 = vmul.f32 %v6669_v42, %v2317_v40  ;;  %v2527_v45 = vpop.permute.xlu0 %2526  ;;  %v1256_v27 = vpop.f32.mrf.mxu0 }
 0x76a   : > { %v2347_v46 = vpop.permute.xlu1 %2346  ;;  %v2533_v14 = vmul.f32 %v2527_v45, %v4605_v38 }
 0x76b   : > { %v2615_v0 = vadd.f32 %v6668_v56, %v2595_v6  ;;  %v2353_v52 = vmul.f32 %v2347_v46, %v4572_v3  ;;  %v2341_v61 = vadd.f32 %v2337_v22, %v2305_v36  ;;  %v1257_v6 = vadd.f32 %v1256_v27, %v5778_v58  ;;  %v6679_v58 = vld [vmem:[#allocation68_spill] sm:$0xff]  ;;  %v3997_v36 = vld [vmem:[%s6421_s10] sm:$0xff]  }
 0x76c   : > { %v2553_v63 = vmul.f32 %v6676_v49, %v2533_v14  ;;  %v6680_v56 = vmov 0   ;;  %3726 = vmatprep.mubr.msk.bf16.mxu1 %vm506_vm0, %v3997_v36  ;;  %v2984_v14 = vld [vmem:[%s6422_s11 + $0x70] sm:$0xff] }
 0x76d   : > { %v5985_v4 = vmul.f32 %v2615_v0, %v1265_v53  ;;  %2820 = vrot.lane.b32.xlu1 %v5947_v26, %s4137_s29  ;;  %v2373_v31 = vmul.f32 %v6671_v60, %v2353_v52  ;;  %v2563_v19 = vpop.permute.xlu0 %2562  ;;  %v2980_v49 = vld [vmem:[%s6422_s11 + $0x50] sm:$0xff] }
 0x76e   : > { %v2383_v44 = vpop.permute.xlu1 %2382  ;;  %v2569_v32 = vmul.f32 %v5904_v59, %v2563_v19  ;;  %v6688_v36 = vld [vmem:[#allocation52_spill] sm:$0xff] }
 0x76f   : > { %v2389_v34 = vmul.f32 %v2383_v44, %v4579_v55  ;;  %2898 = vrot.lane.b32.xlu0 %v5985_v4, %s6523_s14  ;;  %v2377_v30 = vadd.f32 %v2373_v31, %v2341_v61 }
 0x770   : > { %v2589_v50 = vmul.f32 %v6677_v23, %v2569_v32  ;;  %v6685_v23 = vld [vmem:[#allocation39_spill] sm:$0xff] }
 0x771   : > { %2646 = vrot.lane.b32.xlu1 %v5985_v4, %s4132_s22  ;;  %v2409_v2 = vmul.f32 %v6672_v1, %v2389_v34  ;;  %v6038_v0 = vpop.permute.xlu0 %2845 }
 0x772   : > { %v2419_v8 = vpop.permute.xlu1 %2418 }
 0x773   : > { %v2425_v21 = vmul.f32 %v2419_v8, %v4582_v20  ;;  %v2413_v29 = vadd.f32 %v2409_v2, %v2377_v30 }
 0x775   : > { %v2445_v39 = vmul.f32 %v6673_v10, %v2425_v21  ;;  %2682 = vrot.lane.b32.xlu1 %v5985_v4, %s4133_s23  ;;  %v6044_v17 = vpop.permute.xlu0 %2833 }
 0x776   : > { %v2455_v28 = vpop.permute.xlu1 %2454 }
 0x777   : > { %v2461_v15 = vmul.f32 %v2455_v28, %v4586_v41  ;;  %v2449_v13 = vadd.f32 %v2445_v39, %v2413_v29  ;;  %v6682_v29 = vld [vmem:[#allocation41_spill] sm:$0xff] }
 0x779   : > { %v2481_v5 = vmul.f32 %v6674_v47, %v2461_v15  ;;  %2718 = vrot.lane.b32.xlu1 %v5985_v4, %s4134_s24  ;;  %v6052_v44 = vpop.permute.xlu0 %2881  ;;  %v6683_v47 = vld [vmem:[#allocation66_spill] sm:$0xff] }
 0x77b   : > { %v2485_v35 = vadd.f32 %v2481_v5, %v2449_v13  ;;  %v2985_v13 = vld [vmem:[%s6422_s11 + $0x78] sm:$0xff]  ;;  %v2638_v5 = vmul.f32 %v6683_v47, %v5921_v54  ;;  %v2976_v47 = vld [vmem:[%s6422_s11 + $0x30] sm:$0xff] }
 0x77d   : > { %v2521_v33 = vadd.f32 %v2517_v11, %v2485_v35  ;;  %2754 = vrot.lane.b32.xlu1 %v5985_v4, %s4135_s27  ;;  %v6058_v22 = vpop.permute.xlu0 %2869  ;;  %v2982_v35 = vld [vmem:[%s6422_s11 + $0x60] sm:$0xff] }
 0x77f   : > { %v2557_v48 = vadd.f32 %v2553_v63, %v2521_v33 }
 0x781   : > { %v2593_v37 = vadd.f32 %v2589_v50, %v2557_v48  ;;  %2790 = vrot.lane.b32.xlu1 %v5985_v4, %s4136_s28  ;;  %v6067_v60 = vpop.permute.xlu0 %2917 }
 0x783   : > { %v2613_v46 = vadd.f32 %v6678_v62, %v2593_v37  ;;  %v6040_v40 = vpop.permute.xlu1 %2801 }
 0x785   : > { %v6020_v53 = vmul.f32 %v2613_v46, %v1257_v6  ;;  %2826 = vrot.lane.b32.xlu1 %v5985_v4, %s4137_s29  ;;  %v6072_v45 = vpop.permute.xlu0 %2909  ;;  %v6686_v6 = vld [vmem:[#allocation64_spill] sm:$0xff]  ;;  %v2983_v46 = vld [vmem:[%s6422_s11 + $0x68] sm:$0xff] }
 0x787   : > { %2822 = vrot.lane.b32.xlu0 %v6020_v53, %s4137_s29 }
 0x788   : > { %v6046_v52 = vpop.permute.xlu1 %2877 }
 0x789   : > { %2862 = vrot.lane.b32.xlu1 %v5985_v4, %s4138_s30 }
 0x78b   : > { %2892 = vrot.lane.b32.xlu0 %v5947_v26, %s6523_s14 }
 0x78d   : > { %2642 = vrot.lane.b32.xlu1 %v6020_v53, %s4132_s22  ;;  %v6054_v42 = vpop.permute.xlu1 %2837  ;;  %s6706_s22 = sshll.u32 %s6708_s26, 4 }
 0x78f   : > { %2929 = vperm.xlu0 %3976, %v6679_v58   ;;  %v2978_v58 = vld [vmem:[%s6422_s11 + $0x40] sm:$0xff] }
 0x791   : > { %2678 = vrot.lane.b32.xlu1 %v6020_v53, %s4133_s23 }
 0x792   : > { %v6060_v34 = vpop.permute.xlu1 %2913 }
 0x793   : > { %3978 = vset.pattern.permute.xlu0 %v6680_v56 }
 0x794   : > { %3063 = vperm.xlu0 %3978, %v2985_v13  }
 0x795   : > { %2714 = vrot.lane.b32.xlu1 %v6020_v53, %s4134_s24 }
 0x797   : > { %v6070_v31 = vpop.permute.xlu1 %2873 }
 0x798   : > { %3038 = vperm.xlu0 %3978, %v2980_v49  }
 0x799   : > { %2750 = vrot.lane.b32.xlu1 %v6020_v53, %s4135_s27  ;;  %s440_s27 = scalar_lea.vmem %s6424_s13, %s6706_s22 }
 0x79c   : > { %v6074_v8 = vpop.permute.xlu1 %2905  ;;  %3028 = vperm.xlu0 %3978, %v2978_v58   ;;  %v2972_v58 = vld [vmem:[%s6422_s11 + $0x10] sm:$0xff] }
 0x79d   : > { %2786 = vrot.lane.b32.xlu1 %v6020_v53, %s4136_s28 }
 0x7a0   : > { %3018 = vperm.xlu0 %3978, %v2976_v47  }
 0x7a1   : > { %2858 = vrot.lane.b32.xlu1 %v6020_v53, %s4138_s30  ;;  %v6076_v1 = vpop.permute.xlu1 %2937 }
 0x7a5   : > { %2894 = vrot.lane.b32.xlu1 %v6020_v53, %s6523_s14  ;;  %v6078_v21 = vpop.permute.xlu1 %2941 }
 0x7a9   : > { %2933 = vperm.xlu1 %3975, %v6681_v9  }
 0x7ad   : > { %3977 = vset.pattern.permute.xlu1 %v6680_v56  ;;  %v6687_v56 = vld [vmem:[#allocation43_spill] sm:$0xff] }
 0x7ae   : > { %3058 = vperm.xlu1 %3977, %v2984_v14   ;;  %v2636_v9 = vmul.f32 %v6687_v56, %v5947_v26  ;;  %v2981_v26 = vld [vmem:[%s6422_s11 + $0x58] sm:$0xff] }
 0x7b2   : > { %3048 = vperm.xlu1 %3977, %v2982_v35  }
 0x7b6   : > { %3053 = vperm.xlu1 %3977, %v2983_v46   ;;  %v2977_v46 = vld [vmem:[%s6422_s11 + $0x38] sm:$0xff] }
 0x7b9   : > { %v2645_v61 = vpop.permute.xlu0 %2644  ;;  %v2897_v25 = vpop.permute.xlu1 %2896 }
 0x7ba   : > { %v2650_v10 = vmul.f32 %v2645_v61, %v4569_v18  ;;  %3043 = vperm.xlu1 %3977, %v2981_v26   ;;  %v6692_v26 = vld [vmem:[#allocation9_spill] sm:$0xff] }
 0x7bc   : > { %v2670_v15 = vmul.f32 %v6682_v29, %v2650_v10  ;;  %v6689_v10 = vld [vmem:[#allocation12_spill] sm:$0xff] }
 0x7bd   : > { %v2681_v2 = vpop.permute.xlu0 %2680 }
 0x7be   : > { %v2686_v39 = vmul.f32 %v2681_v2, %v4572_v3  ;;  %v2674_v33 = vadd.f32 %v2670_v15, %v2638_v5  ;;  %v6690_v5 = vld [vmem:[#allocation22_spill] sm:$0xff] }
 0x7c0   : > { %v2706_v11 = vmul.f32 %v6684_v43, %v2686_v39 }
 0x7c1   : > { %v2717_v30 = vpop.permute.xlu0 %2716 }
 0x7c2   : > { %v2722_v19 = vmul.f32 %v2717_v30, %v4579_v55  ;;  %v2710_v37 = vadd.f32 %v2706_v11, %v2674_v33 }
 0x7c4   : > { %v2742_v50 = vmul.f32 %v6685_v23, %v2722_v19 }
 0x7c5   : > { %v2753_v28 = vpop.permute.xlu0 %2752 }
 0x7c6   : > { %v2758_v32 = vmul.f32 %v2753_v28, %v4582_v20  ;;  %v2746_v30 = vadd.f32 %v2742_v50, %v2710_v37 }
 0x7c8   : > { %v2778_v62 = vmul.f32 %v6686_v6, %v2758_v32  ;;  %v2902_v32 = vmul.f32 %v5904_v59, %v2897_v25  ;;  %v2974_v25 = vld [vmem:[%s6422_s11 + $0x20] sm:$0xff] }
 0x7c9   : > { %v2789_v63 = vpop.permute.xlu0 %2788  ;;  %3008 = vperm.xlu0 %3978, %v2974_v25  }
 0x7ca   : > { %v2794_v48 = vmul.f32 %v2789_v63, %v4586_v41  ;;  %v2782_v14 = vadd.f32 %v2778_v62, %v2746_v30  ;;  %v2971_v30 = vld [vmem:[%s6422_s11 + $0x8] sm:$0xff] }
 0x7cb   : > { %v2641_v27 = vpop.permute.xlu1 %2640 }
 0x7cc   : > { %v2648_v54 = vmul.f32 %v2641_v27, %v4569_v18  ;;  %v2814_v39 = vmul.f32 %v6689_v10, %v2794_v48  ;;  %v2979_v48 = vld [vmem:[%s6422_s11 + $0x48] sm:$0xff]  ;;  %v4110_v10 = vld [vmem:[%s6414_s3] sm:$0xff] }
 0x7cd   : > { %v2825_v2 = vpop.permute.xlu0 %2824  ;;  %3033 = vperm.xlu1 %3977, %v2979_v48   ;;  %2998 = vperm.xlu0 %3978, %v2972_v58  }
 0x7ce   : > { %v2668_v61 = vmul.f32 %v6688_v36, %v2648_v54  ;;  %v2830_v28 = vmul.f32 %v2825_v2, %v4598_v12  ;;  %v2818_v35 = vadd.f32 %v2814_v39, %v2782_v14  ;;  %v2922_v54 = vmul.f32 %v6060_v34, %v2902_v32  ;;  %v2975_v34 = vld [vmem:[%s6422_s11 + $0x28] sm:$0xff] }
 0x7cf   : > { %v2677_v29 = vpop.permute.xlu1 %2676 }
 0x7d0   : > { %v2672_v15 = vadd.f32 %v2668_v61, %v2636_v9  ;;  %v2684_v19 = vmul.f32 %v2677_v29, %v4572_v3  ;;  %v2850_v13 = vmul.f32 %v5772_v16, %v2830_v28  ;;  %v2970_v9 = vld [vmem:[%s6422_s11] sm:$0xff]  ;;  %v2973_v61 = vld [vmem:[%s6422_s11 + $0x18] sm:$0xff] }
 0x7d1   : > { %v2861_v11 = vpop.permute.xlu0 %2860  ;;  %3023 = vperm.xlu1 %3977, %v2977_v46   ;;  %2988 = vperm.xlu0 %3978, %v2970_v9   ;;  %v4111_v28 = vld [vmem:[%s6414_s3 + $0x18] sm:$0xff] }
 0x7d2   : > { %v2704_v43 = vmul.f32 %v6690_v5, %v2684_v19  ;;  %v2866_v49 = vmul.f32 %v2861_v11, %v4605_v38  ;;  %v2854_v23 = vadd.f32 %v2850_v13, %v2818_v35  ;;  %v4112_v19 = vld [vmem:[%s6414_s3 + $0x8] sm:$0xff]  ;;  %v6694_v35 = vld [vmem:[#allocation37_spill] sm:$0xff] }
 0x7d3   : > { %v2713_v63 = vpop.permute.xlu1 %2712  ;;  %v6693_v11 = vld [vmem:[#allocation7_spill] sm:$0xff] }
 0x7d4   : > { %v2708_v33 = vadd.f32 %v2704_v43, %v2672_v15  ;;  %v2720_v16 = vmul.f32 %v2713_v63, %v4579_v55  ;;  %v2886_v50 = vmul.f32 %v6046_v52, %v2866_v49  ;;  %v4113_v43 = vld [vmem:[%s6414_s3 + $0x10] sm:$0xff]  ;;  %v2639_v32 = vmul.f32 %v6693_v11, %v5985_v4 }
 0x7d5   : > { %3013 = vperm.xlu1 %3977, %v2975_v34   ;;  %v2857_v25 = vpop.permute.xlu0 %2856  ;;  %v6698_v11 = vld [vmem:[#allocation40_spill] sm:$0xff] }
 0x7d6   : > { %v2740_v27 = vmul.f32 %v5869_v51, %v2720_v16  ;;  %v2890_v37 = vadd.f32 %v2886_v50, %v2854_v23  ;;  %v6695_v23 = vld [vmem:[#allocation53_spill] sm:$0xff] }
 0x7d7   : > { %v6136_v6 = vpop.permute.xlu1 %2748 }
 0x7d8   : > { %v6138_v62 = vadd.f32 %v2740_v27, %v2708_v33  ;;  %v2926_v52 = vadd.f32 %v2922_v54, %v2890_v37 }
 0x7d9   : > { %3003 = vperm.xlu1 %3977, %v2973_v61  }
 0x7da   : > { %v2946_v51 = vadd.f32 %v6076_v1, %v2926_v52  ;;  %v6691_v1 = vmov 9  }
 0x7db   : > { %v6146_v56 = vpop.permute.xlu1 %2784  ;;  %3979 = vset.pattern.permute.xlu0 %v6691_v1 }
 0x7dc   : > { %3384 = vperm.xlu0 %3979, %v4110_v10  }
 0x7dd   : > { %2993 = vperm.xlu1 %3977, %v2971_v30  }
 0x7df   : > { %v6155_v36 = vpop.permute.xlu1 %2820 }
 0x7e0   : > { %3396 = vperm.xlu0 %3979, %v4111_v28  }
 0x7e1   : > { %3980 = vset.pattern.permute.xlu1 %v6691_v1  ;;  %v2899_v58 = vpop.permute.xlu0 %2898 }
 0x7e2   : > { %3388 = vperm.xlu1 %3980, %v4112_v19  }
 0x7e3   : > { %v2647_v2 = vpop.permute.xlu1 %2646 }
 0x7e4   : > { %v2651_v15 = vmul.f32 %v2647_v2, %v4569_v18  ;;  %v2903_v2 = vmul.f32 %v5904_v59, %v2899_v58 }
 0x7e6   : > { %v2671_v47 = vmul.f32 %v6692_v26, %v2651_v15  ;;  %3392 = vperm.xlu1 %3980, %v4113_v43   ;;  %v2923_v28 = vmul.f32 %v6067_v60, %v2903_v2  ;;  %v2864_v2 = vmul.f32 %v2857_v25, %v4605_v38 }
 0x7e7   : > { %v2683_v39 = vpop.permute.xlu1 %2682 }
 0x7e8   : > { %v2687_v14 = vmul.f32 %v2683_v39, %v4572_v3  ;;  %v2675_v16 = vadd.f32 %v2671_v47, %v2639_v32 }
 0x7ea   : > { %v2707_v49 = vmul.f32 %v6694_v35, %v2687_v14  ;;  %v6696_v14 = vld [vmem:[#allocation11_spill] sm:$0xff]  ;;  %v6699_v35 = vld [vmem:[#allocation25_spill] sm:$0xff] }
 0x7eb   : > { %v2719_v29 = vpop.permute.xlu1 %2718 }
 0x7ec   : > { %v2723_v5 = vmul.f32 %v2719_v29, %v4579_v55  ;;  %v2711_v27 = vadd.f32 %v2707_v49, %v2675_v16  ;;  %v2637_v49 = vmul.f32 %v6699_v35, %v6020_v53 }
 0x7ee   : > { %v2743_v50 = vmul.f32 %v6695_v23, %v2723_v5 }
 0x7ef   : > { %v2755_v13 = vpop.permute.xlu1 %2754 }
 0x7f0   : > { %v2759_v63 = vmul.f32 %v2755_v13, %v4582_v20  ;;  %v2747_v52 = vadd.f32 %v2743_v50, %v2711_v27  ;;  %v6197_v13 = vadd.f32 %v2946_v51, %v6696_v14  ;;  %v2756_v51 = vmul.f32 %v6136_v6, %v4582_v20 }
 0x7f1   : > { %v2828_v6 = vmul.f32 %v6155_v36, %v4598_v12 }
 0x7f2   : > { %v2779_v54 = vmul.f32 %v5873_v24, %v2759_v63  ;;  %v6700_v63 = vld [vmem:[#allocation56_spill] sm:$0xff] }
 0x7f3   : > { %v2791_v33 = vpop.permute.xlu1 %2790 }
 0x7f4   : > { %v2795_v48 = vmul.f32 %v2791_v33, %v4586_v41  ;;  %v2783_v34 = vadd.f32 %v2779_v54, %v2747_v52  ;;  %v2776_v54 = vmul.f32 %v5876_v57, %v2756_v51  ;;  %v4005_v51 = vld [vmem:[%s6423_s12] sm:$0xff]  }
 0x7f5   : > { %3758 = vmatprep.mubr.bf16.mxu0 %v4005_v51 }
 0x7f6   : > { %v2815_v46 = vmul.f32 %v5879_v7, %v2795_v48  ;;  %v6701_v48 = vld [vmem:[#allocation20_spill] sm:$0xff] }
 0x7f7   : > { %v2827_v37 = vpop.permute.xlu1 %2826 }
 0x7f8   : > { %v2831_v4 = vmul.f32 %v2827_v37, %v4598_v12  ;;  %v2819_v1 = vadd.f32 %v2815_v46, %v2783_v34  ;;  %v6702_v37 = vld [vmem:[#allocation14_spill] sm:$0xff] }
 0x7f9   : > { %v2823_v23 = vpop.permute.xlu0 %2822 }
 0x7fa   : > { %v2851_v9 = vmul.f32 %v6038_v0, %v2831_v4  ;;  %v6697_v0 = vld [vmem:[#allocation5_spill] sm:$0xff] }
 0x7fb   : > { %v2863_v61 = vpop.permute.xlu1 %2862 }
 0x7fc   : > { %v2867_v30 = vmul.f32 %v2863_v61, %v4605_v38  ;;  %v2855_v10 = vadd.f32 %v2851_v9, %v2819_v1  ;;  %v2780_v9 = vadd.f32 %v2776_v54, %v6138_v62  ;;  %v2848_v61 = vmul.f32 %v6044_v17, %v2828_v6 }
 0x7fd   : > { %v2884_v62 = vmul.f32 %v6058_v22, %v2864_v2 }
 0x7fe   : > { %v2887_v39 = vmul.f32 %v6052_v44, %v2867_v30 }
 0x7ff   : > { %v2643_v24 = vpop.permute.xlu1 %2642 }
 0x800   : > { %v2891_v29 = vadd.f32 %v2887_v39, %v2855_v10  ;;  %v2649_v44 = vmul.f32 %v2643_v24, %v4569_v18 }
 0x802   : > { %v2927_v7 = vadd.f32 %v2923_v28, %v2891_v29  ;;  %v2669_v32 = vmul.f32 %v6698_v11, %v2649_v44  ;;  %v4002_v11 = vld [vmem:[%s6421_s10 + $0x28] sm:$0xff]  }
 0x803   : > { %v2679_v15 = vpop.permute.xlu1 %2678 }
 0x804   : > { %v2947_v19 = vadd.f32 %v6078_v21, %v2927_v7  ;;  %v2685_v60 = vmul.f32 %v2679_v15, %v4572_v3  ;;  %v2792_v3 = vmul.f32 %v6146_v56, %v4586_v41  ;;  %v2673_v50 = vadd.f32 %v2669_v32, %v2637_v49  ;;  %v2893_v56 = vpop.permute.xlu0 %2892  ;;  %v4003_v32 = vld [vmem:[%s6421_s10 + $0x30] sm:$0xff]  }
 0x805   : > { %v2900_v30 = vmul.f32 %v5904_v59, %v2893_v56 }
 0x806   : > { %v6200_v26 = vadd.f32 %v2947_v19, %v6697_v0  ;;  %v2705_v33 = vmul.f32 %v6700_v63, %v2685_v60  ;;  %v4000_v60 = vld [vmem:[%s6421_s10 + $0x18] sm:$0xff]  }
 0x807   : > { %v2715_v47 = vpop.permute.xlu1 %2714  ;;  %v2920_v17 = vmul.f32 %v6074_v8, %v2900_v30  ;;  %v3999_v8 = vld [vmem:[%s6421_s10 + $0x10] sm:$0xff]  }
 0x808   : > { %v2969_v5 = vpack.c.bf16 %v6200_v26, %v6197_v13  ;;  %v2721_v21 = vmul.f32 %v2715_v47, %v4579_v55  ;;  %v2709_v53 = vadd.f32 %v2705_v33, %v2673_v50 }
 0x80a   : > { %3722 = vmatprep.subr.bf16.mxu1 %v2969_v5  ;;  %v2741_v27 = vmul.f32 %v6701_v48, %v2721_v21  ;;  %v2930_v15 = vpop.permute.xlu0 %2929  ;;  %v4004_v21 = vld [vmem:[%s6421_s10 + $0x38] sm:$0xff]  }
 0x80b   : > { %v2751_v43 = vpop.permute.xlu1 %2750  ;;  %3723 = vmatpush3.bf16.msra.mxu1 %v2969_v5 }
 0x80c   : > { %v2757_v16 = vmul.f32 %v2751_v43, %v4582_v20  ;;  %v6703_v20 = vld [vmem:[#allocation18_spill] sm:$0xff]  ;;  %v2745_v58 = vadd.f32 %v2741_v27, %v2709_v53 }
 0x80d   : > { %v2812_v4 = vmul.f32 %v6703_v20, %v2792_v3  ;;  %v4001_v43 = vld [vmem:[%s6421_s10 + $0x20] sm:$0xff]  }
 0x80e   : > { %v2777_v52 = vmul.f32 %v6702_v37, %v2757_v16 }
 0x80f   : > { %v2787_v18 = vpop.permute.xlu1 %2786  ;;  %v2816_v1 = vadd.f32 %v2812_v4, %v2780_v9  ;;  %v3064_v33 = vpop.permute.xlu0 %3063 }
 0x810   : > { %v2793_v55 = vmul.f32 %v2787_v18, %v4586_v41  ;;  %v2829_v41 = vmul.f32 %v2823_v23, %v4598_v12  ;;  %v2781_v57 = vadd.f32 %v2777_v52, %v2745_v58 }
 0x811   : > { %v2852_v24 = vadd.f32 %v2848_v61, %v2816_v1 }
 0x812   : > { %v2813_v34 = vmul.f32 %v6040_v40, %v2793_v55  ;;  %v2849_v40 = vmul.f32 %v6054_v42, %v2829_v41  ;;  %v6704_v42 = vld [vmem:[#allocation4_spill] sm:$0xff] }
 0x813   : > { %v2859_v46 = vpop.permute.xlu1 %2858  ;;  %v2888_v25 = vadd.f32 %v2884_v62, %v2852_v24  ;;  %v3039_v18 = vpop.permute.xlu0 %3038 }
 0x814   : > { %v2817_v10 = vadd.f32 %v2813_v34, %v2781_v57  ;;  %v2865_v39 = vmul.f32 %v2859_v46, %v4605_v38 }
 0x815   : > { %v2924_v19 = vadd.f32 %v2920_v17, %v2888_v25 }
 0x816   : > { %v2885_v12 = vmul.f32 %v6070_v31, %v2865_v39  ;;  %v2853_v29 = vadd.f32 %v2849_v40, %v2817_v10 }
 0x817   : > { %v2895_v36 = vpop.permute.xlu1 %2894  ;;  %v2944_v0 = vadd.f32 %v2930_v15, %v2924_v19  ;;  %v3029_v48 = vpop.permute.xlu0 %3028 }
 0x818   : > { %v2901_v28 = vmul.f32 %v5904_v59, %v2895_v36  ;;  %v2889_v14 = vadd.f32 %v2885_v12, %v2853_v29  ;;  %v6705_v59 = vld [vmem:[#allocation2_spill] sm:$0xff] }
 0x819   : > { %v6237_v44 = vadd.f32 %v2944_v0, %v6704_v42 }
 0x81a   : > { %v2921_v7 = vmul.f32 %v6072_v45, %v2901_v28  ;;  %v3998_v45 = vld [vmem:[%s6421_s10 + $0x8] sm:$0xff]  }
 0x81b   : > { %v3019_v53 = vpop.permute.xlu0 %3018 }
 0x81c   : > { %v2925_v38 = vadd.f32 %v2921_v7, %v2889_v14 }
 0x824   : > { %v2934_v47 = vpop.permute.xlu1 %2933 }
 0x825   : > { %v2945_v5 = vadd.f32 %v2934_v47, %v2925_v38 }
 0x827   : > { %v6240_v22 = vadd.f32 %v2945_v5, %v6705_v59 }
 0x829   : > { %v2968_v31 = vpack.c.bf16 %v6240_v22, %v6237_v44  ;;  %v3059_v35 = vpop.permute.xlu1 %3058 }
 0x82b   : > { %3724 = vmatprep.subr.bf16.mxu1 %v2968_v31 }
 0x82c   : > { %3725 = vmatpush3.bf16.msra.mxu1 %v2968_v31 }
 0x82d   : > { %v3049_v49 = vpop.permute.xlu1 %3048 }
 0x82f   : > { %3727 = vmatmul.mubr.msk.bf16.vlgmr.msra.gmra.mxu1 %vm506_vm0, %v3998_v45 }
 0x830   : > { %3730 = vmatprep.mubr.msk.bf16.mxu1 %vm506_vm0, %v3999_v8 }
 0x831   : > { %v6275_v63 = vpop.permute.xlu1 %3053 }
 0x835   : > { %v3044_v16 = vpop.permute.xlu1 %3043 }
 0x837   : > { %3731 = vmatmul.mubr.msk.bf16.gmra.mxu1 %vm506_vm0, %v4000_v60 }
 0x838   : > { %3734 = vmatprep.mubr.msk.bf16.mxu1 %vm506_vm0, %v4001_v43 }
 0x83f   : > { %3735 = vmatmul.mubr.msk.bf16.gmra.mxu1 %vm506_vm0, %v4002_v11 }
 0x840   : > { %3738 = vmatprep.mubr.msk.bf16.mxu1 %vm506_vm0, %v4003_v32 }
 0x844   : > { %v3009_v4 = vpop.permute.xlu0 %3008 }
 0x847   : > { %3739 = vmatmul.mubr.msk.bf16.gmra.mxu1 %vm506_vm0, %v4004_v21 }
 0x848   : > { %v3034_v3 = vpop.permute.xlu1 %3033  ;;  %v2999_v57 = vpop.permute.xlu0 %2998 }
 0x84c   : > { %v3024_v54 = vpop.permute.xlu1 %3023 }
 0x850   : > { %v3014_v46 = vpop.permute.xlu1 %3013 }
 0x854   : > { %v3004_v9 = vpop.permute.xlu1 %3003 }
 0x858   : > { %v2994_v29 = vpop.permute.xlu1 %2993 }
 0x8ef   : > { %v3728_v23 = vpop.f32.mrf.mxu1 }
 0x8f0   : > { %v6286_v30 = vadd.f32 %v3728_v23, %v2999_v57 }
 0x8f1   : > { %v6277_v50 = vpop.f32.mrf.mxu1 }
 0x8f2   : > { %v6304_v14 = vmul.f32 0.044715, %v6286_v30 }
 0x8f3   : > { %v3729_v27 = vpop.f32.mrf.mxu1 }
 0x8f4   : > { %v6288_v10 = vadd.f32 %v3729_v27, %v3004_v9 }
 0x8f5   : > { %v3167_v55 = vpop.f32.mrf.mxu1 }
 0x8f6   : > { %v3246_v0 = vmul.f32 0.044715, %v6288_v10  ;;  %v6315_v8 = vadd.f32 %v3167_v55, %v2994_v29 }
 0x8f7   : > { %v3732_v6 = vpop.f32.mrf.mxu1 }
 0x8f8   : > { %v6299_v25 = vadd.f32 %v3732_v6, %v3019_v53 }
 0x8f9   : > { %v3180_v37 = vpop.f32.mrf.mxu1 }
 0x8fa   : > { %v3249_v32 = vmul.f32 0.044715, %v6299_v25  ;;  %v6322_v21 = vadd.f32 %v3180_v37, %v3009_v4  ;;  %v2989_v4 = vpop.permute.xlu0 %2988 }
 0x8fb   : > { %v3733_v52 = vpop.f32.mrf.mxu1  ;;  %v6353_v29 = vadd.f32 %v6277_v50, %v2989_v4 }
 0x8fc   : > { %v6293_v40 = vadd.f32 %v3733_v52, %v3024_v54  ;;  %v3265_v52 = vmul.f32 %v3249_v32, %v6299_v25 }
 0x8fd   : > { %v3183_v20 = vpop.f32.mrf.mxu1 }
 0x8fe   : > { %v3250_v5 = vmul.f32 0.044715, %v6293_v40  ;;  %v6311_v42 = vadd.f32 %v3183_v20, %v3014_v46 }
 0x8ff   : > { %v3736_v58 = vpop.f32.mrf.mxu1 }
 0x900   : > { %v6279_v34 = vadd.f32 %v3736_v58, %v3039_v18 }
 0x901   : > { %v3196_v56 = vpop.f32.mrf.mxu1 }
 0x902   : > { %v3253_v2 = vmul.f32 0.044715, %v6279_v34  ;;  %v6284_v36 = vadd.f32 %v3196_v56, %v3029_v48  ;;  %v3248_v48 = vmul.f32 0.044715, %v6311_v42 }
 0x903   : > { %v3737_v61 = vpop.f32.mrf.mxu1 }
 0x904   : > { %v6281_v41 = vadd.f32 %v3737_v61, %v3044_v16  ;;  %v3269_v7 = vmul.f32 %v3253_v2, %v6279_v34  ;;  %v3251_v15 = vmul.f32 0.044715, %v6284_v36  ;;  %v3264_v2 = vmul.f32 %v3248_v48, %v6311_v42 }
 0x905   : > { %v3199_v1 = vpop.f32.mrf.mxu1 }
 0x906   : > { %v3254_v39 = vmul.f32 0.044715, %v6281_v41  ;;  %v6291_v24 = vadd.f32 %v3199_v1, %v3034_v3  ;;  %v3285_v51 = vmul.f32 %v3269_v7, %v6279_v34  ;;  %v3281_v7 = vmul.f32 %v3265_v52, %v6299_v25 }
 0x907   : > { %v3740_v28 = vpop.f32.mrf.mxu1 }
 0x908   : > { %v3270_v62 = vmul.f32 %v3254_v39, %v6281_v41  ;;  %v3252_v17 = vmul.f32 0.044715, %v6291_v24  ;;  %v6297_v12 = vadd.f32 %v3740_v28, %v3059_v35  ;;  %v3267_v35 = vmul.f32 %v3251_v15, %v6284_v36 }
 0x909   : > { %v3212_v19 = vpop.f32.mrf.mxu1  ;;  %v3301_v20 = vadd.f32 %v3285_v51, %v6279_v34  ;;  %v3261_v51 = vmul.f32 %v6304_v14, %v6286_v30 }
 0x90a   : > { %v3257_v38 = vmul.f32 0.044715, %v6297_v12  ;;  %v6308_v47 = vadd.f32 %v3212_v19, %v3049_v49  ;;  %v3286_v59 = vmul.f32 %v3270_v62, %v6281_v41  ;;  %v3268_v31 = vmul.f32 %v3252_v17, %v6291_v24 }
 0x90b   : > { %v3741_v45 = vpop.f32.mrf.mxu1  ;;  %v3283_v46 = vmul.f32 %v3267_v35, %v6284_v36  ;;  %v3317_v19 = vmul.f32 0.7978846, %v3301_v20  ;;  %v3243_v35 = vmul.f32 0.044715, %v6353_v29 }
 0x90c   : > { %v3273_v60 = vmul.f32 %v3257_v38, %v6297_v12  ;;  %v3255_v43 = vmul.f32 0.044715, %v6308_v47  ;;  %v6319_v11 = vadd.f32 %v3741_v45, %v3064_v33  ;;  %v3266_v33 = vmul.f32 %v3250_v5, %v6293_v40 }
 0x90d   : > { %v3215_v49 = vpop.f32.mrf.mxu1  ;;  %v3284_v27 = vmul.f32 %v3268_v31, %v6291_v24  ;;  %v3302_v55 = vadd.f32 %v3286_v59, %v6281_v41  ;;  %v3299_v59 = vadd.f32 %v3283_v46, %v6284_v36  ;;  %v3262_v31 = vmul.f32 %v3246_v0, %v6288_v10 }
 0x90e   : > { %v3289_v16 = vmul.f32 %v3273_v60, %v6297_v12  ;;  %v3271_v18 = vmul.f32 %v3255_v43, %v6308_v47  ;;  %v3258_v23 = vmul.f32 0.044715, %v6319_v11  ;;  %v6330_v3 = vadd.f32 %v3215_v49, %v6275_v63 }
 0x90f   : > { %v3247_v63 = vmul.f32 0.044715, %v6322_v21  ;;  %v3282_v57 = vmul.f32 %v3266_v33, %v6293_v40  ;;  %v3318_v1 = vmul.f32 0.7978846, %v3302_v55  ;;  %v3300_v39 = vadd.f32 %v3284_v27, %v6291_v24 }
 0x910   : > { %v3287_v54 = vmul.f32 %v3271_v18, %v6308_v47  ;;  %v3274_v6 = vmul.f32 %v3258_v23, %v6319_v11  ;;  %v3256_v53 = vmul.f32 0.044715, %v6330_v3  ;;  %v3305_v37 = vadd.f32 %v3289_v16, %v6297_v12 }
 0x911   : > { %v3263_v15 = vmul.f32 %v3247_v63, %v6322_v21  ;;  %v3244_v45 = vmul.f32 0.044715, %v6315_v8  ;;  %v3280_v60 = vmul.f32 %v3264_v2, %v6311_v42  ;;  %v3316_v43 = vmul.f32 0.7978846, %v3300_v39 }
 0x912   : > { %v3290_v58 = vmul.f32 %v3274_v6, %v6319_v11  ;;  %v3272_v56 = vmul.f32 %v3256_v53, %v6330_v3  ;;  %v3321_v9 = vmul.f32 0.7978846, %v3305_v37  ;;  %v3303_v61 = vadd.f32 %v3287_v54, %v6308_v47 }
 0x913   : > { %v3298_v32 = vadd.f32 %v3282_v57, %v6293_v40  ;;  %v3279_v49 = vmul.f32 %v3263_v15, %v6322_v21  ;;  %v3315_v0 = vmul.f32 0.7978846, %v3299_v59  ;;  %v3297_v16 = vadd.f32 %v3281_v7, %v6299_v25 }
 0x914   : > { %v3288_v28 = vmul.f32 %v3272_v56, %v6330_v3  ;;  %v3306_v62 = vadd.f32 %v3290_v58, %v6319_v11  ;;  %4057 = vtanh.f32 %v3321_v9  ;;  %v3319_v17 = vmul.f32 0.7978846, %v3303_v61 }
 0x915   : > { %v3278_v18 = vmul.f32 %v3262_v31, %v6288_v10  ;;  %v3260_v23 = vmul.f32 %v3244_v45, %v6315_v8  ;;  %v3314_v33 = vmul.f32 0.7978846, %v3298_v32  ;;  %v3296_v48 = vadd.f32 %v3280_v60, %v6311_v42 }
 0x916   : > { %v3322_v38 = vmul.f32 0.7978846, %v3306_v62  ;;  %v3304_v5 = vadd.f32 %v3288_v28, %v6330_v3  ;;  %4059 = vtanh.f32 %v3319_v17  ;;  %v3277_v27 = vmul.f32 %v3261_v51, %v6286_v30 }
 0x917   : > { %4061 = vtanh.f32 %v3318_v1  ;;  %v3259_v14 = vmul.f32 %v3243_v35, %v6353_v29  ;;  %v3295_v55 = vadd.f32 %v3279_v49, %v6322_v21  ;;  %v3313_v54 = vmul.f32 0.7978846, %v3297_v16 }
 0x918   : > { %4063 = vtanh.f32 %v3322_v38  ;;  %v3320_v50 = vmul.f32 0.7978846, %v3304_v5  ;;  %v3276_v6 = vmul.f32 %v3260_v23, %v6315_v8  ;;  %v3294_v53 = vadd.f32 %v3278_v18, %v6288_v10 }
 0x919   : > { %4065 = vtanh.f32 %v3317_v19  ;;  %v3312_v37 = vmul.f32 0.7978846, %v3296_v48  ;;  %v3275_v63 = vmul.f32 %v3259_v14, %v6353_v29  ;;  %v3311_v46 = vmul.f32 0.7978846, %v3295_v55 }
 0x91a   : > { %4067 = vtanh.f32 %v3320_v50  ;;  %v3293_v20 = vadd.f32 %v3277_v27, %v6286_v30  ;;  %v3310_v58 = vmul.f32 0.7978846, %v3294_v53  ;;  %v3292_v56 = vadd.f32 %v3276_v6, %v6315_v8 }
 0x91b   : > { %4069 = vtanh.f32 %v3316_v43  ;;  %v3291_v1 = vadd.f32 %v3275_v63, %v6353_v29  ;;  %v3241_v28 = vmul.f32 0.5, %v6297_v12  ;;  %v3242_v62 = vmul.f32 0.5, %v6319_v11 }
 0x91c   : > { %4071 = vtanh.f32 %v3315_v0  ;;  %v3309_v2 = vmul.f32 0.7978846, %v3293_v20  ;;  %v3239_v19 = vmul.f32 0.5, %v6308_v47  ;;  %v3240_v38 = vmul.f32 0.5, %v6330_v3 }
 0x91d   : > { %4073 = vtanh.f32 %v3314_v33  ;;  %v3308_v5 = vmul.f32 0.7978846, %v3292_v56  ;;  %v3238_v43 = vmul.f32 0.5, %v6281_v41  ;;  %v3307_v12 = vmul.f32 0.7978846, %v3291_v1 }
 0x91e   : > { %4075 = vtanh.f32 %v3313_v54  ;;  %v3237_v47 = vmul.f32 0.5, %v6279_v34  ;;  %v3236_v41 = vmul.f32 0.5, %v6291_v24  ;;  %v3235_v14 = vmul.f32 0.5, %v6284_v36 }
 0x91f   : > { %4077 = vtanh.f32 %v3312_v37  ;;  %v3234_v37 = vmul.f32 0.5, %v6293_v40  ;;  %v3233_v24 = vmul.f32 0.5, %v6299_v25  ;;  %v3232_v56 = vmul.f32 0.5, %v6311_v42 }
 0x920   : > { %4079 = vtanh.f32 %v3311_v46  ;;  %v3230_v25 = vmul.f32 0.5, %v6288_v10 }
 0x921   : > { %v4058_v52 = vpop.eup %4057  ;;  %4081 = vtanh.f32 %v3310_v58 }
 0x922   : > { %v3353_v61 = vadd.f32 1.0, %v4058_v52  ;;  %4083 = vtanh.f32 %v3309_v2 }
 0x923   : > { %v4060_v4 = vpop.eup %4059  ;;  %4085 = vtanh.f32 %v3308_v5 }
 0x924   : > { %v4062_v9 = vpop.eup %4061  ;;  %v3351_v7 = vadd.f32 1.0, %v4060_v4  ;;  %v3369_v59 = vmul.f32 %v3353_v61, %v3241_v28  ;;  %4087 = vtanh.f32 %v3307_v12 }
 0x925   : > { %v4064_v57 = vpop.eup %4063  ;;  %v3350_v60 = vadd.f32 1.0, %v4062_v9 }
 0x926   : > { %v4066_v39 = vpop.eup %4065  ;;  %v3354_v17 = vadd.f32 1.0, %v4064_v57  ;;  %v3367_v11 = vmul.f32 %v3351_v7, %v3239_v19  ;;  %v3231_v57 = vmul.f32 0.5, %v6322_v21  ;;  %v3229_v7 = vmul.f32 0.5, %v6286_v30  ;;  %v4006_v30 = vld [vmem:[%s6423_s12 + $0x8] sm:$0xff]  }
 0x927   : > { %v4068_v15 = vpop.eup %4067  ;;  %v3349_v35 = vadd.f32 1.0, %v4066_v39  ;;  %v3366_v0 = vmul.f32 %v3350_v60, %v3238_v43  ;;  %v3228_v21 = vmul.f32 0.5, %v6315_v8  ;;  %v3389_v60 = vpop.permute.xlu1 %3388 }
 0x928   : > { %v3370_v31 = vmul.f32 %v3354_v17, %v3242_v62  ;;  %v3352_v45 = vadd.f32 1.0, %v4068_v15  ;;  %v4070_v50 = vpop.eup %4069  ;;  %v3385_v8 = vpop.permute.xlu0 %3384 }
 0x929   : > { %v4072_v49 = vpop.eup %4071  ;;  %v3348_v16 = vadd.f32 1.0, %v4070_v50  ;;  %v3365_v23 = vmul.f32 %v3349_v35, %v3237_v47 }
 0x92a   : > { %v3382_v32 = vpack.c.bf16 %v3370_v31, %v3369_v59  ;;  %v3368_v51 = vmul.f32 %v3352_v45, %v3240_v38  ;;  %v4074_v18 = vpop.eup %4073  ;;  %v3347_v33 = vadd.f32 1.0, %v4072_v49  ;;  %v3227_v59 = vmul.f32 0.5, %v6353_v29 }
 0x92b   : > { %v4076_v48 = vpop.eup %4075  ;;  %v3380_v27 = vpack.c.bf16 %v3366_v0, %v3365_v23  ;;  %v3364_v55 = vmul.f32 %v3348_v16, %v3236_v41  ;;  %v3346_v54 = vadd.f32 1.0, %v4074_v18  ;;  %v3393_v50 = vpop.permute.xlu1 %3392 }
 0x92c   : > { %3742 = vmatprep.subr.bf16.mxu0 %v3382_v32  ;;  %v3381_v3 = vpack.c.bf16 %v3368_v51, %v3367_v11  ;;  %v4078_v34 = vpop.eup %4077  ;;  %v3363_v53 = vmul.f32 %v3347_v33, %v3235_v14  ;;  %v3345_v52 = vadd.f32 1.0, %v4076_v48 }
 0x92d   : > { %3743 = vmatpush3.bf16.msra.mxu0 %v3382_v32  ;;  %v4080_v6 = vpop.eup %4079  ;;  %v3362_v20 = vmul.f32 %v3346_v54, %v3234_v37  ;;  %v3344_v4 = vadd.f32 1.0, %v4078_v34  ;;  %v3397_v32 = vpop.permute.xlu0 %3396 }
 0x92e   : > { %3744 = vmatprep.subr.bf16.mxu0 %v3381_v3  ;;  %v4082_v63 = vpop.eup %4081  ;;  %v3379_v46 = vpack.c.bf16 %v3364_v55, %v3363_v53  ;;  %v3361_v36 = vmul.f32 %v3345_v52, %v3233_v24  ;;  %v3343_v9 = vadd.f32 1.0, %v4080_v6 }
 0x92f   : > { %v4084_v58 = vpop.eup %4083  ;;  %v3360_v2 = vmul.f32 %v3344_v4, %v3232_v56  ;;  %v3342_v1 = vadd.f32 1.0, %v4082_v63 }
 0x930   : > { %v3378_v61 = vpack.c.bf16 %v3362_v20, %v3361_v36  ;;  %v4086_v40 = vpop.eup %4085  ;;  %v3359_v39 = vmul.f32 %v3343_v9, %v3231_v57  ;;  %v3341_v28 = vadd.f32 1.0, %v4084_v58 }
 0x931   : > { %3745 = vmatpush3.bf16.msra.mxu0 %v3381_v3  ;;  %v4088_v62 = vpop.eup %4087  ;;  %v3358_v15 = vmul.f32 %v3342_v1, %v3230_v25  ;;  %v3340_v19 = vadd.f32 1.0, %v4086_v40 }
 0x932   : > { %3746 = vmatprep.subr.bf16.mxu0 %v3380_v27  ;;  %v3377_v17 = vpack.c.bf16 %v3360_v2, %v3359_v39  ;;  %v3357_v42 = vmul.f32 %v3341_v28, %v3229_v7  ;;  %v3339_v38 = vadd.f32 1.0, %v4088_v62 }
 0x933   : > { %v3356_v31 = vmul.f32 %v3340_v19, %v3228_v21 }
 0x934   : > { %v3376_v5 = vpack.c.bf16 %v3358_v15, %v3357_v42  ;;  %v3355_v10 = vmul.f32 %v3339_v38, %v3227_v59 }
 0x935   : > { %3747 = vmatpush3.bf16.msra.mxu0 %v3380_v27 }
 0x936   : > { %3748 = vmatprep.subr.bf16.mxu0 %v3379_v46  ;;  %v3375_v45 = vpack.c.bf16 %v3356_v31, %v3355_v10 }
 0x939   : > { %3749 = vmatpush3.bf16.msra.mxu0 %v3379_v46 }
 0x93a   : > { %3750 = vmatprep.subr.bf16.mxu0 %v3378_v61 }
 0x93d   : > { %3751 = vmatpush3.bf16.msra.mxu0 %v3378_v61 }
 0x93e   : > { %3752 = vmatprep.subr.bf16.mxu0 %v3377_v17 }
 0x941   : > { %3753 = vmatpush3.bf16.msra.mxu0 %v3377_v17 }
 0x942   : > { %3754 = vmatprep.subr.bf16.mxu0 %v3376_v5 }
 0x945   : > { %3755 = vmatpush3.bf16.msra.mxu0 %v3376_v5 }
 0x946   : > { %3756 = vmatprep.subr.bf16.mxu0 %v3375_v45 }
 0x949   : > { %3757 = vmatpush3.bf16.msra.mxu0 %v3375_v45 }
 0x94c   : > { %3759 = vmatmul.mubr.bf16.vlgmr.msra.gmra.mxu0 %v4006_v30 }
 0xa0c   : > { %v3760_v43 = vpop.f32.mrf.mxu0 }
 0xa0d   : > { %v3454_v29 = vadd.f32 %v3760_v43, %v3393_v50 }
 0xa0e   : > { %v3445_v12 = vpop.f32.mrf.mxu0 }
 0xa0f   : > { %v3446_v51 = vadd.f32 %v3445_v12, %v3385_v8  ;;  %v3462_v47 = vadd.f32 %v3454_v29, %v6197_v13 }
 0xa10   : > { %v3761_v11 = vpop.f32.mrf.mxu0 }
 0xa11   : > { %v3457_v35 = vadd.f32 %v3761_v11, %v3397_v32  ;;  %v3460_v16 = vadd.f32 %v3446_v51, %v6237_v44 }
 0xa12   : > { %v3448_v49 = vpop.f32.mrf.mxu0 }
 0xa13   : > { %v3463_v3 = vadd.f32 %v3457_v35, %v6200_v26  ;;  %v3449_v0 = vadd.f32 %v3448_v49, %v3389_v60 }
 0xa15   : > { %v3627_v18 = vpack.c.bf16 %v3463_v3, %v3462_v47  ;;  %v3461_v23 = vadd.f32 %v3449_v0, %v6240_v22 }
 0xa17   : > { %3629 = vst [vmem:[%s440_s27 + $0x8] sm:$0xff] %v3627_v18   ;;  %v3622_v41 = vpack.c.bf16 %v3461_v23, %v3460_v16 }
 0xa19   : > { %3623 = vst [vmem:[%s440_s27] sm:$0xff] %v3622_v41  }
 0xa1a PF: > { %s23_s25 = sadd.s32 1, %s4120_s25  }
 0xa1b   : > { %p20_p4 = scmp.ge.s32.totalorder %s23_s25, 4  }
 0xa1d   :  { %22 = sbr.rel (!%p20_p4) target bundleno = 1 (0x1), region = 102 }

</bundles_post_ra>
